<compile_context>
chip_gen: v5e
topology: v5e:2x2
jax: 0.10.0
libtpu: 0.0.40
codegen_flags: <defaults>
</compile_context>

<pallas_src>
import jax
import jax.numpy as jnp
from jax.experimental import pallas as pl
from jax.experimental.pallas import tpu as pltpu

Z_DIM = 8
N_HIDDEN = 1000
X_DIM = 784

# lane-aligned (multiple-of-128) padded hidden dim
N_PAD = 1024


def _round_up(x, m):
    return ((x + m - 1) // m) * m


def pnet_kernel(x_ref, w1_ref, b1_ref, w2_ref, b2_ref, w3_ref, b3_ref, o_ref):
    # --- lin1 + (dropout = identity, inference) + relu ---
    x = x_ref[...].astype(jnp.bfloat16)
    h1 = jnp.dot(x, w1_ref[...], preferred_element_type=jnp.float32)
    h1 = jnp.maximum(h1 + b1_ref[...], 0.0)
    # --- lin2 + (dropout = identity) ---
    h2 = jnp.dot(h1.astype(jnp.bfloat16), w2_ref[...],
                 preferred_element_type=jnp.float32)
    h2 = h2 + b2_ref[...]
    # --- lin3 + sigmoid ---
    h3 = jnp.dot(h2.astype(jnp.bfloat16), w3_ref[...],
                 preferred_element_type=jnp.float32)
    h3 = h3 + b3_ref[...]
    # sigmoid(x) = 1 / (1 + exp(-x)); exp and approx-reciprocal both on the EUP.
    o_ref[...] = pl.reciprocal(1.0 + jnp.exp(-h3), approx=True).astype(o_ref.dtype)


def init_params(key):
    """Deterministic init mimicking nn.Linear (U(-1/sqrt(fan_in), 1/sqrt(fan_in))).

    Returned unpadded, f32, with weights stored as (in, out) so forward is x @ W.
    """
    ks = jax.random.split(key, 6)

    def lin(kw, kb, fan_in, fan_out):
        bound = 1.0 / jnp.sqrt(fan_in)
        w = jax.random.uniform(kw, (fan_in, fan_out), jnp.float32, -bound, bound)
        b = jax.random.uniform(kb, (1, fan_out), jnp.float32, -bound, bound)
        return w, b

    w1, b1 = lin(ks[0], ks[1], Z_DIM, N_HIDDEN)
    w2, b2 = lin(ks[2], ks[3], N_HIDDEN, N_HIDDEN)
    w3, b3 = lin(ks[4], ks[5], N_HIDDEN, X_DIM)
    return (w1, b1, w2, b2, w3, b3)


def prepare_params(params):
    """Zero-pad the hidden dim to 1024 and cast weights to bf16 (one-time).

    The output dim (784) is left unpadded so the kernel can store directly
    into a (B, 784) result with no post-kernel column slice.
    """
    w1, b1, w2, b2, w3, b3 = params

    def pad2(a, rows, cols):
        return jnp.pad(a, ((0, rows - a.shape[0]), (0, cols - a.shape[1])))

    w1p = pad2(w1, Z_DIM, N_PAD).astype(jnp.bfloat16)
    b1p = pad2(b1, 1, N_PAD)                       # f32
    w2p = pad2(w2, N_PAD, N_PAD).astype(jnp.bfloat16)
    b2p = pad2(b2, 1, N_PAD)                       # f32
    w3p = pad2(w3, N_PAD, X_DIM).astype(jnp.bfloat16)
    b3p = b3                                       # f32, (1, 784)
    return (w1p, b1p, w2p, b2p, w3p, b3p)


def _const_block(shape):
    """Grid-invariant operand: constant index_map, single VMEM buffer."""
    idx = lambda i: (0, 0)
    try:
        return pl.BlockSpec(shape, idx, pipeline_mode=pl.Buffered(1))
    except (TypeError, AttributeError):
        # Older JAX without pipeline_mode / pl.Buffered: default buffering.
        return pl.BlockSpec(shape, idx)


def p_net_forward(x, prepared_params, *, tm=512):
    """x: (B, Z_DIM) float32 -> (B, X_DIM) float32."""
    w1, b1, w2, b2, w3, b3 = prepared_params
    B = x.shape[0]

    # Batch tile: at most `tm` rows, at least an 8-row sublane multiple.
    TM = min(tm, _round_up(B, 8))
    # Prefer >= 2 grid steps so ("parallel",) can shard batch tiles across
    # both v7x TensorCores (harmless on single-TC v5e/v6e).
    if B > 8:
        TM = min(TM, max(_round_up((B + 1) // 2, 8), 8))

    B_pad = _round_up(B, TM)
    if B_pad != B:
        x = jnp.pad(x, ((0, B_pad - B), (0, 0)))
    grid = (pl.cdiv(B_pad, TM),)

    flops = 2 * B_pad * (Z_DIM * N_PAD + N_PAD * N_PAD + N_PAD * X_DIM)
    bytes_accessed = (
        (w1.size + w2.size + w3.size) * 2            # bf16 weights
        + (b1.size + b2.size + b3.size) * 4          # f32 biases
        + B_pad * (Z_DIM + X_DIM) * 4                # x in, out
    )
    cost = pl.CostEstimate(flops=flops,
                           transcendentals=2 * B_pad * X_DIM,  # exp + reciprocal
                           bytes_accessed=bytes_accessed)

    out = pl.pallas_call(
        pnet_kernel,
        out_shape=jax.ShapeDtypeStruct((B_pad, X_DIM), jnp.float32),
        grid=grid,
        in_specs=[
            pl.BlockSpec((TM, Z_DIM), lambda i: (i, 0)),    # x
            _const_block((Z_DIM, N_PAD)),                   # w1
            _const_block((1, N_PAD)),                       # b1
            _const_block((N_PAD, N_PAD)),                   # w2
            _const_block((1, N_PAD)),                       # b2
            _const_block((N_PAD, X_DIM)),                   # w3
            _const_block((1, X_DIM)),                       # b3
        ],
        out_specs=pl.BlockSpec((TM, X_DIM), lambda i: (i, 0)),
        compiler_params=pltpu.CompilerParams(
            dimension_semantics=("parallel",),
            vmem_limit_bytes=48 << 20,
        ),
        cost_estimate=cost,
    )(x, w1, b1, w2, b2, w3, b3)

    return out if B_pad == B else out[:B]


def p_net_ref(x, params):
    """Pure-JAX f32 reference (unpadded params, eval-mode dropout)."""
    w1, b1, w2, b2, w3, b3 = params
    h = jnp.maximum(x @ w1 + b1, 0.0)
    h = h @ w2 + b2
    return jax.nn.sigmoid(h @ w3 + b3)


if __name__ == "__main__":
    key = jax.random.PRNGKey(0)
    k_x, k_p = jax.random.split(key)
    params = init_params(k_p)
    prepared = prepare_params(params)

    # Small-shape check (B=2): single tile.
    B = 2
    x = jax.random.normal(k_x, (B, Z_DIM), jnp.float32)
    out = jax.block_until_ready(p_net_forward(x, prepared))
    ref = p_net_ref(x, params)
    assert out.shape == (B, X_DIM)
    assert jnp.allclose(out, ref, atol=2e-2, rtol=2e-2), float(
        jnp.max(jnp.abs(out - ref)))

    # Multi-tile grid + non-divisible batch check (B=20, tm=8 -> 3 grid steps).
    B2 = 20
    x2 = jax.random.normal(jax.random.PRNGKey(1), (B2, Z_DIM), jnp.float32)
    out2 = jax.block_until_ready(p_net_forward(x2, prepared, tm=8))
    ref2 = p_net_ref(x2, params)
    assert out2.shape == (B2, X_DIM)
    assert jnp.allclose(out2, ref2, atol=2e-2, rtol=2e-2), float(
        jnp.max(jnp.abs(out2 - ref2)))

    print("KERNEL_OK")
</pallas_src>

<mosaic_0001>
module attributes {stable_mosaic.version = 11 : i64} {
  func.func @pnet_kernel(%arg0: i32, %arg1: memref<8x8xf32, #tpu.memory_space<vmem>>, %arg2: memref<8x1024xbf16, #tpu.memory_space<vmem>>, %arg3: memref<1x1024xf32, #tpu.memory_space<vmem>>, %arg4: memref<1024x1024xbf16, #tpu.memory_space<vmem>>, %arg5: memref<1x1024xf32, #tpu.memory_space<vmem>>, %arg6: memref<1024x784xbf16, #tpu.memory_space<vmem>>, %arg7: memref<1x784xf32, #tpu.memory_space<vmem>>, %arg8: memref<8x784xf32, #tpu.memory_space<vmem>>) attributes {dimension_semantics = [#tpu.dimension_semantics<parallel>], iteration_bounds = array<i64: 1>, scalar_prefetch = 0 : i64, scratch_operands = 0 : i64, tpu.core_type = #tpu.core_type<tc>, window_params = [{transform_indices = @transform_0, window_bounds = array<i64: 8, 8>}, {pipeline_mode = #tpu.pipeline_mode<synchronous>, transform_indices = @transform_1, window_bounds = array<i64: 8, 1024>}, {pipeline_mode = #tpu.pipeline_mode<synchronous>, transform_indices = @transform_2, window_bounds = array<i64: 1, 1024>}, {pipeline_mode = #tpu.pipeline_mode<synchronous>, transform_indices = @transform_3, window_bounds = array<i64: 1024, 1024>}, {pipeline_mode = #tpu.pipeline_mode<synchronous>, transform_indices = @transform_4, window_bounds = array<i64: 1, 1024>}, {pipeline_mode = #tpu.pipeline_mode<synchronous>, transform_indices = @transform_5, window_bounds = array<i64: 1024, 784>}, {pipeline_mode = #tpu.pipeline_mode<synchronous>, transform_indices = @transform_6, window_bounds = array<i64: 1, 784>}, {transform_indices = @transform_7, window_bounds = array<i64: 8, 784>}]} {
    %c0 = arith.constant 0 : index
    %c0_0 = arith.constant 0 : index
    %0 = vector.load %arg1[%c0, %c0_0] : memref<8x8xf32, #tpu.memory_space<vmem>>, vector<8x8xf32>
    %1 = arith.truncf %0 : vector<8x8xf32> to vector<8x8xbf16>
    %c0_1 = arith.constant 0 : index
    %c0_2 = arith.constant 0 : index
    %2 = vector.load %arg2[%c0_1, %c0_2] : memref<8x1024xbf16, #tpu.memory_space<vmem>>, vector<8x1024xbf16>
    %cst = arith.constant dense<0.000000e+00> : vector<8x1024xf32>
    %3 = tpu.matmul %1, %2, %cst {dimension_numbers = #tpu.dot_dimension_numbers<[1], [0], [0], [1], [0, 0, 1, 1], [], []>} : vector<8x8xbf16>, vector<8x1024xbf16>, vector<8x1024xf32> -> vector<8x1024xf32>
    %c0_3 = arith.constant 0 : index
    %c0_4 = arith.constant 0 : index
    %4 = vector.load %arg3[%c0_3, %c0_4] : memref<1x1024xf32, #tpu.memory_space<vmem>>, vector<1x1024xf32>
    %5 = vector.broadcast %4 : vector<1x1024xf32> to vector<8x1024xf32>
    %6 = arith.addf %3, %5 : vector<8x1024xf32>
    %cst_5 = arith.constant 0.000000e+00 : f32
    %7 = vector.broadcast %cst_5 : f32 to vector<8x1024xf32>
    %8 = arith.maximumf %6, %7 : vector<8x1024xf32>
    %9 = arith.truncf %8 : vector<8x1024xf32> to vector<8x1024xbf16>
    %c0_6 = arith.constant 0 : index
    %c0_7 = arith.constant 0 : index
    %10 = vector.load %arg4[%c0_6, %c0_7] : memref<1024x1024xbf16, #tpu.memory_space<vmem>>, vector<1024x1024xbf16>
    %cst_8 = arith.constant dense<0.000000e+00> : vector<8x1024xf32>
    %11 = tpu.matmul %9, %10, %cst_8 {dimension_numbers = #tpu.dot_dimension_numbers<[1], [0], [0], [1], [0, 0, 1, 1], [], []>} : vector<8x1024xbf16>, vector<1024x1024xbf16>, vector<8x1024xf32> -> vector<8x1024xf32>
    %c0_9 = arith.constant 0 : index
    %c0_10 = arith.constant 0 : index
    %12 = vector.load %arg5[%c0_9, %c0_10] : memref<1x1024xf32, #tpu.memory_space<vmem>>, vector<1x1024xf32>
    %13 = vector.broadcast %12 : vector<1x1024xf32> to vector<8x1024xf32>
    %14 = arith.addf %11, %13 : vector<8x1024xf32>
    %15 = arith.truncf %14 : vector<8x1024xf32> to vector<8x1024xbf16>
    %c0_11 = arith.constant 0 : index
    %c0_12 = arith.constant 0 : index
    %16 = vector.load %arg6[%c0_11, %c0_12] : memref<1024x784xbf16, #tpu.memory_space<vmem>>, vector<1024x784xbf16>
    %cst_13 = arith.constant dense<0.000000e+00> : vector<8x784xf32>
    %17 = tpu.matmul %15, %16, %cst_13 {dimension_numbers = #tpu.dot_dimension_numbers<[1], [0], [0], [1], [0, 0, 1, 1], [], []>} : vector<8x1024xbf16>, vector<1024x784xbf16>, vector<8x784xf32> -> vector<8x784xf32>
    %c0_14 = arith.constant 0 : index
    %c0_15 = arith.constant 0 : index
    %18 = vector.load %arg7[%c0_14, %c0_15] : memref<1x784xf32, #tpu.memory_space<vmem>>, vector<1x784xf32>
    %19 = vector.broadcast %18 : vector<1x784xf32> to vector<8x784xf32>
    %20 = arith.addf %17, %19 : vector<8x784xf32>
    %cst_16 = arith.constant 0.000000e+00 : f32
    %21 = vector.broadcast %cst_16 : f32 to vector<8x784xf32>
    %22 = arith.subf %21, %20 : vector<8x784xf32>
    %23 = math.exp %22 : vector<8x784xf32>
    %cst_17 = arith.constant 1.000000e+00 : f32
    %24 = vector.broadcast %cst_17 : f32 to vector<8x784xf32>
    %25 = arith.addf %24, %23 : vector<8x784xf32>
    %26 = tpu.reciprocal %25 {approx = true} : vector<8x784xf32> -> vector<8x784xf32>
    %c0_18 = arith.constant 0 : index
    %c0_19 = arith.constant 0 : index
    %27 = vector.load %arg8[%c0_18, %c0_19] : memref<8x784xf32, #tpu.memory_space<vmem>>, vector<8x784xf32>
    tpu.vector_store %arg8[%c0_18, %c0_19], %26 {strides = array<i32>} : memref<8x784xf32, #tpu.memory_space<vmem>>, vector<8x784xf32>,
    return
  }
  func.func @transform_0(%arg0: i32) -> (i32, i32) {
    %c0_i32 = arith.constant 0 : i32
    %c0_i32_0 = arith.constant 0 : i32
    return %arg0, %c0_i32 : i32, i32
  }
  func.func @transform_1(%arg0: i32) -> (i32, i32) {
    %c0_i32 = arith.constant 0 : i32
    %c0_i32_0 = arith.constant 0 : i32
    %c0_i32_1 = arith.constant 0 : i32
    return %c0_i32, %c0_i32_0 : i32, i32
  }
  func.func @transform_2(%arg0: i32) -> (i32, i32) {
    %c0_i32 = arith.constant 0 : i32
    %c0_i32_0 = arith.constant 0 : i32
    %c0_i32_1 = arith.constant 0 : i32
    return %c0_i32, %c0_i32_0 : i32, i32
  }
  func.func @transform_3(%arg0: i32) -> (i32, i32) {
    %c0_i32 = arith.constant 0 : i32
    %c0_i32_0 = arith.constant 0 : i32
    %c0_i32_1 = arith.constant 0 : i32
    return %c0_i32, %c0_i32_0 : i32, i32
  }
  func.func @transform_4(%arg0: i32) -> (i32, i32) {
    %c0_i32 = arith.constant 0 : i32
    %c0_i32_0 = arith.constant 0 : i32
    %c0_i32_1 = arith.constant 0 : i32
    return %c0_i32, %c0_i32_0 : i32, i32
  }
  func.func @transform_5(%arg0: i32) -> (i32, i32) {
    %c0_i32 = arith.constant 0 : i32
    %c0_i32_0 = arith.constant 0 : i32
    %c0_i32_1 = arith.constant 0 : i32
    return %c0_i32, %c0_i32_0 : i32, i32
  }
  func.func @transform_6(%arg0: i32) -> (i32, i32) {
    %c0_i32 = arith.constant 0 : i32
    %c0_i32_0 = arith.constant 0 : i32
    %c0_i32_1 = arith.constant 0 : i32
    return %c0_i32, %c0_i32_0 : i32, i32
  }
  func.func @transform_7(%arg0: i32) -> (i32, i32) {
    %c0_i32 = arith.constant 0 : i32
    %c0_i32_0 = arith.constant 0 : i32
    return %arg0, %c0_i32 : i32, i32
  }
}

</mosaic_0001>

<bundles_post_ra>
// kernel: tpu_custom_call.1
= control target key start
LH: loop header
LB: loop body
LE: loop exit
PB: predicated region body
PF: predicated region fallthrough
CT: control target
= control target key end

     0   :  { %vm76_vm0 = vcmask 1043456   ;;  %vm72_vm1 = vcmask 64512   ;;  %s18835_s0 = inlined_call_operand.vmem [shape: f32[8,8], index: 0, kind: input, shape index: {}]   ;;  %s18836_s1 = inlined_call_operand.vmem [shape: bf16[8,1024], index: 1, kind: input, shape index: {}]   ;;  %s18837_s2 = inlined_call_operand.vmem [shape: f32[1,1024], index: 2, kind: input, shape index: {}]   ;;  %s18838_s3 = inlined_call_operand.vmem [shape: bf16[1024,1024], index: 3, kind: input, shape index: {}]   ;;  %s18839_s4 = inlined_call_operand.vmem [shape: f32[1,1024], index: 4, kind: input, shape index: {}]   ;;  %s18840_s5 = inlined_call_operand.vmem [shape: bf16[1024,784], index: 5, kind: input, shape index: {}]   ;;  %s18841_s6 = inlined_call_operand.vmem [shape: f32[1,784], index: 6, kind: input, shape index: {}]   ;;  %s18842_s7 = inlined_call_operand.hbm [shape: f32[8,784], index: 7, kind: output, shape index: {}]  }
   0x1   :  { %v30_v0 = vld [vmem:[%s18836_s1] sm:$0xff]  ;;  %v31_v1 = vld [vmem:[%s18836_s1 + $0x8] sm:$0xff]  ;;  %v32_v7 = vld [vmem:[%s18836_s1 + $0x10] sm:$0xff] }
   0x2   :  { %v28_v2 = vld [vmem:[%s18835_s0] sm:$0xff]  ;;  %v56_v3 = vunpack.c.l.b16 %v30_v0  ;;  %v57_v4 = vunpack.c.h.b16 %v30_v0  ;;  %v58_v5 = vunpack.c.l.b16 %v31_v1  ;;  %v59_v6 = vunpack.c.h.b16 %v31_v1  ;;  %v33_v8 = vld [vmem:[%s18836_s1 + $0x18] sm:$0xff] }
   0x3   :  { %v12694_v9 = vpack.c.bf16 %v28_v2, %v28_v2  ;;  %v60_v10 = vunpack.c.l.b16 %v32_v7  ;;  %v61_v11 = vunpack.c.h.b16 %v32_v7  ;;  %v62_v12 = vunpack.c.l.b16 %v33_v8  ;;  %v8004_v17 = vld [vmem:[%s18838_s3 + $0x1c0] sm:$0xf] }
   0x4   :  { %v64_v13 = vpack.c.b16 %v56_v3, %v56_v3  ;;  %v65_v14 = vpack.c.b16 %v57_v4, %v57_v4  ;;  %v66_v15 = vpack.c.b16 %v58_v5, %v58_v5  ;;  %v67_v16 = vpack.c.b16 %v59_v6, %v59_v6  ;;  %v11678_v18 = vld [vmem:[%s18838_s3 + $0x1dc] sm:$0xf0] }
   0x5   :  { %v68_v19 = vpack.c.b16 %v60_v10, %v60_v10  ;;  %v69_v20 = vpack.c.b16 %v61_v11, %v61_v11  ;;  %v70_v21 = vpack.c.b16 %v62_v12, %v62_v12  ;;  %v63_v22 = vunpack.c.h.b16 %v33_v8  ;;  %v8260_v23 = vld [vmem:[%s18838_s3 + $0x3c0] sm:$0xf] }
   0x6   :  { %v11742_v24 = vld [vmem:[%s18838_s3 + $0x3dc] sm:$0xf0]  ;;  %v78_v26 = vsel %vm76_vm0, %v64_v13, 0  ;;  %v81_v27 = vsel %vm76_vm0, %v65_v14, 0  ;;  %v84_v28 = vsel %vm76_vm0, %v66_v15, 0  ;;  %v87_v29 = vsel %vm76_vm0, %v67_v16, 0 }
   0x7   :  { %v8516_v25 = vld [vmem:[%s18838_s3 + $0x5c0] sm:$0xf]  ;;  %108 = vmatpush.bf16.msra.mxu0 %v78_v26  ;;  %121 = vmatpush.bf16.msra.mxu1 %v81_v27  ;;  %v90_v31 = vsel %vm76_vm0, %v68_v19, 0  ;;  %v93_v32 = vsel %vm76_vm0, %v69_v20, 0  ;;  %v71_v33 = vpack.c.b16 %v63_v22, %v63_v22  ;;  %v96_v36 = vsel %vm76_vm0, %v70_v21, 0 }
   0x8   :  { %v11806_v30 = vld [vmem:[%s18838_s3 + $0x5dc] sm:$0xf0]  ;;  %134 = vmatpush.bf16.msra.mxu2 %v84_v28  ;;  %147 = vmatpush.bf16.msra.mxu3 %v87_v29  ;;  %v8005_v38 = vor.u32 %v11678_v18, %v8004_v17  ;;  %v8261_v39 = vor.u32 %v11742_v24, %v8260_v23 }
   0x9   :  { %v8772_v34 = vld [vmem:[%s18838_s3 + $0x7c0] sm:$0xf]  ;;  %v99_v37 = vsel %vm76_vm0, %v71_v33, 0  ;;  %v8517_v44 = vor.u32 %v11806_v30, %v8516_v25 }
   0xa   :  { %v11870_v35 = vld [vmem:[%s18838_s3 + $0x7dc] sm:$0xf0]  ;;  %7770 = vmatmul.msk.bf16.vlgmr.msra.gmra.mxu0 %vm72_vm1, %v12694_v9  ;;  %7771 = vmatmul.msk.bf16.vlgmr.msra.gmra.mxu1 %vm72_vm1, %v12694_v9 }
   0xb   :  { %160 = vmatpush.bf16.msrb.mxu0 %v90_v31  ;;  %173 = vmatpush.bf16.msrb.mxu1 %v93_v32  ;;  %v7972_v40 = vld [vmem:[%s18838_s3 + $0x180] sm:$0xf]  ;;  %v8773_v45 = vor.u32 %v11870_v35, %v8772_v34 }
   0xc   :  { %v11670_v41 = vld [vmem:[%s18838_s3 + $0x19c] sm:$0xf0]  ;;  %7772 = vmatmul.msk.bf16.vlgmr.msra.gmra.mxu2 %vm72_vm1, %v12694_v9  ;;  %7773 = vmatmul.msk.bf16.vlgmr.msra.gmra.mxu3 %vm72_vm1, %v12694_v9 }
   0xd   :  { %v8228_v42 = vld [vmem:[%s18838_s3 + $0x380] sm:$0xf]  ;;  %186 = vmatpush.bf16.msrb.mxu2 %v96_v36  ;;  %199 = vmatpush.bf16.msrb.mxu3 %v99_v37  ;;  %v7973_v50 = vor.u32 %v11670_v41, %v7972_v40 }
   0xe   :  { %v11734_v43 = vld [vmem:[%s18838_s3 + $0x39c] sm:$0xf0] }
   0xf   :  { %v8484_v46 = vld [vmem:[%s18838_s3 + $0x580] sm:$0xf]  ;;  %3311 = vmatpush.bf16.msra.mxu0 %v8005_v38  ;;  %3324 = vmatpush.bf16.msra.mxu1 %v8261_v39  ;;  %v8229_v51 = vor.u32 %v11734_v43, %v8228_v42 }
  0x10   :  { %v11798_v47 = vld [vmem:[%s18838_s3 + $0x59c] sm:$0xf0] }
  0x11   :  { %v8740_v48 = vld [vmem:[%s18838_s3 + $0x780] sm:$0xf]  ;;  %3337 = vmatpush.bf16.msra.mxu2 %v8517_v44  ;;  %3350 = vmatpush.bf16.msra.mxu3 %v8773_v45  ;;  %v8485_v56 = vor.u32 %v11798_v47, %v8484_v46 }
  0x12   :  { %v11862_v49 = vld [vmem:[%s18838_s3 + $0x79c] sm:$0xf0] }
  0x13   :  { %v7940_v52 = vld [vmem:[%s18838_s3 + $0x140] sm:$0xf]  ;;  %v8741_v57 = vor.u32 %v11862_v49, %v8740_v48  ;;  %3312 = vmatpush.bf16.msra.mxu0 %v7973_v50  ;;  %3325 = vmatpush.bf16.msra.mxu1 %v8229_v51 }
  0x14   :  { %v11662_v53 = vld [vmem:[%s18838_s3 + $0x15c] sm:$0xf0] }
  0x15   :  { %v8196_v54 = vld [vmem:[%s18838_s3 + $0x340] sm:$0xf]  ;;  %v7941_v62 = vor.u32 %v11662_v53, %v7940_v52  ;;  %3338 = vmatpush.bf16.msra.mxu2 %v8485_v56  ;;  %3351 = vmatpush.bf16.msra.mxu3 %v8741_v57 }
  0x16   :  { %v11726_v55 = vld [vmem:[%s18838_s3 + $0x35c] sm:$0xf0] }
  0x17   :  { %v8452_v58 = vld [vmem:[%s18838_s3 + $0x540] sm:$0xf]  ;;  %v8197_v63 = vor.u32 %v11726_v55, %v8196_v54  ;;  %3313 = vmatpush.bf16.msra.mxu0 %v7941_v62 }
  0x18   :  { %v11790_v59 = vld [vmem:[%s18838_s3 + $0x55c] sm:$0xf0] }
  0x19   :  { %v8708_v60 = vld [vmem:[%s18838_s3 + $0x740] sm:$0xf]  ;;  %v8453_v4 = vor.u32 %v11790_v59, %v8452_v58  ;;  %3326 = vmatpush.bf16.msra.mxu1 %v8197_v63 }
  0x1a   :  { %v11854_v61 = vld [vmem:[%s18838_s3 + $0x75c] sm:$0xf0]  ;;  %7774 = vmatmul.msk.bf16.vlgmr.msrb.gmra.mxu0 %vm72_vm1, %v12694_v9  ;;  %7775 = vmatmul.msk.bf16.vlgmr.msrb.gmra.mxu1 %vm72_vm1, %v12694_v9 }
  0x1b   :  { %v7908_v0 = vld [vmem:[%s18838_s3 + $0x100] sm:$0xf]  ;;  %v8709_v5 = vor.u32 %v11854_v61, %v8708_v60  ;;  %3339 = vmatpush.bf16.msra.mxu2 %v8453_v4 }
  0x1c   :  { %v11654_v1 = vld [vmem:[%s18838_s3 + $0x11c] sm:$0xf0]  ;;  %7776 = vmatmul.msk.bf16.vlgmr.msrb.gmra.mxu2 %vm72_vm1, %v12694_v9  ;;  %7777 = vmatmul.msk.bf16.vlgmr.msrb.gmra.mxu3 %vm72_vm1, %v12694_v9 }
  0x1d   :  { %v8164_v2 = vld [vmem:[%s18838_s3 + $0x300] sm:$0xf]  ;;  %v7909_v8 = vor.u32 %v11654_v1, %v7908_v0  ;;  %3352 = vmatpush.bf16.msra.mxu3 %v8709_v5 }
  0x1e   :  { %v11718_v3 = vld [vmem:[%s18838_s3 + $0x31c] sm:$0xf0] }
  0x1f   :  { %v7876_v6 = vld [vmem:[%s18838_s3 + $0xc0] sm:$0xf]  ;;  %v8165_v10 = vor.u32 %v11718_v3, %v8164_v2  ;;  %3314 = vmatpush.bf16.msra.mxu0 %v7909_v8 }
  0x20   :  { %v8420_v7 = vld [vmem:[%s18838_s3 + $0x500] sm:$0xf] }
  0x21   :  { %v11782_v11 = vld [vmem:[%s18838_s3 + $0x51c] sm:$0xf0]  ;;  %3327 = vmatpush.bf16.msra.mxu1 %v8165_v10 }
  0x22   :  { %v8676_v12 = vld [vmem:[%s18838_s3 + $0x700] sm:$0xf]  ;;  %v8421_v17 = vor.u32 %v11782_v11, %v8420_v7 }
  0x23   :  { %v11846_v13 = vld [vmem:[%s18838_s3 + $0x71c] sm:$0xf0] }
  0x24   :  { %v11646_v14 = vld [vmem:[%s18838_s3 + $0xdc] sm:$0xf0]  ;;  %v8677_v18 = vor.u32 %v11846_v13, %v8676_v12  ;;  %3340 = vmatpush.bf16.msra.mxu2 %v8421_v17 }
  0x25   :  { %v8132_v15 = vld [vmem:[%s18838_s3 + $0x2c0] sm:$0xf]  ;;  %v7877_v21 = vor.u32 %v11646_v14, %v7876_v6 }
  0x26   :  { %v11710_v16 = vld [vmem:[%s18838_s3 + $0x2dc] sm:$0xf0]  ;;  %3353 = vmatpush.bf16.msra.mxu3 %v8677_v18 }
  0x27   :  { %v7844_v19 = vld [vmem:[%s18838_s3 + $0x80] sm:$0xf]  ;;  %v8133_v22 = vor.u32 %v11710_v16, %v8132_v15  ;;  %3315 = vmatpush.bf16.msra.mxu0 %v7877_v21 }
  0x28   :  { %v8388_v20 = vld [vmem:[%s18838_s3 + $0x4c0] sm:$0xf] }
  0x29   :  { %v11774_v23 = vld [vmem:[%s18838_s3 + $0x4dc] sm:$0xf0]  ;;  %3328 = vmatpush.bf16.msra.mxu1 %v8133_v22 }
  0x2a   :  { %v8644_v24 = vld [vmem:[%s18838_s3 + $0x6c0] sm:$0xf]  ;;  %v8389_v29 = vor.u32 %v11774_v23, %v8388_v20 }
  0x2b   :  { %v11838_v25 = vld [vmem:[%s18838_s3 + $0x6dc] sm:$0xf0] }
  0x2c   :  { %v11638_v26 = vld [vmem:[%s18838_s3 + $0x9c] sm:$0xf0]  ;;  %v8645_v30 = vor.u32 %v11838_v25, %v8644_v24  ;;  %3341 = vmatpush.bf16.msra.mxu2 %v8389_v29 }
  0x2d   :  { %v8100_v27 = vld [vmem:[%s18838_s3 + $0x280] sm:$0xf]  ;;  %v7845_v33 = vor.u32 %v11638_v26, %v7844_v19 }
  0x2e   :  { %v11702_v28 = vld [vmem:[%s18838_s3 + $0x29c] sm:$0xf0]  ;;  %3354 = vmatpush.bf16.msra.mxu3 %v8645_v30 }
  0x2f   :  { %v7812_v31 = vld [vmem:[%s18838_s3 + $0x40] sm:$0xf]  ;;  %v8101_v34 = vor.u32 %v11702_v28, %v8100_v27  ;;  %3316 = vmatpush.bf16.msra.mxu0 %v7845_v33 }
  0x30   :  { %v8356_v32 = vld [vmem:[%s18838_s3 + $0x480] sm:$0xf] }
  0x31   :  { %v11766_v9 = vld [vmem:[%s18838_s3 + $0x49c] sm:$0xf0]  ;;  %3329 = vmatpush.bf16.msra.mxu1 %v8101_v34 }
  0x32   :  { %v8612_v35 = vld [vmem:[%s18838_s3 + $0x680] sm:$0xf]  ;;  %v8357_v40 = vor.u32 %v11766_v9, %v8356_v32 }
  0x33   :  { %v11830_v36 = vld [vmem:[%s18838_s3 + $0x69c] sm:$0xf0] }
  0x34   :  { %v11630_v37 = vld [vmem:[%s18838_s3 + $0x5c] sm:$0xf0]  ;;  %v8613_v41 = vor.u32 %v11830_v36, %v8612_v35  ;;  %3342 = vmatpush.bf16.msra.mxu2 %v8357_v40 }
  0x35   :  { %v8068_v38 = vld [vmem:[%s18838_s3 + $0x240] sm:$0xf]  ;;  %v7813_v45 = vor.u32 %v11630_v37, %v7812_v31 }
  0x36   :  { %v11694_v39 = vld [vmem:[%s18838_s3 + $0x25c] sm:$0xf0]  ;;  %3355 = vmatpush.bf16.msra.mxu3 %v8613_v41 }
  0x37   :  { %v7780_v42 = vld [vmem:[%s18838_s3] sm:$0xf]  ;;  %v8069_v46 = vor.u32 %v11694_v39, %v8068_v38  ;;  %3317 = vmatpush.bf16.msra.mxu0 %v7813_v45 }
  0x38   :  { %v11622_v43 = vld [vmem:[%s18838_s3 + $0x1c] sm:$0xf0] }
  0x39   :  { %v8324_v44 = vld [vmem:[%s18838_s3 + $0x440] sm:$0xf]  ;;  %3330 = vmatpush.bf16.msra.mxu1 %v8069_v46  ;;  %v7781_v60 = vor.u32 %v11622_v43, %v7780_v42 }
  0x3a   :  { %v11758_v47 = vld [vmem:[%s18838_s3 + $0x45c] sm:$0xf0] }
  0x3b   :  { %v8580_v48 = vld [vmem:[%s18838_s3 + $0x640] sm:$0xf]  ;;  %v8325_v56 = vor.u32 %v11758_v47, %v8324_v44 }
  0x3c   :  { %v11822_v49 = vld [vmem:[%s18838_s3 + $0x65c] sm:$0xf0] }
  0x3d   :  { %v8036_v50 = vld [vmem:[%s18838_s3 + $0x200] sm:$0xf]  ;;  %v8581_v57 = vor.u32 %v11822_v49, %v8580_v48 }
  0x3e   :  { %v11686_v51 = vld [vmem:[%s18838_s3 + $0x21c] sm:$0xf0] }
  0x3f   :  { %v9028_v52 = vld [vmem:[%s18838_s3 + $0x9c0] sm:$0xf]  ;;  %v8037_v61 = vor.u32 %v11686_v51, %v8036_v50 }
  0x40   :  { %v11934_v53 = vld [vmem:[%s18838_s3 + $0x9dc] sm:$0xf0] }
  0x41   :  { %v9284_v54 = vld [vmem:[%s18838_s3 + $0xbc0] sm:$0xf]  ;;  %v9029_v3 = vor.u32 %v11934_v53, %v9028_v52 }
  0x42   :  { %v11998_v55 = vld [vmem:[%s18838_s3 + $0xbdc] sm:$0xf0] }
  0x43   :  { %v8292_v58 = vld [vmem:[%s18838_s3 + $0x400] sm:$0xf]  ;;  %v9285_v4 = vor.u32 %v11998_v55, %v9284_v54 }
  0x44   :  { %v11750_v59 = vld [vmem:[%s18838_s3 + $0x41c] sm:$0xf0] }
  0x45   :  { %v8996_v62 = vld [vmem:[%s18838_s3 + $0x980] sm:$0xf] }
  0x46   :  { %v11926_v63 = vld [vmem:[%s18838_s3 + $0x99c] sm:$0xf0] }
  0x47   :  { %v8548_v0 = vld [vmem:[%s18838_s3 + $0x600] sm:$0xf] }
  0x48   :  { %v11814_v1 = vld [vmem:[%s18838_s3 + $0x61c] sm:$0xf0] }
  0x49   :  { %v9540_v2 = vld [vmem:[%s18838_s3 + $0xdc0] sm:$0xf] }
  0x4a   :  { %v12062_v5 = vld [vmem:[%s18838_s3 + $0xddc] sm:$0xf0] }
  0x4b   :  { %v9796_v6 = vld [vmem:[%s18838_s3 + $0xfc0] sm:$0xf] }
  0x4c   :  { %v12126_v7 = vld [vmem:[%s18838_s3 + $0xfdc] sm:$0xf0] }
  0x4d   :  { %v9252_v8 = vld [vmem:[%s18838_s3 + $0xb80] sm:$0xf] }
  0x4e   :  { %v11990_v10 = vld [vmem:[%s18838_s3 + $0xb9c] sm:$0xf0] }
  0x4f   :  { %12 = vsyncpa [#allocation3], 0  ;;  %3343 = vmatpush.bf16.msra.mxu2 %v8325_v56  ;;  %3356 = vmatpush.bf16.msra.mxu3 %v8581_v57  ;;  %v8293_v11 = vor.u32 %v11750_v59, %v8292_v58  ;;  %v8549_v12 = vor.u32 %v11814_v1, %v8548_v0  ;;  %v9541_v13 = vor.u32 %v12062_v5, %v9540_v2  ;;  %v8964_v15 = vld [vmem:[%s18838_s3 + $0x940] sm:$0xf]  ;;  %s7761_s18 = sshll.u32 %s18842_s7, 4  ;;  %vm7752_vm2 = vcmask 130048   ;;  %s7762_s18 = int_to_ptr.hbm [resolvable:$true] %s7761_s18 }
  0x50   :  { %3318 = vmatpush.bf16.msra.mxu0 %v7781_v60  ;;  %3331 = vmatpush.bf16.msra.mxu1 %v8037_v61  ;;  %v9797_v14 = vor.u32 %v12126_v7, %v9796_v6  ;;  %v9508_v16 = vld [vmem:[%s18838_s3 + $0xd80] sm:$0xf]  ;;  %v8997_v17 = vor.u32 %v11926_v63, %v8996_v62  ;;  %v9253_v18 = vor.u32 %v11990_v10, %v9252_v8 }
  0x51   :  { %v12054_v19 = vld [vmem:[%s18838_s3 + $0xd9c] sm:$0xf0] }
  0x52   :  { %v9764_v20 = vld [vmem:[%s18838_s3 + $0xf80] sm:$0xf]  ;;  %v9509_v25 = vor.u32 %v12054_v19, %v9508_v16 }
  0x53   :  { %v12118_v21 = vld [vmem:[%s18838_s3 + $0xf9c] sm:$0xf0]  ;;  %3344 = vmatpush.bf16.msra.mxu2 %v8293_v11  ;;  %3357 = vmatpush.bf16.msra.mxu3 %v8549_v12 }
  0x54   :  { %3363 = vmatpush.bf16.msrb.mxu0 %v9029_v3  ;;  %3376 = vmatpush.bf16.msrb.mxu1 %v9285_v4  ;;  %v11918_v22 = vld [vmem:[%s18838_s3 + $0x95c] sm:$0xf0]  ;;  %v9765_v26 = vor.u32 %v12118_v21, %v9764_v20 }
  0x55   :  { %v9220_v23 = vld [vmem:[%s18838_s3 + $0xb40] sm:$0xf]  ;;  %v8965_v29 = vor.u32 %v11918_v22, %v8964_v15 }
  0x56   :  { %v11982_v24 = vld [vmem:[%s18838_s3 + $0xb5c] sm:$0xf0] }
  0x57   :  { %3389 = vmatpush.bf16.msrb.mxu2 %v9541_v13  ;;  %3402 = vmatpush.bf16.msrb.mxu3 %v9797_v14  ;;  %v8932_v27 = vld [vmem:[%s18838_s3 + $0x900] sm:$0xf]  ;;  %v9221_v30 = vor.u32 %v11982_v24, %v9220_v23 }
  0x58   :  { %v9476_v28 = vld [vmem:[%s18838_s3 + $0xd40] sm:$0xf]  ;;  %3364 = vmatpush.bf16.msrb.mxu0 %v8997_v17  ;;  %3377 = vmatpush.bf16.msrb.mxu1 %v9253_v18 }
  0x59   :  { %v12046_v31 = vld [vmem:[%s18838_s3 + $0xd5c] sm:$0xf0] }
  0x5a   :  { %v9732_v32 = vld [vmem:[%s18838_s3 + $0xf40] sm:$0xf]  ;;  %v9477_v36 = vor.u32 %v12046_v31, %v9476_v28 }
  0x5b   :  { %v12110_v33 = vld [vmem:[%s18838_s3 + $0xf5c] sm:$0xf0]  ;;  %3390 = vmatpush.bf16.msrb.mxu2 %v9509_v25  ;;  %3403 = vmatpush.bf16.msrb.mxu3 %v9765_v26 }
  0x5c   :  { %v11910_v34 = vld [vmem:[%s18838_s3 + $0x91c] sm:$0xf0]  ;;  %v9733_v37 = vor.u32 %v12110_v33, %v9732_v32  ;;  %3365 = vmatpush.bf16.msrb.mxu0 %v8965_v29  ;;  %3378 = vmatpush.bf16.msrb.mxu1 %v9221_v30 }
  0x5d   :  { %v9188_v9 = vld [vmem:[%s18838_s3 + $0xb00] sm:$0xf]  ;;  %v8933_v40 = vor.u32 %v11910_v34, %v8932_v27 }
  0x5e   :  { %v11974_v35 = vld [vmem:[%s18838_s3 + $0xb1c] sm:$0xf0] }
  0x5f   :  { %v8900_v38 = vld [vmem:[%s18838_s3 + $0x8c0] sm:$0xf]  ;;  %v9189_v41 = vor.u32 %v11974_v35, %v9188_v9  ;;  %3391 = vmatpush.bf16.msrb.mxu2 %v9477_v36  ;;  %3404 = vmatpush.bf16.msrb.mxu3 %v9733_v37  ;;  %v11674_v35 = vld [vmem:[%s18838_s3 + $0x1c4] sm:$0xf] }
  0x60   :  { %v9444_v39 = vld [vmem:[%s18838_s3 + $0xd00] sm:$0xf]  ;;  %3366 = vmatpush.bf16.msrb.mxu0 %v8933_v40  ;;  %v8262_v40 = vld [vmem:[%s18838_s3 + $0x3e0] sm:$0xf0] }
  0x61   :  { %v12038_v42 = vld [vmem:[%s18838_s3 + $0xd1c] sm:$0xf0]  ;;  %3379 = vmatpush.bf16.msrb.mxu1 %v9189_v41 }
  0x62   :  { %v9700_v43 = vld [vmem:[%s18838_s3 + $0xf00] sm:$0xf]  ;;  %v9445_v48 = vor.u32 %v12038_v42, %v9444_v39  ;;  %v11738_v39 = vld [vmem:[%s18838_s3 + $0x3c4] sm:$0xf] }
  0x63   :  { %v12102_v44 = vld [vmem:[%s18838_s3 + $0xf1c] sm:$0xf0] }
  0x64   :  { %v11902_v45 = vld [vmem:[%s18838_s3 + $0x8dc] sm:$0xf0]  ;;  %v9701_v49 = vor.u32 %v12102_v44, %v9700_v43  ;;  %3392 = vmatpush.bf16.msrb.mxu2 %v9445_v48  ;;  %v7974_v48 = vld [vmem:[%s18838_s3 + $0x1a0] sm:$0xf0] }
  0x65   :  { %v9156_v46 = vld [vmem:[%s18838_s3 + $0xac0] sm:$0xf]  ;;  %v8901_v50 = vor.u32 %v11902_v45, %v8900_v38  ;;  %v8006_v38 = vld [vmem:[%s18838_s3 + $0x1e0] sm:$0xf0] }
  0x66   :  { %v11966_v47 = vld [vmem:[%s18838_s3 + $0xadc] sm:$0xf0]  ;;  %3405 = vmatpush.bf16.msrb.mxu3 %v9701_v49  ;;  %v8009_v45 = vor.u32 %v11674_v35, %v8006_v38  ;;  %v11642_v38 = vld [vmem:[%s18838_s3 + $0xc4] sm:$0xf] }
  0x67   :  { %v9157_v51 = vor.u32 %v11966_v47, %v9156_v46  ;;  %v8868_v52 = vld [vmem:[%s18838_s3 + $0x880] sm:$0xf]  ;;  %3367 = vmatpush.bf16.msrb.mxu0 %v8901_v50  ;;  %v8265_v46 = vor.u32 %v11738_v39, %v8262_v40  ;;  %v11666_v47 = vld [vmem:[%s18838_s3 + $0x184] sm:$0xf] }
  0x68   :  { %v11894_v53 = vld [vmem:[%s18838_s3 + $0x89c] sm:$0xf0] }
  0x69   :  { %v9124_v54 = vld [vmem:[%s18838_s3 + $0xa80] sm:$0xf]  ;;  %3380 = vmatpush.bf16.msrb.mxu1 %v9157_v51  ;;  %v8869_v56 = vor.u32 %v11894_v53, %v8868_v52  ;;  %v11730_v51 = vld [vmem:[%s18838_s3 + $0x384] sm:$0xf] }
  0x6a   :  { %v11958_v55 = vld [vmem:[%s18838_s3 + $0xa9c] sm:$0xf0]  ;;  %v8230_v52 = vld [vmem:[%s18838_s3 + $0x3a0] sm:$0xf0] }
  0x6b   :  { %v9125_v57 = vor.u32 %v11958_v55, %v9124_v54  ;;  %3368 = vmatpush.bf16.msrb.mxu0 %v8869_v56  ;;  %v9412_v58 = vld [vmem:[%s18838_s3 + $0xcc0] sm:$0xf]  ;;  %v7977_v55 = vor.u32 %v11666_v47, %v7974_v48  ;;  %v11802_v56 = vld [vmem:[%s18838_s3 + $0x5c4] sm:$0xf] }
  0x6c   :  { %v12030_v59 = vld [vmem:[%s18838_s3 + $0xcdc] sm:$0xf0]  ;;  %v11778_v48 = vld [vmem:[%s18838_s3 + $0x504] sm:$0xf] }
  0x6d   :  { %3381 = vmatpush.bf16.msrb.mxu1 %v9125_v57  ;;  %v9668_v60 = vld [vmem:[%s18838_s3 + $0xec0] sm:$0xf]  ;;  %v9413_v61 = vor.u32 %v12030_v59, %v9412_v58  ;;  %v8518_v57 = vld [vmem:[%s18838_s3 + $0x5e0] sm:$0xf0] }
  0x6e   :  { %v12094_v62 = vld [vmem:[%s18838_s3 + $0xedc] sm:$0xf0]  ;;  %v11866_v58 = vld [vmem:[%s18838_s3 + $0x7c4] sm:$0xf] }
  0x6f   :  { %v9669_v63 = vor.u32 %v12094_v62, %v9668_v60  ;;  %v8836_v0 = vld [vmem:[%s18838_s3 + $0x840] sm:$0xf]  ;;  %3393 = vmatpush.bf16.msrb.mxu2 %v9413_v61 }
  0x70   :  { %v11886_v1 = vld [vmem:[%s18838_s3 + $0x85c] sm:$0xf0] }
  0x71   :  { %v8837_v2 = vor.u32 %v11886_v1, %v8836_v0  ;;  %v9092_v3 = vld [vmem:[%s18838_s3 + $0xa40] sm:$0xf]  ;;  %3406 = vmatpush.bf16.msrb.mxu3 %v9669_v63  ;;  %v8233_v63 = vor.u32 %v11730_v51, %v8230_v52  ;;  %v8774_v0 = vld [vmem:[%s18838_s3 + $0x7e0] sm:$0xf0] }
  0x72   :  { %v11950_v4 = vld [vmem:[%s18838_s3 + $0xa5c] sm:$0xf0]  ;;  %v11658_v1 = vld [vmem:[%s18838_s3 + $0x144] sm:$0xf] }
  0x73   :  { %v9093_v5 = vor.u32 %v11950_v4, %v9092_v3  ;;  %v9380_v6 = vld [vmem:[%s18838_s3 + $0xc80] sm:$0xf]  ;;  %3369 = vmatpush.bf16.msrb.mxu0 %v8837_v2  ;;  %v7942_v2 = vld [vmem:[%s18838_s3 + $0x160] sm:$0xf0] }
  0x74   :  { %v12022_v7 = vld [vmem:[%s18838_s3 + $0xc9c] sm:$0xf0]  ;;  %v11722_v3 = vld [vmem:[%s18838_s3 + $0x344] sm:$0xf] }
  0x75   :  { %v9636_v8 = vld [vmem:[%s18838_s3 + $0xe80] sm:$0xf]  ;;  %v9381_v10 = vor.u32 %v12022_v7, %v9380_v6  ;;  %3382 = vmatpush.bf16.msrb.mxu1 %v9093_v5  ;;  %v8198_v4 = vld [vmem:[%s18838_s3 + $0x360] sm:$0xf0]  ;;  %v8521_v7 = vor.u32 %v11802_v56, %v8518_v57 }
  0x76   :  { %v12086_v11 = vld [vmem:[%s18838_s3 + $0xe9c] sm:$0xf0]  ;;  %v8422_v51 = vld [vmem:[%s18838_s3 + $0x520] sm:$0xf0] }
  0x77   :  { %v9637_v12 = vor.u32 %v12086_v11, %v9636_v8  ;;  %v8804_v13 = vld [vmem:[%s18838_s3 + $0x800] sm:$0xf]  ;;  %3394 = vmatpush.bf16.msrb.mxu2 %v9381_v10  ;;  %v8777_v8 = vor.u32 %v11866_v58, %v8774_v0  ;;  %v7945_v10 = vor.u32 %v11658_v1, %v7942_v2  ;;  %v11842_v52 = vld [vmem:[%s18838_s3 + $0x704] sm:$0xf] }
  0x78   :  { %v11878_v14 = vld [vmem:[%s18838_s3 + $0x81c] sm:$0xf0]  ;;  %v11634_v57 = vld [vmem:[%s18838_s3 + $0x84] sm:$0xf] }
  0x79   :  { %v9060_v15 = vld [vmem:[%s18838_s3 + $0xa00] sm:$0xf]  ;;  %v8805_v16 = vor.u32 %v11878_v14, %v8804_v13  ;;  %3407 = vmatpush.bf16.msrb.mxu3 %v9637_v12  ;;  %v11794_v13 = vld [vmem:[%s18838_s3 + $0x584] sm:$0xf] }
  0x7a   :  { %v11942_v17 = vld [vmem:[%s18838_s3 + $0xa1c] sm:$0xf0]  ;;  %v8486_v14 = vld [vmem:[%s18838_s3 + $0x5a0] sm:$0xf0] }
  0x7b   :  { %v9061_v18 = vor.u32 %v11942_v17, %v9060_v15  ;;  %3370 = vmatpush.bf16.msrb.mxu0 %v8805_v16  ;;  %v9348_v19 = vld [vmem:[%s18838_s3 + $0xc40] sm:$0xf]  ;;  %v8201_v17 = vor.u32 %v11722_v3, %v8198_v4  ;;  %v7846_v58 = vld [vmem:[%s18838_s3 + $0xa0] sm:$0xf0] }
  0x7c   :  { %v12014_v20 = vld [vmem:[%s18838_s3 + $0xc5c] sm:$0xf0]  ;;  %v11770_v1 = vld [vmem:[%s18838_s3 + $0x4c4] sm:$0xf] }
  0x7d   :  { %3383 = vmatpush.bf16.msrb.mxu1 %v9061_v18  ;;  %v9349_v21 = vor.u32 %v12014_v20, %v9348_v19  ;;  %v9604_v22 = vld [vmem:[%s18838_s3 + $0xe40] sm:$0xf]  ;;  %v11858_v18 = vld [vmem:[%s18838_s3 + $0x784] sm:$0xf] }
  0x7e   :  { %v12078_v23 = vld [vmem:[%s18838_s3 + $0xe5c] sm:$0xf0]  ;;  %v8742_v19 = vld [vmem:[%s18838_s3 + $0x7a0] sm:$0xf0] }
  0x7f   :  { %v9605_v24 = vor.u32 %v12078_v23, %v9604_v22  ;;  %3395 = vmatpush.bf16.msrb.mxu2 %v9349_v21  ;;  %v9316_v25 = vld [vmem:[%s18838_s3 + $0xc00] sm:$0xf]  ;;  %v11650_v20 = vld [vmem:[%s18838_s3 + $0x104] sm:$0xf] }
  0x80   :  { %v12006_v26 = vld [vmem:[%s18838_s3 + $0xc1c] sm:$0xf0]  ;;  %v7910_v21 = vld [vmem:[%s18838_s3 + $0x120] sm:$0xf0] }
  0x81   :  { %3408 = vmatpush.bf16.msrb.mxu3 %v9605_v24  ;;  %v9317_v27 = vor.u32 %v12006_v26, %v9316_v25  ;;  %v9572_v28 = vld [vmem:[%s18838_s3 + $0xe00] sm:$0xf]  ;;  %v11714_v22 = vld [vmem:[%s18838_s3 + $0x304] sm:$0xf] }
  0x82   :  { %v12070_v29 = vld [vmem:[%s18838_s3 + $0xe1c] sm:$0xf0]  ;;  %v8166_v23 = vld [vmem:[%s18838_s3 + $0x320] sm:$0xf0] }
  0x83   :  { %v9573_v30 = vor.u32 %v12070_v29, %v9572_v28  ;;  %3396 = vmatpush.bf16.msrb.mxu2 %v9317_v27  ;;  %v13107_v31 = vld [vmem:[%s18837_s2] sm:$0xff]  ;;  %v8489_v27 = vor.u32 %v11794_v13, %v8486_v14  ;;  %v8745_v28 = vor.u32 %v11858_v18, %v8742_v19  ;;  %v8169_v35 = vor.u32 %v11714_v22, %v8166_v23 }
  0x84   :  { %v36_v32 = vperm.slane %v13107_v31, 0  ;;  %v37_v33 = vperm.slane %v13107_v31, 1  ;;  %v38_v43 = vperm.slane %v13107_v31, 2  ;;  %v39_v44 = vperm.slane %v13107_v31, 3  ;;  %v11786_v24 = vld [vmem:[%s18838_s3 + $0x544] sm:$0xf] }
  0x85   :  { %3409 = vmatpush.bf16.msrb.mxu3 %v9573_v30  ;;  %v40_v11 = vperm.slane %v13107_v31, 4  ;;  %v41_v12 = vperm.slane %v13107_v31, 5  ;;  %v8454_v29 = vld [vmem:[%s18838_s3 + $0x560] sm:$0xf0]  ;;  %v43_v47 = vperm.slane %v13107_v31, 7 }
  0x86   :  { %v11850_v30 = vld [vmem:[%s18838_s3 + $0x744] sm:$0xf]  ;;  %v8457_v39 = vor.u32 %v11786_v24, %v8454_v29 }
  0x87   :  { %v110_v34 = vpop.f32.mrf.mxu0  ;;  %v123_v9 = vpop.f32.mrf.mxu1  ;;  %v8390_v4 = vld [vmem:[%s18838_s3 + $0x4e0] sm:$0xf0] }
  0x88   :  { %v111_v36 = vadd.f32 %v110_v34, %v36_v32  ;;  %v124_v37 = vadd.f32 %v123_v9, %v37_v33  ;;  %v8710_v32 = vld [vmem:[%s18838_s3 + $0x760] sm:$0xf0]  ;;  %v7913_v9 = vor.u32 %v11650_v20, %v7910_v21  ;;  %v8393_v20 = vor.u32 %v11770_v1, %v8390_v4 }
  0x89   :  { %v8713_v40 = vor.u32 %v11850_v30, %v8710_v32  ;;  %v7814_v13 = vld [vmem:[%s18838_s3 + $0x60] sm:$0xf0] }
  0x8a   :  { %v205_v41 = vmax.f32 %v111_v36, 0.0  ;;  %v206_v42 = vmax.f32 %v124_v37, 0.0  ;;  %v11690_v18 = vld [vmem:[%s18838_s3 + $0x244] sm:$0xf] }
  0x8b   :  { %v8070_v19 = vld [vmem:[%s18838_s3 + $0x260] sm:$0xf0] }
  0x8c   :  { %v13131_v49 = vpack.c.bf16 %v205_v41, %v205_v41  ;;  %v13133_v50 = vpack.c.bf16 %v206_v42, %v206_v42  ;;  %v7878_v41 = vld [vmem:[%s18838_s3 + $0xe0] sm:$0xf0]  ;;  %v8073_v29 = vor.u32 %v11690_v18, %v8070_v19 }
  0x8d   :  { %v11706_v42 = vld [vmem:[%s18838_s3 + $0x2c4] sm:$0xf] }
  0x8e   :  { %3319 = vmatmul.bf16.vlgmr.msra.gmra.mxu0 %v13131_v49  ;;  %3332 = vmatmul.bf16.vlgmr.msra.gmra.mxu1 %v13133_v50  ;;  %v11762_v22 = vld [vmem:[%s18838_s3 + $0x484] sm:$0xf] }
  0x8f   :  { %v136_v53 = vpop.f32.mrf.mxu2  ;;  %v149_v54 = vpop.f32.mrf.mxu3  ;;  %3415 = vmatpush.bf16.msra.mxu0 %v8009_v45  ;;  %3428 = vmatpush.bf16.msra.mxu1 %v8265_v46  ;;  %v42_v46 = vperm.slane %v13107_v31, 6  ;;  %v11618_v30 = vld [vmem:[%s18838_s3 + $0x4] sm:$0xf] }
  0x90   :  { %v137_v59 = vadd.f32 %v136_v53, %v38_v43  ;;  %v150_v60 = vadd.f32 %v149_v54, %v39_v44  ;;  %v112_v61 = vpop.f32.mrf.mxu0  ;;  %v125_v62 = vpop.f32.mrf.mxu1  ;;  %v8134_v43 = vld [vmem:[%s18838_s3 + $0x2e0] sm:$0xf0] }
  0x91   :  { %v8678_v53 = vld [vmem:[%s18838_s3 + $0x720] sm:$0xf0]  ;;  %v8137_v56 = vor.u32 %v11706_v42, %v8134_v43 }
  0x92   :  { %v207_v5 = vmax.f32 %v137_v59, 0.0  ;;  %v208_v6 = vmax.f32 %v150_v60, 0.0  ;;  %v11698_v59 = vld [vmem:[%s18838_s3 + $0x284] sm:$0xf]  ;;  %v8681_v0 = vor.u32 %v11842_v52, %v8678_v53 }
  0x93   :  { %3416 = vmatpush.bf16.msra.mxu0 %v7977_v55  ;;  %3429 = vmatpush.bf16.msra.mxu1 %v8233_v63  ;;  %v7881_v55 = vor.u32 %v11642_v38, %v7878_v41  ;;  %v8102_v60 = vld [vmem:[%s18838_s3 + $0x2a0] sm:$0xf0]  ;;  %v8425_v63 = vor.u32 %v11778_v48, %v8422_v51 }
  0x94   :  { %v13175_v15 = vpack.c.bf16 %v207_v5, %v207_v5  ;;  %v13177_v16 = vpack.c.bf16 %v208_v6, %v208_v6  ;;  %v11834_v5 = vld [vmem:[%s18838_s3 + $0x6c4] sm:$0xf] }
  0x95   :  { %v8646_v6 = vld [vmem:[%s18838_s3 + $0x6e0] sm:$0xf0] }
  0x96   :  { %3345 = vmatmul.bf16.vlgmr.msra.gmra.mxu2 %v13175_v15  ;;  %3358 = vmatmul.bf16.vlgmr.msra.gmra.mxu3 %v13177_v16  ;;  %v8649_v21 = vor.u32 %v11834_v5, %v8646_v6  ;;  %v7782_v32 = vld [vmem:[%s18838_s3 + $0x20] sm:$0xf0] }
  0x97   :  { %3441 = vmatpush.bf16.msra.mxu2 %v8521_v7  ;;  %3454 = vmatpush.bf16.msra.mxu3 %v8777_v8  ;;  %v138_v25 = vpop.f32.mrf.mxu2  ;;  %v151_v26 = vpop.f32.mrf.mxu3  ;;  %v11754_v42 = vld [vmem:[%s18838_s3 + $0x444] sm:$0xf] }
  0x98   :  { %3417 = vmatpush.bf16.msra.mxu0 %v7945_v10  ;;  %3430 = vmatpush.bf16.msra.mxu1 %v8201_v17  ;;  %v162_v33 = vpop.f32.mrf.mxu0  ;;  %v175_v34 = vpop.f32.mrf.mxu1  ;;  %v7849_v10 = vor.u32 %v11634_v57, %v7846_v58  ;;  %v8358_v25 = vld [vmem:[%s18838_s3 + $0x4a0] sm:$0xf0] }
  0x99   :  { %v163_v36 = vadd.f32 %v162_v33, %v40_v11  ;;  %v176_v37 = vadd.f32 %v175_v34, %v41_v12  ;;  %v8105_v11 = vor.u32 %v11698_v59, %v8102_v60  ;;  %v11626_v12 = vld [vmem:[%s18838_s3 + $0x44] sm:$0xf] }
  0x9a   :  { %v11826_v26 = vld [vmem:[%s18838_s3 + $0x684] sm:$0xf] }
  0x9b   :  { %v209_v44 = vmax.f32 %v163_v36, 0.0  ;;  %v210_v45 = vmax.f32 %v176_v37, 0.0  ;;  %3442 = vmatpush.bf16.msra.mxu2 %v8489_v27  ;;  %3455 = vmatpush.bf16.msra.mxu3 %v8745_v28  ;;  %v8614_v27 = vld [vmem:[%s18838_s3 + $0x6a0] sm:$0xf0]  ;;  %v7817_v28 = vor.u32 %v11626_v12, %v7814_v13  ;;  %v8361_v36 = vor.u32 %v11762_v22, %v8358_v25 }
  0x9c   :  { %3418 = vmatpush.bf16.msra.mxu0 %v7913_v9  ;;  %3431 = vmatpush.bf16.msra.mxu1 %v8169_v35  ;;  %v11682_v33 = vld [vmem:[%s18838_s3 + $0x204] sm:$0xf]  ;;  %v8617_v37 = vor.u32 %v11826_v26, %v8614_v27 }
  0x9d   :  { %v13237_v54 = vpack.c.bf16 %v209_v44, %v209_v44  ;;  %v13239_v31 = vpack.c.bf16 %v210_v45, %v210_v45  ;;  %v8038_v34 = vld [vmem:[%s18838_s3 + $0x220] sm:$0xf0] }
  0x9e   :  { %v11930_v9 = vld [vmem:[%s18838_s3 + $0x9c4] sm:$0xf] }
  0x9f   :  { %3443 = vmatpush.bf16.msra.mxu2 %v8457_v39  ;;  %3456 = vmatpush.bf16.msra.mxu3 %v8713_v40  ;;  %v188_v61 = vpop.f32.mrf.mxu2  ;;  %v201_v62 = vpop.f32.mrf.mxu3  ;;  %v9030_v35 = vld [vmem:[%s18838_s3 + $0x9e0] sm:$0xf0] }
  0xa0   :  { %v189_v2 = vadd.f32 %v188_v61, %v42_v46  ;;  %v202_v3 = vadd.f32 %v201_v62, %v43_v47  ;;  %3371 = vmatmul.bf16.vlgmr.msrb.gmra.mxu0 %v13237_v54  ;;  %3384 = vmatmul.bf16.vlgmr.msrb.gmra.mxu1 %v13239_v31  ;;  %v164_v7 = vpop.f32.mrf.mxu0  ;;  %v177_v8 = vpop.f32.mrf.mxu1  ;;  %v11994_v39 = vld [vmem:[%s18838_s3 + $0xbc4] sm:$0xf]  ;;  %v7785_v46 = vor.u32 %v11618_v30, %v7782_v32 }
  0xa1   :  { %3419 = vmatpush.bf16.msra.mxu0 %v7881_v55  ;;  %3432 = vmatpush.bf16.msra.mxu1 %v8137_v56  ;;  %v9286_v40 = vld [vmem:[%s18838_s3 + $0xbe0] sm:$0xf0]  ;;  %v8041_v47 = vor.u32 %v11682_v33, %v8038_v34  ;;  %v9033_v48 = vor.u32 %v11930_v9, %v9030_v35 }
  0xa2   :  { %v211_v14 = vmax.f32 %v189_v2, 0.0  ;;  %v212_v17 = vmax.f32 %v202_v3, 0.0  ;;  %v8326_v43 = vld [vmem:[%s18838_s3 + $0x460] sm:$0xf0]  ;;  %v9289_v51 = vor.u32 %v11994_v39, %v9286_v40 }
  0xa3   :  { %3444 = vmatpush.bf16.msra.mxu2 %v8425_v63  ;;  %3457 = vmatpush.bf16.msra.mxu3 %v8681_v0  ;;  %v11818_v44 = vld [vmem:[%s18838_s3 + $0x644] sm:$0xf]  ;;  %v8329_v56 = vor.u32 %v11754_v42, %v8326_v43 }
  0xa4   :  { %v13282_v23 = vpack.c.bf16 %v211_v14, %v211_v14  ;;  %v13284_v24 = vpack.c.bf16 %v212_v17, %v212_v17  ;;  %v8582_v45 = vld [vmem:[%s18838_s3 + $0x660] sm:$0xf0] }
  0xa5   :  { %3420 = vmatpush.bf16.msra.mxu0 %v7849_v10  ;;  %3433 = vmatpush.bf16.msra.mxu1 %v8105_v11  ;;  %v11922_v52 = vld [vmem:[%s18838_s3 + $0x984] sm:$0xf]  ;;  %v8585_v57 = vor.u32 %v11818_v44, %v8582_v45 }
  0xa6   :  { %3397 = vmatmul.bf16.vlgmr.msrb.gmra.mxu2 %v13282_v23  ;;  %3410 = vmatmul.bf16.vlgmr.msrb.gmra.mxu3 %v13284_v24  ;;  %v8998_v53 = vld [vmem:[%s18838_s3 + $0x9a0] sm:$0xf0] }
  0xa7   :  { %3445 = vmatpush.bf16.msra.mxu2 %v8393_v20  ;;  %3458 = vmatpush.bf16.msra.mxu3 %v8649_v21  ;;  %v190_v38 = vpop.f32.mrf.mxu2  ;;  %v203_v41 = vpop.f32.mrf.mxu3  ;;  %v11986_v55 = vld [vmem:[%s18838_s3 + $0xb84] sm:$0xf]  ;;  %v9001_v3 = vor.u32 %v11922_v52, %v8998_v53 }
  0xa8   :  { %v9254_v58 = vld [vmem:[%s18838_s3 + $0xba0] sm:$0xf0] }
  0xa9   :  { %3421 = vmatpush.bf16.msra.mxu0 %v7817_v28  ;;  %3434 = vmatpush.bf16.msra.mxu1 %v8073_v29  ;;  %v11746_v59 = vld [vmem:[%s18838_s3 + $0x404] sm:$0xf]  ;;  %v9257_v4 = vor.u32 %v11986_v55, %v9254_v58 }
  0xaa   :  { %v8294_v60 = vld [vmem:[%s18838_s3 + $0x420] sm:$0xf0] }
  0xab   :  { %3446 = vmatpush.bf16.msra.mxu2 %v8361_v36  ;;  %3459 = vmatpush.bf16.msra.mxu3 %v8617_v37  ;;  %v11810_v61 = vld [vmem:[%s18838_s3 + $0x604] sm:$0xf]  ;;  %v8297_v6 = vor.u32 %v11746_v59, %v8294_v60 }
  0xac   :  { %v8550_v62 = vld [vmem:[%s18838_s3 + $0x620] sm:$0xf0] }
  0xad   :  { %v12058_v63 = vld [vmem:[%s18838_s3 + $0xdc4] sm:$0xf]  ;;  %3422 = vmatpush.bf16.msra.mxu0 %v7785_v46  ;;  %3435 = vmatpush.bf16.msra.mxu1 %v8041_v47  ;;  %v8553_v7 = vor.u32 %v11810_v61, %v8550_v62 }
  0xae   :  { %v9542_v0 = vld [vmem:[%s18838_s3 + $0xde0] sm:$0xf0] }
  0xaf   :  { %v12122_v1 = vld [vmem:[%s18838_s3 + $0xfc4] sm:$0xf]  ;;  %3447 = vmatpush.bf16.msra.mxu2 %v8329_v56  ;;  %3460 = vmatpush.bf16.msra.mxu3 %v8585_v57  ;;  %v9545_v12 = vor.u32 %v12058_v63, %v9542_v0 }
  0xb0   :  { %v9798_v2 = vld [vmem:[%s18838_s3 + $0xfe0] sm:$0xf0]  ;;  %3423 = vmatmul.bf16.vlgmr.msra.gmra.mxu0 %v13131_v49  ;;  %3436 = vmatmul.bf16.vlgmr.msra.gmra.mxu1 %v13133_v50 }
  0xb1   :  { %3467 = vmatpush.bf16.msrb.mxu0 %v9033_v48  ;;  %3480 = vmatpush.bf16.msrb.mxu1 %v9289_v51  ;;  %v11914_v5 = vld [vmem:[%s18838_s3 + $0x944] sm:$0xf]  ;;  %v9801_v13 = vor.u32 %v12122_v1, %v9798_v2 }
  0xb2   :  { %v8966_v8 = vld [vmem:[%s18838_s3 + $0x960] sm:$0xf0] }
  0xb3   :  { %v11978_v10 = vld [vmem:[%s18838_s3 + $0xb44] sm:$0xf]  ;;  %v8969_v20 = vor.u32 %v11914_v5, %v8966_v8  ;;  %3448 = vmatpush.bf16.msra.mxu2 %v8297_v6  ;;  %3461 = vmatpush.bf16.msra.mxu3 %v8553_v7 }
  0xb4   :  { %v9222_v11 = vld [vmem:[%s18838_s3 + $0xb60] sm:$0xf0] }
  0xb5   :  { %v12050_v14 = vld [vmem:[%s18838_s3 + $0xd84] sm:$0xf]  ;;  %3468 = vmatpush.bf16.msrb.mxu0 %v9001_v3  ;;  %3481 = vmatpush.bf16.msrb.mxu1 %v9257_v4  ;;  %v9225_v21 = vor.u32 %v11978_v10, %v9222_v11 }
  0xb6   :  { %v9510_v17 = vld [vmem:[%s18838_s3 + $0xda0] sm:$0xf0]  ;;  %3449 = vmatmul.bf16.vlgmr.msra.gmra.mxu2 %v13175_v15  ;;  %3462 = vmatmul.bf16.vlgmr.msra.gmra.mxu3 %v13177_v16 }
  0xb7   :  { %v12114_v18 = vld [vmem:[%s18838_s3 + $0xf84] sm:$0xf]  ;;  %3493 = vmatpush.bf16.msrb.mxu2 %v9545_v12  ;;  %3506 = vmatpush.bf16.msrb.mxu3 %v9801_v13  ;;  %v9513_v28 = vor.u32 %v12050_v14, %v9510_v17 }
  0xb8   :  { %v9766_v19 = vld [vmem:[%s18838_s3 + $0xfa0] sm:$0xf0] }
  0xb9   :  { %v11906_v22 = vld [vmem:[%s18838_s3 + $0x904] sm:$0xf]  ;;  %v9769_v29 = vor.u32 %v12114_v18, %v9766_v19  ;;  %3469 = vmatpush.bf16.msrb.mxu0 %v8969_v20  ;;  %3482 = vmatpush.bf16.msrb.mxu1 %v9225_v21  ;;  %v8012_v18 = vld [vmem:[%s18838_s3 + $0x1c8] sm:$0xf] }
  0xba   :  { %v8934_v25 = vld [vmem:[%s18838_s3 + $0x920] sm:$0xf0]  ;;  %v11679_v19 = vld [vmem:[%s18838_s3 + $0x1e4] sm:$0xf0] }
  0xbb   :  { %v11970_v26 = vld [vmem:[%s18838_s3 + $0xb04] sm:$0xf]  ;;  %v8937_v9 = vor.u32 %v11906_v22, %v8934_v25  ;;  %3494 = vmatpush.bf16.msrb.mxu2 %v9513_v28  ;;  %3507 = vmatpush.bf16.msrb.mxu3 %v9769_v29  ;;  %v8268_v22 = vld [vmem:[%s18838_s3 + $0x3c8] sm:$0xf] }
  0xbc   :  { %v9190_v27 = vld [vmem:[%s18838_s3 + $0xb20] sm:$0xf0]  ;;  %v11743_v25 = vld [vmem:[%s18838_s3 + $0x3e4] sm:$0xf0] }
  0xbd   :  { %v12042_v30 = vld [vmem:[%s18838_s3 + $0xd44] sm:$0xf]  ;;  %v9193_v35 = vor.u32 %v11970_v26, %v9190_v27  ;;  %3470 = vmatpush.bf16.msrb.mxu0 %v8937_v9  ;;  %v7980_v9 = vld [vmem:[%s18838_s3 + $0x188] sm:$0xf] }
  0xbe   :  { %v9478_v32 = vld [vmem:[%s18838_s3 + $0xd60] sm:$0xf0] }
  0xbf   :  { %v12106_v33 = vld [vmem:[%s18838_s3 + $0xf44] sm:$0xf]  ;;  %v9481_v40 = vor.u32 %v12042_v30, %v9478_v32  ;;  %3483 = vmatpush.bf16.msrb.mxu1 %v9193_v35  ;;  %v11671_v35 = vld [vmem:[%s18838_s3 + $0x1a4] sm:$0xf0] }
  0xc0   :  { %v9734_v34 = vld [vmem:[%s18838_s3 + $0xf60] sm:$0xf0] }
  0xc1   :  { %v11898_v36 = vld [vmem:[%s18838_s3 + $0x8c4] sm:$0xf]  ;;  %v9737_v41 = vor.u32 %v12106_v33, %v9734_v34  ;;  %3495 = vmatpush.bf16.msrb.mxu2 %v9481_v40  ;;  %v8013_v33 = vor.u32 %v11679_v19, %v8012_v18  ;;  %v8269_v34 = vor.u32 %v11743_v25, %v8268_v22  ;;  %v7884_v18 = vld [vmem:[%s18838_s3 + $0xc8] sm:$0xf] }
  0xc2   :  { %v8902_v37 = vld [vmem:[%s18838_s3 + $0x8e0] sm:$0xf0]  ;;  %v11647_v19 = vld [vmem:[%s18838_s3 + $0xe4] sm:$0xf0] }
  0xc3   :  { %v11962_v38 = vld [vmem:[%s18838_s3 + $0xac4] sm:$0xf]  ;;  %v8905_v46 = vor.u32 %v11898_v36, %v8902_v37  ;;  %3508 = vmatpush.bf16.msrb.mxu3 %v9737_v41  ;;  %v8236_v36 = vld [vmem:[%s18838_s3 + $0x388] sm:$0xf] }
  0xc4   :  { %v9158_v39 = vld [vmem:[%s18838_s3 + $0xae0] sm:$0xf0]  ;;  %v8140_v22 = vld [vmem:[%s18838_s3 + $0x2c8] sm:$0xf] }
  0xc5   :  { %v12034_v42 = vld [vmem:[%s18838_s3 + $0xd04] sm:$0xf]  ;;  %v9161_v47 = vor.u32 %v11962_v38, %v9158_v39  ;;  %3471 = vmatpush.bf16.msrb.mxu0 %v8905_v46  ;;  %v11735_v39 = vld [vmem:[%s18838_s3 + $0x3a4] sm:$0xf0] }
  0xc6   :  { %v9446_v43 = vld [vmem:[%s18838_s3 + $0xd20] sm:$0xf0]  ;;  %v8780_v46 = vld [vmem:[%s18838_s3 + $0x7c8] sm:$0xf] }
  0xc7   :  { %v12098_v44 = vld [vmem:[%s18838_s3 + $0xf04] sm:$0xf]  ;;  %v9449_v55 = vor.u32 %v12034_v42, %v9446_v43  ;;  %3484 = vmatpush.bf16.msrb.mxu1 %v9161_v47  ;;  %v11871_v47 = vld [vmem:[%s18838_s3 + $0x7e4] sm:$0xf0] }
  0xc8   :  { %v9702_v45 = vld [vmem:[%s18838_s3 + $0xf20] sm:$0xf0]  ;;  %v11711_v25 = vld [vmem:[%s18838_s3 + $0x2e4] sm:$0xf0] }
  0xc9   :  { %v11890_v48 = vld [vmem:[%s18838_s3 + $0x884] sm:$0xf]  ;;  %v9705_v56 = vor.u32 %v12098_v44, %v9702_v45  ;;  %3496 = vmatpush.bf16.msrb.mxu2 %v9449_v55  ;;  %v8524_v44 = vld [vmem:[%s18838_s3 + $0x5c8] sm:$0xf] }
  0xca   :  { %v8870_v51 = vld [vmem:[%s18838_s3 + $0x8a0] sm:$0xf0]  ;;  %v11807_v45 = vld [vmem:[%s18838_s3 + $0x5e4] sm:$0xf0] }
  0xcb   :  { %v11954_v52 = vld [vmem:[%s18838_s3 + $0xa84] sm:$0xf]  ;;  %v8873_v61 = vor.u32 %v11890_v48, %v8870_v51  ;;  %3509 = vmatpush.bf16.msrb.mxu3 %v9705_v56  ;;  %v7981_v48 = vor.u32 %v11671_v35, %v7980_v9  ;;  %v8237_v51 = vor.u32 %v11735_v39, %v8236_v36  ;;  %v7948_v55 = vld [vmem:[%s18838_s3 + $0x148] sm:$0xf] }
  0xcc   :  { %v9126_v53 = vld [vmem:[%s18838_s3 + $0xaa0] sm:$0xf0]  ;;  %v11663_v56 = vld [vmem:[%s18838_s3 + $0x164] sm:$0xf0] }
  0xcd   :  { %v12026_v57 = vld [vmem:[%s18838_s3 + $0xcc4] sm:$0xf]  ;;  %v9129_v62 = vor.u32 %v11954_v52, %v9126_v53  ;;  %3472 = vmatpush.bf16.msrb.mxu0 %v8873_v61  ;;  %v8492_v61 = vld [vmem:[%s18838_s3 + $0x588] sm:$0xf] }
  0xce   :  { %v9414_v58 = vld [vmem:[%s18838_s3 + $0xce0] sm:$0xf0]  ;;  %v8108_v36 = vld [vmem:[%s18838_s3 + $0x288] sm:$0xf] }
  0xcf   :  { %v12090_v59 = vld [vmem:[%s18838_s3 + $0xec4] sm:$0xf]  ;;  %v9417_v3 = vor.u32 %v12026_v57, %v9414_v58  ;;  %3485 = vmatpush.bf16.msrb.mxu1 %v9129_v62  ;;  %v8525_v57 = vor.u32 %v11807_v45, %v8524_v44  ;;  %v8781_v58 = vor.u32 %v11871_v47, %v8780_v46  ;;  %v11799_v62 = vld [vmem:[%s18838_s3 + $0x5a4] sm:$0xf0] }
  0xd0   :  { %v9670_v60 = vld [vmem:[%s18838_s3 + $0xee0] sm:$0xf0]  ;;  %v11775_v39 = vld [vmem:[%s18838_s3 + $0x4e4] sm:$0xf0] }
  0xd1   :  { %v11882_v63 = vld [vmem:[%s18838_s3 + $0x844] sm:$0xf]  ;;  %v9673_v4 = vor.u32 %v12090_v59, %v9670_v60  ;;  %3497 = vmatpush.bf16.msrb.mxu2 %v9417_v3  ;;  %v8204_v59 = vld [vmem:[%s18838_s3 + $0x348] sm:$0xf] }
  0xd2   :  { %v8838_v0 = vld [vmem:[%s18838_s3 + $0x860] sm:$0xf0]  ;;  %v11727_v60 = vld [vmem:[%s18838_s3 + $0x364] sm:$0xf0] }
  0xd3   :  { %v11946_v1 = vld [vmem:[%s18838_s3 + $0xa44] sm:$0xf]  ;;  %v8841_v10 = vor.u32 %v11882_v63, %v8838_v0  ;;  %3510 = vmatpush.bf16.msrb.mxu3 %v9673_v4  ;;  %v8748_v63 = vld [vmem:[%s18838_s3 + $0x788] sm:$0xf] }
  0xd4   :  { %v9094_v2 = vld [vmem:[%s18838_s3 + $0xa60] sm:$0xf0]  ;;  %v11863_v0 = vld [vmem:[%s18838_s3 + $0x7a4] sm:$0xf0] }
  0xd5   :  { %v12018_v5 = vld [vmem:[%s18838_s3 + $0xc84] sm:$0xf]  ;;  %v9097_v11 = vor.u32 %v11946_v1, %v9094_v2  ;;  %3473 = vmatpush.bf16.msrb.mxu0 %v8841_v10  ;;  %v7949_v1 = vor.u32 %v11663_v56, %v7948_v55  ;;  %v8205_v2 = vor.u32 %v11727_v60, %v8204_v59  ;;  %v7916_v3 = vld [vmem:[%s18838_s3 + $0x108] sm:$0xf] }
  0xd6   :  { %v9382_v6 = vld [vmem:[%s18838_s3 + $0xca0] sm:$0xf0]  ;;  %v11655_v4 = vld [vmem:[%s18838_s3 + $0x124] sm:$0xf0] }
  0xd7   :  { %v12082_v7 = vld [vmem:[%s18838_s3 + $0xe84] sm:$0xf]  ;;  %v9385_v20 = vor.u32 %v12018_v5, %v9382_v6  ;;  %3486 = vmatpush.bf16.msrb.mxu1 %v9097_v11  ;;  %v8493_v5 = vor.u32 %v11799_v62, %v8492_v61  ;;  %v8749_v6 = vor.u32 %v11863_v0, %v8748_v63  ;;  %v8460_v10 = vld [vmem:[%s18838_s3 + $0x548] sm:$0xf] }
  0xd8   :  { %v9638_v8 = vld [vmem:[%s18838_s3 + $0xea0] sm:$0xf0]  ;;  %v11791_v11 = vld [vmem:[%s18838_s3 + $0x564] sm:$0xf0] }
  0xd9   :  { %v11874_v12 = vld [vmem:[%s18838_s3 + $0x804] sm:$0xf]  ;;  %v9641_v21 = vor.u32 %v12082_v7, %v9638_v8  ;;  %3498 = vmatpush.bf16.msrb.mxu2 %v9385_v20  ;;  %v8172_v7 = vld [vmem:[%s18838_s3 + $0x308] sm:$0xf]  ;;  %v8461_v20 = vor.u32 %v11791_v11, %v8460_v10 }
  0xda   :  { %v8806_v13 = vld [vmem:[%s18838_s3 + $0x820] sm:$0xf0]  ;;  %v11719_v8 = vld [vmem:[%s18838_s3 + $0x324] sm:$0xf0] }
  0xdb   :  { %v11938_v14 = vld [vmem:[%s18838_s3 + $0xa04] sm:$0xf]  ;;  %v8809_v30 = vor.u32 %v11874_v12, %v8806_v13  ;;  %3511 = vmatpush.bf16.msrb.mxu3 %v9641_v21  ;;  %v8716_v12 = vld [vmem:[%s18838_s3 + $0x748] sm:$0xf] }
  0xdc   :  { %v9062_v17 = vld [vmem:[%s18838_s3 + $0xa20] sm:$0xf0]  ;;  %v11855_v13 = vld [vmem:[%s18838_s3 + $0x764] sm:$0xf0] }
  0xdd   :  { %v12010_v26 = vld [vmem:[%s18838_s3 + $0xc44] sm:$0xf]  ;;  %v9065_v32 = vor.u32 %v11938_v14, %v9062_v17  ;;  %3474 = vmatpush.bf16.msrb.mxu0 %v8809_v30  ;;  %v7917_v14 = vor.u32 %v11655_v4, %v7916_v3  ;;  %v8173_v17 = vor.u32 %v11719_v8, %v8172_v7  ;;  %v8717_v21 = vor.u32 %v11855_v13, %v8716_v12  ;;  %v7820_v44 = vld [vmem:[%s18838_s3 + $0x48] sm:$0xf] }
  0xde   :  { %v9350_v27 = vld [vmem:[%s18838_s3 + $0xc60] sm:$0xf0]  ;;  %v7885_v30 = vor.u32 %v11647_v19, %v7884_v18  ;;  %v11631_v45 = vld [vmem:[%s18838_s3 + $0x64] sm:$0xf0] }
  0xdf   :  { %v12074_v28 = vld [vmem:[%s18838_s3 + $0xe44] sm:$0xf]  ;;  %v9353_v37 = vor.u32 %v12010_v26, %v9350_v27  ;;  %3487 = vmatpush.bf16.msrb.mxu1 %v9065_v32  ;;  %v8428_v26 = vld [vmem:[%s18838_s3 + $0x508] sm:$0xf]  ;;  %v8141_v32 = vor.u32 %v11711_v25, %v8140_v22 }
  0xe0   :  { %v9606_v29 = vld [vmem:[%s18838_s3 + $0xe60] sm:$0xf0]  ;;  %3475 = vmatmul.bf16.vlgmr.msrb.gmra.mxu0 %v13237_v54  ;;  %v11783_v27 = vld [vmem:[%s18838_s3 + $0x524] sm:$0xf0] }
  0xe1   :  { %v9609_v38 = vor.u32 %v12074_v28, %v9606_v29  ;;  %v12002_v40 = vld [vmem:[%s18838_s3 + $0xc04] sm:$0xf]  ;;  %3519 = vmatpush.bf16.msra.mxu0 %v8013_v33  ;;  %3499 = vmatpush.bf16.msrb.mxu2 %v9353_v37  ;;  %v8684_v28 = vld [vmem:[%s18838_s3 + $0x708] sm:$0xf]  ;;  %v8429_v9 = vor.u32 %v11783_v27, %v8428_v26 }
  0xe2   :  { %v9318_v41 = vld [vmem:[%s18838_s3 + $0xc20] sm:$0xf0]  ;;  %3488 = vmatmul.bf16.vlgmr.msrb.gmra.mxu1 %v13239_v31  ;;  %v11847_v29 = vld [vmem:[%s18838_s3 + $0x724] sm:$0xf0] }
  0xe3   :  { %v12066_v42 = vld [vmem:[%s18838_s3 + $0xe04] sm:$0xf]  ;;  %3532 = vmatpush.bf16.msra.mxu1 %v8269_v34  ;;  %3512 = vmatpush.bf16.msrb.mxu3 %v9609_v38  ;;  %v9321_v52 = vor.u32 %v12002_v40, %v9318_v41  ;;  %v7852_v33 = vld [vmem:[%s18838_s3 + $0x88] sm:$0xf]  ;;  %v8685_v35 = vor.u32 %v11847_v29, %v8684_v28 }
  0xe4   :  { %v9574_v43 = vld [vmem:[%s18838_s3 + $0xe20] sm:$0xf0]  ;;  %v11639_v34 = vld [vmem:[%s18838_s3 + $0xa4] sm:$0xf0] }
  0xe5   :  { %v9577_v53 = vor.u32 %v12066_v42, %v9574_v43  ;;  %3520 = vmatpush.bf16.msra.mxu0 %v7981_v48  ;;  %3500 = vmatpush.bf16.msrb.mxu2 %v9321_v52  ;;  %v11703_v37 = vld [vmem:[%s18838_s3 + $0x2a4] sm:$0xf0]  ;;  %v7853_v42 = vor.u32 %v11639_v34, %v7852_v33 }
  0xe6   :  { %v8396_v38 = vld [vmem:[%s18838_s3 + $0x4c8] sm:$0xf]  ;;  %v8109_v43 = vor.u32 %v11703_v37, %v8108_v36 }
  0xe7   :  { %3533 = vmatpush.bf16.msra.mxu1 %v8237_v51  ;;  %3513 = vmatpush.bf16.msrb.mxu3 %v9577_v53  ;;  %v8652_v40 = vld [vmem:[%s18838_s3 + $0x6c8] sm:$0xf]  ;;  %v8397_v46 = vor.u32 %v11775_v39, %v8396_v38 }
  0xe8   :  { %3501 = vmatmul.bf16.vlgmr.msrb.gmra.mxu2 %v13282_v23  ;;  %v11839_v41 = vld [vmem:[%s18838_s3 + $0x6e4] sm:$0xf0] }
  0xe9   :  { %3545 = vmatpush.bf16.msra.mxu2 %v8525_v57  ;;  %3521 = vmatpush.bf16.msra.mxu0 %v7949_v1  ;;  %v8653_v47 = vor.u32 %v11839_v41, %v8652_v40  ;;  %v8076_v48 = vld [vmem:[%s18838_s3 + $0x248] sm:$0xf]  ;;  %v7821_v57 = vor.u32 %v11631_v45, %v7820_v44 }
  0xea   :  { %3514 = vmatmul.bf16.vlgmr.msrb.gmra.mxu3 %v13284_v24  ;;  %v11695_v51 = vld [vmem:[%s18838_s3 + $0x264] sm:$0xf0] }
  0xeb   :  { %3558 = vmatpush.bf16.msra.mxu3 %v8781_v58  ;;  %3534 = vmatpush.bf16.msra.mxu1 %v8205_v2  ;;  %v8364_v52 = vld [vmem:[%s18838_s3 + $0x488] sm:$0xf]  ;;  %v8077_v58 = vor.u32 %v11695_v51, %v8076_v48 }
  0xec   :  { %v11767_v53 = vld [vmem:[%s18838_s3 + $0x4a4] sm:$0xf0] }
  0xed   :  { %3546 = vmatpush.bf16.msra.mxu2 %v8493_v5  ;;  %3522 = vmatpush.bf16.msra.mxu0 %v7917_v14  ;;  %v8620_v55 = vld [vmem:[%s18838_s3 + $0x688] sm:$0xf]  ;;  %v8365_v62 = vor.u32 %v11767_v53, %v8364_v52 }
  0xee   :  { %v11831_v56 = vld [vmem:[%s18838_s3 + $0x6a4] sm:$0xf0] }
  0xef   :  { %3559 = vmatpush.bf16.msra.mxu3 %v8749_v6  ;;  %3535 = vmatpush.bf16.msra.mxu1 %v8173_v17  ;;  %v7788_v59 = vld [vmem:[%s18838_s3 + $0x8] sm:$0xf]  ;;  %v8621_v63 = vor.u32 %v11831_v56, %v8620_v55 }
  0xf0   :  { %v11623_v60 = vld [vmem:[%s18838_s3 + $0x24] sm:$0xf0] }
  0xf1   :  { %3547 = vmatpush.bf16.msra.mxu2 %v8461_v20  ;;  %3523 = vmatpush.bf16.msra.mxu0 %v7885_v30  ;;  %v8044_v61 = vld [vmem:[%s18838_s3 + $0x208] sm:$0xf]  ;;  %v7789_v10 = vor.u32 %v11623_v60, %v7788_v59 }
  0xf2   :  { %v11687_v0 = vld [vmem:[%s18838_s3 + $0x224] sm:$0xf0] }
  0xf3   :  { %3560 = vmatpush.bf16.msra.mxu3 %v8717_v21  ;;  %3536 = vmatpush.bf16.msra.mxu1 %v8141_v32  ;;  %v9036_v1 = vld [vmem:[%s18838_s3 + $0x9c8] sm:$0xf]  ;;  %v8045_v11 = vor.u32 %v11687_v0, %v8044_v61 }
  0xf4   :  { %v11935_v2 = vld [vmem:[%s18838_s3 + $0x9e4] sm:$0xf0] }
  0xf5   :  { %3548 = vmatpush.bf16.msra.mxu2 %v8429_v9  ;;  %3524 = vmatpush.bf16.msra.mxu0 %v7853_v42  ;;  %v9292_v3 = vld [vmem:[%s18838_s3 + $0xbc8] sm:$0xf]  ;;  %v9037_v12 = vor.u32 %v11935_v2, %v9036_v1 }
  0xf6   :  { %v11999_v4 = vld [vmem:[%s18838_s3 + $0xbe4] sm:$0xf0] }
  0xf7   :  { %3561 = vmatpush.bf16.msra.mxu3 %v8685_v35  ;;  %3537 = vmatpush.bf16.msra.mxu1 %v8109_v43  ;;  %v8332_v5 = vld [vmem:[%s18838_s3 + $0x448] sm:$0xf]  ;;  %v9293_v13 = vor.u32 %v11999_v4, %v9292_v3 }
  0xf8   :  { %v11759_v6 = vld [vmem:[%s18838_s3 + $0x464] sm:$0xf0] }
  0xf9   :  { %3549 = vmatpush.bf16.msra.mxu2 %v8397_v46  ;;  %v8588_v7 = vld [vmem:[%s18838_s3 + $0x648] sm:$0xf]  ;;  %3525 = vmatpush.bf16.msra.mxu0 %v7821_v57  ;;  %v8333_v19 = vor.u32 %v11759_v6, %v8332_v5 }
  0xfa   :  { %v11823_v8 = vld [vmem:[%s18838_s3 + $0x664] sm:$0xf0] }
  0xfb   :  { %3562 = vmatpush.bf16.msra.mxu3 %v8653_v47  ;;  %3538 = vmatpush.bf16.msra.mxu1 %v8077_v58  ;;  %v9004_v14 = vld [vmem:[%s18838_s3 + $0x988] sm:$0xf]  ;;  %v8589_v20 = vor.u32 %v11823_v8, %v8588_v7 }
  0xfc   :  { %v11927_v17 = vld [vmem:[%s18838_s3 + $0x9a4] sm:$0xf0] }
  0xfd   :  { %3550 = vmatpush.bf16.msra.mxu2 %v8365_v62  ;;  %v9260_v18 = vld [vmem:[%s18838_s3 + $0xb88] sm:$0xf]  ;;  %3526 = vmatpush.bf16.msra.mxu0 %v7789_v10  ;;  %v9005_v33 = vor.u32 %v11927_v17, %v9004_v14 }
  0xfe   :  { %v11991_v21 = vld [vmem:[%s18838_s3 + $0xba4] sm:$0xf0] }
  0xff   :  { %3563 = vmatpush.bf16.msra.mxu3 %v8621_v63  ;;  %v8300_v22 = vld [vmem:[%s18838_s3 + $0x408] sm:$0xf]  ;;  %3539 = vmatpush.bf16.msra.mxu1 %v8045_v11  ;;  %v9261_v34 = vor.u32 %v11991_v21, %v9260_v18 }
 0x100   :  { %v11751_v25 = vld [vmem:[%s18838_s3 + $0x424] sm:$0xf0]  ;;  %3527 = vmatmul.bf16.vlgmr.msra.gmra.mxu0 %v13131_v49 }
 0x101   :  { %v8556_v26 = vld [vmem:[%s18838_s3 + $0x608] sm:$0xf]  ;;  %3571 = vmatpush.bf16.msrb.mxu0 %v9037_v12  ;;  %3551 = vmatpush.bf16.msra.mxu2 %v8333_v19  ;;  %v8301_v9 = vor.u32 %v11751_v25, %v8300_v22 }
 0x102   :  { %v11815_v27 = vld [vmem:[%s18838_s3 + $0x624] sm:$0xf0]  ;;  %3540 = vmatmul.bf16.vlgmr.msra.gmra.mxu1 %v13133_v50 }
 0x103   :  { %v9548_v28 = vld [vmem:[%s18838_s3 + $0xdc8] sm:$0xf]  ;;  %3584 = vmatpush.bf16.msrb.mxu1 %v9293_v13  ;;  %3564 = vmatpush.bf16.msra.mxu3 %v8589_v20  ;;  %v8557_v35 = vor.u32 %v11815_v27, %v8556_v26 }
 0x104   :  { %v12063_v29 = vld [vmem:[%s18838_s3 + $0xde4] sm:$0xf0] }
 0x105   :  { %v9804_v30 = vld [vmem:[%s18838_s3 + $0xfc8] sm:$0xf]  ;;  %v9549_v38 = vor.u32 %v12063_v29, %v9548_v28  ;;  %3572 = vmatpush.bf16.msrb.mxu0 %v9005_v33  ;;  %3552 = vmatpush.bf16.msra.mxu2 %v8301_v9 }
 0x106   :  { %v12127_v32 = vld [vmem:[%s18838_s3 + $0xfe4] sm:$0xf0] }
 0x107   :  { %v8972_v36 = vld [vmem:[%s18838_s3 + $0x948] sm:$0xf]  ;;  %v9805_v39 = vor.u32 %v12127_v32, %v9804_v30  ;;  %3585 = vmatpush.bf16.msrb.mxu1 %v9261_v34  ;;  %3565 = vmatpush.bf16.msra.mxu3 %v8557_v35 }
 0x108   :  { %v11919_v37 = vld [vmem:[%s18838_s3 + $0x964] sm:$0xf0]  ;;  %3553 = vmatmul.bf16.vlgmr.msra.gmra.mxu2 %v13175_v15 }
 0x109   :  { %v9228_v40 = vld [vmem:[%s18838_s3 + $0xb48] sm:$0xf]  ;;  %v8973_v46 = vor.u32 %v11919_v37, %v8972_v36  ;;  %3597 = vmatpush.bf16.msrb.mxu2 %v9549_v38 }
 0x10a   :  { %v11983_v41 = vld [vmem:[%s18838_s3 + $0xb64] sm:$0xf0]  ;;  %3566 = vmatmul.bf16.vlgmr.msra.gmra.mxu3 %v13177_v16 }
 0x10b   :  { %v9516_v42 = vld [vmem:[%s18838_s3 + $0xd88] sm:$0xf]  ;;  %v9229_v47 = vor.u32 %v11983_v41, %v9228_v40  ;;  %3610 = vmatpush.bf16.msrb.mxu3 %v9805_v39  ;;  %3573 = vmatpush.bf16.msrb.mxu0 %v8973_v46  ;;  %v11675_v46 = vld [vmem:[%s18838_s3 + $0x1cc] sm:$0xf] }
 0x10c   :  { %v12055_v43 = vld [vmem:[%s18838_s3 + $0xda4] sm:$0xf0] }
 0x10d   :  { %v9772_v44 = vld [vmem:[%s18838_s3 + $0xf88] sm:$0xf]  ;;  %v9517_v52 = vor.u32 %v12055_v43, %v9516_v42  ;;  %3586 = vmatpush.bf16.msrb.mxu1 %v9229_v47  ;;  %v8014_v47 = vld [vmem:[%s18838_s3 + $0x1e8] sm:$0xf0] }
 0x10e   :  { %v12119_v45 = vld [vmem:[%s18838_s3 + $0xfa4] sm:$0xf0] }
 0x10f   :  { %v8940_v48 = vld [vmem:[%s18838_s3 + $0x908] sm:$0xf]  ;;  %v9773_v53 = vor.u32 %v12119_v45, %v9772_v44  ;;  %3598 = vmatpush.bf16.msrb.mxu2 %v9517_v52 }
 0x110   :  { %v11911_v51 = vld [vmem:[%s18838_s3 + $0x924] sm:$0xf0] }
 0x111   :  { %v9196_v55 = vld [vmem:[%s18838_s3 + $0xb08] sm:$0xf]  ;;  %v8941_v61 = vor.u32 %v11911_v51, %v8940_v48  ;;  %3611 = vmatpush.bf16.msrb.mxu3 %v9773_v53  ;;  %v11739_v48 = vld [vmem:[%s18838_s3 + $0x3cc] sm:$0xf] }
 0x112   :  { %v11975_v56 = vld [vmem:[%s18838_s3 + $0xb24] sm:$0xf0]  ;;  %v8270_v51 = vld [vmem:[%s18838_s3 + $0x3e8] sm:$0xf0] }
 0x113   :  { %v9484_v57 = vld [vmem:[%s18838_s3 + $0xd48] sm:$0xf]  ;;  %v9197_v62 = vor.u32 %v11975_v56, %v9196_v55  ;;  %3574 = vmatpush.bf16.msrb.mxu0 %v8941_v61  ;;  %v8273_v61 = vor.u32 %v11739_v48, %v8270_v51 }
 0x114   :  { %v12047_v58 = vld [vmem:[%s18838_s3 + $0xd64] sm:$0xf0] }
 0x115   :  { %v9740_v59 = vld [vmem:[%s18838_s3 + $0xf48] sm:$0xf]  ;;  %v9485_v1 = vor.u32 %v12047_v58, %v9484_v57  ;;  %3587 = vmatpush.bf16.msrb.mxu1 %v9197_v62  ;;  %v7982_v62 = vld [vmem:[%s18838_s3 + $0x1a8] sm:$0xf0] }
 0x116   :  { %v12111_v60 = vld [vmem:[%s18838_s3 + $0xf64] sm:$0xf0] }
 0x117   :  { %v8908_v63 = vld [vmem:[%s18838_s3 + $0x8c8] sm:$0xf]  ;;  %v9741_v2 = vor.u32 %v12111_v60, %v9740_v59  ;;  %3599 = vmatpush.bf16.msrb.mxu2 %v9485_v1  ;;  %v11667_v59 = vld [vmem:[%s18838_s3 + $0x18c] sm:$0xf]  ;;  %v8017_v60 = vor.u32 %v11675_v46, %v8014_v47 }
 0x118   :  { %v11903_v0 = vld [vmem:[%s18838_s3 + $0x8e4] sm:$0xf0]  ;;  %v8718_v46 = vld [vmem:[%s18838_s3 + $0x768] sm:$0xf0] }
 0x119   :  { %v9164_v3 = vld [vmem:[%s18838_s3 + $0xac8] sm:$0xf]  ;;  %v8909_v10 = vor.u32 %v11903_v0, %v8908_v63  ;;  %3612 = vmatpush.bf16.msrb.mxu3 %v9741_v2  ;;  %v11731_v63 = vld [vmem:[%s18838_s3 + $0x38c] sm:$0xf] }
 0x11a   :  { %v11967_v4 = vld [vmem:[%s18838_s3 + $0xae4] sm:$0xf0]  ;;  %v8238_v0 = vld [vmem:[%s18838_s3 + $0x3a8] sm:$0xf0] }
 0x11b   :  { %v9452_v5 = vld [vmem:[%s18838_s3 + $0xd08] sm:$0xf]  ;;  %v9165_v11 = vor.u32 %v11967_v4, %v9164_v3  ;;  %3575 = vmatpush.bf16.msrb.mxu0 %v8909_v10  ;;  %v11867_v10 = vld [vmem:[%s18838_s3 + $0x7cc] sm:$0xf] }
 0x11c   :  { %v12039_v6 = vld [vmem:[%s18838_s3 + $0xd24] sm:$0xf0] }
 0x11d   :  { %v9708_v7 = vld [vmem:[%s18838_s3 + $0xf08] sm:$0xf]  ;;  %v9453_v14 = vor.u32 %v12039_v6, %v9452_v5  ;;  %3588 = vmatpush.bf16.msrb.mxu1 %v9165_v11  ;;  %v8782_v11 = vld [vmem:[%s18838_s3 + $0x7e8] sm:$0xf0] }
 0x11e   :  { %v12103_v8 = vld [vmem:[%s18838_s3 + $0xf24] sm:$0xf0] }
 0x11f   :  { %v8876_v12 = vld [vmem:[%s18838_s3 + $0x888] sm:$0xf]  ;;  %v9709_v17 = vor.u32 %v12103_v8, %v9708_v7  ;;  %3600 = vmatpush.bf16.msrb.mxu2 %v9453_v14  ;;  %v11803_v7 = vld [vmem:[%s18838_s3 + $0x5cc] sm:$0xf]  ;;  %v8241_v14 = vor.u32 %v11731_v63, %v8238_v0 }
 0x120   :  { %v11895_v13 = vld [vmem:[%s18838_s3 + $0x8a4] sm:$0xf0]  ;;  %v8526_v8 = vld [vmem:[%s18838_s3 + $0x5e8] sm:$0xf0] }
 0x121   :  { %v9132_v18 = vld [vmem:[%s18838_s3 + $0xa88] sm:$0xf]  ;;  %v8877_v26 = vor.u32 %v11895_v13, %v8876_v12  ;;  %3613 = vmatpush.bf16.msrb.mxu3 %v9709_v17  ;;  %v13960_v12 = vld [vmem:[%s18839_s4] sm:$0xff]  ;;  %v7985_v13 = vor.u32 %v11667_v59, %v7982_v62  ;;  %v11779_v59 = vld [vmem:[%s18838_s3 + $0x50c] sm:$0xf] }
 0x122   :  { %v11959_v19 = vld [vmem:[%s18838_s3 + $0xaa4] sm:$0xf0]  ;;  %v8686_v62 = vld [vmem:[%s18838_s3 + $0x728] sm:$0xf0] }
 0x123   :  { %v9420_v20 = vld [vmem:[%s18838_s3 + $0xcc8] sm:$0xf]  ;;  %v9133_v27 = vor.u32 %v11959_v19, %v9132_v18  ;;  %3576 = vmatpush.bf16.msrb.mxu0 %v8877_v26  ;;  %v11659_v19 = vld [vmem:[%s18838_s3 + $0x14c] sm:$0xf] }
 0x124   :  { %v12031_v21 = vld [vmem:[%s18838_s3 + $0xce4] sm:$0xf0]  ;;  %v8206_v26 = vld [vmem:[%s18838_s3 + $0x368] sm:$0xf0] }
 0x125   :  { %v9676_v22 = vld [vmem:[%s18838_s3 + $0xec8] sm:$0xf]  ;;  %v9421_v30 = vor.u32 %v12031_v21, %v9420_v20  ;;  %3589 = vmatpush.bf16.msrb.mxu1 %v9133_v27  ;;  %v7950_v20 = vld [vmem:[%s18838_s3 + $0x168] sm:$0xf0]  ;;  %v735_v27 = vperm.slane %v13960_v12, 0 }
 0x126   :  { %v12095_v25 = vld [vmem:[%s18838_s3 + $0xee4] sm:$0xf0]  ;;  %v11723_v21 = vld [vmem:[%s18838_s3 + $0x34c] sm:$0xf] }
 0x127   :  { %v8844_v28 = vld [vmem:[%s18838_s3 + $0x848] sm:$0xf]  ;;  %v9677_v32 = vor.u32 %v12095_v25, %v9676_v22  ;;  %3601 = vmatpush.bf16.msrb.mxu2 %v9421_v30  ;;  %v8529_v22 = vor.u32 %v11803_v7, %v8526_v8  ;;  %v8785_v25 = vor.u32 %v11867_v10, %v8782_v11  ;;  %v11859_v30 = vld [vmem:[%s18838_s3 + $0x78c] sm:$0xf] }
 0x128   :  { %v11887_v29 = vld [vmem:[%s18838_s3 + $0x864] sm:$0xf0]  ;;  %v11699_v7 = vld [vmem:[%s18838_s3 + $0x28c] sm:$0xf] }
 0x129   :  { %v9100_v33 = vld [vmem:[%s18838_s3 + $0xa48] sm:$0xf]  ;;  %v8845_v38 = vor.u32 %v11887_v29, %v8844_v28  ;;  %3614 = vmatpush.bf16.msrb.mxu3 %v9677_v32  ;;  %v11795_v28 = vld [vmem:[%s18838_s3 + $0x58c] sm:$0xf] }
 0x12a   :  { %v11951_v34 = vld [vmem:[%s18838_s3 + $0xa64] sm:$0xf0]  ;;  %v8494_v29 = vld [vmem:[%s18838_s3 + $0x5a8] sm:$0xf0] }
 0x12b   :  { %v9388_v9 = vld [vmem:[%s18838_s3 + $0xc88] sm:$0xf]  ;;  %v9101_v39 = vor.u32 %v11951_v34, %v9100_v33  ;;  %3577 = vmatpush.bf16.msrb.mxu0 %v8845_v38  ;;  %v8750_v32 = vld [vmem:[%s18838_s3 + $0x7a8] sm:$0xf0]  ;;  %v7953_v33 = vor.u32 %v11659_v19, %v7950_v20  ;;  %v8209_v34 = vor.u32 %v11723_v21, %v8206_v26  ;;  %v3346_v21 = vpop.f32.mrf.mxu2 }
 0x12c   :  { %v12023_v35 = vld [vmem:[%s18838_s3 + $0xca4] sm:$0xf0]  ;;  %v8110_v8 = vld [vmem:[%s18838_s3 + $0x2a8] sm:$0xf0] }
 0x12d   :  { %v9644_v36 = vld [vmem:[%s18838_s3 + $0xe88] sm:$0xf]  ;;  %v9389_v43 = vor.u32 %v12023_v35, %v9388_v9  ;;  %3590 = vmatpush.bf16.msrb.mxu1 %v9101_v39  ;;  %v3320_v9 = vpop.f32.mrf.mxu0  ;;  %v3333_v35 = vpop.f32.mrf.mxu1  ;;  %v8497_v39 = vor.u32 %v11795_v28, %v8494_v29  ;;  %v11771_v10 = vld [vmem:[%s18838_s3 + $0x4cc] sm:$0xf] }
 0x12e   :  { %v12087_v37 = vld [vmem:[%s18838_s3 + $0xea4] sm:$0xf0]  ;;  %v3321_v38 = vadd.f32 %v3320_v9, %v735_v27  ;;  %v8398_v11 = vld [vmem:[%s18838_s3 + $0x4e8] sm:$0xf0] }
 0x12f   :  { %v8812_v40 = vld [vmem:[%s18838_s3 + $0x808] sm:$0xf]  ;;  %v9645_v44 = vor.u32 %v12087_v37, %v9644_v36  ;;  %3602 = vmatpush.bf16.msrb.mxu2 %v9389_v43  ;;  %v11651_v36 = vld [vmem:[%s18838_s3 + $0x10c] sm:$0xf] }
 0x130   :  { %v11879_v41 = vld [vmem:[%s18838_s3 + $0x824] sm:$0xf0]  ;;  %v7918_v37 = vld [vmem:[%s18838_s3 + $0x128] sm:$0xf0]  ;;  %v3334_v47 = vadd.f32 %v3333_v35, %v3321_v38 }
 0x131   :  { %v9068_v42 = vld [vmem:[%s18838_s3 + $0xa08] sm:$0xf]  ;;  %v8813_v57 = vor.u32 %v11879_v41, %v8812_v40  ;;  %3615 = vmatpush.bf16.msrb.mxu3 %v9645_v44  ;;  %v8753_v40 = vor.u32 %v11859_v30, %v8750_v32  ;;  %v11715_v41 = vld [vmem:[%s18838_s3 + $0x30c] sm:$0xf]  ;;  %v7921_v48 = vor.u32 %v11651_v36, %v7918_v37 }
 0x132   :  { %v11943_v45 = vld [vmem:[%s18838_s3 + $0xa24] sm:$0xf0]  ;;  %v11787_v43 = vld [vmem:[%s18838_s3 + $0x54c] sm:$0xf]  ;;  %v3347_v30 = vadd.f32 %v3346_v21, %v3334_v47 }
 0x133   :  { %v9356_v52 = vld [vmem:[%s18838_s3 + $0xc48] sm:$0xf]  ;;  %v9069_v58 = vor.u32 %v11943_v45, %v9068_v42  ;;  %3578 = vmatpush.bf16.msrb.mxu0 %v8813_v57  ;;  %v8174_v42 = vld [vmem:[%s18838_s3 + $0x328] sm:$0xf0] }
 0x134   :  { %v12015_v53 = vld [vmem:[%s18838_s3 + $0xc64] sm:$0xf0]  ;;  %v8462_v44 = vld [vmem:[%s18838_s3 + $0x568] sm:$0xf0]  ;;  %v8177_v51 = vor.u32 %v11715_v41, %v8174_v42 }
 0x135   :  { %v9612_v55 = vld [vmem:[%s18838_s3 + $0xe48] sm:$0xf]  ;;  %v9357_v1 = vor.u32 %v12015_v53, %v9356_v52  ;;  %3591 = vmatpush.bf16.msrb.mxu1 %v9069_v58  ;;  %v11851_v45 = vld [vmem:[%s18838_s3 + $0x74c] sm:$0xf] }
 0x136   :  { %v12079_v56 = vld [vmem:[%s18838_s3 + $0xe64] sm:$0xf0]  ;;  %3579 = vmatmul.bf16.vlgmr.msrb.gmra.mxu0 %v13237_v54  ;;  %v11643_v52 = vld [vmem:[%s18838_s3 + $0xcc] sm:$0xf] }
 0x137   :  { %v9613_v2 = vor.u32 %v12079_v56, %v9612_v55  ;;  %v9324_v3 = vld [vmem:[%s18838_s3 + $0xc08] sm:$0xf]  ;;  %3623 = vmatpush.bf16.msra.mxu0 %v8017_v60  ;;  %3603 = vmatpush.bf16.msrb.mxu2 %v9357_v1  ;;  %v7886_v53 = vld [vmem:[%s18838_s3 + $0xe8] sm:$0xf0]  ;;  %v8465_v55 = vor.u32 %v11787_v43, %v8462_v44  ;;  %v8721_v56 = vor.u32 %v11851_v45, %v8718_v46  ;;  %v3322_v1 = vpop.f32.mrf.mxu0 }
 0x138   :  { %v12007_v4 = vld [vmem:[%s18838_s3 + $0xc24] sm:$0xf0]  ;;  %3592 = vmatmul.bf16.vlgmr.msrb.gmra.mxu1 %v13239_v31  ;;  %v11707_v57 = vld [vmem:[%s18838_s3 + $0x2cc] sm:$0xf]  ;;  %v7889_v63 = vor.u32 %v11643_v52, %v7886_v53 }
 0x139   :  { %v9580_v5 = vld [vmem:[%s18838_s3 + $0xe08] sm:$0xf]  ;;  %3636 = vmatpush.bf16.msra.mxu1 %v8273_v61  ;;  %3616 = vmatpush.bf16.msrb.mxu3 %v9613_v2  ;;  %v9325_v17 = vor.u32 %v12007_v4, %v9324_v3  ;;  %v8142_v58 = vld [vmem:[%s18838_s3 + $0x2e8] sm:$0xf0]  ;;  %v3335_v2 = vpop.f32.mrf.mxu1 }
 0x13a   :  { %v12071_v6 = vld [vmem:[%s18838_s3 + $0xe24] sm:$0xf0]  ;;  %v8430_v60 = vld [vmem:[%s18838_s3 + $0x528] sm:$0xf0]  ;;  %v8145_v0 = vor.u32 %v11707_v57, %v8142_v58 }
 0x13b   :  { %v9581_v18 = vor.u32 %v12071_v6, %v9580_v5  ;;  %3624 = vmatpush.bf16.msra.mxu0 %v7985_v13  ;;  %3604 = vmatpush.bf16.msrb.mxu2 %v9325_v17  ;;  %v11843_v61 = vld [vmem:[%s18838_s3 + $0x70c] sm:$0xf]  ;;  %v8433_v5 = vor.u32 %v11779_v59, %v8430_v60  ;;  %v3348_v60 = vpop.f32.mrf.mxu2 }
 0x13c   :  { %v11635_v3 = vld [vmem:[%s18838_s3 + $0x8c] sm:$0xf]  ;;  %v8689_v6 = vor.u32 %v11843_v61, %v8686_v62 }
 0x13d   :  { %3637 = vmatpush.bf16.msra.mxu1 %v8241_v14  ;;  %3617 = vmatpush.bf16.msrb.mxu3 %v9581_v18  ;;  %v7854_v4 = vld [vmem:[%s18838_s3 + $0xa8] sm:$0xf0]  ;;  %v8113_v18 = vor.u32 %v11699_v7, %v8110_v8 }
 0x13e   :  { %3605 = vmatmul.bf16.vlgmr.msrb.gmra.mxu2 %v13282_v23  ;;  %v11835_v13 = vld [vmem:[%s18838_s3 + $0x6cc] sm:$0xf]  ;;  %v7857_v17 = vor.u32 %v11635_v3, %v7854_v4 }
 0x13f   :  { %3649 = vmatpush.bf16.msra.mxu2 %v8529_v22  ;;  %3625 = vmatpush.bf16.msra.mxu0 %v7953_v33  ;;  %v8654_v14 = vld [vmem:[%s18838_s3 + $0x6e8] sm:$0xf0]  ;;  %v3359_v22 = vpop.f32.mrf.mxu3 }
 0x140   :  { %3618 = vmatmul.bf16.vlgmr.msrb.gmra.mxu3 %v13284_v24  ;;  %v11627_v19 = vld [vmem:[%s18838_s3 + $0x4c] sm:$0xf]  ;;  %v8657_v26 = vor.u32 %v11835_v13, %v8654_v14  ;;  %v3360_v9 = vadd.f32 %v3359_v22, %v3347_v30 }
 0x141   :  { %3662 = vmatpush.bf16.msra.mxu3 %v8785_v25  ;;  %3638 = vmatpush.bf16.msra.mxu1 %v8209_v34  ;;  %v7822_v20 = vld [vmem:[%s18838_s3 + $0x68] sm:$0xf0]  ;;  %v8401_v25 = vor.u32 %v11771_v10, %v8398_v11  ;;  %v3385_v41 = vpop.f32.mrf.mxu1 }
 0x142   :  { %v11691_v27 = vld [vmem:[%s18838_s3 + $0x24c] sm:$0xf]  ;;  %v7825_v35 = vor.u32 %v11627_v19, %v7822_v20 }
 0x143   :  { %3650 = vmatpush.bf16.msra.mxu2 %v8497_v39  ;;  %3626 = vmatpush.bf16.msra.mxu0 %v7921_v48  ;;  %v8078_v28 = vld [vmem:[%s18838_s3 + $0x268] sm:$0xf0] }
 0x144   :  { %v11763_v29 = vld [vmem:[%s18838_s3 + $0x48c] sm:$0xf]  ;;  %v8081_v36 = vor.u32 %v11691_v27, %v8078_v28 }
 0x145   :  { %3663 = vmatpush.bf16.msra.mxu3 %v8753_v40  ;;  %3639 = vmatpush.bf16.msra.mxu1 %v8177_v51  ;;  %v8366_v32 = vld [vmem:[%s18838_s3 + $0x4a8] sm:$0xf0]  ;;  %v3372_v40 = vpop.f32.mrf.mxu0 }
 0x146   :  { %v11827_v33 = vld [vmem:[%s18838_s3 + $0x68c] sm:$0xf]  ;;  %v8369_v42 = vor.u32 %v11763_v29, %v8366_v32  ;;  %v3373_v47 = vadd.f32 %v3372_v40, %v3360_v9 }
 0x147   :  { %3651 = vmatpush.bf16.msra.mxu2 %v8465_v55  ;;  %3627 = vmatpush.bf16.msra.mxu0 %v7889_v63  ;;  %v8622_v34 = vld [vmem:[%s18838_s3 + $0x6a8] sm:$0xf0]  ;;  %v3361_v61 = vpop.f32.mrf.mxu3 }
 0x148   :  { %v11619_v37 = vld [vmem:[%s18838_s3 + $0xc] sm:$0xf]  ;;  %v8625_v43 = vor.u32 %v11827_v33, %v8622_v34  ;;  %v3386_v57 = vadd.f32 %v3385_v41, %v3373_v47  ;;  %v736_v41 = vperm.slane %v13960_v12, 1 }
 0x149   :  { %3664 = vmatpush.bf16.msra.mxu3 %v8721_v56  ;;  %3640 = vmatpush.bf16.msra.mxu1 %v8145_v0  ;;  %v7790_v38 = vld [vmem:[%s18838_s3 + $0x28] sm:$0xf0]  ;;  %v3387_v19 = vpop.f32.mrf.mxu1 }
 0x14a   :  { %v11683_v39 = vld [vmem:[%s18838_s3 + $0x20c] sm:$0xf]  ;;  %v7793_v58 = vor.u32 %v11619_v37, %v7790_v38 }
 0x14b   :  { %3652 = vmatpush.bf16.msra.mxu2 %v8433_v5  ;;  %3628 = vmatpush.bf16.msra.mxu0 %v7857_v17  ;;  %v8046_v44 = vld [vmem:[%s18838_s3 + $0x228] sm:$0xf0] }
 0x14c   :  { %v11931_v45 = vld [vmem:[%s18838_s3 + $0x9cc] sm:$0xf]  ;;  %v8049_v59 = vor.u32 %v11683_v39, %v8046_v44 }
 0x14d   :  { %3665 = vmatpush.bf16.msra.mxu3 %v8689_v6  ;;  %3641 = vmatpush.bf16.msra.mxu1 %v8113_v18  ;;  %v9038_v46 = vld [vmem:[%s18838_s3 + $0x9e8] sm:$0xf0]  ;;  %v3374_v18 = vpop.f32.mrf.mxu0 }
 0x14e   :  { %v11995_v48 = vld [vmem:[%s18838_s3 + $0xbcc] sm:$0xf]  ;;  %v9041_v62 = vor.u32 %v11931_v45, %v9038_v46 }
 0x14f   :  { %3653 = vmatpush.bf16.msra.mxu2 %v8401_v25  ;;  %v9294_v51 = vld [vmem:[%s18838_s3 + $0xbe8] sm:$0xf0]  ;;  %3629 = vmatpush.bf16.msra.mxu0 %v7825_v35  ;;  %v3411_v37 = vpop.f32.mrf.mxu3 }
 0x150   :  { %v11755_v52 = vld [vmem:[%s18838_s3 + $0x44c] sm:$0xf]  ;;  %v9297_v63 = vor.u32 %v11995_v48, %v9294_v51 }
 0x151   :  { %3666 = vmatpush.bf16.msra.mxu3 %v8657_v26  ;;  %v8334_v53 = vld [vmem:[%s18838_s3 + $0x468] sm:$0xf0]  ;;  %3642 = vmatpush.bf16.msra.mxu1 %v8081_v36  ;;  %v3398_v36 = vpop.f32.mrf.mxu2 }
 0x152   :  { %v11819_v55 = vld [vmem:[%s18838_s3 + $0x64c] sm:$0xf]  ;;  %v8337_v3 = vor.u32 %v11755_v52, %v8334_v53  ;;  %v3399_v38 = vadd.f32 %v3398_v36, %v3386_v57  ;;  %v3437_v57 = vpop.f32.mrf.mxu1 }
 0x153   :  { %v8590_v56 = vld [vmem:[%s18838_s3 + $0x668] sm:$0xf0]  ;;  %3654 = vmatpush.bf16.msra.mxu2 %v8369_v42  ;;  %3630 = vmatpush.bf16.msra.mxu0 %v7793_v58 }
 0x154   :  { %v11923_v0 = vld [vmem:[%s18838_s3 + $0x98c] sm:$0xf]  ;;  %v8593_v4 = vor.u32 %v11819_v55, %v8590_v56  ;;  %v14201_v51 = vadd.f32 %v3411_v37, %v3399_v38 }
 0x155   :  { %3667 = vmatpush.bf16.msra.mxu3 %v8625_v43  ;;  %v9006_v1 = vld [vmem:[%s18838_s3 + $0x9a8] sm:$0xf0]  ;;  %3643 = vmatpush.bf16.msra.mxu1 %v8049_v59  ;;  %v3424_v56 = vpop.f32.mrf.mxu0 }
 0x156   :  { %v11987_v2 = vld [vmem:[%s18838_s3 + $0xb8c] sm:$0xf]  ;;  %v9009_v20 = vor.u32 %v11923_v0, %v9006_v1  ;;  %3631 = vmatmul.bf16.vlgmr.msra.gmra.mxu0 %v13131_v49  ;;  %v3425_v58 = vadd.f32 %v3424_v56, %v736_v41 }
 0x157   :  { %v9262_v5 = vld [vmem:[%s18838_s3 + $0xba8] sm:$0xf0]  ;;  %3675 = vmatpush.bf16.msrb.mxu0 %v9041_v62  ;;  %3655 = vmatpush.bf16.msra.mxu2 %v8337_v3 }
 0x158   :  { %v11747_v6 = vld [vmem:[%s18838_s3 + $0x40c] sm:$0xf]  ;;  %v9265_v21 = vor.u32 %v11987_v2, %v9262_v5  ;;  %3644 = vmatmul.bf16.vlgmr.msra.gmra.mxu1 %v13133_v50 }
 0x159   :  { %v8302_v7 = vld [vmem:[%s18838_s3 + $0x428] sm:$0xf0]  ;;  %3688 = vmatpush.bf16.msrb.mxu1 %v9297_v63  ;;  %3668 = vmatpush.bf16.msra.mxu3 %v8593_v4  ;;  %v3438_v4 = vadd.f32 %v3437_v57, %v3425_v58  ;;  %v8020_v57 = vld [vmem:[%s18838_s3 + $0x1d0] sm:$0xf] }
 0x15a   :  { %v11811_v8 = vld [vmem:[%s18838_s3 + $0x60c] sm:$0xf]  ;;  %v8305_v22 = vor.u32 %v11747_v6, %v8302_v7  ;;  %v11680_v58 = vld [vmem:[%s18838_s3 + $0x1ec] sm:$0xf0] }
 0x15b   :  { %v8558_v10 = vld [vmem:[%s18838_s3 + $0x628] sm:$0xf0]  ;;  %3676 = vmatpush.bf16.msrb.mxu0 %v9009_v20 }
 0x15c   :  { %v12059_v11 = vld [vmem:[%s18838_s3 + $0xdcc] sm:$0xf]  ;;  %v8561_v25 = vor.u32 %v11811_v8, %v8558_v10  ;;  %3656 = vmatpush.bf16.msra.mxu2 %v8305_v22  ;;  %v3400_v8 = vpop.f32.mrf.mxu2  ;;  %v3413_v10 = vpop.f32.mrf.mxu3 }
 0x15d   :  { %v9550_v13 = vld [vmem:[%s18838_s3 + $0xde8] sm:$0xf0]  ;;  %3689 = vmatpush.bf16.msrb.mxu1 %v9265_v21  ;;  %v8244_v8 = vld [vmem:[%s18838_s3 + $0x390] sm:$0xf] }
 0x15e   :  { %v12123_v14 = vld [vmem:[%s18838_s3 + $0xfcc] sm:$0xf]  ;;  %v9553_v28 = vor.u32 %v12059_v11, %v9550_v13  ;;  %3669 = vmatpush.bf16.msra.mxu3 %v8561_v25 }
 0x15f   :  { %v9806_v17 = vld [vmem:[%s18838_s3 + $0xfe8] sm:$0xf0]  ;;  %3657 = vmatmul.bf16.vlgmr.msra.gmra.mxu2 %v13175_v15 }
 0x160   :  { %v11915_v26 = vld [vmem:[%s18838_s3 + $0x94c] sm:$0xf]  ;;  %v9809_v29 = vor.u32 %v12123_v14, %v9806_v17  ;;  %3701 = vmatpush.bf16.msrb.mxu2 %v9553_v28  ;;  %v3426_v28 = vpop.f32.mrf.mxu0 }
 0x161   :  { %v8974_v27 = vld [vmem:[%s18838_s3 + $0x968] sm:$0xf0]  ;;  %3670 = vmatmul.bf16.vlgmr.msra.gmra.mxu3 %v13177_v16 }
 0x162   :  { %v11979_v30 = vld [vmem:[%s18838_s3 + $0xb4c] sm:$0xf]  ;;  %v8977_v39 = vor.u32 %v11915_v26, %v8974_v27  ;;  %3714 = vmatpush.bf16.msrb.mxu3 %v9809_v29  ;;  %v3439_v29 = vpop.f32.mrf.mxu1 }
 0x163   :  { %v9230_v32 = vld [vmem:[%s18838_s3 + $0xb68] sm:$0xf0] }
 0x164   :  { %v12051_v33 = vld [vmem:[%s18838_s3 + $0xd8c] sm:$0xf]  ;;  %v9233_v40 = vor.u32 %v11979_v30, %v9230_v32  ;;  %3677 = vmatpush.bf16.msrb.mxu0 %v8977_v39 }
 0x165   :  { %v9518_v34 = vld [vmem:[%s18838_s3 + $0xda8] sm:$0xf0] }
 0x166   :  { %v12115_v9 = vld [vmem:[%s18838_s3 + $0xf8c] sm:$0xf]  ;;  %v9521_v44 = vor.u32 %v12051_v33, %v9518_v34  ;;  %3690 = vmatpush.bf16.msrb.mxu1 %v9233_v40 }
 0x167   :  { %v9774_v35 = vld [vmem:[%s18838_s3 + $0xfa8] sm:$0xf0] }
 0x168   :  { %v11907_v42 = vld [vmem:[%s18838_s3 + $0x90c] sm:$0xf]  ;;  %v9777_v45 = vor.u32 %v12115_v9, %v9774_v35  ;;  %3702 = vmatpush.bf16.msrb.mxu2 %v9521_v44 }
 0x169   :  { %v8942_v43 = vld [vmem:[%s18838_s3 + $0x928] sm:$0xf0] }
 0x16a   :  { %v11971_v46 = vld [vmem:[%s18838_s3 + $0xb0c] sm:$0xf]  ;;  %v8945_v59 = vor.u32 %v11907_v42, %v8942_v43  ;;  %3715 = vmatpush.bf16.msrb.mxu3 %v9777_v45  ;;  %v3450_v42 = vpop.f32.mrf.mxu2  ;;  %v3463_v43 = vpop.f32.mrf.mxu3 }
 0x16b   :  { %v9198_v47 = vld [vmem:[%s18838_s3 + $0xb28] sm:$0xf0] }
 0x16c   :  { %v12043_v48 = vld [vmem:[%s18838_s3 + $0xd4c] sm:$0xf]  ;;  %v9201_v60 = vor.u32 %v11971_v46, %v9198_v47  ;;  %3678 = vmatpush.bf16.msrb.mxu0 %v8945_v59  ;;  %v8276_v59 = vld [vmem:[%s18838_s3 + $0x3d0] sm:$0xf] }
 0x16d   :  { %v9486_v52 = vld [vmem:[%s18838_s3 + $0xd68] sm:$0xf0] }
 0x16e   :  { %v12107_v53 = vld [vmem:[%s18838_s3 + $0xf4c] sm:$0xf]  ;;  %v9489_v63 = vor.u32 %v12043_v48, %v9486_v52  ;;  %3691 = vmatpush.bf16.msrb.mxu1 %v9201_v60  ;;  %v3451_v52 = vadd.f32 %v3450_v42, %v3438_v4  ;;  %v11744_v60 = vld [vmem:[%s18838_s3 + $0x3ec] sm:$0xf0]  ;;  %v8021_v4 = vor.u32 %v11680_v58, %v8020_v57 }
 0x16f   :  { %v9742_v55 = vld [vmem:[%s18838_s3 + $0xf68] sm:$0xf0]  ;;  %v11792_v57 = vld [vmem:[%s18838_s3 + $0x56c] sm:$0xf0] }
 0x170   :  { %v11899_v61 = vld [vmem:[%s18838_s3 + $0x8cc] sm:$0xf]  ;;  %v9745_v0 = vor.u32 %v12107_v53, %v9742_v55  ;;  %3703 = vmatpush.bf16.msrb.mxu2 %v9489_v63  ;;  %v8724_v58 = vld [vmem:[%s18838_s3 + $0x750] sm:$0xf] }
 0x171   :  { %v8910_v62 = vld [vmem:[%s18838_s3 + $0x8e8] sm:$0xf0] }
 0x172   :  { %v11963_v1 = vld [vmem:[%s18838_s3 + $0xacc] sm:$0xf]  ;;  %v8913_v11 = vor.u32 %v11899_v61, %v8910_v62  ;;  %3716 = vmatpush.bf16.msrb.mxu3 %v9745_v0  ;;  %v14313_v62 = vadd.f32 %v3463_v43, %v3451_v52  ;;  %v11720_v52 = vld [vmem:[%s18838_s3 + $0x32c] sm:$0xf0] }
 0x173   :  { %v9166_v2 = vld [vmem:[%s18838_s3 + $0xae8] sm:$0xf0] }
 0x174   :  { %v12035_v3 = vld [vmem:[%s18838_s3 + $0xd0c] sm:$0xf]  ;;  %v9169_v13 = vor.u32 %v11963_v1, %v9166_v2  ;;  %3679 = vmatpush.bf16.msrb.mxu0 %v8913_v11 }
 0x175   :  { %v9454_v5 = vld [vmem:[%s18838_s3 + $0xd28] sm:$0xf0] }
 0x176   :  { %v12099_v6 = vld [vmem:[%s18838_s3 + $0xf0c] sm:$0xf]  ;;  %v9457_v18 = vor.u32 %v12035_v3, %v9454_v5  ;;  %3692 = vmatpush.bf16.msrb.mxu1 %v9169_v13  ;;  %v8277_v5 = vor.u32 %v11744_v60, %v8276_v59  ;;  %v11736_v13 = vld [vmem:[%s18838_s3 + $0x3ac] sm:$0xf0] }
 0x177   :  { %v9710_v7 = vld [vmem:[%s18838_s3 + $0xf28] sm:$0xf0]  ;;  %v8245_v29 = vor.u32 %v11736_v13, %v8244_v8  ;;  %v11856_v59 = vld [vmem:[%s18838_s3 + $0x76c] sm:$0xf0] }
 0x178   :  { %v11891_v14 = vld [vmem:[%s18838_s3 + $0x88c] sm:$0xf]  ;;  %v9713_v19 = vor.u32 %v12099_v6, %v9710_v7  ;;  %3704 = vmatpush.bf16.msrb.mxu2 %v9457_v18  ;;  %v7988_v6 = vld [vmem:[%s18838_s3 + $0x190] sm:$0xf] }
 0x179   :  { %v8878_v17 = vld [vmem:[%s18838_s3 + $0x8a8] sm:$0xf0]  ;;  %v11672_v7 = vld [vmem:[%s18838_s3 + $0x1ac] sm:$0xf0] }
 0x17a   :  { %v11955_v20 = vld [vmem:[%s18838_s3 + $0xa8c] sm:$0xf]  ;;  %v8881_v30 = vor.u32 %v11891_v14, %v8878_v17  ;;  %3717 = vmatpush.bf16.msrb.mxu3 %v9713_v19  ;;  %v7989_v28 = vor.u32 %v11672_v7, %v7988_v6  ;;  %v8436_v6 = vld [vmem:[%s18838_s3 + $0x510] sm:$0xf] }
 0x17b   :  { %v9134_v21 = vld [vmem:[%s18838_s3 + $0xaa8] sm:$0xf0]  ;;  %v11784_v7 = vld [vmem:[%s18838_s3 + $0x52c] sm:$0xf0] }
 0x17c   :  { %v12027_v22 = vld [vmem:[%s18838_s3 + $0xccc] sm:$0xf]  ;;  %v9137_v32 = vor.u32 %v11955_v20, %v9134_v21  ;;  %3680 = vmatpush.bf16.msrb.mxu0 %v8881_v30  ;;  %v8532_v20 = vld [vmem:[%s18838_s3 + $0x5d0] sm:$0xf]  ;;  %v3452_v21 = vpop.f32.mrf.mxu2 }
 0x17d   :  { %v9422_v25 = vld [vmem:[%s18838_s3 + $0xce8] sm:$0xf0]  ;;  %v8692_v8 = vld [vmem:[%s18838_s3 + $0x710] sm:$0xf] }
 0x17e   :  { %v12091_v26 = vld [vmem:[%s18838_s3 + $0xecc] sm:$0xf]  ;;  %v9425_v9 = vor.u32 %v12027_v22, %v9422_v25  ;;  %3693 = vmatpush.bf16.msrb.mxu1 %v9137_v32  ;;  %v3465_v22 = vpop.f32.mrf.mxu3  ;;  %v11808_v25 = vld [vmem:[%s18838_s3 + $0x5ec] sm:$0xf0] }
 0x17f   :  { %v9678_v27 = vld [vmem:[%s18838_s3 + $0xee8] sm:$0xf0]  ;;  %v11704_v21 = vld [vmem:[%s18838_s3 + $0x2ac] sm:$0xf0] }
 0x180   :  { %v11883_v33 = vld [vmem:[%s18838_s3 + $0x84c] sm:$0xf]  ;;  %v9681_v35 = vor.u32 %v12091_v26, %v9678_v27  ;;  %3705 = vmatpush.bf16.msrb.mxu2 %v9425_v9  ;;  %v8788_v26 = vld [vmem:[%s18838_s3 + $0x7d0] sm:$0xf]  ;;  %v8533_v9 = vor.u32 %v11808_v25, %v8532_v20 }
 0x181   :  { %v8846_v34 = vld [vmem:[%s18838_s3 + $0x868] sm:$0xf0]  ;;  %v11872_v27 = vld [vmem:[%s18838_s3 + $0x7ec] sm:$0xf0] }
 0x182   :  { %v11947_v36 = vld [vmem:[%s18838_s3 + $0xa4c] sm:$0xf]  ;;  %v8849_v44 = vor.u32 %v11883_v33, %v8846_v34  ;;  %3718 = vmatpush.bf16.msrb.mxu3 %v9681_v35  ;;  %v7956_v33 = vld [vmem:[%s18838_s3 + $0x150] sm:$0xf]  ;;  %v8789_v35 = vor.u32 %v11872_v27, %v8788_v26 }
 0x183   :  { %v9102_v37 = vld [vmem:[%s18838_s3 + $0xa68] sm:$0xf0]  ;;  %v11664_v34 = vld [vmem:[%s18838_s3 + $0x16c] sm:$0xf0] }
 0x184   :  { %v12019_v38 = vld [vmem:[%s18838_s3 + $0xc8c] sm:$0xf]  ;;  %v9105_v45 = vor.u32 %v11947_v36, %v9102_v37  ;;  %3681 = vmatpush.bf16.msrb.mxu0 %v8849_v44  ;;  %v8212_v36 = vld [vmem:[%s18838_s3 + $0x350] sm:$0xf]  ;;  %v7957_v42 = vor.u32 %v11664_v34, %v7956_v33 }
 0x185   :  { %v9390_v39 = vld [vmem:[%s18838_s3 + $0xca8] sm:$0xf0]  ;;  %v11728_v37 = vld [vmem:[%s18838_s3 + $0x36c] sm:$0xf0] }
 0x186   :  { %v12083_v40 = vld [vmem:[%s18838_s3 + $0xe8c] sm:$0xf]  ;;  %v9393_v53 = vor.u32 %v12019_v38, %v9390_v39  ;;  %3694 = vmatpush.bf16.msrb.mxu1 %v9105_v45  ;;  %v8500_v38 = vld [vmem:[%s18838_s3 + $0x590] sm:$0xf]  ;;  %v8213_v43 = vor.u32 %v11728_v37, %v8212_v36 }
 0x187   :  { %v9646_v41 = vld [vmem:[%s18838_s3 + $0xea8] sm:$0xf0]  ;;  %v11800_v39 = vld [vmem:[%s18838_s3 + $0x5ac] sm:$0xf0] }
 0x188   :  { %v11875_v46 = vld [vmem:[%s18838_s3 + $0x80c] sm:$0xf]  ;;  %v9649_v55 = vor.u32 %v12083_v40, %v9646_v41  ;;  %3706 = vmatpush.bf16.msrb.mxu2 %v9393_v53  ;;  %v8756_v40 = vld [vmem:[%s18838_s3 + $0x790] sm:$0xf] }
 0x189   :  { %v8814_v47 = vld [vmem:[%s18838_s3 + $0x828] sm:$0xf0]  ;;  %v11864_v41 = vld [vmem:[%s18838_s3 + $0x7ac] sm:$0xf0] }
 0x18a   :  { %v11939_v48 = vld [vmem:[%s18838_s3 + $0xa0c] sm:$0xf]  ;;  %v8817_v2 = vor.u32 %v11875_v46, %v8814_v47  ;;  %3719 = vmatpush.bf16.msrb.mxu3 %v9649_v55  ;;  %v7924_v44 = vld [vmem:[%s18838_s3 + $0x110] sm:$0xf]  ;;  %v8501_v46 = vor.u32 %v11800_v39, %v8500_v38  ;;  %v8757_v47 = vor.u32 %v11864_v41, %v8756_v40  ;;  %v3476_v55 = vpop.f32.mrf.mxu0  ;;  %v3502_v39 = vpop.f32.mrf.mxu2 }
 0x18b   :  { %v9070_v56 = vld [vmem:[%s18838_s3 + $0xa28] sm:$0xf0]  ;;  %v11656_v45 = vld [vmem:[%s18838_s3 + $0x12c] sm:$0xf0]  ;;  %v3477_v60 = vadd.f32 %v3476_v55, %v14313_v62  ;;  %v3515_v40 = vpop.f32.mrf.mxu3 }
 0x18c   :  { %v12011_v61 = vld [vmem:[%s18838_s3 + $0xc4c] sm:$0xf]  ;;  %v9073_v3 = vor.u32 %v11939_v48, %v9070_v56  ;;  %3682 = vmatpush.bf16.msrb.mxu0 %v8817_v2  ;;  %v8180_v48 = vld [vmem:[%s18838_s3 + $0x310] sm:$0xf]  ;;  %v3489_v56 = vpop.f32.mrf.mxu1 }
 0x18d   :  { %v9358_v63 = vld [vmem:[%s18838_s3 + $0xc68] sm:$0xf0]  ;;  %v8468_v53 = vld [vmem:[%s18838_s3 + $0x550] sm:$0xf]  ;;  %v3490_v2 = vadd.f32 %v3489_v56, %v3477_v60 }
 0x18e   :  { %v12075_v0 = vld [vmem:[%s18838_s3 + $0xe4c] sm:$0xf]  ;;  %v9361_v10 = vor.u32 %v12011_v61, %v9358_v63  ;;  %3695 = vmatpush.bf16.msrb.mxu1 %v9073_v3  ;;  %v7925_v61 = vor.u32 %v11656_v45, %v7924_v44  ;;  %v8181_v63 = vor.u32 %v11720_v52, %v8180_v48  ;;  %v8469_v3 = vor.u32 %v11792_v57, %v8468_v53  ;;  %v8148_v62 = vld [vmem:[%s18838_s3 + $0x2d0] sm:$0xf] }
 0x18f   :  { %v9614_v1 = vld [vmem:[%s18838_s3 + $0xe68] sm:$0xf0]  ;;  %3683 = vmatmul.bf16.vlgmr.msrb.gmra.mxu0 %v13237_v54  ;;  %v8116_v20 = vld [vmem:[%s18838_s3 + $0x290] sm:$0xf]  ;;  %v3503_v44 = vadd.f32 %v3502_v39, %v3490_v2 }
 0x190   :  { %v9617_v11 = vor.u32 %v12075_v0, %v9614_v1  ;;  %v12003_v14 = vld [vmem:[%s18838_s3 + $0xc0c] sm:$0xf]  ;;  %3727 = vmatpush.bf16.msra.mxu0 %v8021_v4  ;;  %3707 = vmatpush.bf16.msrb.mxu2 %v9361_v10  ;;  %v7892_v0 = vld [vmem:[%s18838_s3 + $0xd0] sm:$0xf]  ;;  %v8725_v4 = vor.u32 %v11856_v59, %v8724_v58 }
 0x191   :  { %v9326_v17 = vld [vmem:[%s18838_s3 + $0xc28] sm:$0xf0]  ;;  %3696 = vmatmul.bf16.vlgmr.msrb.gmra.mxu1 %v13239_v31  ;;  %v11648_v1 = vld [vmem:[%s18838_s3 + $0xec] sm:$0xf0]  ;;  %v14494_v53 = vadd.f32 %v3515_v40, %v3503_v44 }
 0x192   :  { %v12067_v18 = vld [vmem:[%s18838_s3 + $0xe0c] sm:$0xf]  ;;  %3740 = vmatpush.bf16.msra.mxu1 %v8277_v5  ;;  %3720 = vmatpush.bf16.msrb.mxu3 %v9617_v11  ;;  %v9329_v30 = vor.u32 %v12003_v14, %v9326_v17  ;;  %v11712_v5 = vld [vmem:[%s18838_s3 + $0x2ec] sm:$0xf0]  ;;  %v7893_v11 = vor.u32 %v11648_v1, %v7892_v0  ;;  %v3478_v25 = vpop.f32.mrf.mxu0 }
 0x193   :  { %v9582_v19 = vld [vmem:[%s18838_s3 + $0xe28] sm:$0xf0]  ;;  %v11848_v10 = vld [vmem:[%s18838_s3 + $0x72c] sm:$0xf0]  ;;  %v8149_v13 = vor.u32 %v11712_v5, %v8148_v62 }
 0x194   :  { %v9585_v32 = vor.u32 %v12067_v18, %v9582_v19  ;;  %3728 = vmatpush.bf16.msra.mxu0 %v7989_v28  ;;  %3708 = vmatpush.bf16.msrb.mxu2 %v9329_v30  ;;  %v7860_v14 = vld [vmem:[%s18838_s3 + $0x90] sm:$0xf]  ;;  %v8437_v18 = vor.u32 %v11784_v7, %v8436_v6  ;;  %v8693_v19 = vor.u32 %v11848_v10, %v8692_v8  ;;  %v3491_v26 = vpop.f32.mrf.mxu1 }
 0x195   :  { %v11640_v17 = vld [vmem:[%s18838_s3 + $0xac] sm:$0xf0] }
 0x196   :  { %3741 = vmatpush.bf16.msra.mxu1 %v8245_v29  ;;  %3721 = vmatpush.bf16.msrb.mxu3 %v9585_v32  ;;  %v8404_v22 = vld [vmem:[%s18838_s3 + $0x4d0] sm:$0xf]  ;;  %v7861_v30 = vor.u32 %v11640_v17, %v7860_v14  ;;  %v8117_v32 = vor.u32 %v11704_v21, %v8116_v20  ;;  %v3517_v14 = vpop.f32.mrf.mxu3 }
 0x197   :  { %3709 = vmatmul.bf16.vlgmr.msrb.gmra.mxu2 %v13282_v23  ;;  %v11776_v27 = vld [vmem:[%s18838_s3 + $0x4ec] sm:$0xf0] }
 0x198   :  { %3753 = vmatpush.bf16.msra.mxu2 %v8533_v9  ;;  %3729 = vmatpush.bf16.msra.mxu0 %v7957_v42  ;;  %v8660_v28 = vld [vmem:[%s18838_s3 + $0x6d0] sm:$0xf]  ;;  %v8405_v9 = vor.u32 %v11776_v27, %v8404_v22 }
 0x199   :  { %3722 = vmatmul.bf16.vlgmr.msrb.gmra.mxu3 %v13284_v24  ;;  %v11840_v29 = vld [vmem:[%s18838_s3 + $0x6ec] sm:$0xf0] }
 0x19a   :  { %3766 = vmatpush.bf16.msra.mxu3 %v8789_v35  ;;  %3742 = vmatpush.bf16.msra.mxu1 %v8213_v43  ;;  %v7828_v33 = vld [vmem:[%s18838_s3 + $0x50] sm:$0xf]  ;;  %v8661_v35 = vor.u32 %v11840_v29, %v8660_v28 }
 0x19b   :  { %v11632_v34 = vld [vmem:[%s18838_s3 + $0x6c] sm:$0xf0] }
 0x19c   :  { %3754 = vmatpush.bf16.msra.mxu2 %v8501_v46  ;;  %3730 = vmatpush.bf16.msra.mxu0 %v7925_v61  ;;  %v8084_v36 = vld [vmem:[%s18838_s3 + $0x250] sm:$0xf]  ;;  %v7829_v45 = vor.u32 %v11632_v34, %v7828_v33 }
 0x19d   :  { %v11696_v37 = vld [vmem:[%s18838_s3 + $0x26c] sm:$0xf0] }
 0x19e   :  { %3767 = vmatpush.bf16.msra.mxu3 %v8757_v47  ;;  %3743 = vmatpush.bf16.msra.mxu1 %v8181_v63  ;;  %v8372_v38 = vld [vmem:[%s18838_s3 + $0x490] sm:$0xf]  ;;  %v8085_v46 = vor.u32 %v11696_v37, %v8084_v36 }
 0x19f   :  { %v11768_v41 = vld [vmem:[%s18838_s3 + $0x4ac] sm:$0xf0] }
 0x1a0   :  { %3755 = vmatpush.bf16.msra.mxu2 %v8469_v3  ;;  %3731 = vmatpush.bf16.msra.mxu0 %v7893_v11  ;;  %v8628_v42 = vld [vmem:[%s18838_s3 + $0x690] sm:$0xf]  ;;  %v8373_v55 = vor.u32 %v11768_v41, %v8372_v38 }
 0x1a1   :  { %v11832_v43 = vld [vmem:[%s18838_s3 + $0x6ac] sm:$0xf0] }
 0x1a2   :  { %3768 = vmatpush.bf16.msra.mxu3 %v8725_v4  ;;  %3744 = vmatpush.bf16.msra.mxu1 %v8149_v13  ;;  %v7796_v47 = vld [vmem:[%s18838_s3 + $0x10] sm:$0xf]  ;;  %v8629_v56 = vor.u32 %v11832_v43, %v8628_v42  ;;  %v3504_v13 = vpop.f32.mrf.mxu2  ;;  %v737_v42 = vperm.slane %v13960_v12, 2 }
 0x1a3   :  { %v11624_v48 = vld [vmem:[%s18838_s3 + $0x2c] sm:$0xf0] }
 0x1a4   :  { %3756 = vmatpush.bf16.msra.mxu2 %v8437_v18  ;;  %3732 = vmatpush.bf16.msra.mxu0 %v7861_v30  ;;  %v8052_v52 = vld [vmem:[%s18838_s3 + $0x210] sm:$0xf]  ;;  %v7797_v3 = vor.u32 %v11624_v48, %v7796_v47 }
 0x1a5   :  { %v11688_v57 = vld [vmem:[%s18838_s3 + $0x22c] sm:$0xf0] }
 0x1a6   :  { %3769 = vmatpush.bf16.msra.mxu3 %v8693_v19  ;;  %3745 = vmatpush.bf16.msra.mxu1 %v8117_v32  ;;  %v9044_v58 = vld [vmem:[%s18838_s3 + $0x9d0] sm:$0xf]  ;;  %v8053_v4 = vor.u32 %v11688_v57, %v8052_v52  ;;  %v3541_v57 = vpop.f32.mrf.mxu1 }
 0x1a7   :  { %v11936_v59 = vld [vmem:[%s18838_s3 + $0x9ec] sm:$0xf0] }
 0x1a8   :  { %3757 = vmatpush.bf16.msra.mxu2 %v8405_v9  ;;  %v9300_v60 = vld [vmem:[%s18838_s3 + $0xbd0] sm:$0xf]  ;;  %3733 = vmatpush.bf16.msra.mxu0 %v7829_v45  ;;  %v9045_v62 = vor.u32 %v11936_v59, %v9044_v58 }
 0x1a9   :  { %v12000_v61 = vld [vmem:[%s18838_s3 + $0xbec] sm:$0xf0] }
 0x1aa   :  { %3770 = vmatpush.bf16.msra.mxu3 %v8661_v35  ;;  %v8340_v63 = vld [vmem:[%s18838_s3 + $0x450] sm:$0xf]  ;;  %3746 = vmatpush.bf16.msra.mxu1 %v8085_v46  ;;  %v9301_v5 = vor.u32 %v12000_v61, %v9300_v60 }
 0x1ab   :  { %v11760_v0 = vld [vmem:[%s18838_s3 + $0x46c] sm:$0xf0] }
 0x1ac   :  { %v8596_v1 = vld [vmem:[%s18838_s3 + $0x650] sm:$0xf]  ;;  %3758 = vmatpush.bf16.msra.mxu2 %v8373_v55  ;;  %v8341_v10 = vor.u32 %v11760_v0, %v8340_v63  ;;  %3734 = vmatpush.bf16.msra.mxu0 %v7797_v3 }
 0x1ad   :  { %v11824_v2 = vld [vmem:[%s18838_s3 + $0x66c] sm:$0xf0] }
 0x1ae   :  { %3771 = vmatpush.bf16.msra.mxu3 %v8629_v56  ;;  %v9012_v6 = vld [vmem:[%s18838_s3 + $0x990] sm:$0xf]  ;;  %v8597_v11 = vor.u32 %v11824_v2, %v8596_v1  ;;  %3747 = vmatpush.bf16.msra.mxu1 %v8053_v4  ;;  %v3528_v56 = vpop.f32.mrf.mxu0 }
 0x1af   :  { %v11928_v7 = vld [vmem:[%s18838_s3 + $0x9ac] sm:$0xf0]  ;;  %3735 = vmatmul.bf16.vlgmr.msra.gmra.mxu0 %v13131_v49  ;;  %v3529_v61 = vadd.f32 %v3528_v56, %v737_v42 }
 0x1b0   :  { %v9268_v8 = vld [vmem:[%s18838_s3 + $0xb90] sm:$0xf]  ;;  %3779 = vmatpush.bf16.msrb.mxu0 %v9045_v62  ;;  %v9013_v28 = vor.u32 %v11928_v7, %v9012_v6  ;;  %3759 = vmatpush.bf16.msra.mxu2 %v8341_v10 }
 0x1b1   :  { %v11992_v17 = vld [vmem:[%s18838_s3 + $0xbac] sm:$0xf0]  ;;  %3748 = vmatmul.bf16.vlgmr.msra.gmra.mxu1 %v13133_v50  ;;  %v3542_v3 = vadd.f32 %v3541_v57, %v3529_v61  ;;  %v11740_v61 = vld [vmem:[%s18838_s3 + $0x3d4] sm:$0xf] }
 0x1b2   :  { %v8308_v18 = vld [vmem:[%s18838_s3 + $0x410] sm:$0xf]  ;;  %3792 = vmatpush.bf16.msrb.mxu1 %v9301_v5  ;;  %v9269_v29 = vor.u32 %v11992_v17, %v9268_v8  ;;  %3772 = vmatpush.bf16.msra.mxu3 %v8597_v11 }
 0x1b3   :  { %v11752_v19 = vld [vmem:[%s18838_s3 + $0x42c] sm:$0xf0] }
 0x1b4   :  { %v8564_v20 = vld [vmem:[%s18838_s3 + $0x610] sm:$0xf]  ;;  %v8309_v30 = vor.u32 %v11752_v19, %v8308_v18  ;;  %3780 = vmatpush.bf16.msrb.mxu0 %v9013_v28 }
 0x1b5   :  { %v11816_v21 = vld [vmem:[%s18838_s3 + $0x62c] sm:$0xf0] }
 0x1b6   :  { %v9556_v22 = vld [vmem:[%s18838_s3 + $0xdd0] sm:$0xf]  ;;  %v8565_v32 = vor.u32 %v11816_v21, %v8564_v20  ;;  %3793 = vmatpush.bf16.msrb.mxu1 %v9269_v29  ;;  %3760 = vmatpush.bf16.msra.mxu2 %v8309_v30 }
 0x1b7   :  { %v12064_v25 = vld [vmem:[%s18838_s3 + $0xdec] sm:$0xf0] }
 0x1b8   :  { %v9812_v26 = vld [vmem:[%s18838_s3 + $0xfd0] sm:$0xf]  ;;  %v9557_v9 = vor.u32 %v12064_v25, %v9556_v22  ;;  %3773 = vmatpush.bf16.msra.mxu3 %v8565_v32 }
 0x1b9   :  { %v12128_v27 = vld [vmem:[%s18838_s3 + $0xfec] sm:$0xf0]  ;;  %3761 = vmatmul.bf16.vlgmr.msra.gmra.mxu2 %v13175_v15 }
 0x1ba   :  { %v8980_v33 = vld [vmem:[%s18838_s3 + $0x950] sm:$0xf]  ;;  %v9813_v35 = vor.u32 %v12128_v27, %v9812_v26  ;;  %3805 = vmatpush.bf16.msrb.mxu2 %v9557_v9  ;;  %v3530_v26 = vpop.f32.mrf.mxu0  ;;  %v3543_v27 = vpop.f32.mrf.mxu1 }
 0x1bb   :  { %v11920_v34 = vld [vmem:[%s18838_s3 + $0x96c] sm:$0xf0]  ;;  %3774 = vmatmul.bf16.vlgmr.msra.gmra.mxu3 %v13177_v16  ;;  %v8534_v26 = vld [vmem:[%s18838_s3 + $0x5f0] sm:$0xf0] }
 0x1bc   :  { %v9236_v36 = vld [vmem:[%s18838_s3 + $0xb50] sm:$0xf]  ;;  %v8981_v43 = vor.u32 %v11920_v34, %v8980_v33  ;;  %3818 = vmatpush.bf16.msrb.mxu3 %v9813_v35  ;;  %v11868_v27 = vld [vmem:[%s18838_s3 + $0x7d4] sm:$0xf] }
 0x1bd   :  { %v11984_v37 = vld [vmem:[%s18838_s3 + $0xb6c] sm:$0xf0] }
 0x1be   :  { %v9524_v38 = vld [vmem:[%s18838_s3 + $0xd90] sm:$0xf]  ;;  %v9237_v44 = vor.u32 %v11984_v37, %v9236_v36  ;;  %3781 = vmatpush.bf16.msrb.mxu0 %v8981_v43 }
 0x1bf   :  { %v12056_v39 = vld [vmem:[%s18838_s3 + $0xdac] sm:$0xf0] }
 0x1c0   :  { %v9780_v40 = vld [vmem:[%s18838_s3 + $0xf90] sm:$0xf]  ;;  %v9525_v47 = vor.u32 %v12056_v39, %v9524_v38  ;;  %3794 = vmatpush.bf16.msrb.mxu1 %v9237_v44 }
 0x1c1   :  { %v12120_v41 = vld [vmem:[%s18838_s3 + $0xfac] sm:$0xf0] }
 0x1c2   :  { %v8948_v45 = vld [vmem:[%s18838_s3 + $0x910] sm:$0xf]  ;;  %v9781_v48 = vor.u32 %v12120_v41, %v9780_v40  ;;  %3806 = vmatpush.bf16.msrb.mxu2 %v9525_v47  ;;  %v3554_v40 = vpop.f32.mrf.mxu2  ;;  %v3567_v41 = vpop.f32.mrf.mxu3 }
 0x1c3   :  { %v11912_v46 = vld [vmem:[%s18838_s3 + $0x92c] sm:$0xf0] }
 0x1c4   :  { %v9204_v12 = vld [vmem:[%s18838_s3 + $0xb10] sm:$0xf]  ;;  %v8949_v63 = vor.u32 %v11912_v46, %v8948_v45  ;;  %3819 = vmatpush.bf16.msrb.mxu3 %v9781_v48  ;;  %v3555_v45 = vadd.f32 %v3554_v40, %v3542_v3  ;;  %v8502_v40 = vld [vmem:[%s18838_s3 + $0x5b0] sm:$0xf0] }
 0x1c5   :  { %v11976_v52 = vld [vmem:[%s18838_s3 + $0xb2c] sm:$0xf0] }
 0x1c6   :  { %v9492_v55 = vld [vmem:[%s18838_s3 + $0xd50] sm:$0xf]  ;;  %v9205_v0 = vor.u32 %v11976_v52, %v9204_v12  ;;  %3782 = vmatpush.bf16.msrb.mxu0 %v8949_v63  ;;  %v8278_v63 = vld [vmem:[%s18838_s3 + $0x3f0] sm:$0xf0] }
 0x1c7   :  { %v12048_v58 = vld [vmem:[%s18838_s3 + $0xd6c] sm:$0xf0] }
 0x1c8   :  { %v9748_v59 = vld [vmem:[%s18838_s3 + $0xf50] sm:$0xf]  ;;  %v9493_v4 = vor.u32 %v12048_v58, %v9492_v55  ;;  %3795 = vmatpush.bf16.msrb.mxu1 %v9205_v0  ;;  %v14693_v55 = vadd.f32 %v3567_v41, %v3555_v45  ;;  %v11860_v41 = vld [vmem:[%s18838_s3 + $0x794] sm:$0xf] }
 0x1c9   :  { %v12112_v60 = vld [vmem:[%s18838_s3 + $0xf6c] sm:$0xf0]  ;;  %v11652_v45 = vld [vmem:[%s18838_s3 + $0x114] sm:$0xf] }
 0x1ca   :  { %v8916_v1 = vld [vmem:[%s18838_s3 + $0x8d0] sm:$0xf]  ;;  %v9749_v62 = vor.u32 %v12112_v60, %v9748_v59  ;;  %3807 = vmatpush.bf16.msrb.mxu2 %v9493_v4  ;;  %v11676_v59 = vld [vmem:[%s18838_s3 + $0x1d4] sm:$0xf] }
 0x1cb   :  { %v11904_v2 = vld [vmem:[%s18838_s3 + $0x8ec] sm:$0xf0]  ;;  %v8022_v60 = vld [vmem:[%s18838_s3 + $0x1f0] sm:$0xf0] }
 0x1cc   :  { %v9172_v5 = vld [vmem:[%s18838_s3 + $0xad0] sm:$0xf]  ;;  %v8917_v13 = vor.u32 %v11904_v2, %v8916_v1  ;;  %3820 = vmatpush.bf16.msrb.mxu3 %v9749_v62 }
 0x1cd   :  { %v11968_v6 = vld [vmem:[%s18838_s3 + $0xaec] sm:$0xf0] }
 0x1ce   :  { %v9460_v7 = vld [vmem:[%s18838_s3 + $0xd10] sm:$0xf]  ;;  %v9173_v14 = vor.u32 %v11968_v6, %v9172_v5  ;;  %3783 = vmatpush.bf16.msrb.mxu0 %v8917_v13  ;;  %v8025_v5 = vor.u32 %v11676_v59, %v8022_v60  ;;  %v8281_v6 = vor.u32 %v11740_v61, %v8278_v63  ;;  %v8470_v59 = vld [vmem:[%s18838_s3 + $0x570] sm:$0xf0] }
 0x1cf   :  { %v12040_v8 = vld [vmem:[%s18838_s3 + $0xd2c] sm:$0xf0]  ;;  %v11852_v60 = vld [vmem:[%s18838_s3 + $0x754] sm:$0xf] }
 0x1d0   :  { %v9716_v10 = vld [vmem:[%s18838_s3 + $0xf10] sm:$0xf]  ;;  %v9461_v19 = vor.u32 %v12040_v8, %v9460_v7  ;;  %3796 = vmatpush.bf16.msrb.mxu1 %v9173_v14  ;;  %v11668_v7 = vld [vmem:[%s18838_s3 + $0x194] sm:$0xf]  ;;  %v3556_v14 = vpop.f32.mrf.mxu2 }
 0x1d1   :  { %v12104_v11 = vld [vmem:[%s18838_s3 + $0xf2c] sm:$0xf0]  ;;  %v7990_v8 = vld [vmem:[%s18838_s3 + $0x1b0] sm:$0xf0] }
 0x1d2   :  { %v8884_v17 = vld [vmem:[%s18838_s3 + $0x890] sm:$0xf]  ;;  %v9717_v20 = vor.u32 %v12104_v11, %v9716_v10  ;;  %3808 = vmatpush.bf16.msrb.mxu2 %v9461_v19  ;;  %v11732_v10 = vld [vmem:[%s18838_s3 + $0x394] sm:$0xf] }
 0x1d3   :  { %v11896_v18 = vld [vmem:[%s18838_s3 + $0x8ac] sm:$0xf0]  ;;  %v8726_v61 = vld [vmem:[%s18838_s3 + $0x770] sm:$0xf0] }
 0x1d4   :  { %v9140_v21 = vld [vmem:[%s18838_s3 + $0xa90] sm:$0xf]  ;;  %v8885_v32 = vor.u32 %v11896_v18, %v8884_v17  ;;  %3821 = vmatpush.bf16.msrb.mxu3 %v9717_v20  ;;  %v3569_v17 = vpop.f32.mrf.mxu3  ;;  %v8246_v18 = vld [vmem:[%s18838_s3 + $0x3b0] sm:$0xf0] }
 0x1d5   :  { %v11960_v22 = vld [vmem:[%s18838_s3 + $0xaac] sm:$0xf0]  ;;  %v11636_v17 = vld [vmem:[%s18838_s3 + $0x94] sm:$0xf] }
 0x1d6   :  { %v9428_v25 = vld [vmem:[%s18838_s3 + $0xcd0] sm:$0xf]  ;;  %v9141_v33 = vor.u32 %v11960_v22, %v9140_v21  ;;  %3784 = vmatpush.bf16.msrb.mxu0 %v8885_v32 }
 0x1d7   :  { %v12032_v28 = vld [vmem:[%s18838_s3 + $0xcec] sm:$0xf0] }
 0x1d8   :  { %v9684_v29 = vld [vmem:[%s18838_s3 + $0xed0] sm:$0xf]  ;;  %v9429_v35 = vor.u32 %v12032_v28, %v9428_v25  ;;  %3797 = vmatpush.bf16.msrb.mxu1 %v9141_v33  ;;  %v11804_v25 = vld [vmem:[%s18838_s3 + $0x5d4] sm:$0xf] }
 0x1d9   :  { %v12096_v30 = vld [vmem:[%s18838_s3 + $0xeec] sm:$0xf0]  ;;  %v8790_v28 = vld [vmem:[%s18838_s3 + $0x7f0] sm:$0xf0] }
 0x1da   :  { %v8852_v34 = vld [vmem:[%s18838_s3 + $0x850] sm:$0xf]  ;;  %v9685_v36 = vor.u32 %v12096_v30, %v9684_v29  ;;  %3809 = vmatpush.bf16.msrb.mxu2 %v9429_v35  ;;  %v7993_v29 = vor.u32 %v11668_v7, %v7990_v8  ;;  %v8249_v30 = vor.u32 %v11732_v10, %v8246_v18  ;;  %v8537_v35 = vor.u32 %v11804_v25, %v8534_v26  ;;  %v11780_v7 = vld [vmem:[%s18838_s3 + $0x514] sm:$0xf] }
 0x1db   :  { %v11888_v9 = vld [vmem:[%s18838_s3 + $0x86c] sm:$0xf0]  ;;  %v8438_v8 = vld [vmem:[%s18838_s3 + $0x530] sm:$0xf0] }
 0x1dc   :  { %v9108_v37 = vld [vmem:[%s18838_s3 + $0xa50] sm:$0xf]  ;;  %v8853_v46 = vor.u32 %v11888_v9, %v8852_v34  ;;  %3822 = vmatpush.bf16.msrb.mxu3 %v9685_v36  ;;  %v11660_v34 = vld [vmem:[%s18838_s3 + $0x154] sm:$0xf]  ;;  %v8793_v36 = vor.u32 %v11868_v27, %v8790_v28 }
 0x1dd   :  { %v11952_v38 = vld [vmem:[%s18838_s3 + $0xa6c] sm:$0xf0]  ;;  %v7958_v9 = vld [vmem:[%s18838_s3 + $0x170] sm:$0xf0] }
 0x1de   :  { %v9396_v39 = vld [vmem:[%s18838_s3 + $0xc90] sm:$0xf]  ;;  %v9109_v47 = vor.u32 %v11952_v38, %v9108_v37  ;;  %3785 = vmatpush.bf16.msrb.mxu0 %v8853_v46  ;;  %v11724_v37 = vld [vmem:[%s18838_s3 + $0x354] sm:$0xf] }
 0x1df   :  { %v12024_v42 = vld [vmem:[%s18838_s3 + $0xcac] sm:$0xf0]  ;;  %v8214_v38 = vld [vmem:[%s18838_s3 + $0x370] sm:$0xf0] }
 0x1e0   :  { %v9652_v43 = vld [vmem:[%s18838_s3 + $0xe90] sm:$0xf]  ;;  %v9397_v56 = vor.u32 %v12024_v42, %v9396_v39  ;;  %3798 = vmatpush.bf16.msrb.mxu1 %v9109_v47  ;;  %v11796_v39 = vld [vmem:[%s18838_s3 + $0x594] sm:$0xf] }
 0x1e1   :  { %v12088_v44 = vld [vmem:[%s18838_s3 + $0xeac] sm:$0xf0]  ;;  %v8758_v42 = vld [vmem:[%s18838_s3 + $0x7b0] sm:$0xf0]  ;;  %v8505_v47 = vor.u32 %v11796_v39, %v8502_v40  ;;  %v3606_v40 = vpop.f32.mrf.mxu2 }
 0x1e2   :  { %v8820_v48 = vld [vmem:[%s18838_s3 + $0x810] sm:$0xf]  ;;  %v9653_v57 = vor.u32 %v12088_v44, %v9652_v43  ;;  %3810 = vmatpush.bf16.msrb.mxu2 %v9397_v56  ;;  %v7961_v43 = vor.u32 %v11660_v34, %v7958_v9  ;;  %v8217_v44 = vor.u32 %v11724_v37, %v8214_v38  ;;  %v7926_v46 = vld [vmem:[%s18838_s3 + $0x130] sm:$0xf0] }
 0x1e3   :  { %v11880_v12 = vld [vmem:[%s18838_s3 + $0x82c] sm:$0xf0]  ;;  %v11788_v56 = vld [vmem:[%s18838_s3 + $0x554] sm:$0xf] }
 0x1e4   :  { %v9076_v52 = vld [vmem:[%s18838_s3 + $0xa10] sm:$0xf]  ;;  %v8821_v4 = vor.u32 %v11880_v12, %v8820_v48  ;;  %3823 = vmatpush.bf16.msrb.mxu3 %v9653_v57  ;;  %v8761_v48 = vor.u32 %v11860_v41, %v8758_v42  ;;  %v11716_v12 = vld [vmem:[%s18838_s3 + $0x314] sm:$0xf]  ;;  %v3580_v57 = vpop.f32.mrf.mxu0  ;;  %v3619_v41 = vpop.f32.mrf.mxu3 }
 0x1e5   :  { %v11944_v58 = vld [vmem:[%s18838_s3 + $0xa2c] sm:$0xf0]  ;;  %v3581_v63 = vadd.f32 %v3580_v57, %v14693_v55  ;;  %v11708_v55 = vld [vmem:[%s18838_s3 + $0x2d4] sm:$0xf] }
 0x1e6   :  { %v9364_v0 = vld [vmem:[%s18838_s3 + $0xc50] sm:$0xf]  ;;  %v9077_v62 = vor.u32 %v11944_v58, %v9076_v52  ;;  %3786 = vmatpush.bf16.msrb.mxu0 %v8821_v4  ;;  %v8182_v52 = vld [vmem:[%s18838_s3 + $0x330] sm:$0xf0]  ;;  %v3593_v58 = vpop.f32.mrf.mxu1 }
 0x1e7   :  { %v12016_v1 = vld [vmem:[%s18838_s3 + $0xc6c] sm:$0xf0]  ;;  %v3594_v4 = vadd.f32 %v3593_v58, %v3581_v63  ;;  %v11844_v10 = vld [vmem:[%s18838_s3 + $0x714] sm:$0xf] }
 0x1e8   :  { %v9620_v2 = vld [vmem:[%s18838_s3 + $0xe50] sm:$0xf]  ;;  %v9365_v11 = vor.u32 %v12016_v1, %v9364_v0  ;;  %3799 = vmatpush.bf16.msrb.mxu1 %v9077_v62  ;;  %v7929_v0 = vor.u32 %v11652_v45, %v7926_v46  ;;  %v8185_v1 = vor.u32 %v11716_v12, %v8182_v52  ;;  %v8473_v62 = vor.u32 %v11788_v56, %v8470_v59  ;;  %v7862_v18 = vld [vmem:[%s18838_s3 + $0xb0] sm:$0xf0] }
 0x1e9   :  { %v12080_v3 = vld [vmem:[%s18838_s3 + $0xe6c] sm:$0xf0]  ;;  %3787 = vmatmul.bf16.vlgmr.msrb.gmra.mxu0 %v13237_v54  ;;  %v11772_v25 = vld [vmem:[%s18838_s3 + $0x4d4] sm:$0xf]  ;;  %v3607_v45 = vadd.f32 %v3606_v40, %v3594_v4 }
 0x1ea   :  { %v9621_v13 = vor.u32 %v12080_v3, %v9620_v2  ;;  %v9332_v19 = vld [vmem:[%s18838_s3 + $0xc10] sm:$0xf]  ;;  %3831 = vmatpush.bf16.msra.mxu0 %v8025_v5  ;;  %3811 = vmatpush.bf16.msrb.mxu2 %v9365_v11  ;;  %v11644_v2 = vld [vmem:[%s18838_s3 + $0xd4] sm:$0xf]  ;;  %v8729_v5 = vor.u32 %v11852_v60, %v8726_v61 }
 0x1eb   :  { %v12008_v20 = vld [vmem:[%s18838_s3 + $0xc2c] sm:$0xf0]  ;;  %3800 = vmatmul.bf16.vlgmr.msrb.gmra.mxu1 %v13239_v31  ;;  %v7894_v3 = vld [vmem:[%s18838_s3 + $0xf0] sm:$0xf0]  ;;  %v14892_v56 = vadd.f32 %v3619_v41, %v3607_v45 }
 0x1ec   :  { %v9588_v21 = vld [vmem:[%s18838_s3 + $0xe10] sm:$0xf]  ;;  %3844 = vmatpush.bf16.msra.mxu1 %v8281_v6  ;;  %3824 = vmatpush.bf16.msrb.mxu3 %v9621_v13  ;;  %v9333_v32 = vor.u32 %v12008_v20, %v9332_v19  ;;  %v8150_v6 = vld [vmem:[%s18838_s3 + $0x2f0] sm:$0xf0]  ;;  %v7897_v13 = vor.u32 %v11644_v2, %v7894_v3  ;;  %v8441_v19 = vor.u32 %v11780_v7, %v8438_v8  ;;  %v3582_v26 = vpop.f32.mrf.mxu0 }
 0x1ed   :  { %v12072_v22 = vld [vmem:[%s18838_s3 + $0xe2c] sm:$0xf0]  ;;  %v8694_v11 = vld [vmem:[%s18838_s3 + $0x730] sm:$0xf0]  ;;  %v8153_v14 = vor.u32 %v11708_v55, %v8150_v6 }
 0x1ee   :  { %v9589_v33 = vor.u32 %v12072_v22, %v9588_v21  ;;  %3832 = vmatpush.bf16.msra.mxu0 %v7993_v29  ;;  %3812 = vmatpush.bf16.msrb.mxu2 %v9333_v32  ;;  %v8697_v20 = vor.u32 %v11844_v10, %v8694_v11  ;;  %v11700_v21 = vld [vmem:[%s18838_s3 + $0x294] sm:$0xf]  ;;  %v3595_v27 = vpop.f32.mrf.mxu1  ;;  %v7865_v32 = vor.u32 %v11636_v17, %v7862_v18  ;;  %v3621_v17 = vpop.f32.mrf.mxu3 }
 0x1ef   :  { %v8118_v22 = vld [vmem:[%s18838_s3 + $0x2b0] sm:$0xf0] }
 0x1f0   :  { %3845 = vmatpush.bf16.msra.mxu1 %v8249_v30  ;;  %3825 = vmatpush.bf16.msrb.mxu3 %v9589_v33  ;;  %v8406_v28 = vld [vmem:[%s18838_s3 + $0x4f0] sm:$0xf0]  ;;  %v8121_v33 = vor.u32 %v11700_v21, %v8118_v22 }
 0x1f1   :  { %3813 = vmatmul.bf16.vlgmr.msrb.gmra.mxu2 %v13282_v23  ;;  %v11836_v29 = vld [vmem:[%s18838_s3 + $0x6d4] sm:$0xf] }
 0x1f2   :  { %3857 = vmatpush.bf16.msra.mxu2 %v8537_v35  ;;  %3833 = vmatpush.bf16.msra.mxu0 %v7961_v43  ;;  %v8662_v30 = vld [vmem:[%s18838_s3 + $0x6f0] sm:$0xf0]  ;;  %v8409_v35 = vor.u32 %v11772_v25, %v8406_v28 }
 0x1f3   :  { %3826 = vmatmul.bf16.vlgmr.msrb.gmra.mxu3 %v13284_v24  ;;  %v11628_v34 = vld [vmem:[%s18838_s3 + $0x54] sm:$0xf] }
 0x1f4   :  { %3870 = vmatpush.bf16.msra.mxu3 %v8793_v36  ;;  %3846 = vmatpush.bf16.msra.mxu1 %v8217_v44  ;;  %v7830_v9 = vld [vmem:[%s18838_s3 + $0x70] sm:$0xf0]  ;;  %v8665_v36 = vor.u32 %v11836_v29, %v8662_v30 }
 0x1f5   :  { %v11692_v37 = vld [vmem:[%s18838_s3 + $0x254] sm:$0xf]  ;;  %v7833_v46 = vor.u32 %v11628_v34, %v7830_v9 }
 0x1f6   :  { %3858 = vmatpush.bf16.msra.mxu2 %v8505_v47  ;;  %3834 = vmatpush.bf16.msra.mxu0 %v7929_v0  ;;  %v8086_v38 = vld [vmem:[%s18838_s3 + $0x270] sm:$0xf0] }
 0x1f7   :  { %v11764_v39 = vld [vmem:[%s18838_s3 + $0x494] sm:$0xf]  ;;  %v8089_v47 = vor.u32 %v11692_v37, %v8086_v38 }
 0x1f8   :  { %3871 = vmatpush.bf16.msra.mxu3 %v8761_v48  ;;  %3847 = vmatpush.bf16.msra.mxu1 %v8185_v1  ;;  %v8374_v42 = vld [vmem:[%s18838_s3 + $0x4b0] sm:$0xf0] }
 0x1f9   :  { %v11828_v43 = vld [vmem:[%s18838_s3 + $0x694] sm:$0xf]  ;;  %v8377_v57 = vor.u32 %v11764_v39, %v8374_v42 }
 0x1fa   :  { %3859 = vmatpush.bf16.msra.mxu2 %v8473_v62  ;;  %3835 = vmatpush.bf16.msra.mxu0 %v7897_v13  ;;  %v8630_v44 = vld [vmem:[%s18838_s3 + $0x6b0] sm:$0xf0] }
 0x1fb   :  { %v11620_v48 = vld [vmem:[%s18838_s3 + $0x14] sm:$0xf]  ;;  %v8633_v58 = vor.u32 %v11828_v43, %v8630_v44  ;;  %v14986_v43 = vld [vmem:[%s18839_s4] sm:$0xff] }
 0x1fc   :  { %3872 = vmatpush.bf16.msra.mxu3 %v8729_v5  ;;  %3848 = vmatpush.bf16.msra.mxu1 %v8153_v14  ;;  %v7798_v12 = vld [vmem:[%s18838_s3 + $0x30] sm:$0xf0]  ;;  %v3608_v14 = vpop.f32.mrf.mxu2  ;;  %v738_v44 = vperm.slane %v14986_v43, 3 }
 0x1fd   :  { %v11684_v52 = vld [vmem:[%s18838_s3 + $0x214] sm:$0xf]  ;;  %v7801_v62 = vor.u32 %v11620_v48, %v7798_v12 }
 0x1fe   :  { %3860 = vmatpush.bf16.msra.mxu2 %v8441_v19  ;;  %3836 = vmatpush.bf16.msra.mxu0 %v7865_v32  ;;  %v8054_v59 = vld [vmem:[%s18838_s3 + $0x230] sm:$0xf0] }
 0x1ff   :  { %v11932_v60 = vld [vmem:[%s18838_s3 + $0x9d4] sm:$0xf]  ;;  %v8057_v5 = vor.u32 %v11684_v52, %v8054_v59 }
 0x200   :  { %3873 = vmatpush.bf16.msra.mxu3 %v8697_v20  ;;  %3849 = vmatpush.bf16.msra.mxu1 %v8121_v33  ;;  %v9046_v61 = vld [vmem:[%s18838_s3 + $0x9f0] sm:$0xf0] }
 0x201   :  { %v11996_v63 = vld [vmem:[%s18838_s3 + $0xbd4] sm:$0xf]  ;;  %v9049_v55 = vor.u32 %v11932_v60, %v9046_v61  ;;  %v3632_v60 = vpop.f32.mrf.mxu0  ;;  %v3645_v61 = vpop.f32.mrf.mxu1 }
 0x202   :  { %3861 = vmatpush.bf16.msra.mxu2 %v8409_v35  ;;  %v9302_v0 = vld [vmem:[%s18838_s3 + $0xbf0] sm:$0xf0]  ;;  %3837 = vmatpush.bf16.msra.mxu0 %v7833_v46 }
 0x203   :  { %v11756_v1 = vld [vmem:[%s18838_s3 + $0x454] sm:$0xf]  ;;  %v9305_v6 = vor.u32 %v11996_v63, %v9302_v0 }
 0x204   :  { %3874 = vmatpush.bf16.msra.mxu3 %v8665_v36  ;;  %v8342_v2 = vld [vmem:[%s18838_s3 + $0x470] sm:$0xf0]  ;;  %3850 = vmatpush.bf16.msra.mxu1 %v8089_v47 }
 0x205   :  { %v11820_v3 = vld [vmem:[%s18838_s3 + $0x654] sm:$0xf]  ;;  %v8345_v11 = vor.u32 %v11756_v1, %v8342_v2  ;;  %v3633_v2 = vadd.f32 %v3632_v60, %v738_v44  ;;  %v3658_v44 = vpop.f32.mrf.mxu2 }
 0x206   :  { %v8598_v4 = vld [vmem:[%s18838_s3 + $0x670] sm:$0xf0]  ;;  %3862 = vmatpush.bf16.msra.mxu2 %v8377_v57  ;;  %3838 = vmatpush.bf16.msra.mxu0 %v7801_v62 }
 0x207   :  { %v11924_v7 = vld [vmem:[%s18838_s3 + $0x994] sm:$0xf]  ;;  %v8601_v13 = vor.u32 %v11820_v3, %v8598_v4 }
 0x208   :  { %3875 = vmatpush.bf16.msra.mxu3 %v8633_v58  ;;  %v9014_v8 = vld [vmem:[%s18838_s3 + $0x9b0] sm:$0xf0]  ;;  %3851 = vmatpush.bf16.msra.mxu1 %v8057_v5 }
 0x209   :  { %v11988_v10 = vld [vmem:[%s18838_s3 + $0xb94] sm:$0xf]  ;;  %v9017_v29 = vor.u32 %v11924_v7, %v9014_v8  ;;  %3839 = vmatmul.bf16.vlgmr.msra.gmra.mxu0 %v13131_v49 }
 0x20a   :  { %v9270_v18 = vld [vmem:[%s18838_s3 + $0xbb0] sm:$0xf0]  ;;  %3883 = vmatpush.bf16.msrb.mxu0 %v9049_v55  ;;  %3863 = vmatpush.bf16.msra.mxu2 %v8345_v11  ;;  %v3646_v55 = vadd.f32 %v3645_v61, %v3633_v2  ;;  %v8028_v2 = vld [vmem:[%s18838_s3 + $0x1d8] sm:$0xf] }
 0x20b   :  { %v11748_v19 = vld [vmem:[%s18838_s3 + $0x414] sm:$0xf]  ;;  %v9273_v30 = vor.u32 %v11988_v10, %v9270_v18  ;;  %3852 = vmatmul.bf16.vlgmr.msra.gmra.mxu1 %v13133_v50 }
 0x20c   :  { %v8310_v20 = vld [vmem:[%s18838_s3 + $0x430] sm:$0xf0]  ;;  %3896 = vmatpush.bf16.msrb.mxu1 %v9305_v6  ;;  %3876 = vmatpush.bf16.msra.mxu3 %v8601_v13 }
 0x20d   :  { %v11812_v21 = vld [vmem:[%s18838_s3 + $0x614] sm:$0xf]  ;;  %v8313_v32 = vor.u32 %v11748_v19, %v8310_v20 }
 0x20e   :  { %v8566_v22 = vld [vmem:[%s18838_s3 + $0x630] sm:$0xf0]  ;;  %3884 = vmatpush.bf16.msrb.mxu0 %v9017_v29  ;;  %v3634_v29 = vpop.f32.mrf.mxu0 }
 0x20f   :  { %v12060_v25 = vld [vmem:[%s18838_s3 + $0xdd4] sm:$0xf]  ;;  %v8569_v33 = vor.u32 %v11812_v21, %v8566_v22  ;;  %3864 = vmatpush.bf16.msra.mxu2 %v8313_v32 }
 0x210   :  { %v9558_v26 = vld [vmem:[%s18838_s3 + $0xdf0] sm:$0xf0]  ;;  %3897 = vmatpush.bf16.msrb.mxu1 %v9273_v30  ;;  %v3647_v30 = vpop.f32.mrf.mxu1 }
 0x211   :  { %v12124_v27 = vld [vmem:[%s18838_s3 + $0xfd4] sm:$0xf]  ;;  %v9561_v35 = vor.u32 %v12060_v25, %v9558_v26  ;;  %3877 = vmatpush.bf16.msra.mxu3 %v8569_v33  ;;  %v8540_v30 = vld [vmem:[%s18838_s3 + $0x5d8] sm:$0xf] }
 0x212   :  { %v9814_v28 = vld [vmem:[%s18838_s3 + $0xff0] sm:$0xf0]  ;;  %3865 = vmatmul.bf16.vlgmr.msra.gmra.mxu2 %v13175_v15 }
 0x213   :  { %v11916_v34 = vld [vmem:[%s18838_s3 + $0x954] sm:$0xf]  ;;  %v9817_v36 = vor.u32 %v12124_v27, %v9814_v28  ;;  %3909 = vmatpush.bf16.msrb.mxu2 %v9561_v35 }
 0x214   :  { %v8982_v9 = vld [vmem:[%s18838_s3 + $0x970] sm:$0xf0]  ;;  %3878 = vmatmul.bf16.vlgmr.msra.gmra.mxu3 %v13177_v16 }
 0x215   :  { %v11980_v37 = vld [vmem:[%s18838_s3 + $0xb54] sm:$0xf]  ;;  %v8985_v45 = vor.u32 %v11916_v34, %v8982_v9  ;;  %3922 = vmatpush.bf16.msrb.mxu3 %v9817_v36 }
 0x216   :  { %v9238_v38 = vld [vmem:[%s18838_s3 + $0xb70] sm:$0xf0] }
 0x217   :  { %v12052_v39 = vld [vmem:[%s18838_s3 + $0xd94] sm:$0xf]  ;;  %v9241_v46 = vor.u32 %v11980_v37, %v9238_v38  ;;  %3885 = vmatpush.bf16.msrb.mxu0 %v8985_v45  ;;  %v3671_v45 = vpop.f32.mrf.mxu3 }
 0x218   :  { %v9526_v40 = vld [vmem:[%s18838_s3 + $0xdb0] sm:$0xf0] }
 0x219   :  { %v12116_v41 = vld [vmem:[%s18838_s3 + $0xf94] sm:$0xf]  ;;  %v9529_v12 = vor.u32 %v12052_v39, %v9526_v40  ;;  %3898 = vmatpush.bf16.msrb.mxu1 %v9241_v46 }
 0x21a   :  { %v9782_v42 = vld [vmem:[%s18838_s3 + $0xfb0] sm:$0xf0] }
 0x21b   :  { %v11908_v47 = vld [vmem:[%s18838_s3 + $0x914] sm:$0xf]  ;;  %v9785_v52 = vor.u32 %v12116_v41, %v9782_v42  ;;  %3910 = vmatpush.bf16.msrb.mxu2 %v9529_v12  ;;  %v3659_v12 = vadd.f32 %v3658_v44, %v3646_v55  ;;  %v11729_v44 = vld [vmem:[%s18838_s3 + $0x374] sm:$0xf0] }
 0x21c   :  { %v8950_v48 = vld [vmem:[%s18838_s3 + $0x930] sm:$0xf0] }
 0x21d   :  { %v11972_v57 = vld [vmem:[%s18838_s3 + $0xb14] sm:$0xf]  ;;  %v8953_v3 = vor.u32 %v11908_v47, %v8950_v48  ;;  %3923 = vmatpush.bf16.msrb.mxu3 %v9785_v52  ;;  %v15096_v61 = vadd.f32 %v3671_v45, %v3659_v12  ;;  %v8508_v45 = vld [vmem:[%s18838_s3 + $0x598] sm:$0xf] }
 0x21e   :  { %v9206_v58 = vld [vmem:[%s18838_s3 + $0xb30] sm:$0xf0] }
 0x21f   :  { %v12044_v59 = vld [vmem:[%s18838_s3 + $0xd54] sm:$0xf]  ;;  %v9209_v4 = vor.u32 %v11972_v57, %v9206_v58  ;;  %3886 = vmatpush.bf16.msrb.mxu0 %v8953_v3  ;;  %v11681_v3 = vld [vmem:[%s18838_s3 + $0x1f4] sm:$0xf0] }
 0x220   :  { %v9494_v63 = vld [vmem:[%s18838_s3 + $0xd70] sm:$0xf0] }
 0x221   :  { %v12108_v0 = vld [vmem:[%s18838_s3 + $0xf54] sm:$0xf]  ;;  %v9497_v6 = vor.u32 %v12044_v59, %v9494_v63  ;;  %3899 = vmatpush.bf16.msrb.mxu1 %v9209_v4  ;;  %v8284_v4 = vld [vmem:[%s18838_s3 + $0x3d8] sm:$0xf] }
 0x222   :  { %v9750_v1 = vld [vmem:[%s18838_s3 + $0xf70] sm:$0xf0] }
 0x223   :  { %v11900_v62 = vld [vmem:[%s18838_s3 + $0x8d4] sm:$0xf]  ;;  %v9753_v7 = vor.u32 %v12108_v0, %v9750_v1  ;;  %3911 = vmatpush.bf16.msrb.mxu2 %v9497_v6 }
 0x224   :  { %v8918_v5 = vld [vmem:[%s18838_s3 + $0x8f0] sm:$0xf0] }
 0x225   :  { %v11964_v8 = vld [vmem:[%s18838_s3 + $0xad4] sm:$0xf]  ;;  %v8921_v18 = vor.u32 %v11900_v62, %v8918_v5  ;;  %3924 = vmatpush.bf16.msrb.mxu3 %v9753_v7  ;;  %v11745_v62 = vld [vmem:[%s18838_s3 + $0x3f4] sm:$0xf0] }
 0x226   :  { %v9174_v10 = vld [vmem:[%s18838_s3 + $0xaf0] sm:$0xf0] }
 0x227   :  { %v12036_v11 = vld [vmem:[%s18838_s3 + $0xd14] sm:$0xf]  ;;  %v9177_v19 = vor.u32 %v11964_v8, %v9174_v10  ;;  %3887 = vmatpush.bf16.msrb.mxu0 %v8921_v18  ;;  %v8252_v18 = vld [vmem:[%s18838_s3 + $0x398] sm:$0xf] }
 0x228   :  { %v9462_v13 = vld [vmem:[%s18838_s3 + $0xd30] sm:$0xf0] }
 0x229   :  { %v12100_v14 = vld [vmem:[%s18838_s3 + $0xf14] sm:$0xf]  ;;  %v9465_v22 = vor.u32 %v12036_v11, %v9462_v13  ;;  %3900 = vmatpush.bf16.msrb.mxu1 %v9177_v19  ;;  %v8029_v11 = vor.u32 %v11681_v3, %v8028_v2  ;;  %v8285_v13 = vor.u32 %v11745_v62, %v8284_v4  ;;  %v3684_v2 = vpop.f32.mrf.mxu0  ;;  %v3697_v3 = vpop.f32.mrf.mxu1  ;;  %v11793_v4 = vld [vmem:[%s18838_s3 + $0x574] sm:$0xf0] }
 0x22a   :  { %v9718_v17 = vld [vmem:[%s18838_s3 + $0xf30] sm:$0xf0]  ;;  %v8732_v62 = vld [vmem:[%s18838_s3 + $0x758] sm:$0xf] }
 0x22b   :  { %v11892_v20 = vld [vmem:[%s18838_s3 + $0x894] sm:$0xf]  ;;  %v9721_v25 = vor.u32 %v12100_v14, %v9718_v17  ;;  %3912 = vmatpush.bf16.msrb.mxu2 %v9465_v22  ;;  %v7996_v14 = vld [vmem:[%s18838_s3 + $0x198] sm:$0xf]  ;;  %v3673_v22 = vpop.f32.mrf.mxu3 }
 0x22c   :  { %v8886_v21 = vld [vmem:[%s18838_s3 + $0x8b0] sm:$0xf0]  ;;  %v11673_v17 = vld [vmem:[%s18838_s3 + $0x1b4] sm:$0xf0] }
 0x22d   :  { %v11956_v26 = vld [vmem:[%s18838_s3 + $0xa94] sm:$0xf]  ;;  %v8889_v9 = vor.u32 %v11892_v20, %v8886_v21  ;;  %3925 = vmatpush.bf16.msrb.mxu3 %v9721_v25  ;;  %v3660_v21 = vpop.f32.mrf.mxu2  ;;  %v11737_v25 = vld [vmem:[%s18838_s3 + $0x3b4] sm:$0xf0] }
 0x22e   :  { %v9142_v27 = vld [vmem:[%s18838_s3 + $0xab0] sm:$0xf0]  ;;  %v11849_v21 = vld [vmem:[%s18838_s3 + $0x734] sm:$0xf0] }
 0x22f   :  { %v12028_v28 = vld [vmem:[%s18838_s3 + $0xcd4] sm:$0xf]  ;;  %v9145_v35 = vor.u32 %v11956_v26, %v9142_v27  ;;  %3888 = vmatpush.bf16.msrb.mxu0 %v8889_v9  ;;  %v7997_v9 = vor.u32 %v11673_v17, %v7996_v14  ;;  %v11713_v17 = vld [vmem:[%s18838_s3 + $0x2f4] sm:$0xf0] }
 0x230   :  { %v9430_v32 = vld [vmem:[%s18838_s3 + $0xcf0] sm:$0xf0] }
 0x231   :  { %v12092_v33 = vld [vmem:[%s18838_s3 + $0xed4] sm:$0xf]  ;;  %v9433_v38 = vor.u32 %v12028_v28, %v9430_v32  ;;  %3901 = vmatpush.bf16.msrb.mxu1 %v9145_v35  ;;  %v11809_v32 = vld [vmem:[%s18838_s3 + $0x5f4] sm:$0xf0]  ;;  %v8253_v35 = vor.u32 %v11737_v25, %v8252_v18 }
 0x232   :  { %v9686_v34 = vld [vmem:[%s18838_s3 + $0xef0] sm:$0xf0]  ;;  %v8444_v18 = vld [vmem:[%s18838_s3 + $0x518] sm:$0xf] }
 0x233   :  { %v11884_v36 = vld [vmem:[%s18838_s3 + $0x854] sm:$0xf]  ;;  %v9689_v39 = vor.u32 %v12092_v33, %v9686_v34  ;;  %3913 = vmatpush.bf16.msrb.mxu2 %v9433_v38  ;;  %v8796_v33 = vld [vmem:[%s18838_s3 + $0x7d8] sm:$0xf] }
 0x234   :  { %v8854_v37 = vld [vmem:[%s18838_s3 + $0x870] sm:$0xf0]  ;;  %v11873_v34 = vld [vmem:[%s18838_s3 + $0x7f4] sm:$0xf0] }
 0x235   :  { %v11948_v40 = vld [vmem:[%s18838_s3 + $0xa54] sm:$0xf]  ;;  %v8857_v52 = vor.u32 %v11884_v36, %v8854_v37  ;;  %3926 = vmatpush.bf16.msrb.mxu3 %v9689_v39  ;;  %v7964_v38 = vld [vmem:[%s18838_s3 + $0x158] sm:$0xf] }
 0x236   :  { %v9110_v41 = vld [vmem:[%s18838_s3 + $0xa70] sm:$0xf0]  ;;  %v11665_v39 = vld [vmem:[%s18838_s3 + $0x174] sm:$0xf0] }
 0x237   :  { %v12020_v42 = vld [vmem:[%s18838_s3 + $0xc94] sm:$0xf]  ;;  %v9113_v57 = vor.u32 %v11948_v40, %v9110_v41  ;;  %3889 = vmatpush.bf16.msrb.mxu0 %v8857_v52  ;;  %v8541_v40 = vor.u32 %v11809_v32, %v8540_v30  ;;  %v8797_v41 = vor.u32 %v11873_v34, %v8796_v33  ;;  %v7965_v12 = vor.u32 %v11665_v39, %v7964_v38  ;;  %v8124_v30 = vld [vmem:[%s18838_s3 + $0x298] sm:$0xf]  ;;  %v3686_v34 = vpop.f32.mrf.mxu0 }
 0x238   :  { %v9398_v46 = vld [vmem:[%s18838_s3 + $0xcb0] sm:$0xf0]  ;;  %v11705_v32 = vld [vmem:[%s18838_s3 + $0x2b4] sm:$0xf0] }
 0x239   :  { %v12084_v47 = vld [vmem:[%s18838_s3 + $0xe94] sm:$0xf]  ;;  %v9401_v63 = vor.u32 %v12020_v42, %v9398_v46  ;;  %3902 = vmatpush.bf16.msrb.mxu1 %v9113_v57  ;;  %v8220_v42 = vld [vmem:[%s18838_s3 + $0x358] sm:$0xf]  ;;  %v8125_v39 = vor.u32 %v11705_v32, %v8124_v30 }
 0x23a   :  { %v9654_v48 = vld [vmem:[%s18838_s3 + $0xeb0] sm:$0xf0]  ;;  %v11801_v46 = vld [vmem:[%s18838_s3 + $0x5b4] sm:$0xf0]  ;;  %v8221_v52 = vor.u32 %v11729_v44, %v8220_v42 }
 0x23b   :  { %v11876_v58 = vld [vmem:[%s18838_s3 + $0x814] sm:$0xf]  ;;  %v9657_v0 = vor.u32 %v12084_v47, %v9654_v48  ;;  %3914 = vmatpush.bf16.msrb.mxu2 %v9401_v63  ;;  %v8764_v47 = vld [vmem:[%s18838_s3 + $0x798] sm:$0xf] }
 0x23c   :  { %v8822_v59 = vld [vmem:[%s18838_s3 + $0x830] sm:$0xf0]  ;;  %v11865_v48 = vld [vmem:[%s18838_s3 + $0x7b4] sm:$0xf0] }
 0x23d   :  { %v11940_v60 = vld [vmem:[%s18838_s3 + $0xa14] sm:$0xf]  ;;  %v8825_v8 = vor.u32 %v11876_v58, %v8822_v59  ;;  %3927 = vmatpush.bf16.msrb.mxu3 %v9657_v0  ;;  %v7932_v57 = vld [vmem:[%s18838_s3 + $0x118] sm:$0xf]  ;;  %v8509_v59 = vor.u32 %v11801_v46, %v8508_v45 }
 0x23e   :  { %v9078_v1 = vld [vmem:[%s18838_s3 + $0xa30] sm:$0xf0]  ;;  %v11657_v58 = vld [vmem:[%s18838_s3 + $0x134] sm:$0xf0] }
 0x23f   :  { %v12012_v5 = vld [vmem:[%s18838_s3 + $0xc54] sm:$0xf]  ;;  %v9081_v10 = vor.u32 %v11940_v60, %v9078_v1  ;;  %3890 = vmatpush.bf16.msrb.mxu0 %v8825_v8  ;;  %v8765_v60 = vor.u32 %v11865_v48, %v8764_v47  ;;  %v8188_v63 = vld [vmem:[%s18838_s3 + $0x318] sm:$0xf]  ;;  %v3710_v48 = vpop.f32.mrf.mxu2 }
 0x240   :  { %v9366_v55 = vld [vmem:[%s18838_s3 + $0xc70] sm:$0xf0]  ;;  %v11721_v0 = vld [vmem:[%s18838_s3 + $0x334] sm:$0xf0] }
 0x241   :  { %v12076_v6 = vld [vmem:[%s18838_s3 + $0xe54] sm:$0xf]  ;;  %v9369_v19 = vor.u32 %v12012_v5, %v9366_v55  ;;  %3903 = vmatpush.bf16.msrb.mxu1 %v9081_v10  ;;  %v8476_v1 = vld [vmem:[%s18838_s3 + $0x558] sm:$0xf]  ;;  %v3685_v55 = vadd.f32 %v3684_v2, %v15096_v61 }
 0x242   :  { %v9622_v7 = vld [vmem:[%s18838_s3 + $0xe70] sm:$0xf0]  ;;  %3891 = vmatmul.bf16.vlgmr.msrb.gmra.mxu0 %v13237_v54  ;;  %v11857_v5 = vld [vmem:[%s18838_s3 + $0x774] sm:$0xf0] }
 0x243   :  { %v9625_v20 = vor.u32 %v12076_v6, %v9622_v7  ;;  %v12004_v26 = vld [vmem:[%s18838_s3 + $0xc14] sm:$0xf]  ;;  %3935 = vmatpush.bf16.msra.mxu0 %v8029_v11  ;;  %3915 = vmatpush.bf16.msrb.mxu2 %v9369_v19  ;;  %v7933_v6 = vor.u32 %v11657_v58, %v7932_v57  ;;  %v8189_v7 = vor.u32 %v11721_v0, %v8188_v63  ;;  %v7900_v8 = vld [vmem:[%s18838_s3 + $0xd8] sm:$0xf] }
 0x244   :  { %v9334_v27 = vld [vmem:[%s18838_s3 + $0xc30] sm:$0xf0]  ;;  %3904 = vmatmul.bf16.vlgmr.msrb.gmra.mxu1 %v13239_v31  ;;  %v11649_v10 = vld [vmem:[%s18838_s3 + $0xf4] sm:$0xf0]  ;;  %v3698_v11 = vadd.f32 %v3697_v3, %v3685_v55  ;;  %v8733_v14 = vor.u32 %v11857_v5, %v8732_v62 }
 0x245   :  { %v12068_v28 = vld [vmem:[%s18838_s3 + $0xe14] sm:$0xf]  ;;  %3948 = vmatpush.bf16.msra.mxu1 %v8285_v13  ;;  %3928 = vmatpush.bf16.msrb.mxu3 %v9625_v20  ;;  %v9337_v36 = vor.u32 %v12004_v26, %v9334_v27  ;;  %v8477_v13 = vor.u32 %v11793_v4, %v8476_v1  ;;  %v8156_v61 = vld [vmem:[%s18838_s3 + $0x2d8] sm:$0xf]  ;;  %v7901_v22 = vor.u32 %v11649_v10, %v7900_v8 }
 0x246   :  { %v9590_v29 = vld [vmem:[%s18838_s3 + $0xe30] sm:$0xf0]  ;;  %v11785_v19 = vld [vmem:[%s18838_s3 + $0x534] sm:$0xf0]  ;;  %v8157_v25 = vor.u32 %v11713_v17, %v8156_v61 }
 0x247   :  { %v9593_v37 = vor.u32 %v12068_v28, %v9590_v29  ;;  %3936 = vmatpush.bf16.msra.mxu0 %v7997_v9  ;;  %3916 = vmatpush.bf16.msrb.mxu2 %v9337_v36  ;;  %v8700_v20 = vld [vmem:[%s18838_s3 + $0x718] sm:$0xf]  ;;  %v8445_v28 = vor.u32 %v11785_v19, %v8444_v18  ;;  %v3699_v9 = vpop.f32.mrf.mxu1 }
 0x248   :  { %v7868_v26 = vld [vmem:[%s18838_s3 + $0x98] sm:$0xf]  ;;  %v8701_v29 = vor.u32 %v11849_v21, %v8700_v20 }
 0x249   :  { %3949 = vmatpush.bf16.msra.mxu1 %v8253_v35  ;;  %3929 = vmatpush.bf16.msrb.mxu3 %v9593_v37  ;;  %v11641_v27 = vld [vmem:[%s18838_s3 + $0xb4] sm:$0xf0] }
 0x24a   :  { %3917 = vmatmul.bf16.vlgmr.msrb.gmra.mxu2 %v13282_v23  ;;  %v8412_v33 = vld [vmem:[%s18838_s3 + $0x4d8] sm:$0xf]  ;;  %v7869_v38 = vor.u32 %v11641_v27, %v7868_v26  ;;  %v3712_v27 = vpop.f32.mrf.mxu2 }
 0x24b   :  { %3961 = vmatpush.bf16.msra.mxu2 %v8541_v40  ;;  %3937 = vmatpush.bf16.msra.mxu0 %v7965_v12  ;;  %v11777_v35 = vld [vmem:[%s18838_s3 + $0x4f4] sm:$0xf0]  ;;  %v3723_v12 = vpop.f32.mrf.mxu3 }
 0x24c   :  { %3930 = vmatmul.bf16.vlgmr.msrb.gmra.mxu3 %v13284_v24  ;;  %v8668_v36 = vld [vmem:[%s18838_s3 + $0x6d8] sm:$0xf]  ;;  %v8413_v42 = vor.u32 %v11777_v35, %v8412_v33 }
 0x24d   :  { %3974 = vmatpush.bf16.msra.mxu3 %v8797_v41  ;;  %3950 = vmatpush.bf16.msra.mxu1 %v8221_v52  ;;  %v11841_v37 = vld [vmem:[%s18838_s3 + $0x6f4] sm:$0xf0] }
 0x24e   :  { %v7836_v40 = vld [vmem:[%s18838_s3 + $0x58] sm:$0xf]  ;;  %v8669_v44 = vor.u32 %v11841_v37, %v8668_v36 }
 0x24f   :  { %3962 = vmatpush.bf16.msra.mxu2 %v8509_v59  ;;  %3938 = vmatpush.bf16.msra.mxu0 %v7933_v6  ;;  %v11633_v41 = vld [vmem:[%s18838_s3 + $0x74] sm:$0xf0]  ;;  %v3711_v59 = vadd.f32 %v3710_v48, %v3698_v11 }
 0x250   :  { %v8092_v45 = vld [vmem:[%s18838_s3 + $0x258] sm:$0xf] }
 0x251   :  { %3975 = vmatpush.bf16.msra.mxu3 %v8765_v60  ;;  %3951 = vmatpush.bf16.msra.mxu1 %v8189_v7  ;;  %v11697_v46 = vld [vmem:[%s18838_s3 + $0x274] sm:$0xf0]  ;;  %v7837_v60 = vor.u32 %v11633_v41, %v7836_v40  ;;  %v15295_v3 = vadd.f32 %v3723_v12, %v3711_v59  ;;  %v739_v59 = vperm.slane %v14986_v43, 4 }
 0x252   :  { %v8380_v47 = vld [vmem:[%s18838_s3 + $0x498] sm:$0xf]  ;;  %v8093_v63 = vor.u32 %v11697_v46, %v8092_v45 }
 0x253   :  { %3963 = vmatpush.bf16.msra.mxu2 %v8477_v13  ;;  %3939 = vmatpush.bf16.msra.mxu0 %v7901_v22  ;;  %v11769_v52 = vld [vmem:[%s18838_s3 + $0x4b4] sm:$0xf0] }
 0x254   :  { %v8636_v57 = vld [vmem:[%s18838_s3 + $0x698] sm:$0xf]  ;;  %v8381_v4 = vor.u32 %v11769_v52, %v8380_v47 }
 0x255   :  { %3976 = vmatpush.bf16.msra.mxu3 %v8733_v14  ;;  %3952 = vmatpush.bf16.msra.mxu1 %v8157_v25  ;;  %v11833_v58 = vld [vmem:[%s18838_s3 + $0x6b4] sm:$0xf0] }
 0x256   :  { %v7804_v0 = vld [vmem:[%s18838_s3 + $0x18] sm:$0xf]  ;;  %v8637_v62 = vor.u32 %v11833_v58, %v8636_v57 }
 0x257   :  { %3964 = vmatpush.bf16.msra.mxu2 %v8445_v28  ;;  %3940 = vmatpush.bf16.msra.mxu0 %v7869_v38  ;;  %v11625_v1 = vld [vmem:[%s18838_s3 + $0x34] sm:$0xf0]  ;;  %v3725_v28 = vpop.f32.mrf.mxu3 }
 0x258   :  { %v8060_v2 = vld [vmem:[%s18838_s3 + $0x218] sm:$0xf]  ;;  %v7805_v61 = vor.u32 %v11625_v1, %v7804_v0 }
 0x259   :  { %3977 = vmatpush.bf16.msra.mxu3 %v8701_v29  ;;  %3953 = vmatpush.bf16.msra.mxu1 %v8125_v39  ;;  %v11689_v5 = vld [vmem:[%s18838_s3 + $0x234] sm:$0xf0] }
 0x25a   :  { %v9052_v55 = vld [vmem:[%s18838_s3 + $0x9d8] sm:$0xf]  ;;  %v8061_v17 = vor.u32 %v11689_v5, %v8060_v2 }
 0x25b   :  { %3965 = vmatpush.bf16.msra.mxu2 %v8413_v42  ;;  %v11937_v6 = vld [vmem:[%s18838_s3 + $0x9f4] sm:$0xf0]  ;;  %3941 = vmatpush.bf16.msra.mxu0 %v7837_v60 }
 0x25c   :  { %v9308_v7 = vld [vmem:[%s18838_s3 + $0xbd8] sm:$0xf]  ;;  %v9053_v18 = vor.u32 %v11937_v6, %v9052_v55  ;;  %v3736_v55 = vpop.f32.mrf.mxu0  ;;  %v3749_v6 = vpop.f32.mrf.mxu1 }
 0x25d   :  { %3978 = vmatpush.bf16.msra.mxu3 %v8669_v44  ;;  %v12001_v8 = vld [vmem:[%s18838_s3 + $0xbf4] sm:$0xf0]  ;;  %3954 = vmatpush.bf16.msra.mxu1 %v8093_v63 }
 0x25e   :  { %v8348_v10 = vld [vmem:[%s18838_s3 + $0x458] sm:$0xf]  ;;  %v9309_v19 = vor.u32 %v12001_v8, %v9308_v7 }
 0x25f   :  { %v11761_v11 = vld [vmem:[%s18838_s3 + $0x474] sm:$0xf0]  ;;  %3966 = vmatpush.bf16.msra.mxu2 %v8381_v4  ;;  %3942 = vmatpush.bf16.msra.mxu0 %v7805_v61 }
 0x260   :  { %v8604_v13 = vld [vmem:[%s18838_s3 + $0x658] sm:$0xf]  ;;  %v8349_v25 = vor.u32 %v11761_v11, %v8348_v10  ;;  %v3737_v11 = vadd.f32 %v3736_v55, %v739_v59  ;;  %v3762_v59 = vpop.f32.mrf.mxu2 }
 0x261   :  { %v11825_v14 = vld [vmem:[%s18838_s3 + $0x674] sm:$0xf0]  ;;  %3979 = vmatpush.bf16.msra.mxu3 %v8637_v62  ;;  %3955 = vmatpush.bf16.msra.mxu1 %v8061_v17 }
 0x262   :  { %v9020_v20 = vld [vmem:[%s18838_s3 + $0x998] sm:$0xf]  ;;  %v8605_v26 = vor.u32 %v11825_v14, %v8604_v13  ;;  %3943 = vmatmul.bf16.vlgmr.msra.gmra.mxu0 %v13131_v49 }
 0x263   :  { %v11929_v21 = vld [vmem:[%s18838_s3 + $0x9b4] sm:$0xf0]  ;;  %3987 = vmatpush.bf16.msrb.mxu0 %v9053_v18  ;;  %3967 = vmatpush.bf16.msra.mxu2 %v8349_v25  ;;  %v3750_v18 = vadd.f32 %v3749_v6, %v3737_v11  ;;  %v11677_v11 = vld [vmem:[%s18838_s3 + $0x1dc] sm:$0xf] }
 0x264   :  { %v9276_v22 = vld [vmem:[%s18838_s3 + $0xb98] sm:$0xf]  ;;  %v9021_v38 = vor.u32 %v11929_v21, %v9020_v20  ;;  %3956 = vmatmul.bf16.vlgmr.msra.gmra.mxu1 %v13133_v50 }
 0x265   :  { %v11993_v29 = vld [vmem:[%s18838_s3 + $0xbb4] sm:$0xf0]  ;;  %4000 = vmatpush.bf16.msrb.mxu1 %v9309_v19  ;;  %3980 = vmatpush.bf16.msra.mxu3 %v8605_v26 }
 0x266   :  { %v8316_v30 = vld [vmem:[%s18838_s3 + $0x418] sm:$0xf]  ;;  %v9277_v39 = vor.u32 %v11993_v29, %v9276_v22 }
 0x267   :  { %v11753_v32 = vld [vmem:[%s18838_s3 + $0x434] sm:$0xf0]  ;;  %3988 = vmatpush.bf16.msrb.mxu0 %v9021_v38  ;;  %v3738_v38 = vpop.f32.mrf.mxu0 }
 0x268   :  { %v8572_v33 = vld [vmem:[%s18838_s3 + $0x618] sm:$0xf]  ;;  %v8317_v40 = vor.u32 %v11753_v32, %v8316_v30 }
 0x269   :  { %v11817_v34 = vld [vmem:[%s18838_s3 + $0x634] sm:$0xf0]  ;;  %4001 = vmatpush.bf16.msrb.mxu1 %v9277_v39  ;;  %v3751_v39 = vpop.f32.mrf.mxu1 }
 0x26a   :  { %v9564_v9 = vld [vmem:[%s18838_s3 + $0xdd8] sm:$0xf]  ;;  %v8573_v41 = vor.u32 %v11817_v34, %v8572_v33  ;;  %3968 = vmatpush.bf16.msra.mxu2 %v8317_v40  ;;  %v11805_v39 = vld [vmem:[%s18838_s3 + $0x5dc] sm:$0xf] }
 0x26b   :  { %v12065_v35 = vld [vmem:[%s18838_s3 + $0xdf4] sm:$0xf0] }
 0x26c   :  { %v9820_v36 = vld [vmem:[%s18838_s3 + $0xfd8] sm:$0xf]  ;;  %v9565_v45 = vor.u32 %v12065_v35, %v9564_v9  ;;  %3981 = vmatpush.bf16.msra.mxu3 %v8573_v41 }
 0x26d   :  { %v12129_v37 = vld [vmem:[%s18838_s3 + $0xff4] sm:$0xf0]  ;;  %3969 = vmatmul.bf16.vlgmr.msra.gmra.mxu2 %v13175_v15 }
 0x26e   :  { %v8988_v42 = vld [vmem:[%s18838_s3 + $0x958] sm:$0xf]  ;;  %v9821_v46 = vor.u32 %v12129_v37, %v9820_v36  ;;  %4013 = vmatpush.bf16.msrb.mxu2 %v9565_v45 }
 0x26f   :  { %v11921_v44 = vld [vmem:[%s18838_s3 + $0x974] sm:$0xf0]  ;;  %3982 = vmatmul.bf16.vlgmr.msra.gmra.mxu3 %v13177_v16 }
 0x270   :  { %v9244_v47 = vld [vmem:[%s18838_s3 + $0xb58] sm:$0xf]  ;;  %v8989_v60 = vor.u32 %v11921_v44, %v8988_v42  ;;  %4026 = vmatpush.bf16.msrb.mxu3 %v9821_v46 }
 0x271   :  { %v11985_v48 = vld [vmem:[%s18838_s3 + $0xb74] sm:$0xf0] }
 0x272   :  { %v9532_v12 = vld [vmem:[%s18838_s3 + $0xd98] sm:$0xf]  ;;  %v9245_v63 = vor.u32 %v11985_v48, %v9244_v47  ;;  %3989 = vmatpush.bf16.msrb.mxu0 %v8989_v60  ;;  %v3775_v60 = vpop.f32.mrf.mxu3 }
 0x273   :  { %v12057_v52 = vld [vmem:[%s18838_s3 + $0xdb4] sm:$0xf0] }
 0x274   :  { %v9788_v57 = vld [vmem:[%s18838_s3 + $0xf98] sm:$0xf]  ;;  %v9533_v2 = vor.u32 %v12057_v52, %v9532_v12  ;;  %4002 = vmatpush.bf16.msrb.mxu1 %v9245_v63 }
 0x275   :  { %v12121_v58 = vld [vmem:[%s18838_s3 + $0xfb4] sm:$0xf0] }
 0x276   :  { %v8956_v0 = vld [vmem:[%s18838_s3 + $0x918] sm:$0xf]  ;;  %v9789_v4 = vor.u32 %v12121_v58, %v9788_v57  ;;  %4014 = vmatpush.bf16.msrb.mxu2 %v9533_v2  ;;  %v3763_v2 = vadd.f32 %v3762_v59, %v3750_v18  ;;  %v8222_v59 = vld [vmem:[%s18838_s3 + $0x378] sm:$0xf0] }
 0x277   :  { %v11913_v1 = vld [vmem:[%s18838_s3 + $0x934] sm:$0xf0] }
 0x278   :  { %v9212_v43 = vld [vmem:[%s18838_s3 + $0xb18] sm:$0xf]  ;;  %v8957_v13 = vor.u32 %v11913_v1, %v8956_v0  ;;  %4027 = vmatpush.bf16.msrb.mxu3 %v9789_v4  ;;  %v15494_v6 = vadd.f32 %v3775_v60, %v3763_v2  ;;  %v11797_v60 = vld [vmem:[%s18838_s3 + $0x59c] sm:$0xf] }
 0x279   :  { %v11977_v62 = vld [vmem:[%s18838_s3 + $0xb34] sm:$0xf0] }
 0x27a   :  { %v9500_v5 = vld [vmem:[%s18838_s3 + $0xd58] sm:$0xf]  ;;  %v9213_v14 = vor.u32 %v11977_v62, %v9212_v43  ;;  %3990 = vmatpush.bf16.msrb.mxu0 %v8957_v13  ;;  %v8030_v13 = vld [vmem:[%s18838_s3 + $0x1f8] sm:$0xf0] }
 0x27b   :  { %v12049_v7 = vld [vmem:[%s18838_s3 + $0xd74] sm:$0xf0] }
 0x27c   :  { %v9756_v8 = vld [vmem:[%s18838_s3 + $0xf58] sm:$0xf]  ;;  %v9501_v19 = vor.u32 %v12049_v7, %v9500_v5  ;;  %4003 = vmatpush.bf16.msrb.mxu1 %v9213_v14  ;;  %v11741_v14 = vld [vmem:[%s18838_s3 + $0x3dc] sm:$0xf] }
 0x27d   :  { %v12113_v10 = vld [vmem:[%s18838_s3 + $0xf74] sm:$0xf0] }
 0x27e   :  { %v8924_v61 = vld [vmem:[%s18838_s3 + $0x8d8] sm:$0xf]  ;;  %v9757_v20 = vor.u32 %v12113_v10, %v9756_v8  ;;  %4015 = vmatpush.bf16.msrb.mxu2 %v9501_v19 }
 0x27f   :  { %v11905_v17 = vld [vmem:[%s18838_s3 + $0x8f4] sm:$0xf0] }
 0x280   :  { %v9180_v21 = vld [vmem:[%s18838_s3 + $0xad8] sm:$0xf]  ;;  %v8925_v29 = vor.u32 %v11905_v17, %v8924_v61  ;;  %4028 = vmatpush.bf16.msrb.mxu3 %v9757_v20  ;;  %v8286_v61 = vld [vmem:[%s18838_s3 + $0x3f8] sm:$0xf0] }
 0x281   :  { %v11969_v22 = vld [vmem:[%s18838_s3 + $0xaf4] sm:$0xf0] }
 0x282   :  { %v9468_v25 = vld [vmem:[%s18838_s3 + $0xd18] sm:$0xf]  ;;  %v9181_v30 = vor.u32 %v11969_v22, %v9180_v21  ;;  %3991 = vmatpush.bf16.msrb.mxu0 %v8925_v29  ;;  %v11733_v29 = vld [vmem:[%s18838_s3 + $0x39c] sm:$0xf] }
 0x283   :  { %v12041_v26 = vld [vmem:[%s18838_s3 + $0xd34] sm:$0xf0] }
 0x284   :  { %v9724_v27 = vld [vmem:[%s18838_s3 + $0xf18] sm:$0xf]  ;;  %v9469_v34 = vor.u32 %v12041_v26, %v9468_v25  ;;  %4004 = vmatpush.bf16.msrb.mxu1 %v9181_v30  ;;  %v8033_v25 = vor.u32 %v11677_v11, %v8030_v13  ;;  %v8289_v26 = vor.u32 %v11741_v14, %v8286_v61  ;;  %v3788_v11 = vpop.f32.mrf.mxu0  ;;  %v3801_v13 = vpop.f32.mrf.mxu1  ;;  %v8478_v14 = vld [vmem:[%s18838_s3 + $0x578] sm:$0xf0] }
 0x285   :  { %v12105_v28 = vld [vmem:[%s18838_s3 + $0xf34] sm:$0xf0]  ;;  %v11853_v61 = vld [vmem:[%s18838_s3 + $0x75c] sm:$0xf] }
 0x286   :  { %v8892_v32 = vld [vmem:[%s18838_s3 + $0x898] sm:$0xf]  ;;  %v9725_v9 = vor.u32 %v12105_v28, %v9724_v27  ;;  %4016 = vmatpush.bf16.msrb.mxu2 %v9469_v34  ;;  %v11669_v27 = vld [vmem:[%s18838_s3 + $0x19c] sm:$0xf]  ;;  %v3777_v34 = vpop.f32.mrf.mxu3 }
 0x287   :  { %v11897_v33 = vld [vmem:[%s18838_s3 + $0x8b4] sm:$0xf0]  ;;  %v7998_v28 = vld [vmem:[%s18838_s3 + $0x1b8] sm:$0xf0] }
 0x288   :  { %v9148_v35 = vld [vmem:[%s18838_s3 + $0xa98] sm:$0xf]  ;;  %v8893_v44 = vor.u32 %v11897_v33, %v8892_v32  ;;  %4029 = vmatpush.bf16.msrb.mxu3 %v9725_v9  ;;  %v3764_v33 = vpop.f32.mrf.mxu2  ;;  %v8254_v9 = vld [vmem:[%s18838_s3 + $0x3b8] sm:$0xf0] }
 0x289   :  { %v11961_v36 = vld [vmem:[%s18838_s3 + $0xab4] sm:$0xf0]  ;;  %v8702_v33 = vld [vmem:[%s18838_s3 + $0x738] sm:$0xf0] }
 0x28a   :  { %v9436_v37 = vld [vmem:[%s18838_s3 + $0xcd8] sm:$0xf]  ;;  %v9149_v45 = vor.u32 %v11961_v36, %v9148_v35  ;;  %3992 = vmatpush.bf16.msrb.mxu0 %v8893_v44  ;;  %v8001_v44 = vor.u32 %v11669_v27, %v7998_v28  ;;  %v8158_v28 = vld [vmem:[%s18838_s3 + $0x2f8] sm:$0xf0] }
 0x28b   :  { %v12033_v40 = vld [vmem:[%s18838_s3 + $0xcf4] sm:$0xf0] }
 0x28c   :  { %v9692_v41 = vld [vmem:[%s18838_s3 + $0xed8] sm:$0xf]  ;;  %v9437_v48 = vor.u32 %v12033_v40, %v9436_v37  ;;  %4005 = vmatpush.bf16.msrb.mxu1 %v9149_v45  ;;  %v8542_v40 = vld [vmem:[%s18838_s3 + $0x5f8] sm:$0xf0]  ;;  %v8257_v45 = vor.u32 %v11733_v29, %v8254_v9 }
 0x28d   :  { %v12097_v42 = vld [vmem:[%s18838_s3 + $0xef4] sm:$0xf0]  ;;  %v11781_v29 = vld [vmem:[%s18838_s3 + $0x51c] sm:$0xf] }
 0x28e   :  { %v8860_v46 = vld [vmem:[%s18838_s3 + $0x858] sm:$0xf]  ;;  %v9693_v12 = vor.u32 %v12097_v42, %v9692_v41  ;;  %4017 = vmatpush.bf16.msrb.mxu2 %v9437_v48  ;;  %v11869_v41 = vld [vmem:[%s18838_s3 + $0x7dc] sm:$0xf] }
 0x28f   :  { %v11889_v47 = vld [vmem:[%s18838_s3 + $0x874] sm:$0xf0]  ;;  %v8798_v42 = vld [vmem:[%s18838_s3 + $0x7f8] sm:$0xf0] }
 0x290   :  { %v9116_v52 = vld [vmem:[%s18838_s3 + $0xa58] sm:$0xf]  ;;  %v8861_v4 = vor.u32 %v11889_v47, %v8860_v46  ;;  %4030 = vmatpush.bf16.msrb.mxu3 %v9693_v12  ;;  %v11661_v48 = vld [vmem:[%s18838_s3 + $0x15c] sm:$0xf] }
 0x291   :  { %v11953_v57 = vld [vmem:[%s18838_s3 + $0xa74] sm:$0xf0]  ;;  %v7966_v12 = vld [vmem:[%s18838_s3 + $0x178] sm:$0xf0] }
 0x292   :  { %v9404_v58 = vld [vmem:[%s18838_s3 + $0xc98] sm:$0xf]  ;;  %v9117_v43 = vor.u32 %v11953_v57, %v9116_v52  ;;  %3993 = vmatpush.bf16.msrb.mxu0 %v8861_v4  ;;  %v8545_v52 = vor.u32 %v11805_v39, %v8542_v40  ;;  %v8801_v57 = vor.u32 %v11869_v41, %v8798_v42  ;;  %v7969_v2 = vor.u32 %v11661_v48, %v7966_v12  ;;  %v11701_v39 = vld [vmem:[%s18838_s3 + $0x29c] sm:$0xf]  ;;  %v3790_v42 = vpop.f32.mrf.mxu0 }
 0x293   :  { %v12025_v63 = vld [vmem:[%s18838_s3 + $0xcb4] sm:$0xf0]  ;;  %v8126_v40 = vld [vmem:[%s18838_s3 + $0x2b8] sm:$0xf0] }
 0x294   :  { %v9660_v0 = vld [vmem:[%s18838_s3 + $0xe98] sm:$0xf]  ;;  %v9405_v7 = vor.u32 %v12025_v63, %v9404_v58  ;;  %4006 = vmatpush.bf16.msrb.mxu1 %v9117_v43  ;;  %v11725_v58 = vld [vmem:[%s18838_s3 + $0x35c] sm:$0xf]  ;;  %v8129_v12 = vor.u32 %v11701_v39, %v8126_v40 }
 0x295   :  { %v12089_v1 = vld [vmem:[%s18838_s3 + $0xeb4] sm:$0xf0]  ;;  %v8510_v63 = vld [vmem:[%s18838_s3 + $0x5b8] sm:$0xf0]  ;;  %v8225_v4 = vor.u32 %v11725_v58, %v8222_v59 }
 0x296   :  { %v8828_v62 = vld [vmem:[%s18838_s3 + $0x818] sm:$0xf]  ;;  %v9661_v8 = vor.u32 %v12089_v1, %v9660_v0  ;;  %4018 = vmatpush.bf16.msrb.mxu2 %v9405_v7  ;;  %v11861_v0 = vld [vmem:[%s18838_s3 + $0x79c] sm:$0xf] }
 0x297   :  { %v11881_v5 = vld [vmem:[%s18838_s3 + $0x834] sm:$0xf0]  ;;  %v8766_v1 = vld [vmem:[%s18838_s3 + $0x7b8] sm:$0xf0] }
 0x298   :  { %v9084_v55 = vld [vmem:[%s18838_s3 + $0xa18] sm:$0xf]  ;;  %v8829_v21 = vor.u32 %v11881_v5, %v8828_v62  ;;  %4031 = vmatpush.bf16.msrb.mxu3 %v9661_v8  ;;  %v11653_v43 = vld [vmem:[%s18838_s3 + $0x11c] sm:$0xf]  ;;  %v8513_v5 = vor.u32 %v11797_v60, %v8510_v63 }
 0x299   :  { %v11945_v10 = vld [vmem:[%s18838_s3 + $0xa34] sm:$0xf0]  ;;  %v7934_v62 = vld [vmem:[%s18838_s3 + $0x138] sm:$0xf0] }
 0x29a   :  { %v9372_v17 = vld [vmem:[%s18838_s3 + $0xc58] sm:$0xf]  ;;  %v9085_v22 = vor.u32 %v11945_v10, %v9084_v55  ;;  %3994 = vmatpush.bf16.msrb.mxu0 %v8829_v21  ;;  %v8769_v55 = vor.u32 %v11861_v0, %v8766_v1  ;;  %v11717_v7 = vld [vmem:[%s18838_s3 + $0x31c] sm:$0xf]  ;;  %v3814_v1 = vpop.f32.mrf.mxu2 }
 0x29b   :  { %v12017_v18 = vld [vmem:[%s18838_s3 + $0xc74] sm:$0xf0]  ;;  %v8190_v8 = vld [vmem:[%s18838_s3 + $0x338] sm:$0xf0] }
 0x29c   :  { %v9628_v19 = vld [vmem:[%s18838_s3 + $0xe58] sm:$0xf]  ;;  %v9373_v30 = vor.u32 %v12017_v18, %v9372_v17  ;;  %4007 = vmatpush.bf16.msrb.mxu1 %v9085_v22  ;;  %v11789_v10 = vld [vmem:[%s18838_s3 + $0x55c] sm:$0xf]  ;;  %v3789_v18 = vadd.f32 %v3788_v11, %v15494_v6 }
 0x29d   :  { %v12081_v20 = vld [vmem:[%s18838_s3 + $0xe74] sm:$0xf0]  ;;  %3995 = vmatmul.bf16.vlgmr.msrb.gmra.mxu0 %v13237_v54  ;;  %v8734_v17 = vld [vmem:[%s18838_s3 + $0x778] sm:$0xf0] }
 0x29e   :  { %v9629_v32 = vor.u32 %v12081_v20, %v9628_v19  ;;  %v9340_v35 = vld [vmem:[%s18838_s3 + $0xc18] sm:$0xf]  ;;  %4039 = vmatpush.bf16.msra.mxu0 %v8033_v25  ;;  %4019 = vmatpush.bf16.msrb.mxu2 %v9373_v30  ;;  %v7937_v19 = vor.u32 %v11653_v43, %v7934_v62  ;;  %v8193_v20 = vor.u32 %v11717_v7, %v8190_v8  ;;  %v11645_v21 = vld [vmem:[%s18838_s3 + $0xdc] sm:$0xf] }
 0x29f   :  { %v12009_v36 = vld [vmem:[%s18838_s3 + $0xc34] sm:$0xf0]  ;;  %4008 = vmatmul.bf16.vlgmr.msrb.gmra.mxu1 %v13239_v31  ;;  %v7902_v22 = vld [vmem:[%s18838_s3 + $0xf8] sm:$0xf0]  ;;  %v3802_v25 = vadd.f32 %v3801_v13, %v3789_v18  ;;  %v8737_v27 = vor.u32 %v11853_v61, %v8734_v17 }
 0x2a0   :  { %v9596_v37 = vld [vmem:[%s18838_s3 + $0xe18] sm:$0xf]  ;;  %4052 = vmatpush.bf16.msra.mxu1 %v8289_v26  ;;  %4032 = vmatpush.bf16.msrb.mxu3 %v9629_v32  ;;  %v9341_v46 = vor.u32 %v12009_v36, %v9340_v35  ;;  %v8481_v26 = vor.u32 %v11789_v10, %v8478_v14  ;;  %v11709_v6 = vld [vmem:[%s18838_s3 + $0x2dc] sm:$0xf]  ;;  %v7905_v34 = vor.u32 %v11645_v21, %v7902_v22 }
 0x2a1   :  { %v12073_v38 = vld [vmem:[%s18838_s3 + $0xe34] sm:$0xf0]  ;;  %v8446_v30 = vld [vmem:[%s18838_s3 + $0x538] sm:$0xf0]  ;;  %v8161_v9 = vor.u32 %v11709_v6, %v8158_v28 }
 0x2a2   :  { %v9597_v47 = vor.u32 %v12073_v38, %v9596_v37  ;;  %4040 = vmatpush.bf16.msra.mxu0 %v8001_v44  ;;  %4020 = vmatpush.bf16.msrb.mxu2 %v9341_v46  ;;  %v11845_v32 = vld [vmem:[%s18838_s3 + $0x71c] sm:$0xf]  ;;  %v8449_v37 = vor.u32 %v11781_v29, %v8446_v30  ;;  %v3803_v44 = vpop.f32.mrf.mxu1 }
 0x2a3   :  { %v11637_v35 = vld [vmem:[%s18838_s3 + $0x9c] sm:$0xf]  ;;  %v8705_v38 = vor.u32 %v11845_v32, %v8702_v33 }
 0x2a4   :  { %4053 = vmatpush.bf16.msra.mxu1 %v8257_v45  ;;  %4033 = vmatpush.bf16.msrb.mxu3 %v9597_v47  ;;  %v7870_v36 = vld [vmem:[%s18838_s3 + $0xb8] sm:$0xf0] }
 0x2a5   :  { %4021 = vmatmul.bf16.vlgmr.msrb.gmra.mxu2 %v13282_v23  ;;  %v11773_v41 = vld [vmem:[%s18838_s3 + $0x4dc] sm:$0xf]  ;;  %v7873_v48 = vor.u32 %v11637_v35, %v7870_v36  ;;  %v3816_v36 = vpop.f32.mrf.mxu2 }
 0x2a6   :  { %4065 = vmatpush.bf16.msra.mxu2 %v8545_v52  ;;  %4041 = vmatpush.bf16.msra.mxu0 %v7969_v2  ;;  %v8414_v45 = vld [vmem:[%s18838_s3 + $0x4f8] sm:$0xf0]  ;;  %v3827_v2 = vpop.f32.mrf.mxu3 }
 0x2a7   :  { %4034 = vmatmul.bf16.vlgmr.msrb.gmra.mxu3 %v13284_v24  ;;  %v11837_v46 = vld [vmem:[%s18838_s3 + $0x6dc] sm:$0xf]  ;;  %v8417_v58 = vor.u32 %v11773_v41, %v8414_v45 }
 0x2a8   :  { %4078 = vmatpush.bf16.msra.mxu3 %v8801_v57  ;;  %4054 = vmatpush.bf16.msra.mxu1 %v8225_v4  ;;  %v8670_v47 = vld [vmem:[%s18838_s3 + $0x6f8] sm:$0xf0] }
 0x2a9   :  { %v11629_v52 = vld [vmem:[%s18838_s3 + $0x5c] sm:$0xf]  ;;  %v8673_v59 = vor.u32 %v11837_v46, %v8670_v47 }
 0x2aa   :  { %4066 = vmatpush.bf16.msra.mxu2 %v8513_v5  ;;  %4042 = vmatpush.bf16.msra.mxu0 %v7937_v19  ;;  %v7838_v57 = vld [vmem:[%s18838_s3 + $0x78] sm:$0xf0]  ;;  %v3815_v5 = vadd.f32 %v3814_v1, %v3802_v25 }
 0x2ab   :  { %v11693_v60 = vld [vmem:[%s18838_s3 + $0x25c] sm:$0xf] }
 0x2ac   :  { %4079 = vmatpush.bf16.msra.mxu3 %v8769_v55  ;;  %4055 = vmatpush.bf16.msra.mxu1 %v8193_v20  ;;  %v8094_v63 = vld [vmem:[%s18838_s3 + $0x278] sm:$0xf0]  ;;  %v7841_v55 = vor.u32 %v11629_v52, %v7838_v57  ;;  %v15693_v13 = vadd.f32 %v3827_v2, %v3815_v5 }
 0x2ad   :  { %v11765_v0 = vld [vmem:[%s18838_s3 + $0x49c] sm:$0xf]  ;;  %v8097_v7 = vor.u32 %v11693_v60, %v8094_v63 }
 0x2ae   :  { %4067 = vmatpush.bf16.msra.mxu2 %v8481_v26  ;;  %4043 = vmatpush.bf16.msra.mxu0 %v7905_v34  ;;  %v8382_v4 = vld [vmem:[%s18838_s3 + $0x4b8] sm:$0xf0] }
 0x2af   :  { %v11829_v43 = vld [vmem:[%s18838_s3 + $0x69c] sm:$0xf]  ;;  %v8385_v14 = vor.u32 %v11765_v0, %v8382_v4 }
 0x2b0   :  { %4080 = vmatpush.bf16.msra.mxu3 %v8737_v27  ;;  %4056 = vmatpush.bf16.msra.mxu1 %v8161_v9  ;;  %v8638_v62 = vld [vmem:[%s18838_s3 + $0x6b8] sm:$0xf0] }
 0x2b1   :  { %v11621_v8 = vld [vmem:[%s18838_s3 + $0x1c] sm:$0xf]  ;;  %v8641_v61 = vor.u32 %v11829_v43, %v8638_v62  ;;  %v15787_v43 = vld [vmem:[%s18839_s4] sm:$0xff] }
 0x2b2   :  { %4068 = vmatpush.bf16.msra.mxu2 %v8449_v37  ;;  %4044 = vmatpush.bf16.msra.mxu0 %v7873_v48  ;;  %v7806_v10 = vld [vmem:[%s18838_s3 + $0x38] sm:$0xf0]  ;;  %v3829_v37 = vpop.f32.mrf.mxu3  ;;  %v740_v62 = vperm.slane %v15787_v43, 5 }
 0x2b3   :  { %v11685_v11 = vld [vmem:[%s18838_s3 + $0x21c] sm:$0xf]  ;;  %v7809_v6 = vor.u32 %v11621_v8, %v7806_v10 }
 0x2b4   :  { %4081 = vmatpush.bf16.msra.mxu3 %v8705_v38  ;;  %4057 = vmatpush.bf16.msra.mxu1 %v8129_v12  ;;  %v8062_v17 = vld [vmem:[%s18838_s3 + $0x238] sm:$0xf0] }
 0x2b5   :  { %v11933_v18 = vld [vmem:[%s18838_s3 + $0x9dc] sm:$0xf]  ;;  %v8065_v28 = vor.u32 %v11685_v11, %v8062_v17 }
 0x2b6   :  { %4069 = vmatpush.bf16.msra.mxu2 %v8417_v58  ;;  %v9054_v19 = vld [vmem:[%s18838_s3 + $0x9f8] sm:$0xf0]  ;;  %4045 = vmatpush.bf16.msra.mxu0 %v7841_v55 }
 0x2b7   :  { %v11997_v20 = vld [vmem:[%s18838_s3 + $0xbdc] sm:$0xf]  ;;  %v9057_v29 = vor.u32 %v11933_v18, %v9054_v19  ;;  %v3840_v18 = vpop.f32.mrf.mxu0  ;;  %v3853_v19 = vpop.f32.mrf.mxu1 }
 0x2b8   :  { %4082 = vmatpush.bf16.msra.mxu3 %v8673_v59  ;;  %v9310_v21 = vld [vmem:[%s18838_s3 + $0xbf8] sm:$0xf0]  ;;  %4058 = vmatpush.bf16.msra.mxu1 %v8097_v7 }
 0x2b9   :  { %v11757_v22 = vld [vmem:[%s18838_s3 + $0x45c] sm:$0xf]  ;;  %v9313_v30 = vor.u32 %v11997_v20, %v9310_v21 }
 0x2ba   :  { %v8350_v25 = vld [vmem:[%s18838_s3 + $0x478] sm:$0xf0]  ;;  %4070 = vmatpush.bf16.msra.mxu2 %v8385_v14  ;;  %4046 = vmatpush.bf16.msra.mxu0 %v7809_v6 }
 0x2bb   :  { %v11821_v26 = vld [vmem:[%s18838_s3 + $0x65c] sm:$0xf]  ;;  %v8353_v9 = vor.u32 %v11757_v22, %v8350_v25  ;;  %v3841_v25 = vadd.f32 %v3840_v18, %v740_v62 }
 0x2bc   :  { %v8606_v27 = vld [vmem:[%s18838_s3 + $0x678] sm:$0xf0]  ;;  %4083 = vmatpush.bf16.msra.mxu3 %v8641_v61  ;;  %4059 = vmatpush.bf16.msra.mxu1 %v8065_v28 }
 0x2bd   :  { %v11925_v32 = vld [vmem:[%s18838_s3 + $0x99c] sm:$0xf]  ;;  %v8609_v35 = vor.u32 %v11821_v26, %v8606_v27  ;;  %4047 = vmatmul.bf16.vlgmr.msra.gmra.mxu0 %v13131_v49 }
 0x2be   :  { %v9022_v33 = vld [vmem:[%s18838_s3 + $0x9b8] sm:$0xf0]  ;;  %4091 = vmatpush.bf16.msrb.mxu0 %v9057_v29  ;;  %4071 = vmatpush.bf16.msra.mxu2 %v8353_v9  ;;  %v15822_v29 = vadd.f32 %v3853_v19, %v3841_v25  ;;  %v10024_v19 = vld [vmem:[%s18840_s5 + $0x188] sm:$0xf] }
 0x2bf   :  { %v11989_v34 = vld [vmem:[%s18838_s3 + $0xb9c] sm:$0xf]  ;;  %v9025_v48 = vor.u32 %v11925_v32, %v9022_v33  ;;  %4060 = vmatmul.bf16.vlgmr.msra.gmra.mxu1 %v13133_v50 }
 0x2c0   :  { %v9278_v38 = vld [vmem:[%s18838_s3 + $0xbb8] sm:$0xf0]  ;;  %4104 = vmatpush.bf16.msrb.mxu1 %v9313_v30  ;;  %4084 = vmatpush.bf16.msra.mxu3 %v8609_v35 }
 0x2c1   :  { %v11749_v39 = vld [vmem:[%s18838_s3 + $0x41c] sm:$0xf]  ;;  %v9281_v12 = vor.u32 %v11989_v34, %v9278_v38 }
 0x2c2   :  { %v8318_v40 = vld [vmem:[%s18838_s3 + $0x438] sm:$0xf0]  ;;  %4092 = vmatpush.bf16.msrb.mxu0 %v9025_v48 }
 0x2c3   :  { %v11813_v41 = vld [vmem:[%s18838_s3 + $0x61c] sm:$0xf]  ;;  %v8321_v52 = vor.u32 %v11749_v39, %v8318_v40 }
 0x2c4   :  { %v8574_v42 = vld [vmem:[%s18838_s3 + $0x638] sm:$0xf0]  ;;  %4105 = vmatpush.bf16.msrb.mxu1 %v9281_v12 }
 0x2c5   :  { %v12061_v44 = vld [vmem:[%s18838_s3 + $0xddc] sm:$0xf]  ;;  %v8577_v57 = vor.u32 %v11813_v41, %v8574_v42  ;;  %4072 = vmatpush.bf16.msra.mxu2 %v8321_v52 }
 0x2c6   :  { %v9566_v45 = vld [vmem:[%s18838_s3 + $0xdf8] sm:$0xf0] }
 0x2c7   :  { %v12125_v46 = vld [vmem:[%s18838_s3 + $0xfdc] sm:$0xf]  ;;  %v9569_v60 = vor.u32 %v12061_v44, %v9566_v45  ;;  %4085 = vmatpush.bf16.msra.mxu3 %v8577_v57 }
 0x2c8   :  { %v9822_v47 = vld [vmem:[%s18838_s3 + $0xff8] sm:$0xf0]  ;;  %4073 = vmatmul.bf16.vlgmr.msra.gmra.mxu2 %v13175_v15 }
 0x2c9   :  { %v11917_v58 = vld [vmem:[%s18838_s3 + $0x95c] sm:$0xf]  ;;  %v9825_v63 = vor.u32 %v12125_v46, %v9822_v47  ;;  %4117 = vmatpush.bf16.msrb.mxu2 %v9569_v60  ;;  %v3842_v46 = vpop.f32.mrf.mxu0  ;;  %v3855_v47 = vpop.f32.mrf.mxu1 }
 0x2ca   :  { %v8990_v59 = vld [vmem:[%s18838_s3 + $0x978] sm:$0xf0]  ;;  %4086 = vmatmul.bf16.vlgmr.msra.gmra.mxu3 %v13177_v16  ;;  %v10696_v46 = vld [vmem:[%s18840_s5 + $0x6c8] sm:$0xf]  ;;  %v12350_v47 = vld [vmem:[%s18840_s5 + $0x6e0] sm:$0xf0] }
 0x2cb   :  { %v11981_v0 = vld [vmem:[%s18838_s3 + $0xb5c] sm:$0xf]  ;;  %v8993_v5 = vor.u32 %v11917_v58, %v8990_v59  ;;  %4130 = vmatpush.bf16.msrb.mxu3 %v9825_v63 }
 0x2cc   :  { %v9246_v1 = vld [vmem:[%s18838_s3 + $0xb78] sm:$0xf0] }
 0x2cd   :  { %v12053_v2 = vld [vmem:[%s18838_s3 + $0xd9c] sm:$0xf]  ;;  %v9249_v55 = vor.u32 %v11981_v0, %v9246_v1  ;;  %4093 = vmatpush.bf16.msrb.mxu0 %v8993_v5 }
 0x2ce   :  { %v9534_v49 = vld [vmem:[%s18838_s3 + $0xdb8] sm:$0xf0] }
 0x2cf   :  { %v12117_v50 = vld [vmem:[%s18838_s3 + $0xf9c] sm:$0xf]  ;;  %v9537_v10 = vor.u32 %v12053_v2, %v9534_v49  ;;  %4106 = vmatpush.bf16.msrb.mxu1 %v9249_v55 }
 0x2d0   :  { %v9790_v4 = vld [vmem:[%s18838_s3 + $0xfb8] sm:$0xf0] }
 0x2d1   :  { %v11909_v7 = vld [vmem:[%s18838_s3 + $0x91c] sm:$0xf]  ;;  %v9793_v11 = vor.u32 %v12117_v50, %v9790_v4  ;;  %4118 = vmatpush.bf16.msrb.mxu2 %v9537_v10  ;;  %v15881_v50 = vpop.f32.mrf.mxu2  ;;  %v15883_v4 = vpop.f32.mrf.mxu3 }
 0x2d2   :  { %v8958_v8 = vld [vmem:[%s18838_s3 + $0x938] sm:$0xf0] }
 0x2d3   :  { %v11973_v14 = vld [vmem:[%s18838_s3 + $0xb1c] sm:$0xf]  ;;  %v8961_v26 = vor.u32 %v11909_v7, %v8958_v8  ;;  %4131 = vmatpush.bf16.msrb.mxu3 %v9793_v11 }
 0x2d4   :  { %v9214_v61 = vld [vmem:[%s18838_s3 + $0xb38] sm:$0xf0] }
 0x2d5   :  { %v12045_v17 = vld [vmem:[%s18838_s3 + $0xd5c] sm:$0xf]  ;;  %v9217_v27 = vor.u32 %v11973_v14, %v9214_v61  ;;  %4094 = vmatpush.bf16.msrb.mxu0 %v8961_v26 }
 0x2d6   :  { %v9502_v20 = vld [vmem:[%s18838_s3 + $0xd78] sm:$0xf0] }
 0x2d7   :  { %v12109_v21 = vld [vmem:[%s18838_s3 + $0xf5c] sm:$0xf]  ;;  %v9505_v15 = vor.u32 %v12045_v17, %v9502_v20  ;;  %4107 = vmatpush.bf16.msrb.mxu1 %v9217_v27  ;;  %v12182_v20 = vld [vmem:[%s18840_s5 + $0x1a0] sm:$0xf0] }
 0x2d8   :  { %v9758_v22 = vld [vmem:[%s18838_s3 + $0xf78] sm:$0xf0] }
 0x2d9   :  { %v11901_v6 = vld [vmem:[%s18838_s3 + $0x8dc] sm:$0xf]  ;;  %v9761_v30 = vor.u32 %v12109_v21, %v9758_v22  ;;  %4119 = vmatpush.bf16.msrb.mxu2 %v9505_v15  ;;  %v10248_v21 = vld [vmem:[%s18840_s5 + $0x348] sm:$0xf]  ;;  %v12238_v22 = vld [vmem:[%s18840_s5 + $0x360] sm:$0xf0] }
 0x2da   :  { %v8926_v28 = vld [vmem:[%s18838_s3 + $0x8f8] sm:$0xf0] }
 0x2db   :  { %v11965_v16 = vld [vmem:[%s18838_s3 + $0xadc] sm:$0xf]  ;;  %v8929_v36 = vor.u32 %v11901_v6, %v8926_v28  ;;  %4132 = vmatpush.bf16.msrb.mxu3 %v9761_v30  ;;  %v10025_v30 = vor.u32 %v12182_v20, %v10024_v19  ;;  %v12280_v19 = vld [vmem:[%s18840_s5 + $0x4b0] sm:$0xf0]  ;;  %v10640_v20 = vld [vmem:[%s18840_s5 + $0x658] sm:$0xf] }
 0x2dc   :  { %v9182_v32 = vld [vmem:[%s18838_s3 + $0xaf8] sm:$0xf0] }
 0x2dd   :  { %v12037_v33 = vld [vmem:[%s18838_s3 + $0xd1c] sm:$0xf]  ;;  %v9185_v37 = vor.u32 %v11965_v16, %v9182_v32  ;;  %4095 = vmatpush.bf16.msrb.mxu0 %v8929_v36  ;;  %v10249_v16 = vor.u32 %v12238_v22, %v10248_v21  ;;  %v9996_v32 = vld [vmem:[%s18840_s5 + $0x150] sm:$0xf]  ;;  %v3868_v36 = vpop.f32.mrf.mxu2  ;;  %v12336_v21 = vld [vmem:[%s18840_s5 + $0x670] sm:$0xf0] }
 0x2de   :  { %v9470_v34 = vld [vmem:[%s18838_s3 + $0xd38] sm:$0xf0] }
 0x2df   :  { %v12101_v9 = vld [vmem:[%s18838_s3 + $0xf1c] sm:$0xf]  ;;  %v9473_v40 = vor.u32 %v12037_v33, %v9470_v34  ;;  %4108 = vmatpush.bf16.msrb.mxu1 %v9185_v37  ;;  %v12175_v33 = vld [vmem:[%s18840_s5 + $0x168] sm:$0xf0]  ;;  %v10220_v34 = vld [vmem:[%s18840_s5 + $0x310] sm:$0xf]  ;;  %v3881_v37 = vpop.f32.mrf.mxu3 }
 0x2e0   :  { %v9726_v35 = vld [vmem:[%s18838_s3 + $0xf38] sm:$0xf0] }
 0x2e1   :  { %v11893_v38 = vld [vmem:[%s18838_s3 + $0x89c] sm:$0xf]  ;;  %v9729_v41 = vor.u32 %v12101_v9, %v9726_v35  ;;  %4120 = vmatpush.bf16.msrb.mxu2 %v9473_v40 }
 0x2e2   :  { %v8894_v39 = vld [vmem:[%s18838_s3 + $0x8b8] sm:$0xf0] }
 0x2e3   :  { %v11957_v42 = vld [vmem:[%s18838_s3 + $0xa9c] sm:$0xf]  ;;  %v8897_v57 = vor.u32 %v11893_v38, %v8894_v39  ;;  %4133 = vmatpush.bf16.msrb.mxu3 %v9729_v41  ;;  %v12231_v38 = vld [vmem:[%s18840_s5 + $0x328] sm:$0xf0] }
 0x2e4   :  { %v9150_v44 = vld [vmem:[%s18838_s3 + $0xab8] sm:$0xf0] }
 0x2e5   :  { %v12029_v45 = vld [vmem:[%s18838_s3 + $0xcdc] sm:$0xf]  ;;  %v9153_v58 = vor.u32 %v11957_v42, %v9150_v44  ;;  %4096 = vmatpush.bf16.msrb.mxu0 %v8897_v57  ;;  %v10472_v44 = vld [vmem:[%s18840_s5 + $0x508] sm:$0xf] }
 0x2e6   :  { %v9438_v48 = vld [vmem:[%s18838_s3 + $0xcf8] sm:$0xf0] }
 0x2e7   :  { %v12093_v12 = vld [vmem:[%s18838_s3 + $0xedc] sm:$0xf]  ;;  %v9441_v63 = vor.u32 %v12029_v45, %v9438_v48  ;;  %4109 = vmatpush.bf16.msrb.mxu1 %v9153_v58  ;;  %v12294_v45 = vld [vmem:[%s18840_s5 + $0x520] sm:$0xf0]  ;;  %v9997_v48 = vor.u32 %v12175_v33, %v9996_v32  ;;  %v9968_v58 = vld [vmem:[%s18840_s5 + $0x118] sm:$0xf] }
 0x2e8   :  { %v9694_v52 = vld [vmem:[%s18838_s3 + $0xef8] sm:$0xf0] }
 0x2e9   :  { %v11885_v59 = vld [vmem:[%s18838_s3 + $0x85c] sm:$0xf]  ;;  %v9697_v0 = vor.u32 %v12093_v12, %v9694_v52  ;;  %4121 = vmatpush.bf16.msrb.mxu2 %v9441_v63  ;;  %v10221_v12 = vor.u32 %v12231_v38, %v10220_v34  ;;  %v10697_v63 = vor.u32 %v12350_v47, %v10696_v46  ;;  %v10108_v38 = vld [vmem:[%s18840_s5 + $0x230] sm:$0xf]  ;;  %v12322_v46 = vld [vmem:[%s18840_s5 + $0x600] sm:$0xf0] }
 0x2ea   :  { %v8862_v60 = vld [vmem:[%s18838_s3 + $0x878] sm:$0xf0] }
 0x2eb   :  { %v11949_v1 = vld [vmem:[%s18838_s3 + $0xa5c] sm:$0xf]  ;;  %v8865_v7 = vor.u32 %v11885_v59, %v8862_v60  ;;  %4134 = vmatpush.bf16.msrb.mxu3 %v9697_v0  ;;  %v12168_v59 = vld [vmem:[%s18840_s5 + $0x130] sm:$0xf0]  ;;  %v10473_v60 = vor.u32 %v12294_v45, %v10472_v44  ;;  %v10192_v0 = vld [vmem:[%s18840_s5 + $0x2d8] sm:$0xf] }
 0x2ec   :  { %v9118_v2 = vld [vmem:[%s18838_s3 + $0xa78] sm:$0xf0]  ;;  %v12266_v44 = vld [vmem:[%s18840_s5 + $0x440] sm:$0xf0]  ;;  %v10584_v45 = vld [vmem:[%s18840_s5 + $0x5e8] sm:$0xf] }
 0x2ed   :  { %v12021_v49 = vld [vmem:[%s18838_s3 + $0xc9c] sm:$0xf]  ;;  %v9121_v8 = vor.u32 %v11949_v1, %v9118_v2  ;;  %4097 = vmatpush.bf16.msrb.mxu0 %v8865_v7  ;;  %v12224_v1 = vld [vmem:[%s18840_s5 + $0x2f0] sm:$0xf0]  ;;  %v10444_v2 = vld [vmem:[%s18840_s5 + $0x4d0] sm:$0xf] }
 0x2ee   :  { %v9406_v62 = vld [vmem:[%s18838_s3 + $0xcb8] sm:$0xf0] }
 0x2ef   :  { %v12085_v5 = vld [vmem:[%s18838_s3 + $0xe9c] sm:$0xf]  ;;  %v9409_v61 = vor.u32 %v12021_v49, %v9406_v62  ;;  %4110 = vmatpush.bf16.msrb.mxu1 %v9121_v8  ;;  %v12343_v49 = vld [vmem:[%s18840_s5 + $0x6a8] sm:$0xf0]  ;;  %v9969_v62 = vor.u32 %v12168_v59, %v9968_v58  ;;  %v10585_v58 = vor.u32 %v12322_v46, %v10584_v45  ;;  %v10080_v59 = vld [vmem:[%s18840_s5 + $0x1f8] sm:$0xf] }
 0x2f0   :  { %v9662_v55 = vld [vmem:[%s18838_s3 + $0xeb8] sm:$0xf0] }
 0x2f1   :  { %v11877_v10 = vld [vmem:[%s18838_s3 + $0x81c] sm:$0xf]  ;;  %v9665_v17 = vor.u32 %v12085_v5, %v9662_v55  ;;  %4122 = vmatpush.bf16.msrb.mxu2 %v9409_v61  ;;  %v10193_v5 = vor.u32 %v12224_v1, %v10192_v0  ;;  %v9940_v55 = vld [vmem:[%s18840_s5 + $0xe0] sm:$0xf]  ;;  %v10416_v61 = vld [vmem:[%s18840_s5 + $0x498] sm:$0xf]  ;;  %v16085_v0 = vpop.f32.mrf.mxu2  ;;  %v16087_v1 = vpop.f32.mrf.mxu3 }
 0x2f2   :  { %v8830_v11 = vld [vmem:[%s18838_s3 + $0x838] sm:$0xf0] }
 0x2f3   :  { %v11941_v14 = vld [vmem:[%s18838_s3 + $0xa1c] sm:$0xf]  ;;  %v8833_v28 = vor.u32 %v11877_v10, %v8830_v11  ;;  %4135 = vmatpush.bf16.msrb.mxu3 %v9665_v17  ;;  %v10164_v11 = vld [vmem:[%s18840_s5 + $0x2a0] sm:$0xf]  ;;  %v16007_v17 = vpop.f32.mrf.mxu0 }
 0x2f4   :  { %v9086_v18 = vld [vmem:[%s18838_s3 + $0xa38] sm:$0xf0] }
 0x2f5   :  { %v12013_v25 = vld [vmem:[%s18838_s3 + $0xc5c] sm:$0xf]  ;;  %v9089_v15 = vor.u32 %v11941_v14, %v9086_v18  ;;  %4098 = vmatpush.bf16.msrb.mxu0 %v8833_v28  ;;  %v16009_v18 = vpop.f32.mrf.mxu1  ;;  %v10641_v28 = vor.u32 %v12336_v21, %v10640_v20  ;;  %v12462_v20 = vld [vmem:[%s18840_s5 + $0xa60] sm:$0xf0]  ;;  %v10304_v21 = vld [vmem:[%s18840_s5 + $0x3b8] sm:$0xf] }
 0x2f6   :  { %v9374_v26 = vld [vmem:[%s18838_s3 + $0xc78] sm:$0xf0] }
 0x2f7   :  { %v12077_v27 = vld [vmem:[%s18838_s3 + $0xe5c] sm:$0xf]  ;;  %v9377_v9 = vor.u32 %v12013_v25, %v9374_v26  ;;  %4111 = vmatpush.bf16.msrb.mxu1 %v9089_v15  ;;  %v9912_v26 = vld [vmem:[%s18840_s5 + $0xa8] sm:$0xf]  ;;  %v10388_v15 = vld [vmem:[%s18840_s5 + $0x460] sm:$0xf] }
 0x2f8   :  { %v9630_v6 = vld [vmem:[%s18838_s3 + $0xe78] sm:$0xf0]  ;;  %4099 = vmatmul.bf16.vlgmr.msrb.gmra.mxu0 %v13237_v54  ;;  %v12287_v54 = vld [vmem:[%s18840_s5 + $0x4e8] sm:$0xf0] }
 0x2f9   :  { %v9633_v35 = vor.u32 %v12077_v27, %v9630_v6  ;;  %v12005_v39 = vld [vmem:[%s18838_s3 + $0xc1c] sm:$0xf]  ;;  %6983 = vmatpush.bf16.msra.mxu0 %v10025_v30  ;;  %4123 = vmatpush.bf16.msrb.mxu2 %v9377_v9  ;;  %v10445_v8 = vor.u32 %v12287_v54, %v10444_v2  ;;  %v12154_v27 = vld [vmem:[%s18840_s5 + $0xc0] sm:$0xf0]  ;;  %v10417_v6 = vor.u32 %v12280_v19, %v10416_v61  ;;  %v9884_v9 = vld [vmem:[%s18840_s5 + $0x70] sm:$0xf] }
 0x2fa   :  { %v9342_v40 = vld [vmem:[%s18838_s3 + $0xc38] sm:$0xf0]  ;;  %4112 = vmatmul.bf16.vlgmr.msrb.gmra.mxu1 %v13239_v31  ;;  %v10668_v31 = vld [vmem:[%s18840_s5 + $0x690] sm:$0xf]  ;;  %v9913_v33 = vor.u32 %v12154_v27, %v9912_v26  ;;  %v12259_v2 = vld [vmem:[%s18840_s5 + $0x408] sm:$0xf0] }
 0x2fb   :  { %v12069_v41 = vld [vmem:[%s18838_s3 + $0xe1c] sm:$0xf]  ;;  %6996 = vmatpush.bf16.msra.mxu1 %v10249_v16  ;;  %4136 = vmatpush.bf16.msrb.mxu3 %v9633_v35  ;;  %v9345_v52 = vor.u32 %v12005_v39, %v9342_v40  ;;  %v10669_v10 = vor.u32 %v12343_v49, %v10668_v31  ;;  %v10612_v16 = vld [vmem:[%s18840_s5 + $0x620] sm:$0xf]  ;;  %v12147_v35 = vld [vmem:[%s18840_s5 + $0x88] sm:$0xf0] }
 0x2fc   :  { %v9598_v42 = vld [vmem:[%s18838_s3 + $0xe38] sm:$0xf0]  ;;  %v12203_v39 = vld [vmem:[%s18840_s5 + $0x248] sm:$0xf0]  ;;  %v10360_v40 = vld [vmem:[%s18840_s5 + $0x428] sm:$0xf]  ;;  %v9885_v47 = vor.u32 %v12147_v35, %v9884_v9 }
 0x2fd   :  { %v9601_v57 = vor.u32 %v12069_v41, %v9598_v42  ;;  %6984 = vmatpush.bf16.msra.mxu0 %v9997_v48  ;;  %4124 = vmatpush.bf16.msrb.mxu2 %v9345_v52  ;;  %v12161_v7 = vld [vmem:[%s18840_s5 + $0xf8] sm:$0xf0]  ;;  %v3894_v41 = vpop.f32.mrf.mxu0  ;;  %v3907_v42 = vpop.f32.mrf.mxu1  ;;  %v10109_v48 = vor.u32 %v12203_v39, %v10108_v38  ;;  %v12140_v52 = vld [vmem:[%s18840_s5 + $0x50] sm:$0xf0]  ;;  %v10556_v54 = vld [vmem:[%s18840_s5 + $0x5b0] sm:$0xf]  ;;  %v16160_v39 = vpack.c.bf16 %v14201_v51, %v14201_v51 }
 0x2fe   :  { %v12217_v14 = vld [vmem:[%s18840_s5 + $0x2b8] sm:$0xf0]  ;;  %v9941_v22 = vor.u32 %v12161_v7, %v9940_v55  ;;  %v12315_v31 = vld [vmem:[%s18840_s5 + $0x5c8] sm:$0xf0]  ;;  %v10052_v7 = vld [vmem:[%s18840_s5 + $0x1c0] sm:$0xf]  ;;  %v16170_v42 = vpack.c.bf16 %v14494_v53, %v14494_v53 }
 0x2ff   :  { %6997 = vmatpush.bf16.msra.mxu1 %v10221_v12  ;;  %4137 = vmatpush.bf16.msrb.mxu3 %v9601_v57  ;;  %v10165_v25 = vor.u32 %v12217_v14, %v10164_v11  ;;  %v12273_v30 = vld [vmem:[%s18840_s5 + $0x478] sm:$0xf0]  ;;  %v9856_v12 = vld [vmem:[%s18840_s5 + $0x38] sm:$0xf]  ;;  %v10361_v57 = vor.u32 %v12266_v44, %v10360_v40  ;;  %v10920_v14 = vld [vmem:[%s18840_s5 + $0x888] sm:$0xf] }
 0x300   :  { %4125 = vmatmul.bf16.vlgmr.msrb.gmra.mxu2 %v13282_v23  ;;  %v10136_v23 = vld [vmem:[%s18840_s5 + $0x268] sm:$0xf]  ;;  %v12329_v32 = vld [vmem:[%s18840_s5 + $0x638] sm:$0xf0]  ;;  %v10389_v36 = vor.u32 %v12273_v30, %v10388_v15  ;;  %v9857_v49 = vor.u32 %v12140_v52, %v9856_v12  ;;  %v12406_v61 = vld [vmem:[%s18840_s5 + $0x8a0] sm:$0xf0] }
 0x301   :  { %7009 = vmatpush.bf16.msra.mxu2 %v10473_v60  ;;  %6985 = vmatpush.bf16.msra.mxu0 %v9969_v62  ;;  %v10613_v37 = vor.u32 %v12329_v32, %v10612_v16  ;;  %v12196_v60 = vld [vmem:[%s18840_s5 + $0x210] sm:$0xf0]  ;;  %v12133_v55 = vld [vmem:[%s18840_s5 + $0x18] sm:$0xf0]  ;;  %v11144_v19 = vld [vmem:[%s18840_s5 + $0xa48] sm:$0xf]  ;;  %v3920_v32 = vpop.f32.mrf.mxu2 }
 0x302   :  { %4138 = vmatmul.bf16.vlgmr.msrb.gmra.mxu3 %v13284_v24  ;;  %v12210_v24 = vld [vmem:[%s18840_s5 + $0x280] sm:$0xf0]  ;;  %v10081_v62 = vor.u32 %v12196_v60, %v10080_v59  ;;  %v12189_v11 = vld [vmem:[%s18840_s5 + $0x1d8] sm:$0xf0]  ;;  %v12308_v26 = vld [vmem:[%s18840_s5 + $0x590] sm:$0xf0] }
 0x303   :  { %7022 = vmatpush.bf16.msra.mxu3 %v10697_v63  ;;  %6998 = vmatpush.bf16.msra.mxu1 %v10193_v5  ;;  %v10137_v34 = vor.u32 %v12210_v24, %v10136_v23  ;;  %v10332_v63 = vld [vmem:[%s18840_s5 + $0x3f0] sm:$0xf]  ;;  %v9828_v5 = vld [vmem:[%s18840_s5] sm:$0xf]  ;;  %v11145_v23 = vor.u32 %v12462_v20, %v11144_v19  ;;  %v12399_v15 = vld [vmem:[%s18840_s5 + $0x868] sm:$0xf0] }
 0x304   :  { %v9829_v27 = vor.u32 %v12133_v55, %v9828_v5  ;;  %v10892_v24 = vld [vmem:[%s18840_s5 + $0x850] sm:$0xf]  ;;  %v12455_v9 = vld [vmem:[%s18840_s5 + $0xa28] sm:$0xf0]  ;;  %v10276_v35 = vld [vmem:[%s18840_s5 + $0x380] sm:$0xf] }
 0x305   :  { %7010 = vmatpush.bf16.msra.mxu2 %v10445_v8  ;;  %6986 = vmatpush.bf16.msra.mxu0 %v9941_v22  ;;  %v10333_v8 = vor.u32 %v12259_v2, %v10332_v63  ;;  %v12252_v22 = vld [vmem:[%s18840_s5 + $0x3d0] sm:$0xf0]  ;;  %v12301_v38 = vld [vmem:[%s18840_s5 + $0x558] sm:$0xf0]  ;;  %v11368_v40 = vld [vmem:[%s18840_s5 + $0xc08] sm:$0xf]  ;;  %v10893_v44 = vor.u32 %v12399_v15, %v10892_v24  ;;  %v16197_v2 = vpack.c.bf16 %v14892_v56, %v14892_v56  ;;  %v16212_v56 = vpop.f32.mrf.mxu0  ;;  %v16214_v55 = vpop.f32.mrf.mxu1 }
 0x306   :  { %v10305_v30 = vor.u32 %v12252_v22, %v10304_v21  ;;  %v12518_v41 = vld [vmem:[%s18840_s5 + $0xc20] sm:$0xf0]  ;;  %v12392_v53 = vld [vmem:[%s18840_s5 + $0x830] sm:$0xf0]  ;;  %v11088_v12 = vld [vmem:[%s18840_s5 + $0x9d8] sm:$0xf] }
 0x307   :  { %7023 = vmatpush.bf16.msra.mxu3 %v10669_v10  ;;  %6999 = vmatpush.bf16.msra.mxu1 %v10165_v25  ;;  %v10557_v10 = vor.u32 %v12315_v31, %v10556_v54  ;;  %v10528_v25 = vld [vmem:[%s18840_s5 + $0x578] sm:$0xf]  ;;  %v12448_v52 = vld [vmem:[%s18840_s5 + $0x9f0] sm:$0xf0]  ;;  %v10836_v63 = vld [vmem:[%s18840_s5 + $0x7e0] sm:$0xf]  ;;  %v16201_v54 = vpack.c.bf16 %v15295_v3, %v15295_v3 }
 0x308   :  { %v10529_v16 = vor.u32 %v12308_v26, %v10528_v25  ;;  %v11089_v60 = vor.u32 %v12448_v52, %v11088_v12  ;;  %v12441_v5 = vld [vmem:[%s18840_s5 + $0x9b8] sm:$0xf0]  ;;  %v11312_v3 = vld [vmem:[%s18840_s5 + $0xb98] sm:$0xf]  ;;  %v12378_v19 = vld [vmem:[%s18840_s5 + $0x7c0] sm:$0xf0] }
 0x309   :  { %7011 = vmatpush.bf16.msra.mxu2 %v10417_v6  ;;  %6987 = vmatpush.bf16.msra.mxu0 %v9913_v33  ;;  %v10053_v6 = vor.u32 %v12189_v11, %v10052_v7  ;;  %v3933_v33 = vpop.f32.mrf.mxu3  ;;  %v12504_v7 = vld [vmem:[%s18840_s5 + $0xbb0] sm:$0xf0]  ;;  %v10808_v11 = vld [vmem:[%s18840_s5 + $0x7a8] sm:$0xf]  ;;  %v12434_v21 = vld [vmem:[%s18840_s5 + $0x980] sm:$0xf0] }
 0x30a   :  { %v11032_v20 = vld [vmem:[%s18840_s5 + $0x968] sm:$0xf]  ;;  %v11284_v22 = vld [vmem:[%s18840_s5 + $0xb60] sm:$0xf]  ;;  %v10780_v26 = vld [vmem:[%s18840_s5 + $0x770] sm:$0xf] }
 0x30b   :  { %7024 = vmatpush.bf16.msra.mxu3 %v10641_v28  ;;  %7000 = vmatpush.bf16.msra.mxu1 %v10137_v34  ;;  %v10921_v28 = vor.u32 %v12406_v61, %v10920_v14  ;;  %v11116_v34 = vld [vmem:[%s18840_s5 + $0xa10] sm:$0xf]  ;;  %v3867_v14 = vadd.f32 %v15881_v50, %v15822_v29  ;;  %v11313_v61 = vor.u32 %v12504_v7, %v11312_v3  ;;  %v12497_v29 = vld [vmem:[%s18840_s5 + $0xb78] sm:$0xf0]  ;;  %v12427_v24 = vld [vmem:[%s18840_s5 + $0x948] sm:$0xf0] }
 0x30c   :  { %v11117_v45 = vor.u32 %v12455_v9, %v11116_v34  ;;  %v10809_v50 = vor.u32 %v12378_v19, %v10808_v11  ;;  %v11033_v25 = vor.u32 %v12434_v21, %v11032_v20  ;;  %v10752_v9 = vld [vmem:[%s18840_s5 + $0x738] sm:$0xf]  ;;  %v12413_v52 = vld [vmem:[%s18840_s5 + $0x8d8] sm:$0xf0]  ;;  %v741_v3 = vperm.slane %v15787_v43, 6 }
 0x30d   :  { %7012 = vmatpush.bf16.msra.mxu2 %v10389_v36  ;;  %6988 = vmatpush.bf16.msra.mxu0 %v9885_v47  ;;  %v12245_v36 = vld [vmem:[%s18840_s5 + $0x398] sm:$0xf0]  ;;  %v10864_v47 = vld [vmem:[%s18840_s5 + $0x818] sm:$0xf]  ;;  %v3946_v15 = vpop.f32.mrf.mxu0  ;;  %v12574_v11 = vld [vmem:[%s18840_s5 + $0xde0] sm:$0xf0] }
 0x30e   :  { %v10277_v51 = vor.u32 %v12245_v36, %v10276_v35  ;;  %v10865_v59 = vor.u32 %v12392_v53, %v10864_v47  ;;  %v12364_v36 = vld [vmem:[%s18840_s5 + $0x750] sm:$0xf0]  ;;  %v10724_v47 = vld [vmem:[%s18840_s5 + $0x700] sm:$0xf]  ;;  %v10222_v20 = vld [vmem:[%s18840_s5 + $0x32c] sm:$0xf0] }
 0x30f   :  { %7025 = vmatpush.bf16.msra.mxu3 %v10613_v37  ;;  %7001 = vmatpush.bf16.msra.mxu1 %v10109_v48  ;;  %v10500_v37 = vld [vmem:[%s18840_s5 + $0x540] sm:$0xf]  ;;  %v11369_v48 = vor.u32 %v12518_v41, %v11368_v40  ;;  %v11228_v41 = vld [vmem:[%s18840_s5 + $0xaf0] sm:$0xf]  ;;  %v12228_v43 = vld [vmem:[%s18840_s5 + $0x314] sm:$0xf] }
 0x310   :  { %v10501_v46 = vor.u32 %v12301_v38, %v10500_v37  ;;  %v10976_v37 = vld [vmem:[%s18840_s5 + $0x8f8] sm:$0xf]  ;;  %v16276_v38 = vpop.f32.mrf.mxu2 }
 0x311   :  { %7013 = vmatpush.bf16.msra.mxu2 %v10361_v57  ;;  %6989 = vmatpush.bf16.msra.mxu0 %v9857_v49  ;;  %v11340_v57 = vld [vmem:[%s18840_s5 + $0xbd0] sm:$0xf]  ;;  %v12385_v49 = vld [vmem:[%s18840_s5 + $0x7f8] sm:$0xf0]  ;;  %v16278_v40 = vpop.f32.mrf.mxu3 }
 0x313   :  { %7026 = vmatpush.bf16.msra.mxu3 %v10585_v58  ;;  %7002 = vmatpush.bf16.msra.mxu1 %v10081_v62  ;;  %v12511_v58 = vld [vmem:[%s18840_s5 + $0xbe8] sm:$0xf0]  ;;  %v11060_v62 = vld [vmem:[%s18840_s5 + $0x9a0] sm:$0xf] }
 0x314   :  { %v11341_v31 = vor.u32 %v12511_v58, %v11340_v57  ;;  %v12179_v57 = vld [vmem:[%s18840_s5 + $0x18c] sm:$0xf]  ;;  %v10026_v58 = vld [vmem:[%s18840_s5 + $0x1a4] sm:$0xf0] }
 0x315   :  { %7014 = vmatpush.bf16.msra.mxu2 %v10333_v8  ;;  %6990 = vmatpush.bf16.msra.mxu0 %v9829_v27  ;;  %v10837_v8 = vor.u32 %v12385_v49, %v10836_v63  ;;  %v3880_v27 = vadd.f32 %v15883_v4, %v3867_v14  ;;  %v11256_v4 = vld [vmem:[%s18840_s5 + $0xb28] sm:$0xf]  ;;  %v12476_v63 = vld [vmem:[%s18840_s5 + $0xad0] sm:$0xf0]  ;;  %v10029_v7 = vor.u32 %v12179_v57, %v10026_v58  ;;  %v11508_v57 = vld [vmem:[%s18840_s5 + $0xd20] sm:$0xf] }
 0x317   :  { %7027 = vmatpush.bf16.msra.mxu3 %v10557_v10  ;;  %7003 = vmatpush.bf16.msra.mxu1 %v10053_v6  ;;  %v11061_v10 = vor.u32 %v12441_v5, %v11060_v62  ;;  %v11285_v6 = vor.u32 %v12497_v29, %v11284_v22  ;;  %v3893_v32 = vadd.f32 %v16007_v17, %v3880_v27  ;;  %v12420_v17 = vld [vmem:[%s18840_s5 + $0x910] sm:$0xf0]  ;;  %v11592_v62 = vld [vmem:[%s18840_s5 + $0xdc8] sm:$0xf]  ;;  %v11172_v22 = vld [vmem:[%s18840_s5 + $0xa80] sm:$0xf] }
 0x318   :  { %6991 = vmatmul.bf16.vlgmr.msra.gmra.mxu0 %v16160_v39  ;;  %v11593_v21 = vor.u32 %v12574_v11, %v11592_v62  ;;  %v12469_v29 = vld [vmem:[%s18840_s5 + $0xa98] sm:$0xf0]  ;;  %v11564_v27 = vld [vmem:[%s18840_s5 + $0xd90] sm:$0xf] }
 0x319   :  { %7035 = vmatpush.bf16.msrb.mxu0 %v10921_v28  ;;  %7015 = vmatpush.bf16.msra.mxu2 %v10305_v30  ;;  %v12371_v28 = vld [vmem:[%s18840_s5 + $0x788] sm:$0xf0]  ;;  %v3959_v30 = vpop.f32.mrf.mxu1  ;;  %v3985_v19 = vpop.f32.mrf.mxu3  ;;  %v11173_v15 = vor.u32 %v12469_v29, %v11172_v22 }
 0x31a   :  { %7004 = vmatmul.bf16.vlgmr.msra.gmra.mxu1 %v16170_v42  ;;  %v10781_v33 = vor.u32 %v12371_v28, %v10780_v26  ;;  %v10474_v26 = vld [vmem:[%s18840_s5 + $0x524] sm:$0xf0]  ;;  %v9970_v30 = vld [vmem:[%s18840_s5 + $0x134] sm:$0xf0]  ;;  %v9886_v19 = vld [vmem:[%s18840_s5 + $0x8c] sm:$0xf0] }
 0x31b   :  { %7048 = vmatpush.bf16.msrb.mxu1 %v11145_v23  ;;  %7028 = vmatpush.bf16.msra.mxu3 %v10529_v16  ;;  %v11004_v23 = vld [vmem:[%s18840_s5 + $0x930] sm:$0xf]  ;;  %v12490_v16 = vld [vmem:[%s18840_s5 + $0xb40] sm:$0xf0]  ;;  %v12263_v22 = vld [vmem:[%s18840_s5 + $0x42c] sm:$0xf] }
 0x31c   :  { %v11005_v34 = vor.u32 %v12427_v24, %v11004_v23  ;;  %v11257_v35 = vor.u32 %v12490_v16, %v11256_v4  ;;  %v10225_v23 = vor.u32 %v12228_v43, %v10222_v20  ;;  %v12165_v24 = vld [vmem:[%s18840_s5 + $0x11c] sm:$0xf]  ;;  %v10194_v16 = vld [vmem:[%s18840_s5 + $0x2f4] sm:$0xf0] }
 0x31d   :  { %7036 = vmatpush.bf16.msrb.mxu0 %v10893_v44  ;;  %7016 = vmatpush.bf16.msra.mxu2 %v10277_v51  ;;  %v12483_v44 = vld [vmem:[%s18840_s5 + $0xb08] sm:$0xf0]  ;;  %v10753_v51 = vor.u32 %v12364_v36, %v10752_v9  ;;  %v12221_v4 = vld [vmem:[%s18840_s5 + $0x2dc] sm:$0xf]  ;;  %v12284_v9 = vld [vmem:[%s18840_s5 + $0x4d4] sm:$0xf] }
 0x31e   :  { %v11229_v12 = vor.u32 %v12483_v44, %v11228_v41  ;;  %v11536_v36 = vld [vmem:[%s18840_s5 + $0xd58] sm:$0xf]  ;;  %v12158_v41 = vld [vmem:[%s18840_s5 + $0xe4] sm:$0xf]  ;;  %v9942_v44 = vld [vmem:[%s18840_s5 + $0xfc] sm:$0xf0] }
 0x31f   :  { %7049 = vmatpush.bf16.msrb.mxu1 %v11117_v45  ;;  %7029 = vmatpush.bf16.msra.mxu3 %v10501_v46  ;;  %v3906_v45 = vadd.f32 %v16009_v18, %v3893_v32  ;;  %v10977_v46 = vor.u32 %v12420_v17, %v10976_v37  ;;  %v10948_v18 = vld [vmem:[%s18840_s5 + $0x8c0] sm:$0xf]  ;;  %v9973_v37 = vor.u32 %v12165_v24, %v9970_v30  ;;  %v12137_v24 = vld [vmem:[%s18840_s5 + $0x3c] sm:$0xf] }
 0x320   :  { %7017 = vmatmul.bf16.vlgmr.msra.gmra.mxu2 %v16197_v2  ;;  %v10949_v49 = vor.u32 %v12413_v52, %v10948_v18  ;;  %v10197_v17 = vor.u32 %v12221_v4, %v10194_v16  ;;  %v12277_v18 = vld [vmem:[%s18840_s5 + $0x49c] sm:$0xf]  ;;  %v10418_v52 = vld [vmem:[%s18840_s5 + $0x4b4] sm:$0xf0] }
 0x321   :  { %7061 = vmatpush.bf16.msrb.mxu2 %v11369_v48  ;;  %7037 = vmatpush.bf16.msrb.mxu0 %v10865_v59  ;;  %v12357_v48 = vld [vmem:[%s18840_s5 + $0x718] sm:$0xf0]  ;;  %v3919_v53 = vadd.f32 %v16085_v0, %v3906_v45  ;;  %v12235_v0 = vld [vmem:[%s18840_s5 + $0x34c] sm:$0xf]  ;;  %v10250_v59 = vld [vmem:[%s18840_s5 + $0x364] sm:$0xf0]  ;;  %v10421_v62 = vor.u32 %v12277_v18, %v10418_v52 }
 0x322   :  { %7030 = vmatmul.bf16.vlgmr.msra.gmra.mxu3 %v16201_v54  ;;  %v12214_v45 = vld [vmem:[%s18840_s5 + $0x2a4] sm:$0xf]  ;;  %v12193_v30 = vld [vmem:[%s18840_s5 + $0x1fc] sm:$0xf]  ;;  %v10082_v4 = vld [vmem:[%s18840_s5 + $0x214] sm:$0xf0] }
 0x323   :  { %7050 = vmatpush.bf16.msrb.mxu1 %v11089_v60  ;;  %v11200_v60 = vld [vmem:[%s18840_s5 + $0xab8] sm:$0xf]  ;;  %v3932_v5 = vadd.f32 %v16087_v1, %v3919_v53  ;;  %v9998_v1 = vld [vmem:[%s18840_s5 + $0x16c] sm:$0xf0]  ;;  %7074 = vmatpush.bf16.msrb.mxu3 %v11593_v21  ;;  %v3996_v53 = vpop.f32.mrf.mxu0 }
 0x324   :  { %v11201_v14 = vor.u32 %v12476_v63, %v11200_v60  ;;  %v12553_v60 = vld [vmem:[%s18840_s5 + $0xd38] sm:$0xf0]  ;;  %v9914_v63 = vld [vmem:[%s18840_s5 + $0xc4] sm:$0xf0] }
 0x325   :  { %7062 = vmatpush.bf16.msrb.mxu2 %v11341_v31  ;;  %7038 = vmatpush.bf16.msrb.mxu0 %v10837_v8  ;;  %v10725_v31 = vor.u32 %v12357_v48, %v10724_v47  ;;  %v10253_v8 = vor.u32 %v12235_v0, %v10250_v59  ;;  %v16360_v28 = vpack.c.bf16 %v3932_v5, %v3932_v5  ;;  %v12151_v59 = vld [vmem:[%s18840_s5 + $0xac] sm:$0xf]  ;;  %v12270_v5 = vld [vmem:[%s18840_s5 + $0x464] sm:$0xf] }
 0x326   :  { %v9917_v11 = vor.u32 %v12151_v59, %v9914_v63  ;;  %v11396_v59 = vld [vmem:[%s18840_s5 + $0xc40] sm:$0xf] }
 0x327   :  { %7051 = vmatpush.bf16.msrb.mxu1 %v11061_v10  ;;  %v12172_v10 = vld [vmem:[%s18840_s5 + $0x154] sm:$0xf] }
 0x329   :  { %7063 = vmatpush.bf16.msrb.mxu2 %v11313_v61  ;;  %7039 = vmatpush.bf16.msrb.mxu0 %v10809_v50  ;;  %v3972_v61 = vpop.f32.mrf.mxu2  ;;  %v12291_v50 = vld [vmem:[%s18840_s5 + $0x50c] sm:$0xf] }
 0x32a   :  { %v12144_v61 = vld [vmem:[%s18840_s5 + $0x74] sm:$0xf] }
 0x32b   :  { %7052 = vmatpush.bf16.msrb.mxu1 %v11033_v25  ;;  %v16349_v25 = vpack.c.bf16 %v15693_v13, %v15693_v13  ;;  %v10001_v13 = vor.u32 %v12172_v10, %v9998_v1  ;;  %v12200_v1 = vld [vmem:[%s18840_s5 + $0x234] sm:$0xf]  ;;  %v3998_v29 = vpop.f32.mrf.mxu0 }
 0x32d   :  { %7064 = vmatpush.bf16.msrb.mxu2 %v11285_v6  ;;  %7040 = vmatpush.bf16.msrb.mxu0 %v10781_v33  ;;  %v12567_v6 = vld [vmem:[%s18840_s5 + $0xda8] sm:$0xf0]  ;;  %v3945_v33 = vadd.f32 %v16212_v56, %v741_v3  ;;  %v12560_v56 = vld [vmem:[%s18840_s5 + $0xd70] sm:$0xf0]  ;;  %v10390_v3 = vld [vmem:[%s18840_s5 + $0x47c] sm:$0xf0] }
 0x32e   :  { %v11565_v32 = vor.u32 %v12567_v6, %v11564_v27  ;;  %v10393_v21 = vor.u32 %v12270_v5, %v10390_v3  ;;  %v11452_v27 = vld [vmem:[%s18840_s5 + $0xcb0] sm:$0xf]  ;;  %v12539_v6 = vld [vmem:[%s18840_s5 + $0xcc8] sm:$0xf0]  ;;  %v12396_v5 = vld [vmem:[%s18840_s5 + $0x854] sm:$0xf] }
 0x32f   :  { %7053 = vmatpush.bf16.msrb.mxu1 %v11005_v34  ;;  %v10477_v34 = vor.u32 %v12291_v50, %v10474_v26  ;;  %v3958_v47 = vadd.f32 %v16214_v55, %v3945_v33  ;;  %v9945_v55 = vor.u32 %v12158_v41, %v9942_v44  ;;  %v10362_v26 = vld [vmem:[%s18840_s5 + $0x444] sm:$0xf0]  ;;  %v11453_v16 = vor.u32 %v12539_v6, %v11452_v27  ;;  %v12347_v3 = vld [vmem:[%s18840_s5 + $0x6cc] sm:$0xf]  ;;  %v12340_v27 = vld [vmem:[%s18840_s5 + $0x694] sm:$0xf] }
 0x330   :  { %7075 = vmatpush.bf16.msrb.mxu3 %v11565_v32  ;;  %v10365_v33 = vor.u32 %v12263_v22, %v10362_v26  ;;  %v10085_v44 = vor.u32 %v12193_v30, %v10082_v4  ;;  %v12389_v26 = vld [vmem:[%s18840_s5 + $0x81c] sm:$0xf]  ;;  %v10670_v6 = vld [vmem:[%s18840_s5 + $0x6ac] sm:$0xf0]  ;;  %v12508_v4 = vld [vmem:[%s18840_s5 + $0xbd4] sm:$0xf] }
 0x331   :  { %7065 = vmatpush.bf16.msrb.mxu2 %v11257_v35  ;;  %7041 = vmatpush.bf16.msrb.mxu0 %v10753_v51  ;;  %v10446_v35 = vld [vmem:[%s18840_s5 + $0x4ec] sm:$0xf0]  ;;  %v10166_v51 = vld [vmem:[%s18840_s5 + $0x2bc] sm:$0xf0]  ;;  %v3971_v58 = vadd.f32 %v16276_v38, %v3958_v47  ;;  %v12207_v38 = vld [vmem:[%s18840_s5 + $0x26c] sm:$0xf] }
 0x332   :  { %v10449_v48 = vor.u32 %v12284_v9, %v10446_v35  ;;  %v10169_v0 = vor.u32 %v12214_v45, %v10166_v51  ;;  %v4022_v9 = vpop.f32.mrf.mxu2  ;;  %v4035_v35 = vpop.f32.mrf.mxu3  ;;  %v12130_v45 = vld [vmem:[%s18840_s5 + $0x4] sm:$0xf]  ;;  %v9830_v51 = vld [vmem:[%s18840_s5 + $0x1c] sm:$0xf0] }
 0x333   :  { %7054 = vmatpush.bf16.msrb.mxu1 %v10977_v46  ;;  %v11537_v46 = vor.u32 %v12560_v56, %v11536_v36  ;;  %v3984_v10 = vadd.f32 %v16278_v40, %v3971_v58  ;;  %v10110_v40 = vld [vmem:[%s18840_s5 + $0x24c] sm:$0xf0]  ;;  %v11424_v56 = vld [vmem:[%s18840_s5 + $0xc78] sm:$0xf]  ;;  %v10054_v47 = vld [vmem:[%s18840_s5 + $0x1dc] sm:$0xf0] }
 0x334   :  { %v10334_v36 = vld [vmem:[%s18840_s5 + $0x40c] sm:$0xf0]  ;;  %v11146_v58 = vld [vmem:[%s18840_s5 + $0xa64] sm:$0xf0] }
 0x335   :  { %7066 = vmatpush.bf16.msrb.mxu2 %v11229_v12  ;;  %7042 = vmatpush.bf16.msrb.mxu0 %v10725_v31  ;;  %v4009_v12 = vpop.f32.mrf.mxu1  ;;  %v10138_v31 = vld [vmem:[%s18840_s5 + $0x284] sm:$0xf0]  ;;  %v3997_v20 = vadd.f32 %v3996_v53, %v3984_v10  ;;  %v10894_v10 = vld [vmem:[%s18840_s5 + $0x86c] sm:$0xf0] }
 0x336   :  { %7076 = vmatpush.bf16.msrb.mxu3 %v11537_v46  ;;  %v12186_v46 = vld [vmem:[%s18840_s5 + $0x1c4] sm:$0xf]  ;;  %v10922_v53 = vld [vmem:[%s18840_s5 + $0x8a4] sm:$0xf0]  ;;  %v10897_v29 = vor.u32 %v12396_v5, %v10894_v10  ;;  %v12319_v5 = vld [vmem:[%s18840_s5 + $0x5ec] sm:$0xf] }
 0x337   :  { %7055 = vmatpush.bf16.msrb.mxu1 %v10949_v49  ;;  %v11509_v49 = vor.u32 %v12553_v60, %v11508_v57  ;;  %v4010_v32 = vadd.f32 %v4009_v12, %v3997_v20  ;;  %v12459_v57 = vld [vmem:[%s18840_s5 + $0xa4c] sm:$0xf]  ;;  %v12525_v60 = vld [vmem:[%s18840_s5 + $0xc58] sm:$0xf0]  ;;  %v11006_v10 = vld [vmem:[%s18840_s5 + $0x94c] sm:$0xf0] }
 0x338   :  { %7043 = vmatmul.bf16.vlgmr.msrb.gmra.mxu0 %v16349_v25  ;;  %v12515_v20 = vld [vmem:[%s18840_s5 + $0xc0c] sm:$0xf] }
 0x339   :  { %7087 = vmatpush.bf16.msra.mxu0 %v10029_v7  ;;  %7067 = vmatpush.bf16.msrb.mxu2 %v11201_v14  ;;  %v11480_v7 = vld [vmem:[%s18840_s5 + $0xce8] sm:$0xf]  ;;  %v10141_v14 = vor.u32 %v12207_v38, %v10138_v31  ;;  %v9833_v38 = vor.u32 %v12130_v45, %v9830_v51  ;;  %v10057_v31 = vor.u32 %v12186_v46, %v10054_v47  ;;  %v11314_v45 = vld [vmem:[%s18840_s5 + $0xbb4] sm:$0xf0] }
 0x33a   :  { %7056 = vmatmul.bf16.vlgmr.msrb.gmra.mxu1 %v16360_v28  ;;  %7077 = vmatpush.bf16.msrb.mxu3 %v11509_v49  ;;  %v16607_v46 = vpop.f32.mrf.mxu0 }
 0x33b   :  { %7100 = vmatpush.bf16.msra.mxu1 %v10253_v8  ;;  %v12546_v8 = vld [vmem:[%s18840_s5 + $0xd00] sm:$0xf0] }
 0x33c   :  { %v11481_v43 = vor.u32 %v12546_v8, %v11480_v7  ;;  %v10698_v7 = vld [vmem:[%s18840_s5 + $0x6e4] sm:$0xf0] }
 0x33d   :  { %7088 = vmatpush.bf16.msra.mxu0 %v10001_v13  ;;  %7068 = vmatpush.bf16.msrb.mxu2 %v11173_v15  ;;  %v4011_v50 = vpop.f32.mrf.mxu1  ;;  %v9889_v13 = vor.u32 %v12144_v61, %v9886_v19  ;;  %v9858_v15 = vld [vmem:[%s18840_s5 + $0x54] sm:$0xf0]  ;;  %v11397_v61 = vor.u32 %v12525_v60, %v11396_v59  ;;  %v4024_v19 = vpop.f32.mrf.mxu2  ;;  %v10701_v22 = vor.u32 %v12347_v3, %v10698_v7  ;;  %v12494_v59 = vld [vmem:[%s18840_s5 + $0xb64] sm:$0xf]  ;;  %v11286_v60 = vld [vmem:[%s18840_s5 + $0xb7c] sm:$0xf0] }
 0x33e   :  { %7078 = vmatpush.bf16.msrb.mxu3 %v11481_v43  ;;  %v9861_v41 = vor.u32 %v12137_v24, %v9858_v15  ;;  %v10278_v43 = vld [vmem:[%s18840_s5 + $0x39c] sm:$0xf0]  ;;  %v12445_v24 = vld [vmem:[%s18840_s5 + $0x9dc] sm:$0xf]  ;;  %v11090_v15 = vld [vmem:[%s18840_s5 + $0x9f4] sm:$0xf0] }
 0x33f   :  { %7101 = vmatpush.bf16.msra.mxu1 %v10225_v23  ;;  %v10113_v23 = vor.u32 %v12200_v1, %v10110_v40  ;;  %v4037_v1 = vpop.f32.mrf.mxu3  ;;  %v12242_v40 = vld [vmem:[%s18840_s5 + $0x384] sm:$0xf]  ;;  %v10586_v3 = vld [vmem:[%s18840_s5 + $0x604] sm:$0xf0]  ;;  %v10782_v7 = vld [vmem:[%s18840_s5 + $0x78c] sm:$0xf0] }
 0x340   :  { %v10589_v19 = vor.u32 %v12319_v5, %v10586_v3  ;;  %v10480_v3 = vld [vmem:[%s18840_s5 + $0x510] sm:$0xf] }
 0x341   :  { %7113 = vmatpush.bf16.msra.mxu2 %v10477_v34  ;;  %7089 = vmatpush.bf16.msra.mxu0 %v9973_v37  ;;  %v12256_v34 = vld [vmem:[%s18840_s5 + $0x3f4] sm:$0xf] }
 0x342   :  { %v12532_v37 = vld [vmem:[%s18840_s5 + $0xc90] sm:$0xf0]  ;;  %7079 = vmatpush.bf16.msrb.mxu3 %v11453_v16  ;;  %v10337_v52 = vor.u32 %v12256_v34, %v10334_v36  ;;  %v11342_v16 = vld [vmem:[%s18840_s5 + $0xbec] sm:$0xf0]  ;;  %v11093_v34 = vor.u32 %v12445_v24, %v11090_v15  ;;  %v10642_v36 = vld [vmem:[%s18840_s5 + $0x674] sm:$0xf0]  ;;  %v4050_v1 = vpop.f32.mrf.mxu0 }
 0x343   :  { %7102 = vmatpush.bf16.msra.mxu1 %v10197_v17  ;;  %v4023_v17 = vadd.f32 %v4022_v9, %v4010_v32  ;;  %v11425_v12 = vor.u32 %v12532_v37, %v11424_v56  ;;  %v10673_v32 = vor.u32 %v12340_v27, %v10670_v6  ;;  %v12382_v9 = vld [vmem:[%s18840_s5 + $0x7e4] sm:$0xf]  ;;  %v10838_v56 = vld [vmem:[%s18840_s5 + $0x7fc] sm:$0xf0]  ;;  %v10978_v27 = vld [vmem:[%s18840_s5 + $0x914] sm:$0xf0] }
 0x344   :  { %v12438_v37 = vld [vmem:[%s18840_s5 + $0x9a4] sm:$0xf]  ;;  %v9976_v1 = vld [vmem:[%s18840_s5 + $0x120] sm:$0xf] }
 0x345   :  { %7114 = vmatpush.bf16.msra.mxu2 %v10449_v48  ;;  %7090 = vmatpush.bf16.msra.mxu0 %v9945_v55  ;;  %v12403_v48 = vld [vmem:[%s18840_s5 + $0x88c] sm:$0xf]  ;;  %v4036_v18 = vadd.f32 %v4035_v35, %v4023_v17  ;;  %v12249_v55 = vld [vmem:[%s18840_s5 + $0x3bc] sm:$0xf]  ;;  %v11062_v17 = vld [vmem:[%s18840_s5 + $0x9bc] sm:$0xf0]  ;;  %v16609_v47 = vpop.f32.mrf.mxu1 }
 0x346   :  { %v10925_v49 = vor.u32 %v12403_v48, %v10922_v53  ;;  %7080 = vmatpush.bf16.msrb.mxu3 %v11425_v12  ;;  %v12333_v35 = vld [vmem:[%s18840_s5 + $0x65c] sm:$0xf]  ;;  %v10841_v48 = vor.u32 %v12382_v9, %v10838_v56  ;;  %v11065_v53 = vor.u32 %v12438_v37, %v11062_v17  ;;  %v12375_v12 = vld [vmem:[%s18840_s5 + $0x7ac] sm:$0xf]  ;;  %v12354_v24 = vld [vmem:[%s18840_s5 + $0x704] sm:$0xf] }
 0x347   :  { %7103 = vmatpush.bf16.msra.mxu1 %v10169_v0  ;;  %v10306_v0 = vld [vmem:[%s18840_s5 + $0x3d4] sm:$0xf0]  ;;  %v16524_v63 = vpack.c.bf16 %v4036_v18, %v4036_v18  ;;  %v10645_v51 = vor.u32 %v12333_v35, %v10642_v36  ;;  %v12326_v18 = vld [vmem:[%s18840_s5 + $0x624] sm:$0xf]  ;;  %v10950_v36 = vld [vmem:[%s18840_s5 + $0x8dc] sm:$0xf0] }
 0x348   :  { %v10309_v8 = vor.u32 %v12249_v55, %v10306_v0  ;;  %v11034_v55 = vld [vmem:[%s18840_s5 + $0x984] sm:$0xf0]  ;;  %v10530_v9 = vld [vmem:[%s18840_s5 + $0x594] sm:$0xf0]  ;;  %v12410_v35 = vld [vmem:[%s18840_s5 + $0x8c4] sm:$0xf] }
 0x349   :  { %7115 = vmatpush.bf16.msra.mxu2 %v10421_v62  ;;  %7091 = vmatpush.bf16.msra.mxu0 %v9917_v11  ;;  %v11149_v62 = vor.u32 %v12459_v57, %v11146_v58  ;;  %v12452_v11 = vld [vmem:[%s18840_s5 + $0xa14] sm:$0xf]  ;;  %v10810_v57 = vld [vmem:[%s18840_s5 + $0x7c4] sm:$0xf0]  ;;  %v12431_v58 = vld [vmem:[%s18840_s5 + $0x96c] sm:$0xf] }
 0x34a   :  { %7069 = vmatmul.bf16.vlgmr.msrb.gmra.mxu2 %v16524_v63  ;;  %7081 = vmatpush.bf16.msrb.mxu3 %v11397_v61  ;;  %v11258_v61 = vld [vmem:[%s18840_s5 + $0xb44] sm:$0xf0]  ;;  %v10032_v56 = vld [vmem:[%s18840_s5 + $0x190] sm:$0xf]  ;;  %v12183_v17 = vld [vmem:[%s18840_s5 + $0x1a8] sm:$0xf0] }
 0x34b   :  { %7104 = vmatpush.bf16.msra.mxu1 %v10141_v14  ;;  %v11118_v14 = vld [vmem:[%s18840_s5 + $0xa2c] sm:$0xf0] }
 0x34c   :  { %v11121_v50 = vor.u32 %v12452_v11, %v11118_v14  ;;  %v11289_v11 = vor.u32 %v12494_v59, %v11286_v60  ;;  %v12487_v14 = vld [vmem:[%s18840_s5 + $0xb2c] sm:$0xf]  ;;  %v12176_v59 = vld [vmem:[%s18840_s5 + $0x170] sm:$0xf0]  ;;  %v10228_v60 = vld [vmem:[%s18840_s5 + $0x318] sm:$0xf] }
 0x34d   :  { %7116 = vmatpush.bf16.msra.mxu2 %v10393_v21  ;;  %7092 = vmatpush.bf16.msra.mxu0 %v9889_v13  ;;  %v11370_v21 = vld [vmem:[%s18840_s5 + $0xc24] sm:$0xf0]  ;;  %v10281_v13 = vor.u32 %v12242_v40, %v10278_v43  ;;  %v4063_v40 = vpop.f32.mrf.mxu1  ;;  %v11261_v6 = vor.u32 %v12487_v14, %v11258_v61 }
 0x34e   :  { %v11373_v30 = vor.u32 %v12515_v20, %v11370_v21  ;;  %7126 = vmatpush.bf16.msra.mxu3 %v10701_v22  ;;  %v12361_v21 = vld [vmem:[%s18840_s5 + $0x73c] sm:$0xf]  ;;  %v12312_v22 = vld [vmem:[%s18840_s5 + $0x5b4] sm:$0xf] }
 0x34f   :  { %7105 = vmatpush.bf16.msra.mxu1 %v10113_v23  ;;  %v10866_v23 = vld [vmem:[%s18840_s5 + $0x834] sm:$0xf0]  ;;  %v12169_v40 = vld [vmem:[%s18840_s5 + $0x138] sm:$0xf0] }
 0x351   :  { %7117 = vmatpush.bf16.msra.mxu2 %v10365_v33  ;;  %7093 = vmatpush.bf16.msra.mxu0 %v9861_v41  ;;  %v10869_v33 = vor.u32 %v12389_v26, %v10866_v23  ;;  %v11345_v41 = vor.u32 %v12508_v4, %v11342_v16  ;;  %v12417_v26 = vld [vmem:[%s18840_s5 + $0x8fc] sm:$0xf]  ;;  %v11230_v23 = vld [vmem:[%s18840_s5 + $0xb0c] sm:$0xf0]  ;;  %v16689_v4 = vpop.f32.mrf.mxu3 }
 0x352   :  { %7127 = vmatpush.bf16.msra.mxu3 %v10673_v32  ;;  %v10981_v32 = vor.u32 %v12417_v26, %v10978_v27  ;;  %v9977_v26 = vor.u32 %v12169_v40, %v9976_v1  ;;  %v12134_v40 = vld [vmem:[%s18840_s5 + $0x20] sm:$0xf0] }
 0x353   :  { %7106 = vmatpush.bf16.msra.mxu1 %v10085_v44  ;;  %v12501_v44 = vld [vmem:[%s18840_s5 + $0xb9c] sm:$0xf] }
 0x354   :  { %v11317_v0 = vor.u32 %v12501_v44, %v11314_v45  ;;  %v12239_v44 = vld [vmem:[%s18840_s5 + $0x368] sm:$0xf0]  ;;  %v12473_v45 = vld [vmem:[%s18840_s5 + $0xabc] sm:$0xf] }
 0x355   :  { %7118 = vmatpush.bf16.msra.mxu2 %v10337_v52  ;;  %7094 = vmatpush.bf16.msra.mxu0 %v9833_v38  ;;  %v10614_v52 = vld [vmem:[%s18840_s5 + $0x63c] sm:$0xf0] }
 0x356   :  { %7128 = vmatpush.bf16.msra.mxu3 %v10645_v51  ;;  %v10617_v38 = vor.u32 %v12326_v18, %v10614_v52  ;;  %v11202_v51 = vld [vmem:[%s18840_s5 + $0xad4] sm:$0xf0]  ;;  %v10033_v18 = vor.u32 %v12183_v17, %v10032_v56  ;;  %v12155_v56 = vld [vmem:[%s18840_s5 + $0xc8] sm:$0xf0]  ;;  %v10144_v17 = vld [vmem:[%s18840_s5 + $0x270] sm:$0xf] }
 0x357   :  { %7107 = vmatpush.bf16.msra.mxu1 %v10057_v31  ;;  %v10813_v31 = vor.u32 %v12375_v12, %v10810_v57  ;;  %v10953_v12 = vor.u32 %v12410_v35, %v10950_v36  ;;  %v10004_v57 = vld [vmem:[%s18840_s5 + $0x158] sm:$0xf]  ;;  %v9920_v36 = vld [vmem:[%s18840_s5 + $0xb0] sm:$0xf] }
 0x358   :  { %7095 = vmatmul.bf16.vlgmr.msra.gmra.mxu0 %v16160_v39  ;;  %v10005_v14 = vor.u32 %v12176_v59, %v10004_v57  ;;  %v12204_v57 = vld [vmem:[%s18840_s5 + $0x250] sm:$0xf0] }
 0x359   :  { %7139 = vmatpush.bf16.msrb.mxu0 %v10925_v49  ;;  %7119 = vmatpush.bf16.msra.mxu2 %v10309_v8  ;;  %v11037_v49 = vor.u32 %v12431_v58, %v11034_v55  ;;  %v12424_v8 = vld [vmem:[%s18840_s5 + $0x934] sm:$0xf]  ;;  %v12298_v58 = vld [vmem:[%s18840_s5 + $0x544] sm:$0xf]  ;;  %v10502_v55 = vld [vmem:[%s18840_s5 + $0x55c] sm:$0xf0]  ;;  %v4089_v5 = vpop.f32.mrf.mxu3 }
 0x35a   :  { %7108 = vmatmul.bf16.vlgmr.msra.gmra.mxu1 %v16170_v42  ;;  %7129 = vmatpush.bf16.msra.mxu3 %v10617_v38  ;;  %v11009_v20 = vor.u32 %v12424_v8, %v11006_v10  ;;  %v12232_v38 = vld [vmem:[%s18840_s5 + $0x330] sm:$0xf0]  ;;  %v10505_v8 = vor.u32 %v12298_v58, %v10502_v55  ;;  %v12609_v10 = vld [vmem:[%s18839_s4] sm:$0xff]  ;;  %v10368_v58 = vld [vmem:[%s18840_s5 + $0x430] sm:$0xf] }
 0x35b   :  { %7152 = vmatpush.bf16.msrb.mxu1 %v11149_v62  ;;  %v12368_v62 = vld [vmem:[%s18840_s5 + $0x774] sm:$0xf]  ;;  %v10229_v61 = vor.u32 %v12232_v38, %v10228_v60  ;;  %v12267_v55 = vld [vmem:[%s18840_s5 + $0x448] sm:$0xf0]  ;;  %v10088_v5 = vld [vmem:[%s18840_s5 + $0x200] sm:$0xf] }
 0x35c   :  { %v10785_v43 = vor.u32 %v12368_v62, %v10782_v7  ;;  %v12295_v7 = vld [vmem:[%s18840_s5 + $0x528] sm:$0xf0] }
 0x35d   :  { %7140 = vmatpush.bf16.msrb.mxu0 %v10897_v29  ;;  %7120 = vmatpush.bf16.msra.mxu2 %v10281_v13  ;;  %v10558_v29 = vld [vmem:[%s18840_s5 + $0x5cc] sm:$0xf0]  ;;  %v12480_v13 = vld [vmem:[%s18840_s5 + $0xaf4] sm:$0xf] }
 0x35e   :  { %7130 = vmatpush.bf16.msra.mxu3 %v10589_v19  ;;  %v10561_v15 = vor.u32 %v12312_v22, %v10558_v29  ;;  %v11233_v37 = vor.u32 %v12480_v13, %v11230_v23  ;;  %v10452_v22 = vld [vmem:[%s18840_s5 + $0x4d8] sm:$0xf]  ;;  %v12288_v29 = vld [vmem:[%s18840_s5 + $0x4f0] sm:$0xf0]  ;;  %v12162_v13 = vld [vmem:[%s18840_s5 + $0x100] sm:$0xf0] }
 0x35f   :  { %7153 = vmatpush.bf16.msrb.mxu1 %v11121_v50  ;;  %v10754_v50 = vld [vmem:[%s18840_s5 + $0x754] sm:$0xf0]  ;;  %v10453_v23 = vor.u32 %v12288_v29, %v10452_v22  ;;  %v10928_v29 = vld [vmem:[%s18840_s5 + $0x890] sm:$0xf] }
 0x360   :  { %7121 = vmatmul.bf16.vlgmr.msra.gmra.mxu2 %v16197_v2  ;;  %v10757_v16 = vor.u32 %v12361_v21, %v10754_v50  ;;  %v12225_v21 = vld [vmem:[%s18840_s5 + $0x2f8] sm:$0xf0] }
 0x361   :  { %7165 = vmatpush.bf16.msrb.mxu2 %v11373_v30  ;;  %7141 = vmatpush.bf16.msrb.mxu0 %v10869_v33  ;;  %v16687_v30 = vpop.f32.mrf.mxu2  ;;  %v10726_v33 = vld [vmem:[%s18840_s5 + $0x71c] sm:$0xf0] }
 0x362   :  { %7131 = vmatpush.bf16.msra.mxu3 %v10561_v15  ;;  %v10424_v15 = vld [vmem:[%s18840_s5 + $0x4a0] sm:$0xf] }
 0x363   :  { %7154 = vmatpush.bf16.msrb.mxu1 %v11093_v34  ;;  %v12305_v34 = vld [vmem:[%s18840_s5 + $0x57c] sm:$0xf] }
 0x365   :  { %7166 = vmatpush.bf16.msrb.mxu2 %v11345_v41  ;;  %7142 = vmatpush.bf16.msrb.mxu0 %v10841_v48  ;;  %v10256_v41 = vld [vmem:[%s18840_s5 + $0x350] sm:$0xf]  ;;  %v10533_v48 = vor.u32 %v12305_v34, %v10530_v9 }
 0x366   :  { %v10257_v52 = vor.u32 %v12239_v44, %v10256_v41  ;;  %v12211_v41 = vld [vmem:[%s18840_s5 + $0x288] sm:$0xf0]  ;;  %v10396_v44 = vld [vmem:[%s18840_s5 + $0x468] sm:$0xf] }
 0x367   :  { %7155 = vmatpush.bf16.msrb.mxu1 %v11065_v53  ;;  %v10729_v53 = vor.u32 %v12354_v24, %v10726_v33  ;;  %7132 = vmatpush.bf16.msra.mxu3 %v10533_v48  ;;  %v10172_v24 = vld [vmem:[%s18840_s5 + $0x2a8] sm:$0xf]  ;;  %v9892_v48 = vld [vmem:[%s18840_s5 + $0x78] sm:$0xf] }
 0x369   :  { %7167 = vmatpush.bf16.msrb.mxu2 %v11317_v0  ;;  %7143 = vmatpush.bf16.msrb.mxu0 %v10813_v31  ;;  %v11205_v0 = vor.u32 %v12473_v45, %v11202_v51  ;;  %v12466_v31 = vld [vmem:[%s18840_s5 + $0xa84] sm:$0xf]  ;;  %v4076_v62 = vpop.f32.mrf.mxu2  ;;  %v10145_v51 = vor.u32 %v12211_v41, %v10144_v17  ;;  %v12564_v17 = vld [vmem:[%s18840_s5 + $0xd94] sm:$0xf]  ;;  %v11566_v41 = vld [vmem:[%s18840_s5 + $0xdac] sm:$0xf0] }
 0x36a   :  { %v12274_v45 = vld [vmem:[%s18840_s5 + $0x480] sm:$0xf0]  ;;  %v10369_v62 = vor.u32 %v12267_v55, %v10368_v58  ;;  %v12393_v58 = vld [vmem:[%s18840_s5 + $0x838] sm:$0xf0] }
 0x36b   :  { %7156 = vmatpush.bf16.msrb.mxu1 %v11037_v49  ;;  %v11174_v49 = vld [vmem:[%s18840_s5 + $0xa9c] sm:$0xf0]  ;;  %7133 = vmatpush.bf16.msra.mxu3 %v10505_v8  ;;  %v12260_v8 = vld [vmem:[%s18840_s5 + $0x410] sm:$0xf0] }
 0x36c   :  { %v11177_v19 = vor.u32 %v12466_v31, %v11174_v49  ;;  %v9864_v31 = vld [vmem:[%s18840_s5 + $0x40] sm:$0xf]  ;;  %v12141_v49 = vld [vmem:[%s18840_s5 + $0x58] sm:$0xf0] }
 0x36d   :  { %7168 = vmatpush.bf16.msrb.mxu2 %v11289_v11  ;;  %7144 = vmatpush.bf16.msrb.mxu0 %v10785_v43  ;;  %v742_v11 = vperm.slane %v12609_v10, 7  ;;  %v10481_v43 = vor.u32 %v12295_v7, %v10480_v3  ;;  %v12197_v3 = vld [vmem:[%s18840_s5 + $0x218] sm:$0xf0]  ;;  %v10340_v7 = vld [vmem:[%s18840_s5 + $0x3f8] sm:$0xf] }
 0x36e   :  { %v10089_v1 = vor.u32 %v12197_v3, %v10088_v5  ;;  %v10341_v22 = vor.u32 %v12260_v8, %v10340_v7  ;;  %v16952_v5 = vld [vmem:[%s18841_s6] sm:$0x7f]  ;;  %v10844_v7 = vld [vmem:[%s18840_s5 + $0x7e8] sm:$0xf] }
 0x36f   :  { %7157 = vmatpush.bf16.msrb.mxu1 %v11009_v20  ;;  %v10200_v20 = vld [vmem:[%s18840_s5 + $0x2e0] sm:$0xf]  ;;  %v4049_v50 = vadd.f32 %v16607_v46, %v742_v11  ;;  %v12218_v46 = vld [vmem:[%s18840_s5 + $0x2c0] sm:$0xf0]  ;;  %v9865_v11 = vor.u32 %v12141_v49, %v9864_v31  ;;  %v11348_v49 = vld [vmem:[%s18840_s5 + $0xbd8] sm:$0xf] }
 0x370   :  { %v10201_v27 = vor.u32 %v12225_v21, %v10200_v20  ;;  %v10173_v35 = vor.u32 %v12218_v46, %v10172_v24  ;;  %v12190_v20 = vld [vmem:[%s18840_s5 + $0x1e0] sm:$0xf0]  ;;  %v10312_v46 = vld [vmem:[%s18840_s5 + $0x3c0] sm:$0xf] }
 0x371   :  { %7169 = vmatpush.bf16.msrb.mxu2 %v11261_v6  ;;  %7145 = vmatpush.bf16.msrb.mxu0 %v10757_v16  ;;  %v9948_v6 = vld [vmem:[%s18840_s5 + $0xe8] sm:$0xf]  ;;  %v12281_v16 = vld [vmem:[%s18840_s5 + $0x4b8] sm:$0xf0]  ;;  %v12386_v8 = vld [vmem:[%s18840_s5 + $0x800] sm:$0xf0] }
 0x372   :  { %v9949_v33 = vor.u32 %v12162_v13, %v9948_v6  ;;  %v12571_v6 = vld [vmem:[%s18840_s5 + $0xdcc] sm:$0xf]  ;;  %v11594_v13 = vld [vmem:[%s18840_s5 + $0xde4] sm:$0xf0] }
 0x373   :  { %7158 = vmatpush.bf16.msrb.mxu1 %v10981_v32  ;;  %v4062_v32 = vadd.f32 %v16609_v47, %v4049_v50  ;;  %v10425_v47 = vor.u32 %v12281_v16, %v10424_v15  ;;  %v12407_v50 = vld [vmem:[%s18840_s5 + $0x8a8] sm:$0xf0]  ;;  %v12253_v15 = vld [vmem:[%s18840_s5 + $0x3d8] sm:$0xf0] }
 0x375   :  { %7170 = vmatpush.bf16.msrb.mxu2 %v11233_v37  ;;  %7146 = vmatpush.bf16.msrb.mxu0 %v10729_v53  ;;  %v4100_v34 = vpop.f32.mrf.mxu0  ;;  %v4075_v37 = vadd.f32 %v16687_v30, %v4062_v32  ;;  %v9921_v30 = vor.u32 %v12155_v56, %v9920_v36  ;;  %v12148_v53 = vld [vmem:[%s18840_s5 + $0x90] sm:$0xf0]  ;;  %v10929_v32 = vor.u32 %v12407_v50, %v10928_v29  ;;  %v11124_v56 = vld [vmem:[%s18840_s5 + $0xa18] sm:$0xf]  ;;  %v10816_v29 = vld [vmem:[%s18840_s5 + $0x7b0] sm:$0xf] }
 0x376   :  { %v12400_v36 = vld [vmem:[%s18840_s5 + $0x870] sm:$0xf0]  ;;  %v12379_v50 = vld [vmem:[%s18840_s5 + $0x7c8] sm:$0xf0] }
 0x377   :  { %7159 = vmatpush.bf16.msrb.mxu1 %v10953_v12  ;;  %v4113_v9 = vpop.f32.mrf.mxu1  ;;  %v4088_v12 = vadd.f32 %v16689_v4, %v4075_v37  ;;  %v9893_v4 = vor.u32 %v12148_v53, %v9892_v48  ;;  %v10313_v37 = vor.u32 %v12253_v15, %v10312_v46  ;;  %v11376_v53 = vld [vmem:[%s18840_s5 + $0xc10] sm:$0xf]  ;;  %v12543_v15 = vld [vmem:[%s18840_s5 + $0xcec] sm:$0xf] }
 0x378   :  { %7147 = vmatmul.bf16.vlgmr.msrb.gmra.mxu0 %v16349_v25 }
 0x379   :  { %7191 = vmatpush.bf16.msra.mxu0 %v10033_v18  ;;  %7171 = vmatpush.bf16.msrb.mxu2 %v11205_v0  ;;  %v10397_v18 = vor.u32 %v12274_v45, %v10396_v44  ;;  %v4101_v0 = vadd.f32 %v4100_v34, %v4088_v12  ;;  %v10284_v44 = vld [vmem:[%s18840_s5 + $0x388] sm:$0xf]  ;;  %v12246_v45 = vld [vmem:[%s18840_s5 + $0x3a0] sm:$0xf0]  ;;  %v12519_v12 = vld [vmem:[%s18840_s5 + $0xc28] sm:$0xf0] }
 0x37a   :  { %7160 = vmatmul.bf16.vlgmr.msrb.gmra.mxu1 %v16360_v28  ;;  %v10285_v55 = vor.u32 %v12246_v45, %v10284_v44  ;;  %v12536_v45 = vld [vmem:[%s18840_s5 + $0xcb4] sm:$0xf] }
 0x37b   :  { %7204 = vmatpush.bf16.msra.mxu1 %v10257_v52  ;;  %v10116_v52 = vld [vmem:[%s18840_s5 + $0x238] sm:$0xf]  ;;  %v4114_v10 = vadd.f32 %v4113_v9, %v4101_v0  ;;  %v11597_v9 = vor.u32 %v12571_v6, %v11594_v13  ;;  %v11096_v0 = vld [vmem:[%s18840_s5 + $0x9e0] sm:$0xf]  ;;  %v11040_v13 = vld [vmem:[%s18840_s5 + $0x970] sm:$0xf] }
 0x37c   :  { %v10117_v38 = vor.u32 %v12204_v57, %v10116_v52  ;;  %v11569_v52 = vor.u32 %v12564_v17, %v11566_v41  ;;  %v10872_v57 = vld [vmem:[%s18840_s5 + $0x820] sm:$0xf]  ;;  %v11012_v17 = vld [vmem:[%s18840_s5 + $0x938] sm:$0xf]  ;;  %v12428_v41 = vld [vmem:[%s18840_s5 + $0x950] sm:$0xf0] }
 0x37d   :  { %7192 = vmatpush.bf16.msra.mxu0 %v10005_v14  ;;  %7172 = vmatpush.bf16.msrb.mxu2 %v11177_v19  ;;  %v4102_v59 = vpop.f32.mrf.mxu0  ;;  %v9836_v14 = vld [vmem:[%s18840_s5 + $0x8] sm:$0xf]  ;;  %v10873_v31 = vor.u32 %v12393_v58, %v10872_v57 }
 0x37e   :  { %v9837_v24 = vor.u32 %v12134_v40, %v9836_v14  ;;  %v11377_v59 = vor.u32 %v12519_v12, %v11376_v53  ;;  %v12442_v14 = vld [vmem:[%s18840_s5 + $0x9c0] sm:$0xf0]  ;;  %v11510_v40 = vld [vmem:[%s18840_s5 + $0xd3c] sm:$0xf0]  ;;  %v12491_v53 = vld [vmem:[%s18840_s5 + $0xb48] sm:$0xf0]  ;;  %v11013_v12 = vor.u32 %v12428_v41, %v11012_v17 }
 0x37f   :  { %7205 = vmatpush.bf16.msra.mxu1 %v10229_v61  ;;  %v4115_v60 = vpop.f32.mrf.mxu1  ;;  %v12344_v17 = vld [vmem:[%s18840_s5 + $0x6b0] sm:$0xf0]  ;;  %v11180_v41 = vld [vmem:[%s18840_s5 + $0xa88] sm:$0xf] }
 0x380   :  { %7173 = vmatmul.bf16.vlgmr.msrb.gmra.mxu2 %v16524_v63  ;;  %v12557_v60 = vld [vmem:[%s18840_s5 + $0xd5c] sm:$0xf] }
 0x381   :  { %7217 = vmatpush.bf16.msra.mxu2 %v10481_v43  ;;  %7193 = vmatpush.bf16.msra.mxu0 %v9977_v26  ;;  %v10060_v43 = vld [vmem:[%s18840_s5 + $0x1c8] sm:$0xf]  ;;  %v11152_v26 = vld [vmem:[%s18840_s5 + $0xa50] sm:$0xf] }
 0x382   :  { %v10061_v16 = vor.u32 %v12190_v20, %v10060_v43  ;;  %v10845_v43 = vor.u32 %v12386_v8, %v10844_v7  ;;  %v11320_v20 = vld [vmem:[%s18840_s5 + $0xba0] sm:$0xf]  ;;  %v12358_v7 = vld [vmem:[%s18840_s5 + $0x720] sm:$0xf0] }
 0x383   :  { %7206 = vmatpush.bf16.msra.mxu1 %v10201_v27  ;;  %v4126_v61 = vpop.f32.mrf.mxu2  ;;  %v12463_v27 = vld [vmem:[%s18840_s5 + $0xa68] sm:$0xf0] }
 0x384   :  { %v4127_v21 = vadd.f32 %v4126_v61, %v4114_v10  ;;  %v11153_v34 = vor.u32 %v12463_v27, %v11152_v26 }
 0x385   :  { %7218 = vmatpush.bf16.msra.mxu2 %v10453_v23  ;;  %7194 = vmatpush.bf16.msra.mxu0 %v9949_v33  ;;  %v4139_v19 = vpop.f32.mrf.mxu3 }
 0x386   :  { %v4140_v23 = vadd.f32 %v4139_v19, %v4127_v21  ;;  %v4665_v19 = vperm.slane %v16952_v5, 0  ;;  %v12505_v21 = vld [vmem:[%s18840_s5 + $0xbb8] sm:$0xf0] }
 0x387   :  { %7207 = vmatpush.bf16.msra.mxu1 %v10173_v35  ;;  %v10900_v35 = vld [vmem:[%s18840_s5 + $0x858] sm:$0xf]  ;;  %v11321_v46 = vor.u32 %v12505_v21, %v11320_v20  ;;  %v10034_v20 = vld [vmem:[%s18840_s5 + $0x1ac] sm:$0xf0] }
 0x388   :  { %v16890_v33 = vpack.c.bf16 %v4140_v23, %v4140_v23  ;;  %v10901_v48 = vor.u32 %v12400_v36, %v10900_v35  ;;  %v12435_v23 = vld [vmem:[%s18840_s5 + $0x988] sm:$0xf0] }
 0x389   :  { %7219 = vmatpush.bf16.msra.mxu2 %v10425_v47  ;;  %7195 = vmatpush.bf16.msra.mxu0 %v9921_v30  ;;  %v12456_v47 = vld [vmem:[%s18840_s5 + $0xa30] sm:$0xf0]  ;;  %v11041_v36 = vor.u32 %v12435_v23, %v11040_v13  ;;  %v11208_v13 = vld [vmem:[%s18840_s5 + $0xac0] sm:$0xf]  ;;  %v12477_v23 = vld [vmem:[%s18840_s5 + $0xad8] sm:$0xf0] }
 0x38a   :  { %7082 = vmatmul.bf16.vlgmr.msrb.gmra.mxu3 %v16890_v33 }
 0x38b   :  { %7208 = vmatpush.bf16.msra.mxu1 %v10145_v51  ;;  %v4128_v30 = vpop.f32.mrf.mxu2  ;;  %7178 = vmatpush.bf16.msrb.mxu3 %v11597_v9  ;;  %v12498_v9 = vld [vmem:[%s18840_s5 + $0xb80] sm:$0xf0] }
 0x38c   :  { %v11454_v30 = vld [vmem:[%s18840_s5 + $0xccc] sm:$0xf0] }
 0x38d   :  { %7220 = vmatpush.bf16.msra.mxu2 %v10397_v18  ;;  %7196 = vmatpush.bf16.msra.mxu0 %v9893_v4  ;;  %v4141_v51 = vpop.f32.mrf.mxu3  ;;  %v11125_v18 = vor.u32 %v12456_v47, %v11124_v56  ;;  %v12449_v4 = vld [vmem:[%s18840_s5 + $0x9f8] sm:$0xf0]  ;;  %v10788_v56 = vld [vmem:[%s18840_s5 + $0x778] sm:$0xf] }
 0x38e   :  { %v11097_v3 = vor.u32 %v12449_v4, %v11096_v0  ;;  %v10984_v0 = vld [vmem:[%s18840_s5 + $0x900] sm:$0xf]  ;;  %v12421_v4 = vld [vmem:[%s18840_s5 + $0x918] sm:$0xf0] }
 0x38f   :  { %7209 = vmatpush.bf16.msra.mxu1 %v10117_v38  ;;  %v11538_v38 = vld [vmem:[%s18840_s5 + $0xd74] sm:$0xf0]  ;;  %7179 = vmatpush.bf16.msrb.mxu3 %v11569_v52  ;;  %v12365_v52 = vld [vmem:[%s18840_s5 + $0x758] sm:$0xf0]  ;;  %v10985_v8 = vor.u32 %v12421_v4, %v10984_v0  ;;  %v10202_v0 = vld [vmem:[%s18840_s5 + $0x2fc] sm:$0xf0] }
 0x390   :  { %v11541_v10 = vor.u32 %v12557_v60, %v11538_v38  ;;  %v12529_v60 = vld [vmem:[%s18840_s5 + $0xc7c] sm:$0xf]  ;;  %v11426_v38 = vld [vmem:[%s18840_s5 + $0xc94] sm:$0xf0] }
 0x391   :  { %7221 = vmatpush.bf16.msra.mxu2 %v10369_v62  ;;  %7197 = vmatpush.bf16.msra.mxu0 %v9865_v11  ;;  %v12512_v62 = vld [vmem:[%s18840_s5 + $0xbf0] sm:$0xf0]  ;;  %v11068_v11 = vld [vmem:[%s18840_s5 + $0x9a8] sm:$0xf] }
 0x392   :  { %v11349_v61 = vor.u32 %v12512_v62, %v11348_v49  ;;  %v12484_v62 = vld [vmem:[%s18840_s5 + $0xb10] sm:$0xf0] }
 0x393   :  { %7210 = vmatpush.bf16.msra.mxu1 %v10089_v1  ;;  %v12550_v1 = vld [vmem:[%s18840_s5 + $0xd24] sm:$0xf]  ;;  %7180 = vmatpush.bf16.msrb.mxu3 %v11541_v10  ;;  %v10956_v10 = vld [vmem:[%s18840_s5 + $0x8c8] sm:$0xf] }
 0x394   :  { %v11513_v6 = vor.u32 %v12550_v1, %v11510_v40  ;;  %v11429_v1 = vor.u32 %v12529_v60, %v11426_v38  ;;  %v11398_v40 = vld [vmem:[%s18840_s5 + $0xc5c] sm:$0xf0]  ;;  %v12337_v60 = vld [vmem:[%s18840_s5 + $0x678] sm:$0xf0] }
 0x395   :  { %7222 = vmatpush.bf16.msra.mxu2 %v10341_v22  ;;  %7198 = vmatpush.bf16.msra.mxu0 %v9837_v24  ;;  %v11069_v22 = vor.u32 %v12442_v14, %v11068_v11  ;;  %v6992_v26 = vpop.f32.mrf.mxu0  ;;  %v12414_v11 = vld [vmem:[%s18840_s5 + $0x8e0] sm:$0xf0] }
 0x396   :  { %v6993_v24 = vadd.f32 %v6992_v26, %v4665_v19  ;;  %v12522_v14 = vld [vmem:[%s18840_s5 + $0xc44] sm:$0xf]  ;;  %v10704_v26 = vld [vmem:[%s18840_s5 + $0x6d0] sm:$0xf] }
 0x397   :  { %7211 = vmatpush.bf16.msra.mxu1 %v10061_v16  ;;  %v7005_v27 = vpop.f32.mrf.mxu1  ;;  %v11482_v16 = vld [vmem:[%s18840_s5 + $0xd04] sm:$0xf0]  ;;  %7181 = vmatpush.bf16.msrb.mxu3 %v11513_v6  ;;  %v12351_v6 = vld [vmem:[%s18840_s5 + $0x6e8] sm:$0xf0] }
 0x398   :  { %7199 = vmatmul.bf16.vlgmr.msra.gmra.mxu0 %v16160_v39  ;;  %v7006_v35 = vadd.f32 %v7005_v27, %v6993_v24  ;;  %v11485_v47 = vor.u32 %v12543_v15, %v11482_v16  ;;  %v11401_v16 = vor.u32 %v12522_v14, %v11398_v40  ;;  %v12278_v40 = vld [vmem:[%s18840_s5 + $0x4a4] sm:$0xf] }
 0x399   :  { %7243 = vmatpush.bf16.msrb.mxu0 %v10929_v32  ;;  %7223 = vmatpush.bf16.msra.mxu2 %v10313_v37  ;;  %v10817_v32 = vor.u32 %v12379_v50, %v10816_v29  ;;  %v12372_v37 = vld [vmem:[%s18840_s5 + $0x790] sm:$0xf0]  ;;  %v10258_v50 = vld [vmem:[%s18840_s5 + $0x36c] sm:$0xf0] }
 0x39a   :  { %7212 = vmatmul.bf16.vlgmr.msra.gmra.mxu1 %v16170_v42  ;;  %7134 = vmatmul.bf16.vlgmr.msra.gmra.mxu3 %v16201_v54  ;;  %v10789_v51 = vor.u32 %v12372_v37, %v10788_v56  ;;  %v12236_v29 = vld [vmem:[%s18840_s5 + $0x354] sm:$0xf]  ;;  %v12229_v56 = vld [vmem:[%s18840_s5 + $0x31c] sm:$0xf]  ;;  %v10230_v37 = vld [vmem:[%s18840_s5 + $0x334] sm:$0xf0] }
 0x39b   :  { %7256 = vmatpush.bf16.msrb.mxu1 %v11153_v34  ;;  %v11292_v34 = vld [vmem:[%s18840_s5 + $0xb68] sm:$0xf]  ;;  %7182 = vmatpush.bf16.msrb.mxu3 %v11485_v47  ;;  %v10676_v47 = vld [vmem:[%s18840_s5 + $0x698] sm:$0xf] }
 0x39c   :  { %v11293_v44 = vor.u32 %v12498_v9, %v11292_v34  ;;  %v12173_v34 = vld [vmem:[%s18840_s5 + $0x15c] sm:$0xf]  ;;  %v10006_v9 = vld [vmem:[%s18840_s5 + $0x174] sm:$0xf0] }
 0x39d   :  { %7244 = vmatpush.bf16.msrb.mxu0 %v10901_v48  ;;  %7224 = vmatpush.bf16.msra.mxu2 %v10285_v55  ;;  %v11264_v48 = vld [vmem:[%s18840_s5 + $0xb30] sm:$0xf]  ;;  %v6994_v57 = vpop.f32.mrf.mxu0  ;;  %v11457_v55 = vor.u32 %v12536_v45, %v11454_v30  ;;  %v10009_v45 = vor.u32 %v12173_v34, %v10006_v9  ;;  %v12292_v30 = vld [vmem:[%s18840_s5 + $0x514] sm:$0xf]  ;;  %v10398_v34 = vld [vmem:[%s18840_s5 + $0x484] sm:$0xf0] }
 0x39e   :  { %v10677_v57 = vor.u32 %v12344_v17, %v10676_v47  ;;  %v10118_v47 = vld [vmem:[%s18840_s5 + $0x254] sm:$0xf0] }
 0x39f   :  { %7257 = vmatpush.bf16.msrb.mxu1 %v11125_v18  ;;  %v10760_v18 = vld [vmem:[%s18840_s5 + $0x740] sm:$0xf]  ;;  %v7007_v58 = vpop.f32.mrf.mxu1  ;;  %7183 = vmatpush.bf16.msrb.mxu3 %v11457_v55  ;;  %v12222_v55 = vld [vmem:[%s18840_s5 + $0x2e4] sm:$0xf] }
 0x3a0   :  { %7225 = vmatmul.bf16.vlgmr.msra.gmra.mxu2 %v16197_v2  ;;  %v10761_v49 = vor.u32 %v12365_v52, %v10760_v18  ;;  %v12166_v18 = vld [vmem:[%s18840_s5 + $0x124] sm:$0xf]  ;;  %v9978_v52 = vld [vmem:[%s18840_s5 + $0x13c] sm:$0xf0] }
 0x3a1   :  { %7269 = vmatpush.bf16.msrb.mxu2 %v11377_v59  ;;  %7245 = vmatpush.bf16.msrb.mxu0 %v10873_v31  ;;  %v11265_v59 = vor.u32 %v12491_v53, %v11264_v48  ;;  %v11236_v31 = vld [vmem:[%s18840_s5 + $0xaf8] sm:$0xf]  ;;  %v9981_v38 = vor.u32 %v12166_v18, %v9978_v52  ;;  %v12194_v52 = vld [vmem:[%s18840_s5 + $0x204] sm:$0xf] }
 0x3a3   :  { %7258 = vmatpush.bf16.msrb.mxu1 %v11097_v3  ;;  %v10732_v3 = vld [vmem:[%s18840_s5 + $0x708] sm:$0xf]  ;;  %7184 = vmatpush.bf16.msrb.mxu3 %v11429_v1 }
 0x3a4   :  { %v10733_v27 = vor.u32 %v12358_v7, %v10732_v3  ;;  %v12159_v3 = vld [vmem:[%s18840_s5 + $0xec] sm:$0xf]  ;;  %v9950_v7 = vld [vmem:[%s18840_s5 + $0x104] sm:$0xf0] }
 0x3a5   :  { %7270 = vmatpush.bf16.msrb.mxu2 %v11349_v61  ;;  %7246 = vmatpush.bf16.msrb.mxu0 %v10845_v43  ;;  %v7018_v61 = vpop.f32.mrf.mxu2  ;;  %v7031_v19 = vpop.f32.mrf.mxu3  ;;  %v12180_v43 = vld [vmem:[%s18840_s5 + $0x194] sm:$0xf]  ;;  %v9953_v1 = vor.u32 %v12159_v3, %v9950_v7  ;;  %v12187_v7 = vld [vmem:[%s18840_s5 + $0x1cc] sm:$0xf] }
 0x3a6   :  { %v7019_v21 = vadd.f32 %v7018_v61, %v7006_v35  ;;  %v10037_v15 = vor.u32 %v12180_v43, %v10034_v20  ;;  %v10705_v35 = vor.u32 %v12351_v6, %v10704_v26  ;;  %v10620_v61 = vld [vmem:[%s18840_s5 + $0x628] sm:$0xf]  ;;  %v10426_v43 = vld [vmem:[%s18840_s5 + $0x4bc] sm:$0xf0]  ;;  %v10146_v26 = vld [vmem:[%s18840_s5 + $0x28c] sm:$0xf0] }
 0x3a7   :  { %7259 = vmatpush.bf16.msrb.mxu1 %v11069_v22  ;;  %v11237_v22 = vor.u32 %v12484_v62, %v11236_v31  ;;  %7185 = vmatpush.bf16.msrb.mxu3 %v11401_v16  ;;  %v12285_v31 = vld [vmem:[%s18840_s5 + $0x4dc] sm:$0xf]  ;;  %v10205_v62 = vor.u32 %v12222_v55, %v10202_v0 }
 0x3a8   :  { %v17095_v24 = vadd.f32 %v7031_v19, %v7019_v21  ;;  %v12330_v19 = vld [vmem:[%s18840_s5 + $0x640] sm:$0xf0]  ;;  %v12152_v21 = vld [vmem:[%s18840_s5 + $0xb4] sm:$0xf] }
 0x3a9   :  { %7271 = vmatpush.bf16.msrb.mxu2 %v11321_v46  ;;  %7247 = vmatpush.bf16.msrb.mxu0 %v10817_v32  ;;  %v10957_v46 = vor.u32 %v12414_v11, %v10956_v10  ;;  %v10261_v32 = vor.u32 %v12236_v29, %v10258_v50  ;;  %v12215_v10 = vld [vmem:[%s18840_s5 + $0x2ac] sm:$0xf]  ;;  %v10174_v11 = vld [vmem:[%s18840_s5 + $0x2c4] sm:$0xf0]  ;;  %v10621_v29 = vor.u32 %v12330_v19, %v10620_v61  ;;  %v12208_v50 = vld [vmem:[%s18840_s5 + $0x274] sm:$0xf] }
 0x3aa   :  { %7186 = vmatmul.bf16.vlgmr.msrb.gmra.mxu3 %v16890_v33  ;;  %v10177_v20 = vor.u32 %v12215_v10, %v10174_v11  ;;  %v10149_v9 = vor.u32 %v12208_v50, %v10146_v26  ;;  %v10508_v10 = vld [vmem:[%s18840_s5 + $0x548] sm:$0xf]  ;;  %v12404_v61 = vld [vmem:[%s18840_s5 + $0x894] sm:$0xf]  ;;  %v10930_v19 = vld [vmem:[%s18840_s5 + $0x8ac] sm:$0xf0] }
 0x3ab   :  { %7260 = vmatpush.bf16.msrb.mxu1 %v11041_v36  ;;  %v11209_v36 = vor.u32 %v12477_v23, %v11208_v13  ;;  %7230 = vmatpush.bf16.msra.mxu3 %v10705_v35  ;;  %v10429_v13 = vor.u32 %v12278_v40, %v10426_v43  ;;  %v10592_v23 = vld [vmem:[%s18840_s5 + $0x5f0] sm:$0xf]  ;;  %v12145_v35 = vld [vmem:[%s18840_s5 + $0x7c] sm:$0xf]  ;;  %v12460_v40 = vld [vmem:[%s18840_s5 + $0xa54] sm:$0xf] }
 0x3ac   :  { %v11154_v43 = vld [vmem:[%s18840_s5 + $0xa6c] sm:$0xf0]  ;;  %v10314_v50 = vld [vmem:[%s18840_s5 + $0x3dc] sm:$0xf0] }
 0x3ad   :  { %7272 = vmatpush.bf16.msrb.mxu2 %v11293_v44  ;;  %7248 = vmatpush.bf16.msrb.mxu0 %v10789_v51  ;;  %v12470_v44 = vld [vmem:[%s18840_s5 + $0xaa0] sm:$0xf0]  ;;  %v10482_v51 = vld [vmem:[%s18840_s5 + $0x52c] sm:$0xf0]  ;;  %v7020_v48 = vpop.f32.mrf.mxu2  ;;  %v7033_v53 = vpop.f32.mrf.mxu3 }
 0x3ae   :  { %v11181_v58 = vor.u32 %v12470_v44, %v11180_v41  ;;  %v10485_v4 = vor.u32 %v12292_v30, %v10482_v51  ;;  %v10564_v41 = vld [vmem:[%s18840_s5 + $0x5b8] sm:$0xf]  ;;  %v12316_v44 = vld [vmem:[%s18840_s5 + $0x5d0] sm:$0xf0]  ;;  %v10370_v51 = vld [vmem:[%s18840_s5 + $0x44c] sm:$0xf0] }
 0x3af   :  { %7261 = vmatpush.bf16.msrb.mxu1 %v11013_v12  ;;  %v10233_v12 = vor.u32 %v12229_v56, %v10230_v37  ;;  %7231 = vmatpush.bf16.msra.mxu3 %v10677_v57  ;;  %v12201_v37 = vld [vmem:[%s18840_s5 + $0x23c] sm:$0xf]  ;;  %v12264_v30 = vld [vmem:[%s18840_s5 + $0x434] sm:$0xf]  ;;  %v12138_v53 = vld [vmem:[%s18840_s5 + $0x44] sm:$0xf]  ;;  %v10565_v18 = vor.u32 %v12316_v44, %v10564_v41 }
 0x3b0   :  { %v10121_v48 = vor.u32 %v12201_v37, %v10118_v47  ;;  %v10090_v57 = vld [vmem:[%s18840_s5 + $0x21c] sm:$0xf0]  ;;  %v10373_v0 = vor.u32 %v12264_v30, %v10370_v51  ;;  %v12516_v47 = vld [vmem:[%s18840_s5 + $0xc14] sm:$0xf]  ;;  %v12390_v44 = vld [vmem:[%s18840_s5 + $0x824] sm:$0xf] }
 0x3b1   :  { %7273 = vmatpush.bf16.msrb.mxu2 %v11265_v59  ;;  %7249 = vmatpush.bf16.msrb.mxu0 %v10761_v49  ;;  %v10648_v59 = vld [vmem:[%s18840_s5 + $0x660] sm:$0xf]  ;;  %v10454_v49 = vld [vmem:[%s18840_s5 + $0x4f4] sm:$0xf0]  ;;  %v10093_v3 = vor.u32 %v12194_v52, %v10090_v57  ;;  %v12561_v52 = vld [vmem:[%s18840_s5 + $0xd78] sm:$0xf0] }
 0x3b2   :  { %v10457_v14 = vor.u32 %v12285_v31, %v10454_v49  ;;  %v10342_v31 = vld [vmem:[%s18840_s5 + $0x414] sm:$0xf0]  ;;  %v12131_v49 = vld [vmem:[%s18840_s5 + $0xc] sm:$0xf] }
 0x3b3   :  { %7262 = vmatpush.bf16.msrb.mxu1 %v10985_v8  ;;  %v10649_v8 = vor.u32 %v12337_v60, %v10648_v59  ;;  %v12309_v59 = vld [vmem:[%s18840_s5 + $0x598] sm:$0xf0] }
 0x3b4   :  { %v12257_v60 = vld [vmem:[%s18840_s5 + $0x3fc] sm:$0xf] }
 0x3b5   :  { %7274 = vmatpush.bf16.msrb.mxu2 %v11237_v22  ;;  %7250 = vmatpush.bf16.msrb.mxu0 %v10733_v27  ;;  %v9922_v22 = vld [vmem:[%s18840_s5 + $0xcc] sm:$0xf0]  ;;  %v7044_v27 = vpop.f32.mrf.mxu0 }
 0x3b6   :  { %7232 = vmatpush.bf16.msra.mxu3 %v10649_v8  ;;  %v9925_v16 = vor.u32 %v12152_v21, %v9922_v22  ;;  %v10062_v8 = vld [vmem:[%s18840_s5 + $0x1e4] sm:$0xf0]  ;;  %v12575_v22 = vld [vmem:[%s18840_s5 + $0xde8] sm:$0xf0] }
 0x3b7   :  { %7263 = vmatpush.bf16.msrb.mxu1 %v10957_v46  ;;  %v7057_v6 = vpop.f32.mrf.mxu1  ;;  %v12323_v46 = vld [vmem:[%s18840_s5 + $0x608] sm:$0xf0]  ;;  %v10065_v26 = vor.u32 %v12187_v7, %v10062_v8  ;;  %v4666_v7 = vperm.slane %v16952_v5, 1  ;;  %v10818_v5 = vld [vmem:[%s18840_s5 + $0x7cc] sm:$0xf0] }
 0x3b8   :  { %7251 = vmatmul.bf16.vlgmr.msrb.gmra.mxu0 %v16349_v25  ;;  %v10593_v56 = vor.u32 %v12323_v46, %v10592_v23  ;;  %v12397_v23 = vld [vmem:[%s18840_s5 + $0x85c] sm:$0xf]  ;;  %v10902_v46 = vld [vmem:[%s18840_s5 + $0x874] sm:$0xf0] }
 0x3b9   :  { %7295 = vmatpush.bf16.msra.mxu0 %v10037_v15  ;;  %7275 = vmatpush.bf16.msrb.mxu2 %v11209_v36  ;;  %v7045_v15 = vadd.f32 %v7044_v27, %v17095_v24  ;;  %v9894_v24 = vld [vmem:[%s18840_s5 + $0x94] sm:$0xf0]  ;;  %v10933_v27 = vor.u32 %v12404_v61, %v10930_v19  ;;  %v10905_v37 = vor.u32 %v12397_v23, %v10902_v46  ;;  %v12376_v61 = vld [vmem:[%s18840_s5 + $0x7b4] sm:$0xf]  ;;  %v12369_v46 = vld [vmem:[%s18840_s5 + $0x77c] sm:$0xf] }
 0x3ba   :  { %7264 = vmatmul.bf16.vlgmr.msrb.gmra.mxu1 %v16360_v28  ;;  %7233 = vmatpush.bf16.msra.mxu3 %v10621_v29  ;;  %v12250_v29 = vld [vmem:[%s18840_s5 + $0x3c4] sm:$0xf] }
 0x3bb   :  { %7308 = vmatpush.bf16.msra.mxu1 %v10261_v32  ;;  %v12271_v32 = vld [vmem:[%s18840_s5 + $0x46c] sm:$0xf]  ;;  %v17210_v36 = vadd.f32 %v7057_v6, %v7045_v15 }
 0x3bc   :  { %v10401_v17 = vor.u32 %v12271_v32, %v10398_v34  ;;  %v12453_v32 = vld [vmem:[%s18840_s5 + $0xa1c] sm:$0xf]  ;;  %v11126_v34 = vld [vmem:[%s18840_s5 + $0xa34] sm:$0xf0] }
 0x3bd   :  { %7296 = vmatpush.bf16.msra.mxu0 %v10009_v45  ;;  %7276 = vmatpush.bf16.msrb.mxu2 %v11181_v58  ;;  %v9897_v45 = vor.u32 %v12145_v35, %v9894_v24  ;;  %v7046_v58 = vpop.f32.mrf.mxu0  ;;  %v12568_v35 = vld [vmem:[%s18840_s5 + $0xdb0] sm:$0xf0]  ;;  %v12243_v24 = vld [vmem:[%s18840_s5 + $0x38c] sm:$0xf]  ;;  %v11129_v41 = vor.u32 %v12453_v32, %v11126_v34  ;;  %v12425_v34 = vld [vmem:[%s18840_s5 + $0x93c] sm:$0xf] }
 0x3be   :  { %7234 = vmatpush.bf16.msra.mxu3 %v10593_v56  ;;  %v10286_v56 = vld [vmem:[%s18840_s5 + $0x3a4] sm:$0xf0]  ;;  %v12509_v58 = vld [vmem:[%s18840_s5 + $0xbdc] sm:$0xf] }
 0x3bf   :  { %7309 = vmatpush.bf16.msra.mxu1 %v10233_v12  ;;  %v9866_v12 = vld [vmem:[%s18840_s5 + $0x5c] sm:$0xf0]  ;;  %v7059_v55 = vpop.f32.mrf.mxu1  ;;  %v10289_v51 = vor.u32 %v12243_v24, %v10286_v56  ;;  %v11460_v24 = vld [vmem:[%s18840_s5 + $0xcb8] sm:$0xf]  ;;  %v12540_v56 = vld [vmem:[%s18840_s5 + $0xcd0] sm:$0xf0] }
 0x3c0   :  { %7277 = vmatmul.bf16.vlgmr.msrb.gmra.mxu2 %v16524_v63  ;;  %v11350_v55 = vld [vmem:[%s18840_s5 + $0xbf4] sm:$0xf0] }
 0x3c1   :  { %7321 = vmatpush.bf16.msra.mxu2 %v10485_v4  ;;  %7297 = vmatpush.bf16.msra.mxu0 %v9981_v38  ;;  %v10536_v4 = vld [vmem:[%s18840_s5 + $0x580] sm:$0xf]  ;;  %v9869_v38 = vor.u32 %v12138_v53, %v9866_v12 }
 0x3c2   :  { %7235 = vmatpush.bf16.msra.mxu3 %v10565_v18  ;;  %v10537_v11 = vor.u32 %v12309_v59, %v10536_v4  ;;  %v11098_v53 = vld [vmem:[%s18840_s5 + $0x9fc] sm:$0xf0]  ;;  %v12383_v4 = vld [vmem:[%s18840_s5 + $0x7ec] sm:$0xf]  ;;  %v10846_v59 = vld [vmem:[%s18840_s5 + $0x804] sm:$0xf0] }
 0x3c3   :  { %7310 = vmatpush.bf16.msra.mxu1 %v10205_v62  ;;  %v9838_v62 = vld [vmem:[%s18840_s5 + $0x24] sm:$0xf0]  ;;  %v11544_v18 = vld [vmem:[%s18840_s5 + $0xd60] sm:$0xf]  ;;  %v10849_v8 = vor.u32 %v12383_v4, %v10846_v59  ;;  %v12355_v4 = vld [vmem:[%s18840_s5 + $0x70c] sm:$0xf] }
 0x3c4   :  { %v9841_v21 = vor.u32 %v12131_v49, %v9838_v62  ;;  %v11353_v49 = vor.u32 %v12509_v58, %v11350_v55  ;;  %v11516_v62 = vld [vmem:[%s18840_s5 + $0xd28] sm:$0xf]  ;;  %v12481_v58 = vld [vmem:[%s18840_s5 + $0xafc] sm:$0xf] }
 0x3c5   :  { %7322 = vmatpush.bf16.msra.mxu2 %v10457_v14  ;;  %7298 = vmatpush.bf16.msra.mxu0 %v9953_v1  ;;  %v12302_v14 = vld [vmem:[%s18840_s5 + $0x560] sm:$0xf0]  ;;  %v10345_v1 = vor.u32 %v12257_v60, %v10342_v31  ;;  %v11545_v60 = vor.u32 %v12561_v52, %v11544_v18  ;;  %v11070_v31 = vld [vmem:[%s18840_s5 + $0x9c4] sm:$0xf0]  ;;  %v11432_v52 = vld [vmem:[%s18840_s5 + $0xc80] sm:$0xf] }
 0x3c6   :  { %7236 = vmatpush.bf16.msra.mxu3 %v10537_v11  ;;  %v10509_v6 = vor.u32 %v12302_v14, %v10508_v10  ;;  %v12502_v10 = vld [vmem:[%s18840_s5 + $0xba4] sm:$0xf]  ;;  %v11322_v11 = vld [vmem:[%s18840_s5 + $0xbbc] sm:$0xf0]  ;;  %v10734_v59 = vld [vmem:[%s18840_s5 + $0x724] sm:$0xf0] }
 0x3c7   :  { %7311 = vmatpush.bf16.msra.mxu1 %v10177_v20  ;;  %v11600_v20 = vld [vmem:[%s18840_s5 + $0xdd0] sm:$0xf] }
 0x3c8   :  { %v11601_v15 = vor.u32 %v12575_v22, %v11600_v20  ;;  %v11488_v22 = vld [vmem:[%s18840_s5 + $0xcf0] sm:$0xf] }
 0x3c9   :  { %7323 = vmatpush.bf16.msra.mxu2 %v10429_v13  ;;  %7299 = vmatpush.bf16.msra.mxu0 %v9925_v16  ;;  %v11157_v13 = vor.u32 %v12460_v40, %v11154_v43  ;;  %v10317_v16 = vor.u32 %v12250_v29, %v10314_v50  ;;  %v11042_v40 = vld [vmem:[%s18840_s5 + $0x98c] sm:$0xf0]  ;;  %v12547_v29 = vld [vmem:[%s18840_s5 + $0xd08] sm:$0xf0] }
 0x3ca   :  { %7237 = vmatpush.bf16.msra.mxu3 %v10509_v6  ;;  %v11294_v6 = vld [vmem:[%s18840_s5 + $0xb84] sm:$0xf0]  ;;  %v11489_v32 = vor.u32 %v12547_v29, %v11488_v22 }
 0x3cb   :  { %7312 = vmatpush.bf16.msra.mxu1 %v10149_v9  ;;  %v11572_v9 = vld [vmem:[%s18840_s5 + $0xd98] sm:$0xf] }
 0x3cc   :  { %v11573_v30 = vor.u32 %v12568_v35, %v11572_v9  ;;  %v11014_v9 = vld [vmem:[%s18840_s5 + $0x954] sm:$0xf0] }
 0x3cd   :  { %7324 = vmatpush.bf16.msra.mxu2 %v10401_v17  ;;  %7300 = vmatpush.bf16.msra.mxu0 %v9897_v45  ;;  %v11378_v17 = vld [vmem:[%s18840_s5 + $0xc2c] sm:$0xf0]  ;;  %v10874_v45 = vld [vmem:[%s18840_s5 + $0x83c] sm:$0xf0] }
 0x3ce   :  { %7282 = vmatpush.bf16.msrb.mxu3 %v11601_v15  ;;  %v11381_v12 = vor.u32 %v12516_v47, %v11378_v17  ;;  %v10877_v57 = vor.u32 %v12390_v44, %v10874_v45  ;;  %v10790_v15 = vld [vmem:[%s18840_s5 + $0x794] sm:$0xf0]  ;;  %v12488_v47 = vld [vmem:[%s18840_s5 + $0xb34] sm:$0xf]  ;;  %v11266_v17 = vld [vmem:[%s18840_s5 + $0xb4c] sm:$0xf0] }
 0x3cf   :  { %7313 = vmatpush.bf16.msra.mxu1 %v10121_v48  ;;  %v12446_v48 = vld [vmem:[%s18840_s5 + $0x9e4] sm:$0xf]  ;;  %7238 = vmatmul.bf16.vlgmr.msra.gmra.mxu3 %v16201_v54  ;;  %v10762_v45 = vld [vmem:[%s18840_s5 + $0x75c] sm:$0xf0]  ;;  %v11269_v18 = vor.u32 %v12488_v47, %v11266_v17  ;;  %v9984_v17 = vld [vmem:[%s18840_s5 + $0x128] sm:$0xf] }
 0x3d0   :  { %v12362_v44 = vld [vmem:[%s18840_s5 + $0x744] sm:$0xf] }
 0x3d1   :  { %7325 = vmatpush.bf16.msra.mxu2 %v10373_v0  ;;  %7301 = vmatpush.bf16.msra.mxu0 %v9869_v38  ;;  %v11101_v0 = vor.u32 %v12446_v48, %v11098_v53  ;;  %v12439_v38 = vld [vmem:[%s18840_s5 + $0x9ac] sm:$0xf]  ;;  %v10986_v48 = vld [vmem:[%s18840_s5 + $0x91c] sm:$0xf0]  ;;  %v10765_v55 = vor.u32 %v12362_v44, %v10762_v45 }
 0x3d2   :  { %7283 = vmatpush.bf16.msrb.mxu3 %v11573_v30  ;;  %v11073_v14 = vor.u32 %v12439_v38, %v11070_v31  ;;  %v11461_v30 = vor.u32 %v12540_v56, %v11460_v24  ;;  %v12411_v31 = vld [vmem:[%s18840_s5 + $0x8cc] sm:$0xf]  ;;  %v10488_v24 = vld [vmem:[%s18840_s5 + $0x518] sm:$0xf]  ;;  %v12296_v56 = vld [vmem:[%s18840_s5 + $0x530] sm:$0xf0] }
 0x3d3   :  { %7314 = vmatpush.bf16.msra.mxu1 %v10093_v3  ;;  %v12554_v3 = vld [vmem:[%s18840_s5 + $0xd40] sm:$0xf0] }
 0x3d4   :  { %v11517_v19 = vor.u32 %v12554_v3, %v11516_v62  ;;  %v11404_v62 = vld [vmem:[%s18840_s5 + $0xc48] sm:$0xf] }
 0x3d5   :  { %7326 = vmatpush.bf16.msra.mxu2 %v10345_v1  ;;  %7302 = vmatpush.bf16.msra.mxu0 %v9841_v21  ;;  %v12432_v1 = vld [vmem:[%s18840_s5 + $0x974] sm:$0xf]  ;;  %v7096_v43 = vpop.f32.mrf.mxu0  ;;  %v11325_v21 = vor.u32 %v12502_v10, %v11322_v11 }
 0x3d6   :  { %7284 = vmatpush.bf16.msrb.mxu3 %v11545_v60  ;;  %v7097_v50 = vadd.f32 %v7096_v43, %v4666_v7  ;;  %v11045_v23 = vor.u32 %v12432_v1, %v11042_v40  ;;  %v12526_v7 = vld [vmem:[%s18840_s5 + $0xc60] sm:$0xf0]  ;;  %v12184_v10 = vld [vmem:[%s18840_s5 + $0x1b0] sm:$0xf0]  ;;  %v10706_v1 = vld [vmem:[%s18840_s5 + $0x6ec] sm:$0xf0] }
 0x3d7   :  { %7315 = vmatpush.bf16.msra.mxu1 %v10065_v26  ;;  %v7109_v20 = vpop.f32.mrf.mxu1  ;;  %v10821_v26 = vor.u32 %v12376_v61, %v10818_v5  ;;  %v12240_v61 = vld [vmem:[%s18840_s5 + $0x370] sm:$0xf0]  ;;  %v12474_v40 = vld [vmem:[%s18840_s5 + $0xac4] sm:$0xf]  ;;  %v11210_v43 = vld [vmem:[%s18840_s5 + $0xadc] sm:$0xf0]  ;;  %v11405_v22 = vor.u32 %v12526_v7, %v11404_v62 }
 0x3d8   :  { %7303 = vmatmul.bf16.vlgmr.msra.gmra.mxu0 %v16160_v39  ;;  %v12348_v5 = vld [vmem:[%s18840_s5 + $0x6d4] sm:$0xf]  ;;  %v12282_v7 = vld [vmem:[%s18840_s5 + $0x4c0] sm:$0xf0] }
 0x3d9   :  { %7347 = vmatpush.bf16.msrb.mxu0 %v10933_v27  ;;  %7327 = vmatpush.bf16.msra.mxu2 %v10317_v16  ;;  %v12495_v27 = vld [vmem:[%s18840_s5 + $0xb6c] sm:$0xf]  ;;  %v17411_v16 = vadd.f32 %v7109_v20, %v7097_v50  ;;  %v10012_v50 = vld [vmem:[%s18840_s5 + $0x160] sm:$0xf] }
 0x3da   :  { %7316 = vmatmul.bf16.vlgmr.msra.gmra.mxu1 %v16170_v42  ;;  %7285 = vmatpush.bf16.msrb.mxu3 %v11517_v19  ;;  %v11297_v35 = vor.u32 %v12495_v27, %v11294_v6  ;;  %v10737_v19 = vor.u32 %v12355_v4, %v10734_v59  ;;  %v10709_v27 = vor.u32 %v12348_v5, %v10706_v1  ;;  %v10180_v59 = vld [vmem:[%s18840_s5 + $0x2b0] sm:$0xf]  ;;  %v10152_v5 = vld [vmem:[%s18840_s5 + $0x278] sm:$0xf] }
 0x3db   :  { %7360 = vmatpush.bf16.msrb.mxu1 %v11157_v13  ;;  %v17403_v13 = vpop.f32.mrf.mxu2  ;;  %v11213_v6 = vor.u32 %v12474_v40, %v11210_v43 }
 0x3dd   :  { %7348 = vmatpush.bf16.msrb.mxu0 %v10905_v37  ;;  %7328 = vmatpush.bf16.msra.mxu2 %v10289_v51  ;;  %v10793_v37 = vor.u32 %v12369_v46, %v10790_v15  ;;  %v12418_v51 = vld [vmem:[%s18840_s5 + $0x904] sm:$0xf]  ;;  %v7098_v53 = vpop.f32.mrf.mxu0  ;;  %v12233_v46 = vld [vmem:[%s18840_s5 + $0x338] sm:$0xf0] }
 0x3de   :  { %7286 = vmatpush.bf16.msrb.mxu3 %v11489_v32  ;;  %v10989_v38 = vor.u32 %v12418_v51, %v10986_v48  ;;  %v12341_v15 = vld [vmem:[%s18840_s5 + $0x69c] sm:$0xf]  ;;  %v10678_v32 = vld [vmem:[%s18840_s5 + $0x6b4] sm:$0xf0]  ;;  %v10208_v51 = vld [vmem:[%s18840_s5 + $0x2e8] sm:$0xf]  ;;  %v10489_v53 = vor.u32 %v12296_v56, %v10488_v24 }
 0x3df   :  { %7361 = vmatpush.bf16.msrb.mxu1 %v11129_v41  ;;  %v11017_v41 = vor.u32 %v12425_v34, %v11014_v9  ;;  %v12467_v34 = vld [vmem:[%s18840_s5 + $0xa8c] sm:$0xf]  ;;  %v11182_v9 = vld [vmem:[%s18840_s5 + $0xaa4] sm:$0xf0]  ;;  %v10681_v45 = vor.u32 %v12341_v15, %v10678_v32  ;;  %v12226_v48 = vld [vmem:[%s18840_s5 + $0x300] sm:$0xf0] }
 0x3e0   :  { %7329 = vmatmul.bf16.vlgmr.msra.gmra.mxu2 %v16197_v2  ;;  %v12205_v15 = vld [vmem:[%s18840_s5 + $0x258] sm:$0xf0]  ;;  %v10376_v24 = vld [vmem:[%s18840_s5 + $0x438] sm:$0xf]  ;;  %v12268_v56 = vld [vmem:[%s18840_s5 + $0x450] sm:$0xf0] }
 0x3e1   :  { %7373 = vmatpush.bf16.msrb.mxu2 %v11381_v12  ;;  %7349 = vmatpush.bf16.msrb.mxu0 %v10877_v57  ;;  %v7111_v12 = vpop.f32.mrf.mxu1  ;;  %v12533_v57 = vld [vmem:[%s18840_s5 + $0xc98] sm:$0xf0] }
 0x3e2   :  { %7287 = vmatpush.bf16.msrb.mxu3 %v11461_v30  ;;  %v11433_v3 = vor.u32 %v12533_v57, %v11432_v52  ;;  %v11185_v30 = vor.u32 %v12467_v34, %v11182_v9  ;;  %v10650_v12 = vld [vmem:[%s18840_s5 + $0x67c] sm:$0xf0]  ;;  %v12289_v57 = vld [vmem:[%s18840_s5 + $0x4f8] sm:$0xf0]  ;;  %v10566_v9 = vld [vmem:[%s18840_s5 + $0x5d4] sm:$0xf0] }
 0x3e3   :  { %7362 = vmatpush.bf16.msrb.mxu1 %v11101_v0  ;;  %v11238_v0 = vld [vmem:[%s18840_s5 + $0xb14] sm:$0xf0]  ;;  %v7072_v60 = vpop.f32.mrf.mxu2  ;;  %v10460_v52 = vld [vmem:[%s18840_s5 + $0x4e0] sm:$0xf]  ;;  %v12313_v34 = vld [vmem:[%s18840_s5 + $0x5bc] sm:$0xf] }
 0x3e4   :  { %v11241_v11 = vor.u32 %v12481_v58, %v11238_v0  ;;  %v10209_v58 = vor.u32 %v12226_v48, %v10208_v51  ;;  %v12163_v0 = vld [vmem:[%s18840_s5 + $0x108] sm:$0xf0] }
 0x3e5   :  { %7374 = vmatpush.bf16.msrb.mxu2 %v11353_v49  ;;  %7350 = vmatpush.bf16.msrb.mxu0 %v10849_v8  ;;  %v10958_v49 = vld [vmem:[%s18840_s5 + $0x8e4] sm:$0xf0]  ;;  %v10040_v8 = vld [vmem:[%s18840_s5 + $0x198] sm:$0xf]  ;;  %v12219_v60 = vld [vmem:[%s18840_s5 + $0x2c8] sm:$0xf0] }
 0x3e6   :  { %v10961_v20 = vor.u32 %v12411_v31, %v10958_v49  ;;  %7288 = vmatpush.bf16.msrb.mxu3 %v11433_v3  ;;  %v12327_v31 = vld [vmem:[%s18840_s5 + $0x62c] sm:$0xf]  ;;  %v10622_v49 = vld [vmem:[%s18840_s5 + $0x644] sm:$0xf0] }
 0x3e7   :  { %7363 = vmatpush.bf16.msrb.mxu1 %v11073_v14  ;;  %v10264_v14 = vld [vmem:[%s18840_s5 + $0x358] sm:$0xf]  ;;  %v10432_v3 = vld [vmem:[%s18840_s5 + $0x4a8] sm:$0xf] }
 0x3e8   :  { %v10265_v29 = vor.u32 %v12240_v61, %v10264_v14  ;;  %v12156_v14 = vld [vmem:[%s18840_s5 + $0xd0] sm:$0xf0]  ;;  %v10625_v61 = vor.u32 %v12327_v31, %v10622_v49  ;;  %v10433_v43 = vor.u32 %v12282_v7, %v10432_v3  ;;  %v10510_v31 = vld [vmem:[%s18840_s5 + $0x564] sm:$0xf0]  ;;  %v10936_v49 = vld [vmem:[%s18840_s5 + $0x898] sm:$0xf] }
 0x3e9   :  { %7375 = vmatpush.bf16.msrb.mxu2 %v11325_v21  ;;  %7351 = vmatpush.bf16.msrb.mxu0 %v10821_v26  ;;  %v10041_v21 = vor.u32 %v12184_v10, %v10040_v8  ;;  %v12177_v26 = vld [vmem:[%s18840_s5 + $0x178] sm:$0xf0]  ;;  %v10181_v10 = vor.u32 %v12219_v60, %v10180_v59  ;;  %v12191_v59 = vld [vmem:[%s18840_s5 + $0x1e8] sm:$0xf0] }
 0x3ea   :  { %7289 = vmatpush.bf16.msrb.mxu3 %v11405_v22  ;;  %v12299_v60 = vld [vmem:[%s18840_s5 + $0x54c] sm:$0xf] }
 0x3eb   :  { %7364 = vmatpush.bf16.msrb.mxu1 %v11045_v23  ;;  %v10236_v23 = vld [vmem:[%s18840_s5 + $0x320] sm:$0xf] }
 0x3ec   :  { %v10237_v47 = vor.u32 %v12233_v46, %v10236_v23  ;;  %v10124_v46 = vld [vmem:[%s18840_s5 + $0x240] sm:$0xf] }
 0x3ed   :  { %7376 = vmatpush.bf16.msrb.mxu2 %v11297_v35  ;;  %7352 = vmatpush.bf16.msrb.mxu0 %v10793_v37  ;;  %v10013_v35 = vor.u32 %v12177_v26, %v10012_v50  ;;  %v7122_v37 = vpop.f32.mrf.mxu2  ;;  %v12275_v50 = vld [vmem:[%s18840_s5 + $0x488] sm:$0xf0] }
 0x3ee   :  { %7334 = vmatpush.bf16.msra.mxu3 %v10709_v27  ;;  %v17534_v44 = vadd.f32 %v7122_v37, %v17411_v16  ;;  %v12334_v16 = vld [vmem:[%s18840_s5 + $0x664] sm:$0xf]  ;;  %v9900_v27 = vld [vmem:[%s18840_s5 + $0x80] sm:$0xf]  ;;  %v10125_v37 = vor.u32 %v12205_v15, %v10124_v46  ;;  %v12565_v46 = vld [vmem:[%s18840_s5 + $0xd9c] sm:$0xf] }
 0x3ef   :  { %7365 = vmatpush.bf16.msrb.mxu1 %v11017_v41  ;;  %v12170_v41 = vld [vmem:[%s18840_s5 + $0x140] sm:$0xf0]  ;;  %7290 = vmatmul.bf16.vlgmr.msrb.gmra.mxu3 %v16890_v33  ;;  %v10653_v4 = vor.u32 %v12334_v16, %v10650_v12  ;;  %v10538_v12 = vld [vmem:[%s18840_s5 + $0x59c] sm:$0xf0]  ;;  %v11574_v15 = vld [vmem:[%s18840_s5 + $0xdb4] sm:$0xf0] }
 0x3f0   :  { %v12306_v16 = vld [vmem:[%s18840_s5 + $0x584] sm:$0xf] }
 0x3f1   :  { %7377 = vmatpush.bf16.msrb.mxu2 %v11269_v18  ;;  %7353 = vmatpush.bf16.msrb.mxu0 %v10765_v55  ;;  %v9985_v18 = vor.u32 %v12170_v41, %v9984_v17  ;;  %v9956_v55 = vld [vmem:[%s18840_s5 + $0xf0] sm:$0xf]  ;;  %v12142_v17 = vld [vmem:[%s18840_s5 + $0x60] sm:$0xf0]  ;;  %v10569_v41 = vor.u32 %v12313_v34, %v10566_v9  ;;  %v12247_v34 = vld [vmem:[%s18840_s5 + $0x3a8] sm:$0xf0] }
 0x3f2   :  { %7335 = vmatpush.bf16.msra.mxu3 %v10681_v45  ;;  %v9957_v62 = vor.u32 %v12163_v0, %v9956_v55  ;;  %v10096_v45 = vld [vmem:[%s18840_s5 + $0x208] sm:$0xf]  ;;  %v12135_v55 = vld [vmem:[%s18840_s5 + $0x28] sm:$0xf0] }
 0x3f3   :  { %7366 = vmatpush.bf16.msrb.mxu1 %v10989_v38  ;;  %v10461_v38 = vor.u32 %v12289_v57, %v10460_v52  ;;  %v12261_v57 = vld [vmem:[%s18840_s5 + $0x418] sm:$0xf0] }
 0x3f5   :  { %7378 = vmatpush.bf16.msrb.mxu2 %v11241_v11  ;;  %7354 = vmatpush.bf16.msrb.mxu0 %v10737_v19  ;;  %v7124_v8 = vpop.f32.mrf.mxu2  ;;  %v9928_v11 = vld [vmem:[%s18840_s5 + $0xb8] sm:$0xf]  ;;  %v12212_v19 = vld [vmem:[%s18840_s5 + $0x290] sm:$0xf0]  ;;  %v17594_v1 = vpop.f32.mrf.mxu0 }
 0x3f6   :  { %7336 = vmatpush.bf16.msra.mxu3 %v10653_v4  ;;  %v9929_v22 = vor.u32 %v12156_v14, %v9928_v11  ;;  %v10153_v26 = vor.u32 %v12212_v19, %v10152_v5  ;;  %v10068_v4 = vld [vmem:[%s18840_s5 + $0x1d0] sm:$0xf]  ;;  %v11160_v8 = vld [vmem:[%s18840_s5 + $0xa58] sm:$0xf]  ;;  %v12572_v11 = vld [vmem:[%s18840_s5 + $0xdd4] sm:$0xf] }
 0x3f7   :  { %7367 = vmatpush.bf16.msrb.mxu1 %v10961_v20  ;;  %v17596_v40 = vpop.f32.mrf.mxu1  ;;  %v12320_v20 = vld [vmem:[%s18840_s5 + $0x5f4] sm:$0xf]  ;;  %v10320_v5 = vld [vmem:[%s18840_s5 + $0x3c8] sm:$0xf]  ;;  %v12254_v19 = vld [vmem:[%s18840_s5 + $0x3e0] sm:$0xf0] }
 0x3f8   :  { %7355 = vmatmul.bf16.vlgmr.msrb.gmra.mxu0 %v16349_v25 }
 0x3f9   :  { %7399 = vmatpush.bf16.msra.mxu0 %v10041_v21  ;;  %7379 = vmatpush.bf16.msrb.mxu2 %v11213_v6  ;;  %v10594_v21 = vld [vmem:[%s18840_s5 + $0x60c] sm:$0xf0]  ;;  %v12149_v6 = vld [vmem:[%s18840_s5 + $0x98] sm:$0xf0] }
 0x3fa   :  { %7368 = vmatmul.bf16.vlgmr.msrb.gmra.mxu1 %v16360_v28  ;;  %7337 = vmatpush.bf16.msra.mxu3 %v10625_v61  ;;  %v10597_v23 = vor.u32 %v12320_v20, %v10594_v21  ;;  %v11602_v61 = vld [vmem:[%s18840_s5 + $0xdec] sm:$0xf0]  ;;  %v10513_v21 = vor.u32 %v12299_v60, %v10510_v31  ;;  %v11518_v31 = vld [vmem:[%s18840_s5 + $0xd44] sm:$0xf0] }
 0x3fb   :  { %7412 = vmatpush.bf16.msra.mxu1 %v10265_v29  ;;  %v10404_v29 = vld [vmem:[%s18840_s5 + $0x470] sm:$0xf] }
 0x3fc   :  { %v10405_v32 = vor.u32 %v12275_v50, %v10404_v29  ;;  %v10908_v29 = vld [vmem:[%s18840_s5 + $0x860] sm:$0xf]  ;;  %v12401_v50 = vld [vmem:[%s18840_s5 + $0x878] sm:$0xf0] }
 0x3fd   :  { %7400 = vmatpush.bf16.msra.mxu0 %v10013_v35  ;;  %7380 = vmatpush.bf16.msrb.mxu2 %v11185_v30  ;;  %v9901_v35 = vor.u32 %v12149_v6, %v9900_v27  ;;  %v12198_v30 = vld [vmem:[%s18840_s5 + $0x220] sm:$0xf0]  ;;  %v7150_v51 = vpop.f32.mrf.mxu0  ;;  %v10321_v27 = vor.u32 %v12254_v19, %v10320_v5  ;;  %v11132_v6 = vld [vmem:[%s18840_s5 + $0xa20] sm:$0xf]  ;;  %v10909_v9 = vor.u32 %v12401_v50, %v10908_v29  ;;  %v11048_v19 = vld [vmem:[%s18840_s5 + $0x978] sm:$0xf] }
 0x3fe   :  { %7338 = vmatpush.bf16.msra.mxu3 %v10597_v23  ;;  %v10097_v0 = vor.u32 %v12198_v30, %v10096_v45  ;;  %v12457_v23 = vld [vmem:[%s18840_s5 + $0xa38] sm:$0xf0]  ;;  %v11104_v30 = vld [vmem:[%s18840_s5 + $0x9e8] sm:$0xf]  ;;  %v12450_v51 = vld [vmem:[%s18840_s5 + $0xa00] sm:$0xf0] }
 0x3ff   :  { %7413 = vmatpush.bf16.msra.mxu1 %v10237_v47  ;;  %v9872_v47 = vld [vmem:[%s18840_s5 + $0x48] sm:$0xf]  ;;  %v7163_v48 = vpop.f32.mrf.mxu1  ;;  %v11490_v29 = vld [vmem:[%s18840_s5 + $0xd0c] sm:$0xf0] }
 0x400   :  { %7381 = vmatmul.bf16.vlgmr.msrb.gmra.mxu2 %v16524_v63  ;;  %v9873_v52 = vor.u32 %v12142_v17, %v9872_v47  ;;  %v12394_v47 = vld [vmem:[%s18840_s5 + $0x840] sm:$0xf0] }
 0x401   :  { %7425 = vmatpush.bf16.msra.mxu2 %v10489_v53  ;;  %7401 = vmatpush.bf16.msra.mxu0 %v9985_v18  ;;  %v10377_v53 = vor.u32 %v12268_v56, %v10376_v24  ;;  %v10348_v18 = vld [vmem:[%s18840_s5 + $0x400] sm:$0xf]  ;;  %v12520_v24 = vld [vmem:[%s18840_s5 + $0xc30] sm:$0xf0]  ;;  %v11133_v56 = vor.u32 %v12457_v23, %v11132_v6  ;;  %v11300_v6 = vld [vmem:[%s18840_s5 + $0xb70] sm:$0xf] }
 0x402   :  { %7339 = vmatpush.bf16.msra.mxu3 %v10569_v41  ;;  %v10349_v7 = vor.u32 %v12261_v57, %v10348_v18  ;;  %v11577_v41 = vor.u32 %v12565_v46, %v11574_v15  ;;  %v11356_v18 = vld [vmem:[%s18840_s5 + $0xbe0] sm:$0xf]  ;;  %v11105_v57 = vor.u32 %v12450_v51, %v11104_v30  ;;  %v12499_v23 = vld [vmem:[%s18840_s5 + $0xb88] sm:$0xf0]  ;;  %v7071_v46 = vadd.f32 %v17403_v13, %v17210_v36  ;;  %v12429_v36 = vld [vmem:[%s18840_s5 + $0x958] sm:$0xf0] }
 0x403   :  { %7414 = vmatpush.bf16.msra.mxu1 %v10209_v58  ;;  %v9844_v58 = vld [vmem:[%s18840_s5 + $0x10] sm:$0xf]  ;;  %v17682_v3 = vpop.f32.mrf.mxu2  ;;  %v12492_v30 = vld [vmem:[%s18840_s5 + $0xb50] sm:$0xf0] }
 0x404   :  { %v9845_v14 = vor.u32 %v12135_v55, %v9844_v58  ;;  %v10852_v58 = vld [vmem:[%s18840_s5 + $0x7f0] sm:$0xf]  ;;  %v12387_v55 = vld [vmem:[%s18840_s5 + $0x808] sm:$0xf0] }
 0x405   :  { %7426 = vmatpush.bf16.msra.mxu2 %v10461_v38  ;;  %7402 = vmatpush.bf16.msra.mxu0 %v9957_v62  ;;  %v10541_v38 = vor.u32 %v12306_v16, %v10538_v12  ;;  %v12408_v62 = vld [vmem:[%s18840_s5 + $0x8b0] sm:$0xf0]  ;;  %v11546_v16 = vld [vmem:[%s18840_s5 + $0xd7c] sm:$0xf0] }
 0x406   :  { %v10937_v20 = vor.u32 %v12408_v62, %v10936_v49  ;;  %v17780_v49 = vld [vmem:[%s18841_s6] sm:$0x7f] }
 0x407   :  { %7415 = vmatpush.bf16.msra.mxu1 %v10181_v10  ;;  %v12464_v10 = vld [vmem:[%s18840_s5 + $0xa70] sm:$0xf0]  ;;  %7340 = vmatpush.bf16.msra.mxu3 %v10541_v38  ;;  %v12551_v38 = vld [vmem:[%s18840_s5 + $0xd2c] sm:$0xf]  ;;  %v4667_v62 = vperm.slane %v17780_v49, 2 }
 0x408   :  { %v11521_v5 = vor.u32 %v12551_v38, %v11518_v31  ;;  %v12485_v31 = vld [vmem:[%s18840_s5 + $0xb18] sm:$0xf0] }
 0x409   :  { %7427 = vmatpush.bf16.msra.mxu2 %v10433_v43  ;;  %7403 = vmatpush.bf16.msra.mxu0 %v9929_v22  ;;  %v10069_v43 = vor.u32 %v12191_v59, %v10068_v4  ;;  %v11161_v22 = vor.u32 %v12464_v10, %v11160_v8  ;;  %v11076_v4 = vld [vmem:[%s18840_s5 + $0x9b0] sm:$0xf]  ;;  %v12443_v59 = vld [vmem:[%s18840_s5 + $0x9c8] sm:$0xf0]  ;;  %v11328_v8 = vld [vmem:[%s18840_s5 + $0xba8] sm:$0xf] }
 0x40a   :  { %v12506_v10 = vld [vmem:[%s18840_s5 + $0xbc0] sm:$0xf0] }
 0x40b   :  { %7416 = vmatpush.bf16.msra.mxu1 %v10153_v26  ;;  %v11605_v26 = vor.u32 %v12572_v11, %v11602_v61  ;;  %7341 = vmatpush.bf16.msra.mxu3 %v10513_v21  ;;  %v7176_v17 = vpop.f32.mrf.mxu2  ;;  %v11077_v11 = vor.u32 %v12443_v59, %v11076_v4  ;;  %v12380_v61 = vld [vmem:[%s18840_s5 + $0x7d0] sm:$0xf0]  ;;  %v11329_v21 = vor.u32 %v12506_v10, %v11328_v8  ;;  %v11434_v4 = vld [vmem:[%s18840_s5 + $0xc9c] sm:$0xf0]  ;;  %v10964_v10 = vld [vmem:[%s18840_s5 + $0x8d0] sm:$0xf] }
 0x40c   :  { %v11462_v17 = vld [vmem:[%s18840_s5 + $0xcd4] sm:$0xf0]  ;;  %v11244_v59 = vld [vmem:[%s18840_s5 + $0xb00] sm:$0xf] }
 0x40d   :  { %7428 = vmatpush.bf16.msra.mxu2 %v10405_v32  ;;  %7404 = vmatpush.bf16.msra.mxu0 %v9901_v35  ;;  %v10292_v32 = vld [vmem:[%s18840_s5 + $0x390] sm:$0xf]  ;;  %v11384_v35 = vld [vmem:[%s18840_s5 + $0xc18] sm:$0xf] }
 0x40e   :  { %v10293_v45 = vor.u32 %v12247_v34, %v10292_v32  ;;  %v11385_v48 = vor.u32 %v12520_v24, %v11384_v35  ;;  %7342 = vmatmul.bf16.vlgmr.msra.gmra.mxu3 %v16201_v54  ;;  %v10796_v32 = vld [vmem:[%s18840_s5 + $0x780] sm:$0xf]  ;;  %v12373_v34 = vld [vmem:[%s18840_s5 + $0x798] sm:$0xf0]  ;;  %v7083_v35 = vpop.f32.mrf.mxu3 }
 0x40f   :  { %7417 = vmatpush.bf16.msra.mxu1 %v10125_v37  ;;  %v10880_v37 = vld [vmem:[%s18840_s5 + $0x828] sm:$0xf]  ;;  %7386 = vmatpush.bf16.msrb.mxu3 %v11605_v26  ;;  %v7084_v13 = vadd.f32 %v7083_v35, %v7071_v46  ;;  %v12478_v46 = vld [vmem:[%s18840_s5 + $0xae0] sm:$0xf0] }
 0x410   :  { %v10881_v12 = vor.u32 %v12394_v47, %v10880_v37  ;;  %v11301_v37 = vor.u32 %v12499_v23, %v11300_v6  ;;  %v12537_v47 = vld [vmem:[%s18840_s5 + $0xcbc] sm:$0xf]  ;;  %v12352_v6 = vld [vmem:[%s18840_s5 + $0x6f0] sm:$0xf0]  ;;  %v11216_v23 = vld [vmem:[%s18840_s5 + $0xac8] sm:$0xf] }
 0x411   :  { %7429 = vmatpush.bf16.msra.mxu2 %v10377_v53  ;;  %7405 = vmatpush.bf16.msra.mxu0 %v9873_v52  ;;  %v12558_v53 = vld [vmem:[%s18840_s5 + $0xd64] sm:$0xf]  ;;  %v12513_v52 = vld [vmem:[%s18840_s5 + $0xbf8] sm:$0xf0]  ;;  %v7711_v51 = vsub.f32 0.0, %v7084_v13 }
 0x412   :  { %v11357_v60 = vor.u32 %v12513_v52, %v11356_v18  ;;  %v10992_v18 = vld [vmem:[%s18840_s5 + $0x908] sm:$0xf]  ;;  %v12422_v52 = vld [vmem:[%s18840_s5 + $0x920] sm:$0xf0] }
 0x413   :  { %7418 = vmatpush.bf16.msra.mxu1 %v10097_v0  ;;  %7387 = vmatpush.bf16.msrb.mxu3 %v11577_v41  ;;  %v11549_v0 = vor.u32 %v12558_v53, %v11546_v16  ;;  %v10797_v41 = vor.u32 %v12373_v34, %v10796_v32  ;;  %v10768_v53 = vld [vmem:[%s18840_s5 + $0x748] sm:$0xf]  ;;  %v12366_v16 = vld [vmem:[%s18840_s5 + $0x760] sm:$0xf0]  ;;  %v10993_v8 = vor.u32 %v12422_v52, %v10992_v18 }
 0x414   :  { %v10769_v38 = vor.u32 %v12366_v16, %v10768_v53  ;;  %v12230_v13 = vld [vmem:[%s18840_s5 + $0x324] sm:$0xf]  ;;  %v12293_v16 = vld [vmem:[%s18840_s5 + $0x51c] sm:$0xf] }
 0x415   :  { %7430 = vmatpush.bf16.msra.mxu2 %v10349_v7  ;;  %7406 = vmatpush.bf16.msra.mxu0 %v9845_v14  ;;  %v10853_v7 = vor.u32 %v12387_v55, %v10852_v58  ;;  %v10824_v14 = vld [vmem:[%s18840_s5 + $0x7b8] sm:$0xf]  ;;  %v7718_v58 = vmul.f32 1.442695, %v7711_v51  ;;  %v11188_v51 = vld [vmem:[%s18840_s5 + $0xa90] sm:$0xf] }
 0x417   :  { %7419 = vmatpush.bf16.msra.mxu1 %v10069_v43  ;;  %7388 = vmatpush.bf16.msrb.mxu3 %v11549_v0  ;;  %v12436_v43 = vld [vmem:[%s18840_s5 + $0x990] sm:$0xf0]  ;;  %v7213_v26 = vpop.f32.mrf.mxu1  ;;  %12579 = vpow2.f32 %v7718_v58  ;;  %v9986_v58 = vld [vmem:[%s18840_s5 + $0x144] sm:$0xf0] }
 0x418   :  { %7407 = vmatmul.bf16.vlgmr.msra.gmra.mxu0 %v16160_v39  ;;  %v11049_v15 = vor.u32 %v12436_v43, %v11048_v19  ;;  %v11406_v19 = vld [vmem:[%s18840_s5 + $0xc64] sm:$0xf0]  ;;  %v12181_v43 = vld [vmem:[%s18840_s5 + $0x19c] sm:$0xf] }
 0x419   :  { %7451 = vmatpush.bf16.msrb.mxu0 %v10937_v20  ;;  %7431 = vmatpush.bf16.msra.mxu2 %v10321_v27  ;;  %v7200_v20 = vpop.f32.mrf.mxu0  ;;  %v10825_v27 = vor.u32 %v12380_v61, %v10824_v14  ;;  %v12523_v14 = vld [vmem:[%s18840_s5 + $0xc4c] sm:$0xf]  ;;  %v7085_v61 = vpop.f32.mrf.mxu3 }
 0x41a   :  { %7420 = vmatmul.bf16.vlgmr.msra.gmra.mxu1 %v16170_v42  ;;  %v7201_v50 = vadd.f32 %v7200_v20, %v4667_v62  ;;  %v10740_v62 = vld [vmem:[%s18840_s5 + $0x710] sm:$0xf]  ;;  %v10042_v20 = vld [vmem:[%s18840_s5 + $0x1b4] sm:$0xf0]  ;;  %v11409_v35 = vor.u32 %v12523_v14, %v11406_v19  ;;  %v12160_v14 = vld [vmem:[%s18840_s5 + $0xf4] sm:$0xf] }
 0x41b   :  { %7464 = vmatpush.bf16.msrb.mxu1 %v11161_v22  ;;  %v12544_v22 = vld [vmem:[%s18840_s5 + $0xcf4] sm:$0xf]  ;;  %7389 = vmatpush.bf16.msrb.mxu3 %v11521_v5  ;;  %v10045_v34 = vor.u32 %v12181_v43, %v10042_v20  ;;  %v9958_v61 = vld [vmem:[%s18840_s5 + $0x10c] sm:$0xf0] }
 0x41c   :  { %v11493_v24 = vor.u32 %v12544_v22, %v11490_v29  ;;  %v12237_v22 = vld [vmem:[%s18840_s5 + $0x35c] sm:$0xf]  ;;  %v10266_v29 = vld [vmem:[%s18840_s5 + $0x374] sm:$0xf0]  ;;  %v12216_v43 = vld [vmem:[%s18840_s5 + $0x2b4] sm:$0xf] }
 0x41d   :  { %7452 = vmatpush.bf16.msrb.mxu0 %v10909_v9  ;;  %7432 = vmatpush.bf16.msra.mxu2 %v10293_v45  ;;  %v7214_v9 = vadd.f32 %v7213_v26, %v7201_v50  ;;  %v11272_v45 = vld [vmem:[%s18840_s5 + $0xb38] sm:$0xf]  ;;  %v10182_v20 = vld [vmem:[%s18840_s5 + $0x2cc] sm:$0xf0] }
 0x41e   :  { %v11273_v0 = vor.u32 %v12492_v30, %v11272_v45  ;;  %v10712_v50 = vld [vmem:[%s18840_s5 + $0x6d8] sm:$0xf]  ;;  %v12345_v45 = vld [vmem:[%s18840_s5 + $0x6b8] sm:$0xf0] }
 0x41f   :  { %7465 = vmatpush.bf16.msrb.mxu1 %v11133_v56  ;;  %v11020_v56 = vld [vmem:[%s18840_s5 + $0x940] sm:$0xf]  ;;  %7390 = vmatpush.bf16.msrb.mxu3 %v11493_v24  ;;  %v10269_v24 = vor.u32 %v12237_v22, %v10266_v29  ;;  %v10628_v29 = vld [vmem:[%s18840_s5 + $0x630] sm:$0xf] }
 0x420   :  { %7433 = vmatmul.bf16.vlgmr.msra.gmra.mxu2 %v16197_v2 }
 0x421   :  { %7477 = vmatpush.bf16.msrb.mxu2 %v11385_v48  ;;  %7453 = vmatpush.bf16.msrb.mxu0 %v10881_v12  ;;  %v11021_v48 = vor.u32 %v12429_v36, %v11020_v56  ;;  %v11465_v12 = vor.u32 %v12537_v47, %v11462_v17  ;;  %v7202_v55 = vpop.f32.mrf.mxu0  ;;  %v12174_v56 = vld [vmem:[%s18840_s5 + $0x164] sm:$0xf]  ;;  %v10014_v36 = vld [vmem:[%s18840_s5 + $0x17c] sm:$0xf0]  ;;  %v11217_v47 = vor.u32 %v12478_v46, %v11216_v23  ;;  %v7135_v18 = vpop.f32.mrf.mxu3  ;;  %v12153_v46 = vld [vmem:[%s18840_s5 + $0xbc] sm:$0xf] }
 0x422   :  { %v10238_v17 = vld [vmem:[%s18840_s5 + $0x33c] sm:$0xf0]  ;;  %v10017_v53 = vor.u32 %v12174_v56, %v10014_v36  ;;  %v10185_v23 = vor.u32 %v12216_v43, %v10182_v20  ;;  %v10154_v56 = vld [vmem:[%s18840_s5 + $0x294] sm:$0xf0] }
 0x423   :  { %7466 = vmatpush.bf16.msrb.mxu1 %v11105_v57  ;;  %v12530_v57 = vld [vmem:[%s18840_s5 + $0xc84] sm:$0xf]  ;;  %7391 = vmatpush.bf16.msrb.mxu3 %v11465_v12  ;;  %v7226_v26 = vpop.f32.mrf.mxu2  ;;  %v10490_v12 = vld [vmem:[%s18840_s5 + $0x534] sm:$0xf0]  ;;  %v10241_v52 = vor.u32 %v12230_v13, %v10238_v17  ;;  %v12272_v17 = vld [vmem:[%s18840_s5 + $0x474] sm:$0xf] }
 0x424   :  { %v11437_v5 = vor.u32 %v12530_v57, %v11434_v4  ;;  %v12167_v57 = vld [vmem:[%s18840_s5 + $0x12c] sm:$0xf]  ;;  %v10600_v13 = vld [vmem:[%s18840_s5 + $0x5f8] sm:$0xf] }
 0x425   :  { %7478 = vmatpush.bf16.msrb.mxu2 %v11357_v60  ;;  %7454 = vmatpush.bf16.msrb.mxu0 %v10853_v7  ;;  %v7215_v60 = vpop.f32.mrf.mxu1  ;;  %v12359_v7 = vld [vmem:[%s18840_s5 + $0x728] sm:$0xf0] }
 0x426   :  { %v12223_v4 = vld [vmem:[%s18840_s5 + $0x2ec] sm:$0xf] }
 0x427   :  { %7467 = vmatpush.bf16.msrb.mxu1 %v11077_v11  ;;  %v12415_v11 = vld [vmem:[%s18840_s5 + $0x8e8] sm:$0xf0]  ;;  %7392 = vmatpush.bf16.msrb.mxu3 %v11437_v5  ;;  %v7136_v5 = vadd.f32 %v7135_v18, %v17534_v44 }
 0x428   :  { %v10965_v32 = vor.u32 %v12415_v11, %v10964_v10  ;;  %v10462_v10 = vld [vmem:[%s18840_s5 + $0x4fc] sm:$0xf0]  ;;  %v12331_v44 = vld [vmem:[%s18840_s5 + $0x648] sm:$0xf0] }
 0x429   :  { %7479 = vmatpush.bf16.msrb.mxu2 %v11329_v21  ;;  %7455 = vmatpush.bf16.msrb.mxu0 %v10825_v27  ;;  %v11245_v21 = vor.u32 %v12485_v31, %v11244_v59  ;;  %v10741_v27 = vor.u32 %v12359_v7, %v10740_v62  ;;  %v10210_v59 = vld [vmem:[%s18840_s5 + $0x304] sm:$0xf0]  ;;  %v12338_v62 = vld [vmem:[%s18840_s5 + $0x680] sm:$0xf0]  ;;  %v9989_v7 = vor.u32 %v12167_v57, %v9986_v58  ;;  %v12317_v57 = vld [vmem:[%s18840_s5 + $0x5d8] sm:$0xf0] }
 0x42a   :  { %v10656_v31 = vld [vmem:[%s18840_s5 + $0x668] sm:$0xf]  ;;  %v10213_v11 = vor.u32 %v12223_v4, %v10210_v59  ;;  %v12265_v58 = vld [vmem:[%s18840_s5 + $0x43c] sm:$0xf]  ;;  %v12139_v4 = vld [vmem:[%s18840_s5 + $0x4c] sm:$0xf] }
 0x42b   :  { %7468 = vmatpush.bf16.msrb.mxu1 %v11049_v15  ;;  %v17906_v15 = vadd.f32 %v7226_v26, %v7214_v9  ;;  %v12580_v9 = vpop.eup %12579  ;;  %7393 = vmatpush.bf16.msrb.mxu3 %v11409_v35  ;;  %v7228_v60 = vpop.f32.mrf.mxu2  ;;  %v10657_v19 = vor.u32 %v12338_v62, %v10656_v31  ;;  %v12279_v26 = vld [vmem:[%s18840_s5 + $0x4ac] sm:$0xf]  ;;  %v10629_v35 = vor.u32 %v12331_v44, %v10628_v29  ;;  %v9874_v59 = vld [vmem:[%s18840_s5 + $0x64] sm:$0xf0]  ;;  %v10070_v29 = vld [vmem:[%s18840_s5 + $0x1ec] sm:$0xf0] }
 0x42c   :  { %v7732_v30 = vadd.f32 1.0, %v12580_v9  ;;  %v12195_v60 = vld [vmem:[%s18840_s5 + $0x20c] sm:$0xf]  ;;  %v10098_v62 = vld [vmem:[%s18840_s5 + $0x224] sm:$0xf0]  ;;  %v9877_v20 = vor.u32 %v12139_v4, %v9874_v59 }
 0x42d   :  { %7480 = vmatpush.bf16.msrb.mxu2 %v11301_v37  ;;  %7456 = vmatpush.bf16.msrb.mxu0 %v10797_v41  ;;  %v10713_v37 = vor.u32 %v12352_v6, %v10712_v50  ;;  %v10684_v41 = vld [vmem:[%s18840_s5 + $0x6a0] sm:$0xf]  ;;  %v9961_v50 = vor.u32 %v12160_v14, %v9958_v61  ;;  %v7137_v6 = vpop.f32.mrf.mxu3  ;;  %v12132_v61 = vld [vmem:[%s18840_s5 + $0x14] sm:$0xf]  ;;  %v10101_v44 = vor.u32 %v12195_v60, %v10098_v62  ;;  %v12517_v59 = vld [vmem:[%s18840_s5 + $0xc1c] sm:$0xf] }
 0x42e   :  { %12581 = vrcp.f32 %v7732_v30  ;;  %v10685_v55 = vor.u32 %v12345_v45, %v10684_v41  ;;  %7394 = vmatmul.bf16.vlgmr.msrb.gmra.mxu3 %v16890_v33  ;;  %v10406_v41 = vld [vmem:[%s18840_s5 + $0x48c] sm:$0xf0]  ;;  %v12146_v30 = vld [vmem:[%s18840_s5 + $0x84] sm:$0xf]  ;;  %v10350_v14 = vld [vmem:[%s18840_s5 + $0x41c] sm:$0xf0] }
 0x42f   :  { %7469 = vmatpush.bf16.msrb.mxu1 %v11021_v48  ;;  %v12471_v48 = vld [vmem:[%s18840_s5 + $0xaa8] sm:$0xf0]  ;;  %7438 = vmatpush.bf16.msra.mxu3 %v10713_v37  ;;  %v10409_v18 = vor.u32 %v12272_v17, %v10406_v41  ;;  %v10322_v17 = vld [vmem:[%s18840_s5 + $0x3e4] sm:$0xf0]  ;;  %v11386_v60 = vld [vmem:[%s18840_s5 + $0xc34] sm:$0xf0] }
 0x430   :  { %v10882_v62 = vld [vmem:[%s18840_s5 + $0x844] sm:$0xf0] }
 0x431   :  { %7481 = vmatpush.bf16.msrb.mxu2 %v11273_v0  ;;  %7457 = vmatpush.bf16.msrb.mxu0 %v10769_v38  ;;  %v11189_v0 = vor.u32 %v12471_v48, %v11188_v51  ;;  %v10493_v38 = vor.u32 %v12293_v16, %v10490_v12  ;;  %v9902_v51 = vld [vmem:[%s18840_s5 + $0x9c] sm:$0xf0]  ;;  %v12202_v16 = vld [vmem:[%s18840_s5 + $0x244] sm:$0xf] }
 0x432   :  { %v10126_v12 = vld [vmem:[%s18840_s5 + $0x25c] sm:$0xf0] }
 0x433   :  { %7470 = vmatpush.bf16.msrb.mxu1 %v10993_v8  ;;  %v12286_v8 = vld [vmem:[%s18840_s5 + $0x4e4] sm:$0xf]  ;;  %7439 = vmatpush.bf16.msra.mxu3 %v10685_v55  ;;  %v10378_v55 = vld [vmem:[%s18840_s5 + $0x454] sm:$0xf0] }
 0x434   :  { %v10465_v22 = vor.u32 %v12286_v8, %v10462_v10  ;;  %v12310_v8 = vld [vmem:[%s18840_s5 + $0x5a0] sm:$0xf0] }
 0x435   :  { %7482 = vmatpush.bf16.msrb.mxu2 %v11245_v21  ;;  %7458 = vmatpush.bf16.msrb.mxu0 %v10741_v27  ;;  %v12582_v21 = vpop.eup %12581  ;;  %v10434_v27 = vld [vmem:[%s18840_s5 + $0x4c4] sm:$0xf0]  ;;  %v18010_v9 = vpop.f32.mrf.mxu0 }
 0x436   :  { %7746 = vst [vmem:[#allocation2] sm:$0xff] %v12582_v21  ;;  %v10437_v36 = vor.u32 %v12279_v26, %v10434_v27  ;;  %v7187_v10 = vpop.f32.mrf.mxu3  ;;  %v9846_v21 = vld [vmem:[%s18840_s5 + $0x2c] sm:$0xf0]  ;;  %v12303_v26 = vld [vmem:[%s18840_s5 + $0x568] sm:$0xf0] }
 0x437   :  { %7471 = vmatpush.bf16.msrb.mxu1 %v10965_v32  ;;  %v9930_v32 = vld [vmem:[%s18840_s5 + $0xd4] sm:$0xf0]  ;;  %7440 = vmatpush.bf16.msra.mxu3 %v10657_v19  ;;  %v18012_v37 = vpop.f32.mrf.mxu1  ;;  %v12405_v27 = vld [vmem:[%s18840_s5 + $0x89c] sm:$0xf] }
 0x438   :  { %7459 = vmatmul.bf16.vlgmr.msrb.gmra.mxu0 %v16349_v25 }
 0x439   :  { %7503 = vmatpush.bf16.msra.mxu0 %v10045_v34  ;;  %7483 = vmatpush.bf16.msrb.mxu2 %v11217_v47  ;;  %v7149_v34 = vadd.f32 %v17594_v1, %v7136_v5  ;;  %v12324_v1 = vld [vmem:[%s18840_s5 + $0x610] sm:$0xf0]  ;;  %v9933_v47 = vor.u32 %v12153_v46, %v9930_v32  ;;  %v10938_v46 = vld [vmem:[%s18840_s5 + $0x8b4] sm:$0xf0]  ;;  %v12461_v32 = vld [vmem:[%s18840_s5 + $0xa5c] sm:$0xf] }
 0x43a   :  { %7472 = vmatmul.bf16.vlgmr.msrb.gmra.mxu1 %v16360_v28  ;;  %v10601_v48 = vor.u32 %v12324_v1, %v10600_v13  ;;  %v9849_v1 = vor.u32 %v12132_v61, %v9846_v21  ;;  %v11389_v61 = vor.u32 %v12517_v59, %v11386_v60  ;;  %v12510_v21 = vld [vmem:[%s18840_s5 + $0xbe4] sm:$0xf]  ;;  %v11022_v59 = vld [vmem:[%s18840_s5 + $0x95c] sm:$0xf0] }
 0x43b   :  { %7516 = vmatpush.bf16.msra.mxu1 %v10269_v24  ;;  %v12209_v24 = vld [vmem:[%s18840_s5 + $0x27c] sm:$0xf]  ;;  %7441 = vmatpush.bf16.msra.mxu3 %v10629_v35  ;;  %v11162_v35 = vld [vmem:[%s18840_s5 + $0xa74] sm:$0xf0] }
 0x43c   :  { %v10157_v45 = vor.u32 %v12209_v24, %v10154_v56  ;;  %v11608_v24 = vld [vmem:[%s18840_s5 + $0xdd8] sm:$0xf]  ;;  %v12576_v56 = vld [vmem:[%s18840_s5 + $0xdf0] sm:$0xf0] }
 0x43d   :  { %7504 = vmatpush.bf16.msra.mxu0 %v10017_v53  ;;  %7484 = vmatpush.bf16.msrb.mxu2 %v11189_v0  ;;  %v7162_v53 = vadd.f32 %v17596_v40, %v7149_v34  ;;  %v9905_v40 = vor.u32 %v12146_v30, %v9902_v51  ;;  %v10129_v0 = vor.u32 %v12202_v16, %v10126_v12  ;;  %v7254_v19 = vpop.f32.mrf.mxu0 }
 0x43e   :  { %v11165_v51 = vor.u32 %v12461_v32, %v11162_v35  ;;  %v7189_v16 = vpop.f32.mrf.mxu3  ;;  %v11609_v12 = vor.u32 %v12576_v56, %v11608_v24  ;;  %v12562_v19 = vld [vmem:[%s18840_s5 + $0xd80] sm:$0xf0]  ;;  %v12555_v32 = vld [vmem:[%s18840_s5 + $0xd48] sm:$0xf0]  ;;  %v11330_v24 = vld [vmem:[%s18840_s5 + $0xbc4] sm:$0xf0] }
 0x43f   :  { %7517 = vmatpush.bf16.msra.mxu1 %v10241_v52  ;;  %v10572_v52 = vld [vmem:[%s18840_s5 + $0x5c0] sm:$0xf]  ;;  %7442 = vmatpush.bf16.msra.mxu3 %v10601_v48  ;;  %v7267_v43 = vpop.f32.mrf.mxu1  ;;  %v12398_v48 = vld [vmem:[%s18840_s5 + $0x864] sm:$0xf]  ;;  %v12503_v35 = vld [vmem:[%s18840_s5 + $0xbac] sm:$0xf] }
 0x440   :  { %7485 = vmatmul.bf16.vlgmr.msrb.gmra.mxu2 %v16524_v63  ;;  %v10573_v31 = vor.u32 %v12317_v57, %v10572_v52  ;;  %v12454_v52 = vld [vmem:[%s18840_s5 + $0xa24] sm:$0xf]  ;;  %v11134_v57 = vld [vmem:[%s18840_s5 + $0xa3c] sm:$0xf0]  ;;  %v4668_v56 = vperm.slane %v17780_v49, 3  ;;  %v11333_v49 = vor.u32 %v12503_v35, %v11330_v24 }
 0x441   :  { %7529 = vmatpush.bf16.msra.mxu2 %v10493_v38  ;;  %7505 = vmatpush.bf16.msra.mxu0 %v9989_v7  ;;  %v7175_v38 = vadd.f32 %v17682_v3, %v7162_v53  ;;  %v10544_v7 = vld [vmem:[%s18840_s5 + $0x588] sm:$0xf]  ;;  %v12258_v3 = vld [vmem:[%s18840_s5 + $0x404] sm:$0xf]  ;;  %v10910_v53 = vld [vmem:[%s18840_s5 + $0x87c] sm:$0xf0] }
 0x442   :  { %v10353_v34 = vor.u32 %v12258_v3, %v10350_v14  ;;  %v10913_v4 = vor.u32 %v12398_v48, %v10910_v53  ;;  %v11412_v35 = vld [vmem:[%s18840_s5 + $0xc50] sm:$0xf] }
 0x443   :  { %7518 = vmatpush.bf16.msra.mxu1 %v10213_v11  ;;  %v10381_v11 = vor.u32 %v12265_v58, %v10378_v55  ;;  %v7188_v5 = vadd.f32 %v7187_v10, %v7175_v38  ;;  %7443 = vmatpush.bf16.msra.mxu3 %v10573_v31  ;;  %v18106_v13 = vpop.f32.mrf.mxu2  ;;  %v12569_v58 = vld [vmem:[%s18840_s5 + $0xdb8] sm:$0xf0]  ;;  %v12244_v55 = vld [vmem:[%s18840_s5 + $0x394] sm:$0xf]  ;;  %v11137_v38 = vor.u32 %v12454_v52, %v11134_v57  ;;  %v12391_v31 = vld [vmem:[%s18840_s5 + $0x82c] sm:$0xf] }
 0x444   :  { %v12447_v10 = vld [vmem:[%s18840_s5 + $0x9ec] sm:$0xf]  ;;  %v11302_v52 = vld [vmem:[%s18840_s5 + $0xb8c] sm:$0xf0] }
 0x445   :  { %7530 = vmatpush.bf16.msra.mxu2 %v10465_v22  ;;  %7506 = vmatpush.bf16.msra.mxu0 %v9961_v50  ;;  %v12188_v22 = vld [vmem:[%s18840_s5 + $0x1d4] sm:$0xf]  ;;  %v10516_v50 = vld [vmem:[%s18840_s5 + $0x550] sm:$0xf]  ;;  %v7712_v6 = vsub.f32 0.0, %v7188_v5 }
 0x446   :  { %v10073_v41 = vor.u32 %v12188_v22, %v10070_v29  ;;  %v10517_v30 = vor.u32 %v12303_v26, %v10516_v50  ;;  %v11552_v5 = vld [vmem:[%s18840_s5 + $0xd68] sm:$0xf]  ;;  %v11358_v22 = vld [vmem:[%s18840_s5 + $0xbfc] sm:$0xf0]  ;;  %v10854_v50 = vld [vmem:[%s18840_s5 + $0x80c] sm:$0xf0] }
 0x447   :  { %7519 = vmatpush.bf16.msra.mxu1 %v10185_v23  ;;  %v10545_v23 = vor.u32 %v12310_v8, %v10544_v7  ;;  %v11553_v26 = vor.u32 %v12562_v19, %v11552_v5  ;;  %v12419_v5 = vld [vmem:[%s18840_s5 + $0x90c] sm:$0xf]  ;;  %v10994_v19 = vld [vmem:[%s18840_s5 + $0x924] sm:$0xf0] }
 0x449   :  { %7531 = vmatpush.bf16.msra.mxu2 %v10437_v36  ;;  %7507 = vmatpush.bf16.msra.mxu0 %v9933_v47  ;;  %v7720_v36 = vmul.f32 1.442695, %v7712_v6  ;;  %v12251_v47 = vld [vmem:[%s18840_s5 + $0x3cc] sm:$0xf]  ;;  %v11078_v6 = vld [vmem:[%s18840_s5 + $0x9cc] sm:$0xf0] }
 0x44a   :  { %7444 = vmatpush.bf16.msra.mxu3 %v10545_v23  ;;  %v11361_v23 = vor.u32 %v12510_v21, %v11358_v22  ;;  %v11440_v21 = vld [vmem:[%s18840_s5 + $0xc88] sm:$0xf]  ;;  %v12534_v22 = vld [vmem:[%s18840_s5 + $0xca0] sm:$0xf0] }
 0x44b   :  { %7520 = vmatpush.bf16.msra.mxu1 %v10157_v45  ;;  %v10941_v45 = vor.u32 %v12405_v27, %v10938_v46  ;;  %12583 = vpow2.f32 %v7720_v36  ;;  %v7280_v14 = vpop.f32.mrf.mxu2  ;;  %v12440_v27 = vld [vmem:[%s18840_s5 + $0x9b4] sm:$0xf]  ;;  %v11524_v46 = vld [vmem:[%s18840_s5 + $0xd30] sm:$0xf]  ;;  %v11441_v24 = vor.u32 %v12534_v22, %v11440_v21  ;;  %v12227_v21 = vld [vmem:[%s18840_s5 + $0x308] sm:$0xf0] }
 0x44c   :  { %v11081_v36 = vor.u32 %v12440_v27, %v11078_v6  ;;  %v10770_v14 = vld [vmem:[%s18840_s5 + $0x764] sm:$0xf0]  ;;  %v11246_v27 = vld [vmem:[%s18840_s5 + $0xb1c] sm:$0xf0]  ;;  %v12356_v6 = vld [vmem:[%s18840_s5 + $0x714] sm:$0xf] }
 0x44d   :  { %7532 = vmatpush.bf16.msra.mxu2 %v10409_v18  ;;  %7508 = vmatpush.bf16.msra.mxu0 %v9905_v40  ;;  %v10325_v18 = vor.u32 %v12251_v47, %v10322_v17  ;;  %v11580_v40 = vld [vmem:[%s18840_s5 + $0xda0] sm:$0xf]  ;;  %v10826_v47 = vld [vmem:[%s18840_s5 + $0x7d4] sm:$0xf0]  ;;  %v11525_v17 = vor.u32 %v12555_v32, %v11524_v46  ;;  %v10997_v46 = vor.u32 %v12419_v5, %v10994_v19  ;;  %v12412_v32 = vld [vmem:[%s18840_s5 + $0x8d4] sm:$0xf] }
 0x44e   :  { %7445 = vmatpush.bf16.msra.mxu3 %v10517_v30  ;;  %v11581_v7 = vor.u32 %v12569_v58, %v11580_v40  ;;  %v11496_v30 = vld [vmem:[%s18840_s5 + $0xcf8] sm:$0xf]  ;;  %v12370_v58 = vld [vmem:[%s18840_s5 + $0x784] sm:$0xf] }
 0x44f   :  { %7521 = vmatpush.bf16.msra.mxu1 %v10129_v0  ;;  %v10294_v0 = vld [vmem:[%s18840_s5 + $0x3ac] sm:$0xf0] }
 0x450   :  { %v10297_v8 = vor.u32 %v12244_v55, %v10294_v0  ;;  %v10798_v55 = vld [vmem:[%s18840_s5 + $0x79c] sm:$0xf0] }
 0x451   :  { %7533 = vmatpush.bf16.msra.mxu2 %v10381_v11  ;;  %7509 = vmatpush.bf16.msra.mxu0 %v9877_v20  ;;  %v11106_v11 = vld [vmem:[%s18840_s5 + $0xa04] sm:$0xf0]  ;;  %v12584_v3 = vpop.eup %12583  ;;  %v10885_v20 = vor.u32 %v12391_v31, %v10882_v62  ;;  %v11468_v31 = vld [vmem:[%s18840_s5 + $0xcc0] sm:$0xf]  ;;  %v12541_v62 = vld [vmem:[%s18840_s5 + $0xcd8] sm:$0xf0] }
 0x452   :  { %7490 = vmatpush.bf16.msrb.mxu3 %v11609_v12  ;;  %v7733_v43 = vadd.f32 1.0, %v12584_v3  ;;  %v11109_v29 = vor.u32 %v12447_v10, %v11106_v11  ;;  %v11274_v10 = vld [vmem:[%s18840_s5 + $0xb54] sm:$0xf0]  ;;  %v12363_v3 = vld [vmem:[%s18840_s5 + $0x74c] sm:$0xf] }
 0x453   :  { %7522 = vmatpush.bf16.msra.mxu1 %v10101_v44  ;;  %7446 = vmatmul.bf16.vlgmr.msra.gmra.mxu3 %v16201_v54  ;;  %v12384_v44 = vld [vmem:[%s18840_s5 + $0x7f4] sm:$0xf] }
 0x454   :  { %12585 = vrcp.f32 %v7733_v43  ;;  %v18257_v43 = vpop.f32.mrf.mxu3 }
 0x455   :  { %7534 = vmatpush.bf16.msra.mxu2 %v10353_v34  ;;  %7510 = vmatpush.bf16.msra.mxu0 %v9849_v1  ;;  %v10857_v34 = vor.u32 %v12384_v44, %v10854_v50  ;;  %v12377_v1 = vld [vmem:[%s18840_s5 + $0x7bc] sm:$0xf]  ;;  %v7304_v53 = vpop.f32.mrf.mxu0 }
 0x456   :  { %7491 = vmatpush.bf16.msrb.mxu3 %v11581_v7  ;;  %v10829_v12 = vor.u32 %v12377_v1, %v10826_v47  ;;  %v7305_v57 = vadd.f32 %v7304_v53, %v4668_v56  ;;  %v10801_v7 = vor.u32 %v12370_v58, %v10798_v55  ;;  %v12527_v56 = vld [vmem:[%s18840_s5 + $0xc68] sm:$0xf0]  ;;  %v12185_v1 = vld [vmem:[%s18840_s5 + $0x1b8] sm:$0xf0]  ;;  %v11218_v53 = vld [vmem:[%s18840_s5 + $0xae4] sm:$0xf0] }
 0x457   :  { %7523 = vmatpush.bf16.msra.mxu1 %v10073_v41  ;;  %v12433_v41 = vld [vmem:[%s18840_s5 + $0x97c] sm:$0xf]  ;;  %v7317_v16 = vpop.f32.mrf.mxu1  ;;  %v12178_v58 = vld [vmem:[%s18840_s5 + $0x180] sm:$0xf0] }
 0x458   :  { %7511 = vmatmul.bf16.vlgmr.msra.gmra.mxu0 %v16160_v39  ;;  %v7318_v60 = vadd.f32 %v7317_v16, %v7305_v57 }
 0x459   :  { %7555 = vmatpush.bf16.msrb.mxu0 %v10941_v45  ;;  %7535 = vmatpush.bf16.msra.mxu2 %v10325_v18  ;;  %v11050_v45 = vld [vmem:[%s18840_s5 + $0x994] sm:$0xf0]  ;;  %v12496_v18 = vld [vmem:[%s18840_s5 + $0xb74] sm:$0xf] }
 0x45a   :  { %7524 = vmatmul.bf16.vlgmr.msra.gmra.mxu1 %v16170_v42  ;;  %7492 = vmatpush.bf16.msrb.mxu3 %v11553_v26  ;;  %v12586_v48 = vpop.eup %12585  ;;  %v11053_v40 = vor.u32 %v12433_v41, %v11050_v45  ;;  %v10773_v26 = vor.u32 %v12363_v3, %v10770_v14  ;;  %v12241_v41 = vld [vmem:[%s18840_s5 + $0x378] sm:$0xf0]  ;;  %v9992_v14 = vld [vmem:[%s18840_s5 + $0x130] sm:$0xf] }
 0x45b   :  { %7568 = vmatpush.bf16.msrb.mxu1 %v11165_v51  ;;  %v12548_v51 = vld [vmem:[%s18840_s5 + $0xd10] sm:$0xf0]  ;;  %7747 = vst [vmem:[#allocation2 + $0x8] sm:$0xff] %v12586_v48  ;;  %v12349_v45 = vld [vmem:[%s18840_s5 + $0x6dc] sm:$0xf] }
 0x45c   :  { %v11497_v0 = vor.u32 %v12548_v51, %v11496_v30  ;;  %v10714_v51 = vld [vmem:[%s18840_s5 + $0x6f4] sm:$0xf0]  ;;  %v12475_v48 = vld [vmem:[%s18840_s5 + $0xacc] sm:$0xf]  ;;  %v7241_v55 = vpop.f32.mrf.mxu3 }
 0x45d   :  { %7556 = vmatpush.bf16.msrb.mxu0 %v10913_v4  ;;  %7536 = vmatpush.bf16.msra.mxu2 %v10297_v8  ;;  %v12426_v4 = vld [vmem:[%s18840_s5 + $0x944] sm:$0xf]  ;;  %v12489_v8 = vld [vmem:[%s18840_s5 + $0xb3c] sm:$0xf]  ;;  %v7306_v44 = vpop.f32.mrf.mxu0  ;;  %v12276_v55 = vld [vmem:[%s18840_s5 + $0x490] sm:$0xf0] }
 0x45e   :  { %7493 = vmatpush.bf16.msrb.mxu3 %v11525_v17  ;;  %v11025_v11 = vor.u32 %v12426_v4, %v11022_v59  ;;  %v10272_v17 = vld [vmem:[%s18840_s5 + $0x360] sm:$0xf]  ;;  %v11221_v4 = vor.u32 %v12475_v48, %v11218_v53  ;;  %v10244_v59 = vld [vmem:[%s18840_s5 + $0x328] sm:$0xf]  ;;  %v12335_v44 = vld [vmem:[%s18840_s5 + $0x66c] sm:$0xf] }
 0x45f   :  { %7569 = vmatpush.bf16.msrb.mxu1 %v11137_v38  ;;  %v11305_v38 = vor.u32 %v12496_v18, %v11302_v52  ;;  %v7319_v50 = vpop.f32.mrf.mxu1  ;;  %v11413_v52 = vor.u32 %v12527_v56, %v11412_v35  ;;  %v10273_v57 = vor.u32 %v12241_v41, %v10272_v17  ;;  %v12220_v56 = vld [vmem:[%s18840_s5 + $0x2d0] sm:$0xf0]  ;;  %v12283_v17 = vld [vmem:[%s18840_s5 + $0x4c8] sm:$0xf0]  ;;  %v10160_v48 = vld [vmem:[%s18840_s5 + $0x280] sm:$0xf] }
 0x460   :  { %7537 = vmatmul.bf16.vlgmr.msra.gmra.mxu2 %v16197_v2  ;;  %v10658_v50 = vld [vmem:[%s18840_s5 + $0x684] sm:$0xf0]  ;;  %v12213_v53 = vld [vmem:[%s18840_s5 + $0x298] sm:$0xf0] }
 0x461   :  { %7581 = vmatpush.bf16.msrb.mxu2 %v11389_v61  ;;  %7557 = vmatpush.bf16.msrb.mxu0 %v10885_v20  ;;  %v11469_v61 = vor.u32 %v12541_v62, %v11468_v31  ;;  %v11277_v20 = vor.u32 %v12489_v8, %v11274_v10  ;;  %v10686_v31 = vld [vmem:[%s18840_s5 + $0x6bc] sm:$0xf0]  ;;  %v12468_v62 = vld [vmem:[%s18840_s5 + $0xa94] sm:$0xf]  ;;  %v10661_v35 = vor.u32 %v12335_v44, %v10658_v50  ;;  %v10546_v44 = vld [vmem:[%s18840_s5 + $0x5a4] sm:$0xf0] }
 0x462   :  { %7494 = vmatpush.bf16.msrb.mxu3 %v11497_v0  ;;  %v10717_v0 = vor.u32 %v12349_v45, %v10714_v51  ;;  %v10496_v10 = vld [vmem:[%s18840_s5 + $0x520] sm:$0xf] }
 0x463   :  { %7570 = vmatpush.bf16.msrb.mxu1 %v11109_v29  ;;  %v12482_v29 = vld [vmem:[%s18840_s5 + $0xb04] sm:$0xf]  ;;  %v9936_v45 = vld [vmem:[%s18840_s5 + $0xc0] sm:$0xf] }
 0x464   :  { %v11249_v47 = vor.u32 %v12482_v29, %v11246_v27  ;;  %v10468_v27 = vld [vmem:[%s18840_s5 + $0x4e8] sm:$0xf] }
 0x465   :  { %7582 = vmatpush.bf16.msrb.mxu2 %v11361_v23  ;;  %7558 = vmatpush.bf16.msrb.mxu0 %v10857_v34  ;;  %v10742_v23 = vld [vmem:[%s18840_s5 + $0x72c] sm:$0xf0] }
 0x466   :  { %v10966_v34 = vld [vmem:[%s18840_s5 + $0x8ec] sm:$0xf0]  ;;  %7495 = vmatpush.bf16.msrb.mxu3 %v11469_v61  ;;  %v10745_v30 = vor.u32 %v12356_v6, %v10742_v23  ;;  %v12171_v61 = vld [vmem:[%s18840_s5 + $0x148] sm:$0xf0]  ;;  %v12290_v6 = vld [vmem:[%s18840_s5 + $0x500] sm:$0xf0] }
 0x467   :  { %7571 = vmatpush.bf16.msrb.mxu1 %v11081_v36  ;;  %v10048_v36 = vld [vmem:[%s18840_s5 + $0x1a0] sm:$0xf] }
 0x468   :  { %v10049_v18 = vor.u32 %v12185_v1, %v10048_v36  ;;  %v10469_v36 = vor.u32 %v12290_v6, %v10468_v27  ;;  %v12328_v1 = vld [vmem:[%s18840_s5 + $0x634] sm:$0xf]  ;;  %v12262_v27 = vld [vmem:[%s18840_s5 + $0x420] sm:$0xf0]  ;;  %v9852_v6 = vld [vmem:[%s18840_s5 + $0x18] sm:$0xf] }
 0x469   :  { %7583 = vmatpush.bf16.msrb.mxu2 %v11333_v49  ;;  %7559 = vmatpush.bf16.msrb.mxu0 %v10829_v12  ;;  %v7330_v49 = vpop.f32.mrf.mxu2  ;;  %v10969_v12 = vor.u32 %v12412_v32, %v10966_v34  ;;  %v12164_v32 = vld [vmem:[%s18840_s5 + $0x110] sm:$0xf0]  ;;  %v7240_v34 = vadd.f32 %v18257_v43, %v17906_v15  ;;  %v10630_v15 = vld [vmem:[%s18840_s5 + $0x64c] sm:$0xf0] }
 0x46a   :  { %v18313_v16 = vadd.f32 %v7330_v49, %v7318_v60  ;;  %7496 = vmatpush.bf16.msrb.mxu3 %v11441_v24  ;;  %v12234_v60 = vld [vmem:[%s18840_s5 + $0x340] sm:$0xf0]  ;;  %v10188_v24 = vld [vmem:[%s18840_s5 + $0x2b8] sm:$0xf]  ;;  %v12157_v49 = vld [vmem:[%s18840_s5 + $0xd8] sm:$0xf0]  ;;  %v10633_v51 = vor.u32 %v12328_v1, %v10630_v15 }
 0x46b   :  { %7572 = vmatpush.bf16.msrb.mxu1 %v11053_v40  ;;  %v10020_v40 = vld [vmem:[%s18840_s5 + $0x168] sm:$0xf]  ;;  %v10245_v3 = vor.u32 %v12234_v60, %v10244_v59  ;;  %v10189_v41 = vor.u32 %v12220_v56, %v10188_v24  ;;  %v12150_v59 = vld [vmem:[%s18840_s5 + $0xa0] sm:$0xf0]  ;;  %v10076_v24 = vld [vmem:[%s18840_s5 + $0x1d8] sm:$0xf] }
 0x46c   :  { %v10021_v8 = vor.u32 %v12178_v58, %v10020_v40  ;;  %v9937_v40 = vor.u32 %v12157_v49, %v9936_v45  ;;  %v10412_v58 = vld [vmem:[%s18840_s5 + $0x478] sm:$0xf]  ;;  %v12192_v56 = vld [vmem:[%s18840_s5 + $0x1f0] sm:$0xf0]  ;;  %v10518_v15 = vld [vmem:[%s18840_s5 + $0x56c] sm:$0xf0] }
 0x46d   :  { %7584 = vmatpush.bf16.msrb.mxu2 %v11305_v38  ;;  %7560 = vmatpush.bf16.msrb.mxu0 %v10801_v7  ;;  %v12342_v38 = vld [vmem:[%s18840_s5 + $0x6a4] sm:$0xf]  ;;  %v11190_v7 = vld [vmem:[%s18840_s5 + $0xaac] sm:$0xf0]  ;;  %v12300_v1 = vld [vmem:[%s18840_s5 + $0x554] sm:$0xf] }
 0x46e   :  { %7497 = vmatpush.bf16.msrb.mxu3 %v11413_v52  ;;  %v10689_v5 = vor.u32 %v12342_v38, %v10686_v31  ;;  %v11193_v19 = vor.u32 %v12468_v62, %v11190_v7  ;;  %v10132_v31 = vld [vmem:[%s18840_s5 + $0x248] sm:$0xf]  ;;  %v12206_v62 = vld [vmem:[%s18840_s5 + $0x260] sm:$0xf0]  ;;  %v10413_v7 = vor.u32 %v12276_v55, %v10412_v58  ;;  %v11168_v45 = vld [vmem:[%s18840_s5 + $0xa60] sm:$0xf]  ;;  %v10077_v58 = vor.u32 %v12192_v56, %v10076_v24 }
 0x46f   :  { %7573 = vmatpush.bf16.msrb.mxu1 %v11025_v11  ;;  %v12297_v11 = vld [vmem:[%s18840_s5 + $0x538] sm:$0xf0]  ;;  %v12388_v24 = vld [vmem:[%s18840_s5 + $0x810] sm:$0xf0] }
 0x470   :  { %v10497_v29 = vor.u32 %v12297_v11, %v10496_v10  ;;  %v10574_v10 = vld [vmem:[%s18840_s5 + $0x5dc] sm:$0xf0] }
 0x471   :  { %7585 = vmatpush.bf16.msrb.mxu2 %v11277_v20  ;;  %7561 = vmatpush.bf16.msrb.mxu0 %v10773_v26  ;;  %v10216_v20 = vld [vmem:[%s18840_s5 + $0x2f0] sm:$0xf]  ;;  %v7332_v22 = vpop.f32.mrf.mxu2  ;;  %v9993_v26 = vor.u32 %v12171_v61, %v9992_v14  ;;  %v10384_v11 = vld [vmem:[%s18840_s5 + $0x440] sm:$0xf]  ;;  %v10133_v14 = vor.u32 %v12206_v62, %v10132_v31 }
 0x472   :  { %7542 = vmatpush.bf16.msra.mxu3 %v10717_v0  ;;  %v10217_v23 = vor.u32 %v12227_v21, %v10216_v20  ;;  %v10161_v0 = vor.u32 %v12213_v53, %v10160_v48  ;;  %v9880_v61 = vld [vmem:[%s18840_s5 + $0x50] sm:$0xf]  ;;  %v12199_v22 = vld [vmem:[%s18840_s5 + $0x228] sm:$0xf0]  ;;  %v7291_v50 = vpop.f32.mrf.mxu3  ;;  %v11610_v48 = vld [vmem:[%s18840_s5 + $0xdf4] sm:$0xf0] }
 0x473   :  { %7574 = vmatpush.bf16.msrb.mxu1 %v10997_v46  ;;  %7498 = vmatmul.bf16.vlgmr.msrb.gmra.mxu3 %v16890_v33  ;;  %v9964_v46 = vld [vmem:[%s18840_s5 + $0xf8] sm:$0xf] }
 0x474   :  { %v9965_v43 = vor.u32 %v12164_v32, %v9964_v46 }
 0x475   :  { %7586 = vmatpush.bf16.msrb.mxu2 %v11249_v47  ;;  %7562 = vmatpush.bf16.msrb.mxu0 %v10745_v30  ;;  %v10440_v47 = vld [vmem:[%s18840_s5 + $0x4b0] sm:$0xf]  ;;  %v7253_v30 = vadd.f32 %v18010_v9, %v7240_v34  ;;  %v10602_v9 = vld [vmem:[%s18840_s5 + $0x614] sm:$0xf0]  ;;  %v18418_v52 = vpop.f32.mrf.mxu0 }
 0x476   :  { %7543 = vmatpush.bf16.msra.mxu3 %v10689_v5  ;;  %v12143_v5 = vld [vmem:[%s18840_s5 + $0x68] sm:$0xf0] }
 0x477   :  { %7575 = vmatpush.bf16.msrb.mxu1 %v10969_v12  ;;  %v10441_v12 = vor.u32 %v12283_v17, %v10440_v47  ;;  %v7266_v38 = vadd.f32 %v18012_v37, %v7253_v30  ;;  %v9881_v34 = vor.u32 %v12143_v5, %v9880_v61  ;;  %v12465_v30 = vld [vmem:[%s18840_s5 + $0xa78] sm:$0xf0]  ;;  %v11392_v61 = vld [vmem:[%s18840_s5 + $0xc20] sm:$0xf] }
 0x478   :  { %7563 = vmatmul.bf16.vlgmr.msrb.gmra.mxu0 %v16349_v25  ;;  %v12521_v5 = vld [vmem:[%s18840_s5 + $0xc38] sm:$0xf0] }
 0x479   :  { %7607 = vmatpush.bf16.msra.mxu0 %v10049_v18  ;;  %7587 = vmatpush.bf16.msrb.mxu2 %v11221_v4  ;;  %v12321_v18 = vld [vmem:[%s18840_s5 + $0x5fc] sm:$0xf]  ;;  %v9908_v4 = vld [vmem:[%s18840_s5 + $0x88] sm:$0xf]  ;;  %v7279_v20 = vadd.f32 %v18106_v13, %v7266_v38 }
 0x47a   :  { %7576 = vmatmul.bf16.vlgmr.msrb.gmra.mxu1 %v16360_v28  ;;  %7544 = vmatpush.bf16.msra.mxu3 %v10661_v35  ;;  %v10605_v60 = vor.u32 %v12321_v18, %v10602_v9  ;;  %v9909_v37 = vor.u32 %v12150_v59, %v9908_v4  ;;  %v10356_v13 = vld [vmem:[%s18840_s5 + $0x408] sm:$0xf]  ;;  %v12136_v35 = vld [vmem:[%s18840_s5 + $0x30] sm:$0xf0]  ;;  %v10328_v9 = vld [vmem:[%s18840_s5 + $0x3d0] sm:$0xf]  ;;  %v11169_v4 = vor.u32 %v12465_v30, %v11168_v45  ;;  %v7293_v38 = vpop.f32.mrf.mxu3 }
 0x47b   :  { %7620 = vmatpush.bf16.msra.mxu1 %v10273_v57  ;;  %v18420_v57 = vpop.f32.mrf.mxu1  ;;  %v10357_v49 = vor.u32 %v12262_v27, %v10356_v13  ;;  %v9853_v18 = vor.u32 %v12136_v35, %v9852_v6  ;;  %v10916_v59 = vld [vmem:[%s18840_s5 + $0x868] sm:$0xf]  ;;  %v11393_v27 = vor.u32 %v12521_v5, %v11392_v61  ;;  %v12559_v6 = vld [vmem:[%s18840_s5 + $0xd6c] sm:$0xf]  ;;  %v10860_v35 = vld [vmem:[%s18840_s5 + $0x7f8] sm:$0xf] }
 0x47c   :  { %v12507_v45 = vld [vmem:[%s18840_s5 + $0xbc8] sm:$0xf0]  ;;  %v11308_v38 = vld [vmem:[%s18840_s5 + $0xb78] sm:$0xf]  ;;  %v12538_v5 = vld [vmem:[%s18840_s5 + $0xcc4] sm:$0xf] }
 0x47d   :  { %7608 = vmatpush.bf16.msra.mxu0 %v10021_v8  ;;  %7588 = vmatpush.bf16.msrb.mxu2 %v11193_v19  ;;  %v12314_v8 = vld [vmem:[%s18840_s5 + $0x5c4] sm:$0xf]  ;;  %v10104_v19 = vld [vmem:[%s18840_s5 + $0x210] sm:$0xf]  ;;  %v7358_v46 = vpop.f32.mrf.mxu0 }
 0x47e   :  { %7545 = vmatpush.bf16.msra.mxu3 %v10633_v51  ;;  %v10577_v21 = vor.u32 %v12314_v8, %v10574_v10  ;;  %v12573_v51 = vld [vmem:[%s18840_s5 + $0xddc] sm:$0xf]  ;;  %v12458_v8 = vld [vmem:[%s18840_s5 + $0xa40] sm:$0xf0] }
 0x47f   :  { %7621 = vmatpush.bf16.msra.mxu1 %v10245_v3  ;;  %v12269_v3 = vld [vmem:[%s18840_s5 + $0x458] sm:$0xf0]  ;;  %v11613_v31 = vor.u32 %v12573_v51, %v11610_v48  ;;  %v12566_v10 = vld [vmem:[%s18840_s5 + $0xda4] sm:$0xf]  ;;  %v10832_v48 = vld [vmem:[%s18840_s5 + $0x7c0] sm:$0xf] }
 0x480   :  { %7589 = vmatmul.bf16.vlgmr.msrb.gmra.mxu2 %v16524_v63 }
 0x481   :  { %7633 = vmatpush.bf16.msra.mxu2 %v10497_v29  ;;  %7609 = vmatpush.bf16.msra.mxu0 %v9993_v26  ;;  %v12307_v29 = vld [vmem:[%s18840_s5 + $0x58c] sm:$0xf]  ;;  %v10385_v26 = vor.u32 %v12269_v3, %v10384_v11  ;;  %v10300_v11 = vld [vmem:[%s18840_s5 + $0x398] sm:$0xf]  ;;  %v12248_v3 = vld [vmem:[%s18840_s5 + $0x3b0] sm:$0xf0] }
 0x482   :  { %7546 = vmatpush.bf16.msra.mxu3 %v10605_v60  ;;  %v10549_v17 = vor.u32 %v12307_v29, %v10546_v44  ;;  %v12402_v60 = vld [vmem:[%s18840_s5 + $0x880] sm:$0xf0]  ;;  %v10301_v29 = vor.u32 %v12248_v3, %v10300_v11  ;;  %v11112_v44 = vld [vmem:[%s18840_s5 + $0x9f0] sm:$0xf]  ;;  %v11028_v11 = vld [vmem:[%s18840_s5 + $0x948] sm:$0xf] }
 0x483   :  { %7622 = vmatpush.bf16.msra.mxu1 %v10217_v23  ;;  %v7292_v23 = vadd.f32 %v7291_v50, %v7279_v20  ;;  %v7371_v32 = vpop.f32.mrf.mxu1  ;;  %v10888_v20 = vld [vmem:[%s18840_s5 + $0x830] sm:$0xf]  ;;  %v12451_v50 = vld [vmem:[%s18840_s5 + $0xa08] sm:$0xf0]  ;;  %v12430_v3 = vld [vmem:[%s18840_s5 + $0x960] sm:$0xf0] }
 0x485   :  { %7634 = vmatpush.bf16.msra.mxu2 %v10469_v36  ;;  %7610 = vmatpush.bf16.msra.mxu0 %v9965_v43  ;;  %v10105_v36 = vor.u32 %v12199_v22, %v10104_v19  ;;  %v10944_v43 = vld [vmem:[%s18840_s5 + $0x8a0] sm:$0xf]  ;;  %v7713_v47 = vsub.f32 0.0, %v7292_v23  ;;  %v11554_v23 = vld [vmem:[%s18840_s5 + $0xd84] sm:$0xf0] }
 0x486   :  { %7547 = vmatpush.bf16.msra.mxu3 %v10577_v21  ;;  %v12395_v21 = vld [vmem:[%s18840_s5 + $0x848] sm:$0xf0]  ;;  %v11557_v56 = vor.u32 %v12559_v6, %v11554_v23 }
 0x487   :  { %7623 = vmatpush.bf16.msra.mxu1 %v10189_v41  ;;  %v12409_v41 = vld [vmem:[%s18840_s5 + $0x8b8] sm:$0xf0]  ;;  %v7722_v53 = vmul.f32 1.442695, %v7713_v47  ;;  %v10889_v32 = vor.u32 %v12395_v21, %v10888_v20  ;;  %v11526_v47 = vld [vmem:[%s18840_s5 + $0xd4c] sm:$0xf0] }
 0x488   :  { %v10945_v55 = vor.u32 %v12409_v41, %v10944_v43  ;;  %v12552_v43 = vld [vmem:[%s18840_s5 + $0xd34] sm:$0xf]  ;;  %v11336_v41 = vld [vmem:[%s18840_s5 + $0xbb0] sm:$0xf]  ;;  %v11280_v21 = vld [vmem:[%s18840_s5 + $0xb40] sm:$0xf] }
 0x489   :  { %7635 = vmatpush.bf16.msra.mxu2 %v10441_v12  ;;  %7611 = vmatpush.bf16.msra.mxu0 %v9937_v40  ;;  %v18514_v12 = vpop.f32.mrf.mxu2  ;;  %v12255_v40 = vld [vmem:[%s18840_s5 + $0x3e8] sm:$0xf0]  ;;  %12587 = vpow2.f32 %v7722_v53  ;;  %v12381_v53 = vld [vmem:[%s18840_s5 + $0x7d8] sm:$0xf0] }
 0x48a   :  { %7548 = vmatpush.bf16.msra.mxu3 %v10549_v17  ;;  %v10329_v62 = vor.u32 %v12255_v40, %v10328_v9  ;;  %v10861_v17 = vor.u32 %v12388_v24, %v10860_v35  ;;  %v12437_v9 = vld [vmem:[%s18840_s5 + $0x998] sm:$0xf0]  ;;  %v11337_v40 = vor.u32 %v12507_v45, %v11336_v41  ;;  %v11252_v35 = vld [vmem:[%s18840_s5 + $0xb08] sm:$0xf]  ;;  %v12486_v24 = vld [vmem:[%s18840_s5 + $0xb20] sm:$0xf0] }
 0x48b   :  { %7624 = vmatpush.bf16.msra.mxu1 %v10161_v0  ;;  %v10521_v0 = vor.u32 %v12300_v1, %v10518_v15  ;;  %v12444_v1 = vld [vmem:[%s18840_s5 + $0x9d0] sm:$0xf0]  ;;  %v11414_v45 = vld [vmem:[%s18840_s5 + $0xc6c] sm:$0xf0] }
 0x48c   :  { %v12524_v41 = vld [vmem:[%s18840_s5 + $0xc54] sm:$0xf] }
 0x48d   :  { %7636 = vmatpush.bf16.msra.mxu2 %v10413_v7  ;;  %7612 = vmatpush.bf16.msra.mxu0 %v9909_v37  ;;  %v11140_v7 = vld [vmem:[%s18840_s5 + $0xa28] sm:$0xf]  ;;  %v11582_v37 = vld [vmem:[%s18840_s5 + $0xdbc] sm:$0xf0] }
 0x48e   :  { %7549 = vmatpush.bf16.msra.mxu3 %v10521_v0  ;;  %v11141_v19 = vor.u32 %v12458_v8, %v11140_v7  ;;  %v11585_v22 = vor.u32 %v12566_v10, %v11582_v37  ;;  %v10804_v8 = vld [vmem:[%s18840_s5 + $0x788] sm:$0xf]  ;;  %v12374_v10 = vld [vmem:[%s18840_s5 + $0x7a0] sm:$0xf0] }
 0x48f   :  { %7625 = vmatpush.bf16.msra.mxu1 %v10133_v14  ;;  %v10917_v14 = vor.u32 %v12402_v60, %v10916_v59  ;;  %v10833_v60 = vor.u32 %v12381_v53, %v10832_v48  ;;  %v10805_v20 = vor.u32 %v12374_v10, %v10804_v8  ;;  %v12353_v53 = vld [vmem:[%s18840_s5 + $0x6f8] sm:$0xf0]  ;;  %v10664_v10 = vld [vmem:[%s18840_s5 + $0x670] sm:$0xf] }
 0x491   :  { %7637 = vmatpush.bf16.msra.mxu2 %v10385_v26  ;;  %7613 = vmatpush.bf16.msra.mxu0 %v9881_v34  ;;  %v12588_v26 = vpop.eup %12587  ;;  %v7384_v13 = vpop.f32.mrf.mxu2  ;;  %v11113_v34 = vor.u32 %v12451_v50, %v11112_v44  ;;  %v10776_v44 = vld [vmem:[%s18840_s5 + $0x750] sm:$0xf]  ;;  %v12367_v50 = vld [vmem:[%s18840_s5 + $0x768] sm:$0xf0] }
 0x492   :  { %7594 = vmatpush.bf16.msrb.mxu3 %v11613_v31  ;;  %v7734_v46 = vadd.f32 1.0, %v12588_v26  ;;  %v12500_v31 = vld [vmem:[%s18840_s5 + $0xb90] sm:$0xf0]  ;;  %v11000_v13 = vld [vmem:[%s18840_s5 + $0x910] sm:$0xf]  ;;  %v7343_v6 = vpop.f32.mrf.mxu3 }
 0x493   :  { %7626 = vmatpush.bf16.msra.mxu1 %v10105_v36  ;;  %7550 = vmatmul.bf16.vlgmr.msra.gmra.mxu3 %v16201_v54  ;;  %v11084_v36 = vld [vmem:[%s18840_s5 + $0x9b8] sm:$0xf]  ;;  %v11309_v61 = vor.u32 %v12500_v31, %v11308_v38  ;;  %v12472_v31 = vld [vmem:[%s18840_s5 + $0xab0] sm:$0xf0] }
 0x494   :  { %12589 = vrcp.f32 %v7734_v46  ;;  %v11085_v51 = vor.u32 %v12444_v1, %v11084_v36  ;;  %v12531_v46 = vld [vmem:[%s18840_s5 + $0xc8c] sm:$0xf]  ;;  %v10748_v36 = vld [vmem:[%s18840_s5 + $0x718] sm:$0xf]  ;;  %v12360_v1 = vld [vmem:[%s18840_s5 + $0x730] sm:$0xf0] }
 0x495   :  { %7638 = vmatpush.bf16.msra.mxu2 %v10357_v49  ;;  %7614 = vmatpush.bf16.msra.mxu0 %v9853_v18  ;;  %v18607_v49 = vld [vmem:[%s18841_s6] sm:$0x7f]  ;;  %v11529_v18 = vor.u32 %v12552_v43, %v11526_v47  ;;  %v10972_v43 = vld [vmem:[%s18840_s5 + $0x8d8] sm:$0xf]  ;;  %v12416_v47 = vld [vmem:[%s18840_s5 + $0x8f0] sm:$0xf0]  ;;  %v10749_v48 = vor.u32 %v12360_v1, %v10748_v36 }
 0x496   :  { %7595 = vmatpush.bf16.msrb.mxu3 %v11585_v22  ;;  %v4669_v30 = vperm.slane %v18607_v49, 4  ;;  %v12493_v22 = vld [vmem:[%s18840_s5 + $0xb58] sm:$0xf0]  ;;  %v11196_v38 = vld [vmem:[%s18840_s5 + $0xa98] sm:$0xf] }
 0x497   :  { %7627 = vmatpush.bf16.msra.mxu1 %v10077_v58  ;;  %v12545_v58 = vld [vmem:[%s18840_s5 + $0xcfc] sm:$0xf]  ;;  %v7421_v59 = vpop.f32.mrf.mxu1  ;;  %v11281_v23 = vor.u32 %v12493_v22, %v11280_v21  ;;  %v12318_v22 = vld [vmem:[%s18840_s5 + $0x5e0] sm:$0xf0]  ;;  %v11588_v1 = vld [vmem:[%s18840_s5 + $0xda8] sm:$0xf] }
 0x498   :  { %7615 = vmatmul.bf16.vlgmr.msra.gmra.mxu0 %v16160_v39  ;;  %v11364_v39 = vld [vmem:[%s18840_s5 + $0xbe8] sm:$0xf] }
 0x499   :  { %7659 = vmatpush.bf16.msrb.mxu0 %v10945_v55  ;;  %7639 = vmatpush.bf16.msra.mxu2 %v10329_v62  ;;  %v11498_v55 = vld [vmem:[%s18840_s5 + $0xd14] sm:$0xf0] }
 0x49a   :  { %7628 = vmatmul.bf16.vlgmr.msra.gmra.mxu1 %v16170_v42  ;;  %v12514_v42 = vld [vmem:[%s18840_s5 + $0xc00] sm:$0xf0]  ;;  %7596 = vmatpush.bf16.msrb.mxu3 %v11557_v56  ;;  %v12590_v0 = vpop.eup %12589  ;;  %v11501_v37 = vor.u32 %v12545_v58, %v11498_v55  ;;  %v11417_v58 = vor.u32 %v12524_v41, %v11414_v45  ;;  %v7345_v55 = vpop.f32.mrf.mxu3  ;;  %v11560_v41 = vld [vmem:[%s18840_s5 + $0xd70] sm:$0xf]  ;;  %v12563_v45 = vld [vmem:[%s18840_s5 + $0xd88] sm:$0xf0] }
 0x49b   :  { %7672 = vmatpush.bf16.msrb.mxu1 %v11169_v4  ;;  %v11365_v15 = vor.u32 %v12514_v42, %v11364_v39  ;;  %v7408_v4 = vpop.f32.mrf.mxu0  ;;  %7748 = vst [vmem:[#allocation2 + $0x10] sm:$0xff] %v12590_v0 }
 0x49c   :  { %v7409_v62 = vadd.f32 %v7408_v4, %v4669_v30  ;;  %v10720_v30 = vld [vmem:[%s18840_s5 + $0x6e0] sm:$0xf] }
 0x49d   :  { %7660 = vmatpush.bf16.msrb.mxu0 %v10917_v14  ;;  %7640 = vmatpush.bf16.msra.mxu2 %v10301_v29  ;;  %v11029_v29 = vor.u32 %v12430_v3, %v11028_v11  ;;  %v10721_v0 = vor.u32 %v12353_v53, %v10720_v30  ;;  %v7344_v11 = vadd.f32 %v7343_v6, %v18313_v16  ;;  %v10608_v16 = vld [vmem:[%s18840_s5 + $0x600] sm:$0xf]  ;;  %v12556_v53 = vld [vmem:[%s18840_s5 + $0xd50] sm:$0xf0] }
 0x49e   :  { %7597 = vmatpush.bf16.msrb.mxu3 %v11529_v18  ;;  %v7422_v14 = vadd.f32 %v7421_v59, %v7409_v62  ;;  %v11224_v18 = vld [vmem:[%s18840_s5 + $0xad0] sm:$0xf]  ;;  %v10692_v59 = vld [vmem:[%s18840_s5 + $0x6a8] sm:$0xf] }
 0x49f   :  { %7673 = vmatpush.bf16.msrb.mxu1 %v11141_v19  ;;  %v11470_v19 = vld [vmem:[%s18840_s5 + $0xcdc] sm:$0xf0]  ;;  %v7423_v42 = vpop.f32.mrf.mxu1 }
 0x4a0   :  { %7641 = vmatmul.bf16.vlgmr.msra.gmra.mxu2 %v16197_v2  ;;  %v11056_v2 = vld [vmem:[%s18840_s5 + $0x980] sm:$0xf]  ;;  %v11473_v26 = vor.u32 %v12538_v5, %v11470_v19  ;;  %v12325_v5 = vld [vmem:[%s18840_s5 + $0x618] sm:$0xf0] }
 0x4a1   :  { %7685 = vmatpush.bf16.msrb.mxu2 %v11393_v27  ;;  %7661 = vmatpush.bf16.msrb.mxu0 %v10889_v32  ;;  %v11057_v7 = vor.u32 %v12437_v9, %v11056_v2  ;;  %v12423_v27 = vld [vmem:[%s18840_s5 + $0x928] sm:$0xf0]  ;;  %v11442_v32 = vld [vmem:[%s18840_s5 + $0xca4] sm:$0xf0]  ;;  %v10609_v21 = vor.u32 %v12325_v5, %v10608_v16 }
 0x4a2   :  { %7598 = vmatpush.bf16.msrb.mxu3 %v11501_v37  ;;  %v11001_v56 = vor.u32 %v12423_v27, %v11000_v13  ;;  %v12479_v2 = vld [vmem:[%s18840_s5 + $0xae8] sm:$0xf0] }
 0x4a3   :  { %7674 = vmatpush.bf16.msrb.mxu1 %v11113_v34  ;;  %v7410_v39 = vpop.f32.mrf.mxu0  ;;  %v10777_v34 = vor.u32 %v12367_v50, %v10776_v44  ;;  %v11225_v4 = vor.u32 %v12479_v2, %v11224_v18  ;;  %v12339_v37 = vld [vmem:[%s18840_s5 + $0x688] sm:$0xf0]  ;;  %v4670_v18 = vperm.slane %v18607_v49, 5 }
 0x4a4   :  { %v10665_v3 = vor.u32 %v12339_v37, %v10664_v10  ;;  %v12535_v10 = vld [vmem:[%s18840_s5 + $0xca8] sm:$0xf0] }
 0x4a5   :  { %7686 = vmatpush.bf16.msrb.mxu2 %v11365_v15  ;;  %7662 = vmatpush.bf16.msrb.mxu0 %v10861_v17  ;;  %v11445_v15 = vor.u32 %v12531_v46, %v11442_v32  ;;  %v11253_v17 = vor.u32 %v12486_v24, %v11252_v35  ;;  %v12304_v32 = vld [vmem:[%s18840_s5 + $0x570] sm:$0xf0]  ;;  %v12577_v35 = vld [vmem:[%s18840_s5 + $0xdf8] sm:$0xf0] }
 0x4a6   :  { %7599 = vmatpush.bf16.msrb.mxu3 %v11473_v26  ;;  %v10552_v26 = vld [vmem:[%s18840_s5 + $0x590] sm:$0xf] }
 0x4a7   :  { %7675 = vmatpush.bf16.msrb.mxu1 %v11085_v51  ;;  %v7434_v51 = vpop.f32.mrf.mxu2 }
 0x4a8   :  { %v18712_v9 = vadd.f32 %v7434_v51, %v7422_v14  ;;  %v7357_v14 = vadd.f32 %v18418_v52, %v7344_v11  ;;  %v10580_v52 = vld [vmem:[%s18840_s5 + $0x5c8] sm:$0xf]  ;;  %v11561_v51 = vor.u32 %v12563_v45, %v11560_v41 }
 0x4a9   :  { %7687 = vmatpush.bf16.msrb.mxu2 %v11337_v40  ;;  %7663 = vmatpush.bf16.msrb.mxu0 %v10833_v60  ;;  %v10973_v40 = vor.u32 %v12416_v47, %v10972_v43  ;;  %v12346_v60 = vld [vmem:[%s18840_s5 + $0x6c0] sm:$0xf0]  ;;  %v10581_v44 = vor.u32 %v12318_v22, %v10580_v52 }
 0x4aa   :  { %7600 = vmatpush.bf16.msrb.mxu3 %v11445_v15  ;;  %v10693_v62 = vor.u32 %v12346_v60, %v10692_v59  ;;  %v12570_v15 = vld [vmem:[%s18840_s5 + $0xdc0] sm:$0xf0] }
 0x4ab   :  { %7676 = vmatpush.bf16.msrb.mxu1 %v11057_v7  ;;  %v11197_v7 = vor.u32 %v12472_v31, %v11196_v38  ;;  %v11589_v43 = vor.u32 %v12570_v15, %v11588_v1  ;;  %v11476_v38 = vld [vmem:[%s18840_s5 + $0xcc8] sm:$0xf]  ;;  %v12542_v31 = vld [vmem:[%s18840_s5 + $0xce0] sm:$0xf0] }
 0x4ad   :  { %7688 = vmatpush.bf16.msrb.mxu2 %v11309_v61  ;;  %7664 = vmatpush.bf16.msrb.mxu0 %v10805_v20 }
 0x4ae   :  { %7601 = vmatpush.bf16.msrb.mxu3 %v11417_v58 }
 0x4af   :  { %7677 = vmatpush.bf16.msrb.mxu1 %v11029_v29  ;;  %v7436_v8 = vpop.f32.mrf.mxu2 }
 0x4b0   :  { %v11448_v8 = vld [vmem:[%s18840_s5 + $0xc90] sm:$0xf] }
 0x4b1   :  { %7689 = vmatpush.bf16.msrb.mxu2 %v11281_v23  ;;  %7665 = vmatpush.bf16.msrb.mxu0 %v10777_v34  ;;  %v7395_v50 = vpop.f32.mrf.mxu3  ;;  %v11616_v34 = vld [vmem:[%s18840_s5 + $0xde0] sm:$0xf] }
 0x4b2   :  { %7646 = vmatpush.bf16.msra.mxu3 %v10721_v0  ;;  %v11617_v36 = vor.u32 %v12577_v35, %v11616_v34 }
 0x4b3   :  { %7678 = vmatpush.bf16.msrb.mxu1 %v11001_v56  ;;  %7602 = vmatmul.bf16.vlgmr.msrb.gmra.mxu3 %v16890_v33 }
 0x4b5   :  { %7690 = vmatpush.bf16.msrb.mxu2 %v11253_v17  ;;  %7666 = vmatpush.bf16.msrb.mxu0 %v10749_v48  ;;  %v18750_v19 = vpop.f32.mrf.mxu0  ;;  %v11532_v48 = vld [vmem:[%s18840_s5 + $0xd38] sm:$0xf] }
 0x4b6   :  { %7647 = vmatpush.bf16.msra.mxu3 %v10693_v62  ;;  %v11533_v2 = vor.u32 %v12556_v53, %v11532_v48  ;;  %v11477_v62 = vor.u32 %v12542_v31, %v11476_v38 }
 0x4b7   :  { %7679 = vmatpush.bf16.msrb.mxu1 %v10973_v40  ;;  %v18752_v20 = vpop.f32.mrf.mxu1  ;;  %v11504_v40 = vld [vmem:[%s18840_s5 + $0xd00] sm:$0xf] }
 0x4b8   :  { %7667 = vmatmul.bf16.vlgmr.msrb.gmra.mxu0 %v16349_v25  ;;  %v10636_v25 = vld [vmem:[%s18840_s5 + $0x638] sm:$0xf] }
 0x4b9   :  { %7691 = vmatpush.bf16.msrb.mxu2 %v11225_v4  ;;  %v7397_v56 = vpop.f32.mrf.mxu3 }
 0x4ba   :  { %7680 = vmatmul.bf16.vlgmr.msrb.gmra.mxu1 %v16360_v28  ;;  %v12332_v28 = vld [vmem:[%s18840_s5 + $0x650] sm:$0xf0]  ;;  %7648 = vmatpush.bf16.msra.mxu3 %v10665_v3  ;;  %v11449_v3 = vor.u32 %v12535_v10, %v11448_v8 }
 0x4bb   :  { %v10637_v61 = vor.u32 %v12332_v28, %v10636_v25  ;;  %v11420_v25 = vld [vmem:[%s18840_s5 + $0xc58] sm:$0xf]  ;;  %v12528_v28 = vld [vmem:[%s18840_s5 + $0xc70] sm:$0xf0] }
 0x4bc   :  { %v11421_v16 = vor.u32 %v12528_v28, %v11420_v25 }
 0x4bd   :  { %7692 = vmatpush.bf16.msrb.mxu2 %v11197_v7  ;;  %v7462_v27 = vpop.f32.mrf.mxu0 }
 0x4be   :  { %7649 = vmatpush.bf16.msra.mxu3 %v10637_v61 }
 0x4bf   :  { %v7475_v6 = vpop.f32.mrf.mxu1 }
 0x4c0   :  { %7693 = vmatmul.bf16.vlgmr.msrb.gmra.mxu2 %v16524_v63  ;;  %v7370_v63 = vadd.f32 %v18420_v57, %v7357_v14  ;;  %v12311_v57 = vld [vmem:[%s18840_s5 + $0x5a8] sm:$0xf0] }
 0x4c1   :  { %v10553_v46 = vor.u32 %v12311_v57, %v10552_v26 }
 0x4c2   :  { %7650 = vmatpush.bf16.msra.mxu3 %v10609_v21  ;;  %v7383_v29 = vadd.f32 %v18514_v12, %v7370_v63  ;;  %v10524_v12 = vld [vmem:[%s18840_s5 + $0x558] sm:$0xf] }
 0x4c3   :  { %v18774_v42 = vpop.f32.mrf.mxu2  ;;  %v10525_v24 = vor.u32 %v12304_v32, %v10524_v12 }
 0x4c4   :  { %v7396_v13 = vadd.f32 %v7395_v50, %v7383_v29 }
 0x4c6   :  { %v7714_v23 = vsub.f32 0.0, %v7396_v13  ;;  %7651 = vmatpush.bf16.msra.mxu3 %v10581_v44 }
 0x4c8   :  { %v7724_v39 = vmul.f32 1.442695, %v7714_v23 }
 0x4ca   :  { %12591 = vpow2.f32 %v7724_v39  ;;  %7652 = vmatpush.bf16.msra.mxu3 %v10553_v46 }
 0x4cb   :  { %v7488_v17 = vpop.f32.mrf.mxu2 }
 0x4ce   :  { %7653 = vmatpush.bf16.msra.mxu3 %v10525_v24 }
 0x4d0   :  { %v12592_v47 = vpop.eup %12591 }
 0x4d1   :  { %v7735_v30 = vadd.f32 1.0, %v12592_v47  ;;  %7654 = vmatmul.bf16.vlgmr.msra.gmra.mxu3 %v16201_v54  ;;  %v12549_v54 = vld [vmem:[%s18840_s5 + $0xd18] sm:$0xf0]  ;;  %s12638_s5 = smov [#allocation2]  }
 0x4d2   :  { %7698 = vmatpush.bf16.msrb.mxu3 %v11617_v36  ;;  %v11505_v59 = vor.u32 %v12549_v54, %v11504_v40  ;;  %s7759_s15 = sshll.u32 %s12638_s5, 4  ;;  %s7760_s15 = int_to_ptr.vmem [resolvable:$true] %s7759_s15 }
 0x4d3   :  { %12593 = vrcp.f32 %v7735_v30 }
 0x4d5   :  { %v7512_v55 = vpop.f32.mrf.mxu0 }
 0x4d6   :  { %7699 = vmatpush.bf16.msrb.mxu3 %v11589_v43  ;;  %v7513_v4 = vadd.f32 %v7512_v55, %v4670_v18  ;;  %v7447_v7 = vpop.f32.mrf.mxu3 }
 0x4d7   :  { %v7525_v0 = vpop.f32.mrf.mxu1  ;;  %v7448_v63 = vadd.f32 %v7447_v7, %v18712_v9 }
 0x4d8   :  { %v7526_v60 = vadd.f32 %v7525_v0, %v7513_v4 }
 0x4d9   :  { %v12594_v58 = vpop.eup %12593  ;;  %v7461_v52 = vadd.f32 %v18750_v19, %v7448_v63  ;;  %v4671_v19 = vperm.slane %v18607_v49, 6 }
 0x4da   :  { %7700 = vmatpush.bf16.msrb.mxu3 %v11561_v51  ;;  %7749 = vst [vmem:[#allocation2 + $0x18] sm:$0xff] %v12594_v58 }
 0x4db   :  { %v7474_v44 = vadd.f32 %v18752_v20, %v7461_v52 }
 0x4dd   :  { %v7514_v37 = vpop.f32.mrf.mxu0  ;;  %v7487_v50 = vadd.f32 %v18774_v42, %v7474_v44 }
 0x4de   :  { %7701 = vmatpush.bf16.msrb.mxu3 %v11533_v2  ;;  %v7449_v5 = vpop.f32.mrf.mxu3 }
 0x4df   :  { %v7527_v11 = vpop.f32.mrf.mxu1 }
 0x4e2   :  { %7702 = vmatpush.bf16.msrb.mxu3 %v11505_v59 }
 0x4e3   :  { %v7538_v14 = vpop.f32.mrf.mxu2 }
 0x4e4   :  { %v7539_v61 = vadd.f32 %v7538_v14, %v7526_v60 }
 0x4e6   :  { %7703 = vmatpush.bf16.msrb.mxu3 %v11477_v62 }
 0x4ea   :  { %7704 = vmatpush.bf16.msrb.mxu3 %v11449_v3 }
 0x4eb   :  { %v7540_v21 = vpop.f32.mrf.mxu2 }
 0x4ee   :  { %7705 = vmatpush.bf16.msrb.mxu3 %v11421_v16 }
 0x4f1   :  { %7706 = vmatmul.bf16.vlgmr.msrb.gmra.mxu3 %v16890_v33 }
 0x4f5   :  { %v7564_v22 = vpop.f32.mrf.mxu0 }
 0x4f6   :  { %v7499_v26 = vpop.f32.mrf.mxu3 }
 0x4f7   :  { %v7577_v29 = vpop.f32.mrf.mxu1  ;;  %v7500_v57 = vadd.f32 %v7499_v26, %v7487_v50 }
 0x4f9   :  { %v7715_v6 = vsub.f32 0.0, %v7500_v57 }
 0x4fb   :  { %v7726_v23 = vmul.f32 1.442695, %v7715_v6 }
 0x4fd   :  { %v7566_v13 = vpop.f32.mrf.mxu0  ;;  %12595 = vpow2.f32 %v7726_v23 }
 0x4fe   :  { %v7501_v12 = vpop.f32.mrf.mxu3 }
 0x4ff   :  { %v7579_v27 = vpop.f32.mrf.mxu1 }
 0x503   :  { %v7590_v46 = vpop.f32.mrf.mxu2  ;;  %v12596_v33 = vpop.eup %12595 }
 0x504   :  { %v7736_v9 = vadd.f32 1.0, %v12596_v33 }
 0x506   :  { %12597 = vrcp.f32 %v7736_v9 }
 0x50b   :  { %v7592_v32 = vpop.f32.mrf.mxu2 }
 0x50c   :  { %v12598_v39 = vpop.eup %12597 }
 0x50d   :  { %7750 = vst [vmem:[#allocation2 + $0x20] sm:$0xff] %v12598_v39 }
 0x515   :  { %v7616_v34 = vpop.f32.mrf.mxu0 }
 0x516   :  { %v7617_v42 = vadd.f32 %v7616_v34, %v4671_v19  ;;  %v7551_v24 = vpop.f32.mrf.mxu3 }
 0x517   :  { %v7629_v20 = vpop.f32.mrf.mxu1  ;;  %v7552_v17 = vadd.f32 %v7551_v24, %v7539_v61 }
 0x518   :  { %v7630_v35 = vadd.f32 %v7629_v20, %v7617_v42 }
 0x519   :  { %v7565_v41 = vadd.f32 %v7564_v22, %v7552_v17 }
 0x51b   :  { %v7578_v51 = vadd.f32 %v7577_v29, %v7565_v41 }
 0x51d   :  { %v7618_v56 = vpop.f32.mrf.mxu0  ;;  %v7591_v48 = vadd.f32 %v7590_v46, %v7578_v51 }
 0x51e   :  { %v7553_v43 = vpop.f32.mrf.mxu3 }
 0x51f   :  { %v7631_v36 = vpop.f32.mrf.mxu1 }
 0x523   :  { %v7642_v1 = vpop.f32.mrf.mxu2 }
 0x524   :  { %v7643_v15 = vadd.f32 %v7642_v1, %v7630_v35 }
 0x52b   :  { %v7644_v47 = vpop.f32.mrf.mxu2 }
 0x535   :  { %v7668_v45 = vpop.f32.mrf.mxu0 }
 0x536   :  { %v7603_v49 = vpop.f32.mrf.mxu3 }
 0x537   :  { %v7681_v30 = vpop.f32.mrf.mxu1  ;;  %v7604_v53 = vadd.f32 %v7603_v49, %v7591_v48 }
 0x539   :  { %v7716_v40 = vsub.f32 0.0, %v7604_v53 }
 0x53b   :  { %v7728_v54 = vmul.f32 1.442695, %v7716_v40 }
 0x53d   :  { %v7670_v18 = vpop.f32.mrf.mxu0  ;;  %12599 = vpow2.f32 %v7728_v54 }
 0x53e   :  { %v7605_v55 = vpop.f32.mrf.mxu3 }
 0x53f   :  { %v7683_v2 = vpop.f32.mrf.mxu1 }
 0x543   :  { %v7694_v58 = vpop.f32.mrf.mxu2  ;;  %v12600_v0 = vpop.eup %12599 }
 0x544   :  { %v7737_v59 = vadd.f32 1.0, %v12600_v0 }
 0x546   :  { %12601 = vrcp.f32 %v7737_v59 }
 0x54b   :  { %v7696_v4 = vpop.f32.mrf.mxu2 }
 0x54c   :  { %v12602_v60 = vpop.eup %12601 }
 0x54d   :  { %7751 = vst [vmem:[#allocation2 + $0x28] sm:$0xff] %v12602_v60 }
 0x554   :  { %v7655_v38 = vpop.f32.mrf.mxu3 }
 0x555   :  { %v7656_v62 = vadd.f32 %v7655_v38, %v7643_v15 }
 0x557   :  { %v7669_v7 = vadd.f32 %v7668_v45, %v7656_v62 }
 0x559   :  { %v7682_v8 = vadd.f32 %v7681_v30, %v7669_v7 }
 0x55b   :  { %v7695_v10 = vadd.f32 %v7694_v58, %v7682_v8 }
 0x55c   :  { %v7657_v31 = vpop.f32.mrf.mxu3 }
 0x574   :  { %v7707_v37 = vpop.f32.mrf.mxu3 }
 0x575   :  { %v7708_v11 = vadd.f32 %v7707_v37, %v7695_v10 }
 0x577   :  { %v7717_v3 = vsub.f32 0.0, %v7708_v11 }
 0x579   :  { %v7730_v25 = vmul.f32 1.442695, %v7717_v3 }
 0x57b   :  { %12603 = vpow2.f32 %v7730_v25 }
 0x57c   :  { %v7709_v28 = vpop.f32.mrf.mxu3 }
 0x581   :  { %v12604_v14 = vpop.eup %12603 }
 0x582   :  { %v7738_v61 = vadd.f32 1.0, %v12604_v14 }
 0x584   :  { %12605 = vrcp.f32 %v7738_v61 }
 0x58a   :  { %v12606_v16 = vpop.eup %12605 }
 0x58b   :  { %7753 = vst.msk [vmem:[#allocation2 + $0x30] sm:$0xff] %vm7752_vm2, %v12606_v16 }
 0x58c   :  { %7764 = dma.vmem_to_hbm [thread:$0]  %s7760_s15, 896, %s7762_s18, [#allocation3]  }
 0x58d   :  { %12636 = dma.done.wait [#allocation3], 896  }
 0x58e   :  { %12637 = vsyncadd [#allocation3], 4294966400 }
 0x58f   :  { %7769 = vsyncpa [#allocation3], 1 }

</bundles_post_ra>
